<compile_context>
chip_gen: v5e
topology: v5e:2x2
jax: 0.10.0
libtpu: 0.0.40
codegen_flags: <defaults>
</compile_context>

<pallas_src>
import functools

import jax
import jax.numpy as jnp
from jax.experimental import pallas as pl
from jax.experimental.pallas import tpu as pltpu

EMBED = 128
NUM_HEADS = 8
HEAD_DIM = EMBED // NUM_HEADS
LSTM_H = 256


# ----------------------------------------------------------------------------
# Single fused kernel: per-batch MHA -> 2-layer LSTM step -> MLP, per timestep
# ----------------------------------------------------------------------------
def _task_head_kernel(x_ref, wqkv_ref, bqkv_ref, wo_ref, bo_ref,
                      wih0_ref, whh0_ref, b0_ref, w1_ref, b1_ref,
                      fc1_ref, fc1b_ref, fc2_ref, fc2b_ref,
                      o_ref, *, num_heads, scale):
    S, B, E = x_ref.shape                    # (8, 2, 128)
    H = whh0_ref.shape[0]                    # 256
    Dh = E // num_heads                      # 16
    fc1_out = fc1_ref.shape[1]               # 128
    out_dim = fc2_ref.shape[1]

    # ---- weight loads hoisted once (bf16 values, reused by every timestep) ----
    wqkv = wqkv_ref[...]                     # (E, 3E)
    wo = wo_ref[...]                         # (E, E)
    wih0 = wih0_ref[...]                     # (E, 4H)
    whh0 = whh0_ref[...]                     # (H, 4H)
    w1 = w1_ref[...]                         # (2H, 4H)   [wih1; whh1]
    fc1 = fc1_ref[...]                       # (H, fc1_out)
    fc2 = fc2_ref[...]                       # (fc1_out, out_dim)

    # ---- bias broadcasts hoisted once (f32), not re-materialized per step ----
    bqkv = jnp.broadcast_to(bqkv_ref[...], (S, 3 * E))
    bo = jnp.broadcast_to(bo_ref[...], (S, E))
    b0 = jnp.broadcast_to(b0_ref[...], (S, 4 * H))
    b1 = jnp.broadcast_to(b1_ref[...], (S, 4 * H))
    fc1b = jnp.broadcast_to(fc1b_ref[...], (S, fc1_out))
    fc2b = jnp.broadcast_to(fc2b_ref[...], (S, out_dim))

    def lstm_cell(gates, c_prev):
        # PyTorch gate order: i, f, g, o ; all math in f32.
        i_g = jax.nn.sigmoid(gates[:, 0:H])
        f_g = jax.nn.sigmoid(gates[:, H:2 * H])
        g_g = jnp.tanh(gates[:, 2 * H:3 * H])
        o_g = jax.nn.sigmoid(gates[:, 3 * H:4 * H])
        c_new = f_g * c_prev + i_g * g_g
        h_new = o_g * jnp.tanh(c_new)
        return h_new, c_new

    # LSTM state lives in registers (loop-carried values), not VMEM scratch.
    h0 = jnp.zeros((S, H), jnp.float32)
    c0 = jnp.zeros((S, H), jnp.float32)
    h1 = jnp.zeros((S, H), jnp.float32)
    c1 = jnp.zeros((S, H), jnp.float32)

    # The LSTM time axis IS the attention batch axis (batch_first quirk): one
    # static loop over t = 0..B-1 runs attention(batch t) -> LSTM step t -> MLP.
    for t in range(B):                                        # B == 2: full unroll
        xt = x_ref[:, t, :]                                   # (S, E) f32
        # -------- multi-head self-attention for batch column t --------
        qkv = jnp.dot(xt.astype(jnp.bfloat16), wqkv,
                      preferred_element_type=jnp.float32) + bqkv
        attn = bo                                             # start from out-proj bias
        for h in range(num_heads):                            # static unroll, 8 heads
            qh = qkv[:, h * Dh:(h + 1) * Dh].astype(jnp.bfloat16)
            kh = qkv[:, E + h * Dh:E + (h + 1) * Dh].astype(jnp.bfloat16)
            vh = qkv[:, 2 * E + h * Dh:2 * E + (h + 1) * Dh].astype(jnp.bfloat16)
            s = jax.lax.dot_general(qh, kh, (((1,), (1,)), ((), ())),
                                    preferred_element_type=jnp.float32) * scale
            p = jnp.exp(s - jnp.max(s, axis=-1, keepdims=True))
            p = p / jnp.sum(p, axis=-1, keepdims=True)        # exact softmax
            hd = jnp.dot(p.astype(jnp.bfloat16), vh,
                         preferred_element_type=jnp.float32)  # (S, Dh)
            # out-projection fused per head: no head concatenation / lane reassembly.
            attn = attn + jnp.dot(hd.astype(jnp.bfloat16),
                                  wo[h * Dh:(h + 1) * Dh, :],
                                  preferred_element_type=jnp.float32)
        # -------- LSTM layer 0 --------
        g0 = (jnp.dot(attn.astype(jnp.bfloat16), wih0,
                      preferred_element_type=jnp.float32)
              + jnp.dot(h0.astype(jnp.bfloat16), whh0,
                        preferred_element_type=jnp.float32)
              + b0)
        h0, c0 = lstm_cell(g0, c0)
        # -------- LSTM layer 1 (inter-layer dropout p=0.5 is identity in eval) --------
        hcat = jnp.concatenate([h0, h1], axis=-1).astype(jnp.bfloat16)   # (S, 2H)
        g1 = jnp.dot(hcat, w1, preferred_element_type=jnp.float32) + b1
        h1, c1 = lstm_cell(g1, c1)
        # -------- output MLP (Dropout identity in eval) --------
        z = jnp.maximum(
            jnp.dot(h1.astype(jnp.bfloat16), fc1,
                    preferred_element_type=jnp.float32) + fc1b, 0.0)
        y = jnp.dot(z.astype(jnp.bfloat16), fc2,
                    preferred_element_type=jnp.float32) + fc2b           # (S, out_dim)
        # Write directly in the module's (S, B, out) layout: absorbs the output
        # transpose into the kernel (no wrapper jnp.transpose dispatch).
        o_ref[:, t, :] = y


# ----------------------------------------------------------------------------
# TaskHead forward (single pallas_call, no wrapper transposes)
# ----------------------------------------------------------------------------
def task_head_forward(x, pp):
    """x: (S, B, 128) f32 -> (S, B, output_dim) f32."""
    S, B, E = x.shape
    H = LSTM_H
    fc1_out = pp["fc1_t"].shape[1]
    out_dim = pp["fc2_t"].shape[1]

    flops = 2 * B * S * (E * 3 * E + E * E                     # attention projections
                         + NUM_HEADS * 2 * S * HEAD_DIM        # scores + p@v
                         + E * 4 * H + H * 4 * H               # LSTM layer 0
                         + 2 * H * 4 * H                       # LSTM layer 1
                         + H * fc1_out + fc1_out * out_dim)    # MLP
    transcendentals = B * S * (NUM_HEADS * S + 10 * H)         # softmax exp + gates
    bytes_accessed = int(sum(v.size * v.dtype.itemsize for v in pp.values())
                         + x.size * x.dtype.itemsize
                         + S * B * out_dim * 4)

    vmem = pl.BlockSpec(memory_space=pltpu.MemorySpace.VMEM)
    kernel = functools.partial(_task_head_kernel, num_heads=NUM_HEADS,
                               scale=1.0 / (HEAD_DIM ** 0.5))
    return pl.pallas_call(
        kernel,
        out_shape=jax.ShapeDtypeStruct((S, B, out_dim), jnp.float32),
        in_specs=[vmem] * 14,
        out_specs=vmem,
        cost_estimate=pl.CostEstimate(flops=int(flops),
                                      transcendentals=int(transcendentals),
                                      bytes_accessed=bytes_accessed),
    )(x, pp["wqkv_t"], pp["bqkv"], pp["wo_t"], pp["bo"],
      pp["wih0_t"], pp["whh0_t"], pp["b0"], pp["w1_t"], pp["b1"],
      pp["fc1_t"], pp["fc1_b"], pp["fc2_t"], pp["fc2_b"])


# ----------------------------------------------------------------------------
# Parameters: raw PyTorch-layout init + one-time kernel-ready preparation
# ----------------------------------------------------------------------------
def init_params(key, output_dim):
    def nrm(k, shape, scale=0.05):
        return scale * jax.random.normal(k, shape, dtype=jnp.float32)

    ks = jax.random.split(key, 16)
    return {
        "in_proj_w": nrm(ks[0], (3 * EMBED, EMBED)),
        "in_proj_b": nrm(ks[1], (3 * EMBED,)),
        "out_proj_w": nrm(ks[2], (EMBED, EMBED)),
        "out_proj_b": nrm(ks[3], (EMBED,)),
        "w_ih_l0": nrm(ks[4], (4 * LSTM_H, EMBED)),
        "w_hh_l0": nrm(ks[5], (4 * LSTM_H, LSTM_H)),
        "b_ih_l0": nrm(ks[6], (4 * LSTM_H,)),
        "b_hh_l0": nrm(ks[7], (4 * LSTM_H,)),
        "w_ih_l1": nrm(ks[8], (4 * LSTM_H, LSTM_H)),
        "w_hh_l1": nrm(ks[9], (4 * LSTM_H, LSTM_H)),
        "b_ih_l1": nrm(ks[10], (4 * LSTM_H,)),
        "b_hh_l1": nrm(ks[11], (4 * LSTM_H,)),
        "fc1_w": nrm(ks[12], (128, LSTM_H)),
        "fc1_b": nrm(ks[13], (128,)),
        "fc2_w": nrm(ks[14], (output_dim, 128)),
        "fc2_b": nrm(ks[15], (output_dim,)),
    }


def prepare_params(p):
    """One-time: pre-transpose matmul weights to (in, out), store bf16 for the MXU,
    fold LSTM b_ih+b_hh, and pre-concatenate layer-1 [W_ih; W_hh]."""
    def wt(w):
        return jnp.asarray(w.T, dtype=jnp.bfloat16)

    def bias(b):
        return jnp.asarray(b, dtype=jnp.float32).reshape(1, -1)

    return {
        "wqkv_t": wt(p["in_proj_w"]),                                  # (E, 3E)
        "bqkv": bias(p["in_proj_b"]),
        "wo_t": wt(p["out_proj_w"]),                                   # (E, E)
        "bo": bias(p["out_proj_b"]),
        "wih0_t": wt(p["w_ih_l0"]),                                    # (E, 4H)
        "whh0_t": wt(p["w_hh_l0"]),                                    # (H, 4H)
        "b0": bias(p["b_ih_l0"] + p["b_hh_l0"]),
        "w1_t": jnp.concatenate([wt(p["w_ih_l1"]), wt(p["w_hh_l1"])],
                                axis=0),                               # (2H, 4H)
        "b1": bias(p["b_ih_l1"] + p["b_hh_l1"]),
        "fc1_t": wt(p["fc1_w"]),                                       # (H, 128)
        "fc1_b": bias(p["fc1_b"]),
        "fc2_t": wt(p["fc2_w"]),                                       # (128, out)
        "fc2_b": bias(p["fc2_b"]),
    }


if __name__ == "__main__":
    S, B, OUT = 8, 2, 4
    x = jax.random.normal(jax.random.PRNGKey(0), (S, B, EMBED), dtype=jnp.float32)
    raw = init_params(jax.random.PRNGKey(1), OUT)
    params = prepare_params(raw)

    fwd = jax.jit(task_head_forward)
    y = fwd(x, params)
    jax.block_until_ready(y)

    assert y.shape == (S, B, OUT), y.shape
    assert bool(jnp.all(jnp.isfinite(y)))
    print("KERNEL_OK")
</pallas_src>

<mosaic_0001>
module attributes {stable_mosaic.version = 11 : i64} {
  func.func @_task_head_kernel(%arg0: memref<8x2x128xf32, #tpu.memory_space<vmem>>, %arg1: memref<128x384xbf16, #tpu.memory_space<vmem>>, %arg2: memref<1x384xf32, #tpu.memory_space<vmem>>, %arg3: memref<128x128xbf16, #tpu.memory_space<vmem>>, %arg4: memref<1x128xf32, #tpu.memory_space<vmem>>, %arg5: memref<128x1024xbf16, #tpu.memory_space<vmem>>, %arg6: memref<256x1024xbf16, #tpu.memory_space<vmem>>, %arg7: memref<1x1024xf32, #tpu.memory_space<vmem>>, %arg8: memref<512x1024xbf16, #tpu.memory_space<vmem>>, %arg9: memref<1x1024xf32, #tpu.memory_space<vmem>>, %arg10: memref<256x128xbf16, #tpu.memory_space<vmem>>, %arg11: memref<1x128xf32, #tpu.memory_space<vmem>>, %arg12: memref<128x4xbf16, #tpu.memory_space<vmem>>, %arg13: memref<1x4xf32, #tpu.memory_space<vmem>>, %arg14: memref<8x2x4xf32, #tpu.memory_space<vmem>>) attributes {dimension_semantics = [], scalar_prefetch = 0 : i64, scratch_operands = 0 : i64, tpu.core_type = #tpu.core_type<tc>} {
    %c0 = arith.constant 0 : index
    %c0_0 = arith.constant 0 : index
    %0 = vector.load %arg1[%c0, %c0_0] : memref<128x384xbf16, #tpu.memory_space<vmem>>, vector<128x384xbf16>
    %c0_1 = arith.constant 0 : index
    %c0_2 = arith.constant 0 : index
    %1 = vector.load %arg3[%c0_1, %c0_2] : memref<128x128xbf16, #tpu.memory_space<vmem>>, vector<128x128xbf16>
    %c0_3 = arith.constant 0 : index
    %c0_4 = arith.constant 0 : index
    %2 = vector.load %arg5[%c0_3, %c0_4] : memref<128x1024xbf16, #tpu.memory_space<vmem>>, vector<128x1024xbf16>
    %c0_5 = arith.constant 0 : index
    %c0_6 = arith.constant 0 : index
    %3 = vector.load %arg6[%c0_5, %c0_6] : memref<256x1024xbf16, #tpu.memory_space<vmem>>, vector<256x1024xbf16>
    %c0_7 = arith.constant 0 : index
    %c0_8 = arith.constant 0 : index
    %4 = vector.load %arg8[%c0_7, %c0_8] : memref<512x1024xbf16, #tpu.memory_space<vmem>>, vector<512x1024xbf16>
    %c0_9 = arith.constant 0 : index
    %c0_10 = arith.constant 0 : index
    %5 = vector.load %arg10[%c0_9, %c0_10] : memref<256x128xbf16, #tpu.memory_space<vmem>>, vector<256x128xbf16>
    %c0_11 = arith.constant 0 : index
    %c0_12 = arith.constant 0 : index
    %6 = vector.load %arg12[%c0_11, %c0_12] : memref<128x4xbf16, #tpu.memory_space<vmem>>, vector<128x4xbf16>
    %c0_13 = arith.constant 0 : index
    %c0_14 = arith.constant 0 : index
    %7 = vector.load %arg2[%c0_13, %c0_14] : memref<1x384xf32, #tpu.memory_space<vmem>>, vector<1x384xf32>
    %8 = vector.shape_cast %7 : vector<1x384xf32> to vector<1x384xf32>
    %9 = vector.broadcast %8 : vector<1x384xf32> to vector<8x384xf32>
    %c0_15 = arith.constant 0 : index
    %c0_16 = arith.constant 0 : index
    %10 = vector.load %arg4[%c0_15, %c0_16] : memref<1x128xf32, #tpu.memory_space<vmem>>, vector<1x128xf32>
    %11 = vector.shape_cast %10 : vector<1x128xf32> to vector<1x128xf32>
    %12 = vector.broadcast %11 : vector<1x128xf32> to vector<8x128xf32>
    %c0_17 = arith.constant 0 : index
    %c0_18 = arith.constant 0 : index
    %13 = vector.load %arg7[%c0_17, %c0_18] : memref<1x1024xf32, #tpu.memory_space<vmem>>, vector<1x1024xf32>
    %14 = vector.shape_cast %13 : vector<1x1024xf32> to vector<1x1024xf32>
    %15 = vector.broadcast %14 : vector<1x1024xf32> to vector<8x1024xf32>
    %c0_19 = arith.constant 0 : index
    %c0_20 = arith.constant 0 : index
    %16 = vector.load %arg9[%c0_19, %c0_20] : memref<1x1024xf32, #tpu.memory_space<vmem>>, vector<1x1024xf32>
    %17 = vector.shape_cast %16 : vector<1x1024xf32> to vector<1x1024xf32>
    %18 = vector.broadcast %17 : vector<1x1024xf32> to vector<8x1024xf32>
    %c0_21 = arith.constant 0 : index
    %c0_22 = arith.constant 0 : index
    %19 = vector.load %arg11[%c0_21, %c0_22] : memref<1x128xf32, #tpu.memory_space<vmem>>, vector<1x128xf32>
    %20 = vector.shape_cast %19 : vector<1x128xf32> to vector<1x128xf32>
    %21 = vector.broadcast %20 : vector<1x128xf32> to vector<8x128xf32>
    %c0_23 = arith.constant 0 : index
    %c0_24 = arith.constant 0 : index
    %22 = vector.load %arg13[%c0_23, %c0_24] : memref<1x4xf32, #tpu.memory_space<vmem>>, vector<1x4xf32>
    %23 = vector.shape_cast %22 : vector<1x4xf32> to vector<1x4xf32>
    %24 = vector.broadcast %23 : vector<1x4xf32> to vector<8x4xf32>
    %cst = arith.constant 0.000000e+00 : f32
    %25 = vector.broadcast %cst : f32 to vector<8x256xf32>
    %cst_25 = arith.constant 0.000000e+00 : f32
    %26 = vector.broadcast %cst_25 : f32 to vector<8x256xf32>
    %cst_26 = arith.constant 0.000000e+00 : f32
    %27 = vector.broadcast %cst_26 : f32 to vector<8x256xf32>
    %cst_27 = arith.constant 0.000000e+00 : f32
    %28 = vector.broadcast %cst_27 : f32 to vector<8x256xf32>
    %c0_28 = arith.constant 0 : index
    %c0_29 = arith.constant 0 : index
    %c0_30 = arith.constant 0 : index
    %29 = vector.load %arg0[%c0_28, %c0_29, %c0_30] : memref<8x2x128xf32, #tpu.memory_space<vmem>>, vector<8x1x128xf32>
    %30 = vector.shape_cast %29 : vector<8x1x128xf32> to vector<8x128xf32>
    %31 = arith.truncf %30 : vector<8x128xf32> to vector<8x128xbf16>
    %cst_31 = arith.constant dense<0.000000e+00> : vector<8x384xf32>
    %32 = tpu.matmul %31, %0, %cst_31 {dimension_numbers = #tpu.dot_dimension_numbers<[1], [0], [0], [1], [0, 0, 1, 1], [], []>} : vector<8x128xbf16>, vector<128x384xbf16>, vector<8x384xf32> -> vector<8x384xf32>
    %33 = arith.addf %32, %9 : vector<8x384xf32>
    %34 = vector.extract_strided_slice %33 {offsets = [0, 0], sizes = [8, 16], strides = [1, 1]} : vector<8x384xf32> to vector<8x16xf32>
    %35 = arith.truncf %34 : vector<8x16xf32> to vector<8x16xbf16>
    %36 = vector.extract_strided_slice %33 {offsets = [0, 128], sizes = [8, 16], strides = [1, 1]} : vector<8x384xf32> to vector<8x16xf32>
    %37 = arith.truncf %36 : vector<8x16xf32> to vector<8x16xbf16>
    %38 = vector.extract_strided_slice %33 {offsets = [0, 256], sizes = [8, 16], strides = [1, 1]} : vector<8x384xf32> to vector<8x16xf32>
    %39 = arith.truncf %38 : vector<8x16xf32> to vector<8x16xbf16>
    %cst_32 = arith.constant dense<0.000000e+00> : vector<8x8xf32>
    %40 = tpu.matmul %35, %37, %cst_32 {dimension_numbers = #tpu.dot_dimension_numbers<[1], [1], [0], [0], [0, 0, 1, 0], [], []>} : vector<8x16xbf16>, vector<8x16xbf16>, vector<8x8xf32> -> vector<8x8xf32>
    %cst_33 = arith.constant 2.500000e-01 : f32
    %41 = vector.broadcast %cst_33 : f32 to vector<8x8xf32>
    %42 = arith.mulf %40, %41 : vector<8x8xf32>
    %cst_34 = arith.constant dense<0xFF800000> : vector<8xf32>
    %43 = vector.multi_reduction <maximumf>, %42, %cst_34 [1] : vector<8x8xf32> to vector<8xf32>
    %44 = vector.shape_cast %43 : vector<8xf32> to vector<8x1xf32>
    %45 = vector.broadcast %44 : vector<8x1xf32> to vector<8x8xf32>
    %46 = arith.subf %42, %45 : vector<8x8xf32>
    %47 = math.exp %46 : vector<8x8xf32>
    %cst_35 = arith.constant dense<0.000000e+00> : vector<8xf32>
    %48 = vector.multi_reduction <add>, %47, %cst_35 [1] : vector<8x8xf32> to vector<8xf32>
    %49 = vector.shape_cast %48 : vector<8xf32> to vector<8x1xf32>
    %50 = vector.broadcast %49 : vector<8x1xf32> to vector<8x8xf32>
    %51 = arith.divf %47, %50 : vector<8x8xf32>
    %52 = arith.truncf %51 : vector<8x8xf32> to vector<8x8xbf16>
    %cst_36 = arith.constant dense<0.000000e+00> : vector<8x16xf32>
    %53 = tpu.matmul %52, %39, %cst_36 {dimension_numbers = #tpu.dot_dimension_numbers<[1], [0], [0], [1], [0, 0, 1, 1], [], []>} : vector<8x8xbf16>, vector<8x16xbf16>, vector<8x16xf32> -> vector<8x16xf32>
    %54 = arith.truncf %53 : vector<8x16xf32> to vector<8x16xbf16>
    %55 = vector.extract_strided_slice %1 {offsets = [0, 0], sizes = [16, 128], strides = [1, 1]} : vector<128x128xbf16> to vector<16x128xbf16>
    %cst_37 = arith.constant dense<0.000000e+00> : vector<8x128xf32>
    %56 = tpu.matmul %54, %55, %cst_37 {dimension_numbers = #tpu.dot_dimension_numbers<[1], [0], [0], [1], [0, 0, 1, 1], [], []>} : vector<8x16xbf16>, vector<16x128xbf16>, vector<8x128xf32> -> vector<8x128xf32>
    %57 = arith.addf %12, %56 : vector<8x128xf32>
    %58 = vector.extract_strided_slice %33 {offsets = [0, 16], sizes = [8, 16], strides = [1, 1]} : vector<8x384xf32> to vector<8x16xf32>
    %59 = arith.truncf %58 : vector<8x16xf32> to vector<8x16xbf16>
    %60 = vector.extract_strided_slice %33 {offsets = [0, 144], sizes = [8, 16], strides = [1, 1]} : vector<8x384xf32> to vector<8x16xf32>
    %61 = arith.truncf %60 : vector<8x16xf32> to vector<8x16xbf16>
    %62 = vector.extract_strided_slice %33 {offsets = [0, 272], sizes = [8, 16], strides = [1, 1]} : vector<8x384xf32> to vector<8x16xf32>
    %63 = arith.truncf %62 : vector<8x16xf32> to vector<8x16xbf16>
    %cst_38 = arith.constant dense<0.000000e+00> : vector<8x8xf32>
    %64 = tpu.matmul %59, %61, %cst_38 {dimension_numbers = #tpu.dot_dimension_numbers<[1], [1], [0], [0], [0, 0, 1, 0], [], []>} : vector<8x16xbf16>, vector<8x16xbf16>, vector<8x8xf32> -> vector<8x8xf32>
    %cst_39 = arith.constant 2.500000e-01 : f32
    %65 = vector.broadcast %cst_39 : f32 to vector<8x8xf32>
    %66 = arith.mulf %64, %65 : vector<8x8xf32>
    %cst_40 = arith.constant dense<0xFF800000> : vector<8xf32>
    %67 = vector.multi_reduction <maximumf>, %66, %cst_40 [1] : vector<8x8xf32> to vector<8xf32>
    %68 = vector.shape_cast %67 : vector<8xf32> to vector<8x1xf32>
    %69 = vector.broadcast %68 : vector<8x1xf32> to vector<8x8xf32>
    %70 = arith.subf %66, %69 : vector<8x8xf32>
    %71 = math.exp %70 : vector<8x8xf32>
    %cst_41 = arith.constant dense<0.000000e+00> : vector<8xf32>
    %72 = vector.multi_reduction <add>, %71, %cst_41 [1] : vector<8x8xf32> to vector<8xf32>
    %73 = vector.shape_cast %72 : vector<8xf32> to vector<8x1xf32>
    %74 = vector.broadcast %73 : vector<8x1xf32> to vector<8x8xf32>
    %75 = arith.divf %71, %74 : vector<8x8xf32>
    %76 = arith.truncf %75 : vector<8x8xf32> to vector<8x8xbf16>
    %cst_42 = arith.constant dense<0.000000e+00> : vector<8x16xf32>
    %77 = tpu.matmul %76, %63, %cst_42 {dimension_numbers = #tpu.dot_dimension_numbers<[1], [0], [0], [1], [0, 0, 1, 1], [], []>} : vector<8x8xbf16>, vector<8x16xbf16>, vector<8x16xf32> -> vector<8x16xf32>
    %78 = arith.truncf %77 : vector<8x16xf32> to vector<8x16xbf16>
    %79 = vector.extract_strided_slice %1 {offsets = [16, 0], sizes = [16, 128], strides = [1, 1]} : vector<128x128xbf16> to vector<16x128xbf16>
    %cst_43 = arith.constant dense<0.000000e+00> : vector<8x128xf32>
    %80 = tpu.matmul %78, %79, %cst_43 {dimension_numbers = #tpu.dot_dimension_numbers<[1], [0], [0], [1], [0, 0, 1, 1], [], []>} : vector<8x16xbf16>, vector<16x128xbf16>, vector<8x128xf32> -> vector<8x128xf32>
    %81 = arith.addf %57, %80 : vector<8x128xf32>
    %82 = vector.extract_strided_slice %33 {offsets = [0, 32], sizes = [8, 16], strides = [1, 1]} : vector<8x384xf32> to vector<8x16xf32>
    %83 = arith.truncf %82 : vector<8x16xf32> to vector<8x16xbf16>
    %84 = vector.extract_strided_slice %33 {offsets = [0, 160], sizes = [8, 16], strides = [1, 1]} : vector<8x384xf32> to vector<8x16xf32>
    %85 = arith.truncf %84 : vector<8x16xf32> to vector<8x16xbf16>
    %86 = vector.extract_strided_slice %33 {offsets = [0, 288], sizes = [8, 16], strides = [1, 1]} : vector<8x384xf32> to vector<8x16xf32>
    %87 = arith.truncf %86 : vector<8x16xf32> to vector<8x16xbf16>
    %cst_44 = arith.constant dense<0.000000e+00> : vector<8x8xf32>
    %88 = tpu.matmul %83, %85, %cst_44 {dimension_numbers = #tpu.dot_dimension_numbers<[1], [1], [0], [0], [0, 0, 1, 0], [], []>} : vector<8x16xbf16>, vector<8x16xbf16>, vector<8x8xf32> -> vector<8x8xf32>
    %cst_45 = arith.constant 2.500000e-01 : f32
    %89 = vector.broadcast %cst_45 : f32 to vector<8x8xf32>
    %90 = arith.mulf %88, %89 : vector<8x8xf32>
    %cst_46 = arith.constant dense<0xFF800000> : vector<8xf32>
    %91 = vector.multi_reduction <maximumf>, %90, %cst_46 [1] : vector<8x8xf32> to vector<8xf32>
    %92 = vector.shape_cast %91 : vector<8xf32> to vector<8x1xf32>
    %93 = vector.broadcast %92 : vector<8x1xf32> to vector<8x8xf32>
    %94 = arith.subf %90, %93 : vector<8x8xf32>
    %95 = math.exp %94 : vector<8x8xf32>
    %cst_47 = arith.constant dense<0.000000e+00> : vector<8xf32>
    %96 = vector.multi_reduction <add>, %95, %cst_47 [1] : vector<8x8xf32> to vector<8xf32>
    %97 = vector.shape_cast %96 : vector<8xf32> to vector<8x1xf32>
    %98 = vector.broadcast %97 : vector<8x1xf32> to vector<8x8xf32>
    %99 = arith.divf %95, %98 : vector<8x8xf32>
    %100 = arith.truncf %99 : vector<8x8xf32> to vector<8x8xbf16>
    %cst_48 = arith.constant dense<0.000000e+00> : vector<8x16xf32>
    %101 = tpu.matmul %100, %87, %cst_48 {dimension_numbers = #tpu.dot_dimension_numbers<[1], [0], [0], [1], [0, 0, 1, 1], [], []>} : vector<8x8xbf16>, vector<8x16xbf16>, vector<8x16xf32> -> vector<8x16xf32>
    %102 = arith.truncf %101 : vector<8x16xf32> to vector<8x16xbf16>
    %103 = vector.extract_strided_slice %1 {offsets = [32, 0], sizes = [16, 128], strides = [1, 1]} : vector<128x128xbf16> to vector<16x128xbf16>
    %cst_49 = arith.constant dense<0.000000e+00> : vector<8x128xf32>
    %104 = tpu.matmul %102, %103, %cst_49 {dimension_numbers = #tpu.dot_dimension_numbers<[1], [0], [0], [1], [0, 0, 1, 1], [], []>} : vector<8x16xbf16>, vector<16x128xbf16>, vector<8x128xf32> -> vector<8x128xf32>
    %105 = arith.addf %81, %104 : vector<8x128xf32>
    %106 = vector.extract_strided_slice %33 {offsets = [0, 48], sizes = [8, 16], strides = [1, 1]} : vector<8x384xf32> to vector<8x16xf32>
    %107 = arith.truncf %106 : vector<8x16xf32> to vector<8x16xbf16>
    %108 = vector.extract_strided_slice %33 {offsets = [0, 176], sizes = [8, 16], strides = [1, 1]} : vector<8x384xf32> to vector<8x16xf32>
    %109 = arith.truncf %108 : vector<8x16xf32> to vector<8x16xbf16>
    %110 = vector.extract_strided_slice %33 {offsets = [0, 304], sizes = [8, 16], strides = [1, 1]} : vector<8x384xf32> to vector<8x16xf32>
    %111 = arith.truncf %110 : vector<8x16xf32> to vector<8x16xbf16>
    %cst_50 = arith.constant dense<0.000000e+00> : vector<8x8xf32>
    %112 = tpu.matmul %107, %109, %cst_50 {dimension_numbers = #tpu.dot_dimension_numbers<[1], [1], [0], [0], [0, 0, 1, 0], [], []>} : vector<8x16xbf16>, vector<8x16xbf16>, vector<8x8xf32> -> vector<8x8xf32>
    %cst_51 = arith.constant 2.500000e-01 : f32
    %113 = vector.broadcast %cst_51 : f32 to vector<8x8xf32>
    %114 = arith.mulf %112, %113 : vector<8x8xf32>
    %cst_52 = arith.constant dense<0xFF800000> : vector<8xf32>
    %115 = vector.multi_reduction <maximumf>, %114, %cst_52 [1] : vector<8x8xf32> to vector<8xf32>
    %116 = vector.shape_cast %115 : vector<8xf32> to vector<8x1xf32>
    %117 = vector.broadcast %116 : vector<8x1xf32> to vector<8x8xf32>
    %118 = arith.subf %114, %117 : vector<8x8xf32>
    %119 = math.exp %118 : vector<8x8xf32>
    %cst_53 = arith.constant dense<0.000000e+00> : vector<8xf32>
    %120 = vector.multi_reduction <add>, %119, %cst_53 [1] : vector<8x8xf32> to vector<8xf32>
    %121 = vector.shape_cast %120 : vector<8xf32> to vector<8x1xf32>
    %122 = vector.broadcast %121 : vector<8x1xf32> to vector<8x8xf32>
    %123 = arith.divf %119, %122 : vector<8x8xf32>
    %124 = arith.truncf %123 : vector<8x8xf32> to vector<8x8xbf16>
    %cst_54 = arith.constant dense<0.000000e+00> : vector<8x16xf32>
    %125 = tpu.matmul %124, %111, %cst_54 {dimension_numbers = #tpu.dot_dimension_numbers<[1], [0], [0], [1], [0, 0, 1, 1], [], []>} : vector<8x8xbf16>, vector<8x16xbf16>, vector<8x16xf32> -> vector<8x16xf32>
    %126 = arith.truncf %125 : vector<8x16xf32> to vector<8x16xbf16>
    %127 = vector.extract_strided_slice %1 {offsets = [48, 0], sizes = [16, 128], strides = [1, 1]} : vector<128x128xbf16> to vector<16x128xbf16>
    %cst_55 = arith.constant dense<0.000000e+00> : vector<8x128xf32>
    %128 = tpu.matmul %126, %127, %cst_55 {dimension_numbers = #tpu.dot_dimension_numbers<[1], [0], [0], [1], [0, 0, 1, 1], [], []>} : vector<8x16xbf16>, vector<16x128xbf16>, vector<8x128xf32> -> vector<8x128xf32>
    %129 = arith.addf %105, %128 : vector<8x128xf32>
    %130 = vector.extract_strided_slice %33 {offsets = [0, 64], sizes = [8, 16], strides = [1, 1]} : vector<8x384xf32> to vector<8x16xf32>
    %131 = arith.truncf %130 : vector<8x16xf32> to vector<8x16xbf16>
    %132 = vector.extract_strided_slice %33 {offsets = [0, 192], sizes = [8, 16], strides = [1, 1]} : vector<8x384xf32> to vector<8x16xf32>
    %133 = arith.truncf %132 : vector<8x16xf32> to vector<8x16xbf16>
    %134 = vector.extract_strided_slice %33 {offsets = [0, 320], sizes = [8, 16], strides = [1, 1]} : vector<8x384xf32> to vector<8x16xf32>
    %135 = arith.truncf %134 : vector<8x16xf32> to vector<8x16xbf16>
    %cst_56 = arith.constant dense<0.000000e+00> : vector<8x8xf32>
    %136 = tpu.matmul %131, %133, %cst_56 {dimension_numbers = #tpu.dot_dimension_numbers<[1], [1], [0], [0], [0, 0, 1, 0], [], []>} : vector<8x16xbf16>, vector<8x16xbf16>, vector<8x8xf32> -> vector<8x8xf32>
    %cst_57 = arith.constant 2.500000e-01 : f32
    %137 = vector.broadcast %cst_57 : f32 to vector<8x8xf32>
    %138 = arith.mulf %136, %137 : vector<8x8xf32>
    %cst_58 = arith.constant dense<0xFF800000> : vector<8xf32>
    %139 = vector.multi_reduction <maximumf>, %138, %cst_58 [1] : vector<8x8xf32> to vector<8xf32>
    %140 = vector.shape_cast %139 : vector<8xf32> to vector<8x1xf32>
    %141 = vector.broadcast %140 : vector<8x1xf32> to vector<8x8xf32>
    %142 = arith.subf %138, %141 : vector<8x8xf32>
    %143 = math.exp %142 : vector<8x8xf32>
    %cst_59 = arith.constant dense<0.000000e+00> : vector<8xf32>
    %144 = vector.multi_reduction <add>, %143, %cst_59 [1] : vector<8x8xf32> to vector<8xf32>
    %145 = vector.shape_cast %144 : vector<8xf32> to vector<8x1xf32>
    %146 = vector.broadcast %145 : vector<8x1xf32> to vector<8x8xf32>
    %147 = arith.divf %143, %146 : vector<8x8xf32>
    %148 = arith.truncf %147 : vector<8x8xf32> to vector<8x8xbf16>
    %cst_60 = arith.constant dense<0.000000e+00> : vector<8x16xf32>
    %149 = tpu.matmul %148, %135, %cst_60 {dimension_numbers = #tpu.dot_dimension_numbers<[1], [0], [0], [1], [0, 0, 1, 1], [], []>} : vector<8x8xbf16>, vector<8x16xbf16>, vector<8x16xf32> -> vector<8x16xf32>
    %150 = arith.truncf %149 : vector<8x16xf32> to vector<8x16xbf16>
    %151 = vector.extract_strided_slice %1 {offsets = [64, 0], sizes = [16, 128], strides = [1, 1]} : vector<128x128xbf16> to vector<16x128xbf16>
    %cst_61 = arith.constant dense<0.000000e+00> : vector<8x128xf32>
    %152 = tpu.matmul %150, %151, %cst_61 {dimension_numbers = #tpu.dot_dimension_numbers<[1], [0], [0], [1], [0, 0, 1, 1], [], []>} : vector<8x16xbf16>, vector<16x128xbf16>, vector<8x128xf32> -> vector<8x128xf32>
    %153 = arith.addf %129, %152 : vector<8x128xf32>
    %154 = vector.extract_strided_slice %33 {offsets = [0, 80], sizes = [8, 16], strides = [1, 1]} : vector<8x384xf32> to vector<8x16xf32>
    %155 = arith.truncf %154 : vector<8x16xf32> to vector<8x16xbf16>
    %156 = vector.extract_strided_slice %33 {offsets = [0, 208], sizes = [8, 16], strides = [1, 1]} : vector<8x384xf32> to vector<8x16xf32>
    %157 = arith.truncf %156 : vector<8x16xf32> to vector<8x16xbf16>
    %158 = vector.extract_strided_slice %33 {offsets = [0, 336], sizes = [8, 16], strides = [1, 1]} : vector<8x384xf32> to vector<8x16xf32>
    %159 = arith.truncf %158 : vector<8x16xf32> to vector<8x16xbf16>
    %cst_62 = arith.constant dense<0.000000e+00> : vector<8x8xf32>
    %160 = tpu.matmul %155, %157, %cst_62 {dimension_numbers = #tpu.dot_dimension_numbers<[1], [1], [0], [0], [0, 0, 1, 0], [], []>} : vector<8x16xbf16>, vector<8x16xbf16>, vector<8x8xf32> -> vector<8x8xf32>
    %cst_63 = arith.constant 2.500000e-01 : f32
    %161 = vector.broadcast %cst_63 : f32 to vector<8x8xf32>
    %162 = arith.mulf %160, %161 : vector<8x8xf32>
    %cst_64 = arith.constant dense<0xFF800000> : vector<8xf32>
    %163 = vector.multi_reduction <maximumf>, %162, %cst_64 [1] : vector<8x8xf32> to vector<8xf32>
    %164 = vector.shape_cast %163 : vector<8xf32> to vector<8x1xf32>
    %165 = vector.broadcast %164 : vector<8x1xf32> to vector<8x8xf32>
    %166 = arith.subf %162, %165 : vector<8x8xf32>
    %167 = math.exp %166 : vector<8x8xf32>
    %cst_65 = arith.constant dense<0.000000e+00> : vector<8xf32>
    %168 = vector.multi_reduction <add>, %167, %cst_65 [1] : vector<8x8xf32> to vector<8xf32>
    %169 = vector.shape_cast %168 : vector<8xf32> to vector<8x1xf32>
    %170 = vector.broadcast %169 : vector<8x1xf32> to vector<8x8xf32>
    %171 = arith.divf %167, %170 : vector<8x8xf32>
    %172 = arith.truncf %171 : vector<8x8xf32> to vector<8x8xbf16>
    %cst_66 = arith.constant dense<0.000000e+00> : vector<8x16xf32>
    %173 = tpu.matmul %172, %159, %cst_66 {dimension_numbers = #tpu.dot_dimension_numbers<[1], [0], [0], [1], [0, 0, 1, 1], [], []>} : vector<8x8xbf16>, vector<8x16xbf16>, vector<8x16xf32> -> vector<8x16xf32>
    %174 = arith.truncf %173 : vector<8x16xf32> to vector<8x16xbf16>
    %175 = vector.extract_strided_slice %1 {offsets = [80, 0], sizes = [16, 128], strides = [1, 1]} : vector<128x128xbf16> to vector<16x128xbf16>
    %cst_67 = arith.constant dense<0.000000e+00> : vector<8x128xf32>
    %176 = tpu.matmul %174, %175, %cst_67 {dimension_numbers = #tpu.dot_dimension_numbers<[1], [0], [0], [1], [0, 0, 1, 1], [], []>} : vector<8x16xbf16>, vector<16x128xbf16>, vector<8x128xf32> -> vector<8x128xf32>
    %177 = arith.addf %153, %176 : vector<8x128xf32>
    %178 = vector.extract_strided_slice %33 {offsets = [0, 96], sizes = [8, 16], strides = [1, 1]} : vector<8x384xf32> to vector<8x16xf32>
    %179 = arith.truncf %178 : vector<8x16xf32> to vector<8x16xbf16>
    %180 = vector.extract_strided_slice %33 {offsets = [0, 224], sizes = [8, 16], strides = [1, 1]} : vector<8x384xf32> to vector<8x16xf32>
    %181 = arith.truncf %180 : vector<8x16xf32> to vector<8x16xbf16>
    %182 = vector.extract_strided_slice %33 {offsets = [0, 352], sizes = [8, 16], strides = [1, 1]} : vector<8x384xf32> to vector<8x16xf32>
    %183 = arith.truncf %182 : vector<8x16xf32> to vector<8x16xbf16>
    %cst_68 = arith.constant dense<0.000000e+00> : vector<8x8xf32>
    %184 = tpu.matmul %179, %181, %cst_68 {dimension_numbers = #tpu.dot_dimension_numbers<[1], [1], [0], [0], [0, 0, 1, 0], [], []>} : vector<8x16xbf16>, vector<8x16xbf16>, vector<8x8xf32> -> vector<8x8xf32>
    %cst_69 = arith.constant 2.500000e-01 : f32
    %185 = vector.broadcast %cst_69 : f32 to vector<8x8xf32>
    %186 = arith.mulf %184, %185 : vector<8x8xf32>
    %cst_70 = arith.constant dense<0xFF800000> : vector<8xf32>
    %187 = vector.multi_reduction <maximumf>, %186, %cst_70 [1] : vector<8x8xf32> to vector<8xf32>
    %188 = vector.shape_cast %187 : vector<8xf32> to vector<8x1xf32>
    %189 = vector.broadcast %188 : vector<8x1xf32> to vector<8x8xf32>
    %190 = arith.subf %186, %189 : vector<8x8xf32>
    %191 = math.exp %190 : vector<8x8xf32>
    %cst_71 = arith.constant dense<0.000000e+00> : vector<8xf32>
    %192 = vector.multi_reduction <add>, %191, %cst_71 [1] : vector<8x8xf32> to vector<8xf32>
    %193 = vector.shape_cast %192 : vector<8xf32> to vector<8x1xf32>
    %194 = vector.broadcast %193 : vector<8x1xf32> to vector<8x8xf32>
    %195 = arith.divf %191, %194 : vector<8x8xf32>
    %196 = arith.truncf %195 : vector<8x8xf32> to vector<8x8xbf16>
    %cst_72 = arith.constant dense<0.000000e+00> : vector<8x16xf32>
    %197 = tpu.matmul %196, %183, %cst_72 {dimension_numbers = #tpu.dot_dimension_numbers<[1], [0], [0], [1], [0, 0, 1, 1], [], []>} : vector<8x8xbf16>, vector<8x16xbf16>, vector<8x16xf32> -> vector<8x16xf32>
    %198 = arith.truncf %197 : vector<8x16xf32> to vector<8x16xbf16>
    %199 = vector.extract_strided_slice %1 {offsets = [96, 0], sizes = [16, 128], strides = [1, 1]} : vector<128x128xbf16> to vector<16x128xbf16>
    %cst_73 = arith.constant dense<0.000000e+00> : vector<8x128xf32>
    %200 = tpu.matmul %198, %199, %cst_73 {dimension_numbers = #tpu.dot_dimension_numbers<[1], [0], [0], [1], [0, 0, 1, 1], [], []>} : vector<8x16xbf16>, vector<16x128xbf16>, vector<8x128xf32> -> vector<8x128xf32>
    %201 = arith.addf %177, %200 : vector<8x128xf32>
    %202 = vector.extract_strided_slice %33 {offsets = [0, 112], sizes = [8, 16], strides = [1, 1]} : vector<8x384xf32> to vector<8x16xf32>
    %203 = arith.truncf %202 : vector<8x16xf32> to vector<8x16xbf16>
    %204 = vector.extract_strided_slice %33 {offsets = [0, 240], sizes = [8, 16], strides = [1, 1]} : vector<8x384xf32> to vector<8x16xf32>
    %205 = arith.truncf %204 : vector<8x16xf32> to vector<8x16xbf16>
    %206 = vector.extract_strided_slice %33 {offsets = [0, 368], sizes = [8, 16], strides = [1, 1]} : vector<8x384xf32> to vector<8x16xf32>
    %207 = arith.truncf %206 : vector<8x16xf32> to vector<8x16xbf16>
    %cst_74 = arith.constant dense<0.000000e+00> : vector<8x8xf32>
    %208 = tpu.matmul %203, %205, %cst_74 {dimension_numbers = #tpu.dot_dimension_numbers<[1], [1], [0], [0], [0, 0, 1, 0], [], []>} : vector<8x16xbf16>, vector<8x16xbf16>, vector<8x8xf32> -> vector<8x8xf32>
    %cst_75 = arith.constant 2.500000e-01 : f32
    %209 = vector.broadcast %cst_75 : f32 to vector<8x8xf32>
    %210 = arith.mulf %208, %209 : vector<8x8xf32>
    %cst_76 = arith.constant dense<0xFF800000> : vector<8xf32>
    %211 = vector.multi_reduction <maximumf>, %210, %cst_76 [1] : vector<8x8xf32> to vector<8xf32>
    %212 = vector.shape_cast %211 : vector<8xf32> to vector<8x1xf32>
    %213 = vector.broadcast %212 : vector<8x1xf32> to vector<8x8xf32>
    %214 = arith.subf %210, %213 : vector<8x8xf32>
    %215 = math.exp %214 : vector<8x8xf32>
    %cst_77 = arith.constant dense<0.000000e+00> : vector<8xf32>
    %216 = vector.multi_reduction <add>, %215, %cst_77 [1] : vector<8x8xf32> to vector<8xf32>
    %217 = vector.shape_cast %216 : vector<8xf32> to vector<8x1xf32>
    %218 = vector.broadcast %217 : vector<8x1xf32> to vector<8x8xf32>
    %219 = arith.divf %215, %218 : vector<8x8xf32>
    %220 = arith.truncf %219 : vector<8x8xf32> to vector<8x8xbf16>
    %cst_78 = arith.constant dense<0.000000e+00> : vector<8x16xf32>
    %221 = tpu.matmul %220, %207, %cst_78 {dimension_numbers = #tpu.dot_dimension_numbers<[1], [0], [0], [1], [0, 0, 1, 1], [], []>} : vector<8x8xbf16>, vector<8x16xbf16>, vector<8x16xf32> -> vector<8x16xf32>
    %222 = arith.truncf %221 : vector<8x16xf32> to vector<8x16xbf16>
    %223 = vector.extract_strided_slice %1 {offsets = [112, 0], sizes = [16, 128], strides = [1, 1]} : vector<128x128xbf16> to vector<16x128xbf16>
    %cst_79 = arith.constant dense<0.000000e+00> : vector<8x128xf32>
    %224 = tpu.matmul %222, %223, %cst_79 {dimension_numbers = #tpu.dot_dimension_numbers<[1], [0], [0], [1], [0, 0, 1, 1], [], []>} : vector<8x16xbf16>, vector<16x128xbf16>, vector<8x128xf32> -> vector<8x128xf32>
    %225 = arith.addf %201, %224 : vector<8x128xf32>
    %226 = arith.truncf %225 : vector<8x128xf32> to vector<8x128xbf16>
    %cst_80 = arith.constant dense<0.000000e+00> : vector<8x1024xf32>
    %227 = tpu.matmul %226, %2, %cst_80 {dimension_numbers = #tpu.dot_dimension_numbers<[1], [0], [0], [1], [0, 0, 1, 1], [], []>} : vector<8x128xbf16>, vector<128x1024xbf16>, vector<8x1024xf32> -> vector<8x1024xf32>
    %228 = arith.truncf %25 : vector<8x256xf32> to vector<8x256xbf16>
    %cst_81 = arith.constant dense<0.000000e+00> : vector<8x1024xf32>
    %229 = tpu.matmul %228, %3, %cst_81 {dimension_numbers = #tpu.dot_dimension_numbers<[1], [0], [0], [1], [0, 0, 1, 1], [], []>} : vector<8x256xbf16>, vector<256x1024xbf16>, vector<8x1024xf32> -> vector<8x1024xf32>
    %230 = arith.addf %227, %229 : vector<8x1024xf32>
    %231 = arith.addf %230, %15 : vector<8x1024xf32>
    %232 = vector.extract_strided_slice %231 {offsets = [0, 0], sizes = [8, 256], strides = [1, 1]} : vector<8x1024xf32> to vector<8x256xf32>
    %233 = arith.negf %232 : vector<8x256xf32>
    %234 = math.exp %233 : vector<8x256xf32>
    %cst_82 = arith.constant 1.000000e+00 : f32
    %235 = vector.broadcast %cst_82 : f32 to vector<8x256xf32>
    %236 = arith.addf %235, %234 : vector<8x256xf32>
    %237 = arith.divf %235, %236 : vector<8x256xf32>
    %238 = vector.extract_strided_slice %231 {offsets = [0, 256], sizes = [8, 256], strides = [1, 1]} : vector<8x1024xf32> to vector<8x256xf32>
    %239 = arith.negf %238 : vector<8x256xf32>
    %240 = math.exp %239 : vector<8x256xf32>
    %cst_83 = arith.constant 1.000000e+00 : f32
    %241 = vector.broadcast %cst_83 : f32 to vector<8x256xf32>
    %242 = arith.addf %241, %240 : vector<8x256xf32>
    %243 = arith.divf %241, %242 : vector<8x256xf32>
    %244 = vector.extract_strided_slice %231 {offsets = [0, 512], sizes = [8, 256], strides = [1, 1]} : vector<8x1024xf32> to vector<8x256xf32>
    %245 = math.tanh %244 : vector<8x256xf32>
    %246 = vector.extract_strided_slice %231 {offsets = [0, 768], sizes = [8, 256], strides = [1, 1]} : vector<8x1024xf32> to vector<8x256xf32>
    %247 = arith.negf %246 : vector<8x256xf32>
    %248 = math.exp %247 : vector<8x256xf32>
    %cst_84 = arith.constant 1.000000e+00 : f32
    %249 = vector.broadcast %cst_84 : f32 to vector<8x256xf32>
    %250 = arith.addf %249, %248 : vector<8x256xf32>
    %251 = arith.divf %249, %250 : vector<8x256xf32>
    %252 = arith.mulf %243, %26 : vector<8x256xf32>
    %253 = arith.mulf %237, %245 : vector<8x256xf32>
    %254 = arith.addf %252, %253 : vector<8x256xf32>
    %255 = math.tanh %254 : vector<8x256xf32>
    %256 = arith.mulf %251, %255 : vector<8x256xf32>
    %257 = tpu.concatenate %256, %27 in 1 : vector<8x256xf32>, vector<8x256xf32> -> vector<8x512xf32>
    %258 = arith.truncf %257 : vector<8x512xf32> to vector<8x512xbf16>
    %cst_85 = arith.constant dense<0.000000e+00> : vector<8x1024xf32>
    %259 = tpu.matmul %258, %4, %cst_85 {dimension_numbers = #tpu.dot_dimension_numbers<[1], [0], [0], [1], [0, 0, 1, 1], [], []>} : vector<8x512xbf16>, vector<512x1024xbf16>, vector<8x1024xf32> -> vector<8x1024xf32>
    %260 = arith.addf %259, %18 : vector<8x1024xf32>
    %261 = vector.extract_strided_slice %260 {offsets = [0, 0], sizes = [8, 256], strides = [1, 1]} : vector<8x1024xf32> to vector<8x256xf32>
    %262 = arith.negf %261 : vector<8x256xf32>
    %263 = math.exp %262 : vector<8x256xf32>
    %cst_86 = arith.constant 1.000000e+00 : f32
    %264 = vector.broadcast %cst_86 : f32 to vector<8x256xf32>
    %265 = arith.addf %264, %263 : vector<8x256xf32>
    %266 = arith.divf %264, %265 : vector<8x256xf32>
    %267 = vector.extract_strided_slice %260 {offsets = [0, 256], sizes = [8, 256], strides = [1, 1]} : vector<8x1024xf32> to vector<8x256xf32>
    %268 = arith.negf %267 : vector<8x256xf32>
    %269 = math.exp %268 : vector<8x256xf32>
    %cst_87 = arith.constant 1.000000e+00 : f32
    %270 = vector.broadcast %cst_87 : f32 to vector<8x256xf32>
    %271 = arith.addf %270, %269 : vector<8x256xf32>
    %272 = arith.divf %270, %271 : vector<8x256xf32>
    %273 = vector.extract_strided_slice %260 {offsets = [0, 512], sizes = [8, 256], strides = [1, 1]} : vector<8x1024xf32> to vector<8x256xf32>
    %274 = math.tanh %273 : vector<8x256xf32>
    %275 = vector.extract_strided_slice %260 {offsets = [0, 768], sizes = [8, 256], strides = [1, 1]} : vector<8x1024xf32> to vector<8x256xf32>
    %276 = arith.negf %275 : vector<8x256xf32>
    %277 = math.exp %276 : vector<8x256xf32>
    %cst_88 = arith.constant 1.000000e+00 : f32
    %278 = vector.broadcast %cst_88 : f32 to vector<8x256xf32>
    %279 = arith.addf %278, %277 : vector<8x256xf32>
    %280 = arith.divf %278, %279 : vector<8x256xf32>
    %281 = arith.mulf %272, %28 : vector<8x256xf32>
    %282 = arith.mulf %266, %274 : vector<8x256xf32>
    %283 = arith.addf %281, %282 : vector<8x256xf32>
    %284 = math.tanh %283 : vector<8x256xf32>
    %285 = arith.mulf %280, %284 : vector<8x256xf32>
    %286 = arith.truncf %285 : vector<8x256xf32> to vector<8x256xbf16>
    %cst_89 = arith.constant dense<0.000000e+00> : vector<8x128xf32>
    %287 = tpu.matmul %286, %5, %cst_89 {dimension_numbers = #tpu.dot_dimension_numbers<[1], [0], [0], [1], [0, 0, 1, 1], [], []>} : vector<8x256xbf16>, vector<256x128xbf16>, vector<8x128xf32> -> vector<8x128xf32>
    %288 = arith.addf %287, %21 : vector<8x128xf32>
    %cst_90 = arith.constant 0.000000e+00 : f32
    %289 = vector.broadcast %cst_90 : f32 to vector<8x128xf32>
    %290 = arith.maximumf %288, %289 : vector<8x128xf32>
    %291 = arith.truncf %290 : vector<8x128xf32> to vector<8x128xbf16>
    %cst_91 = arith.constant dense<0.000000e+00> : vector<8x4xf32>
    %292 = tpu.matmul %291, %6, %cst_91 {dimension_numbers = #tpu.dot_dimension_numbers<[1], [0], [0], [1], [0, 0, 1, 1], [], []>} : vector<8x128xbf16>, vector<128x4xbf16>, vector<8x4xf32> -> vector<8x4xf32>
    %293 = arith.addf %292, %24 : vector<8x4xf32>
    %c0_92 = arith.constant 0 : index
    %c0_93 = arith.constant 0 : index
    %c0_94 = arith.constant 0 : index
    %294 = vector.load %arg14[%c0_92, %c0_93, %c0_94] : memref<8x2x4xf32, #tpu.memory_space<vmem>>, vector<8x1x4xf32>
    %295 = vector.shape_cast %294 : vector<8x1x4xf32> to vector<8x4xf32>
    %296 = vector.shape_cast %293 : vector<8x4xf32> to vector<8x1x4xf32>
    tpu.vector_store %arg14[%c0_92, %c0_93, %c0_94], %296 {strides = array<i32>} : memref<8x2x4xf32, #tpu.memory_space<vmem>>, vector<8x1x4xf32>,
    %c0_95 = arith.constant 0 : index
    %c1 = arith.constant 1 : index
    %c0_96 = arith.constant 0 : index
    %297 = vector.load %arg0[%c0_95, %c1, %c0_96] : memref<8x2x128xf32, #tpu.memory_space<vmem>>, vector<8x1x128xf32>
    %298 = vector.shape_cast %297 : vector<8x1x128xf32> to vector<8x128xf32>
    %299 = arith.truncf %298 : vector<8x128xf32> to vector<8x128xbf16>
    %cst_97 = arith.constant dense<0.000000e+00> : vector<8x384xf32>
    %300 = tpu.matmul %299, %0, %cst_97 {dimension_numbers = #tpu.dot_dimension_numbers<[1], [0], [0], [1], [0, 0, 1, 1], [], []>} : vector<8x128xbf16>, vector<128x384xbf16>, vector<8x384xf32> -> vector<8x384xf32>
    %301 = arith.addf %300, %9 : vector<8x384xf32>
    %302 = vector.extract_strided_slice %301 {offsets = [0, 0], sizes = [8, 16], strides = [1, 1]} : vector<8x384xf32> to vector<8x16xf32>
    %303 = arith.truncf %302 : vector<8x16xf32> to vector<8x16xbf16>
    %304 = vector.extract_strided_slice %301 {offsets = [0, 128], sizes = [8, 16], strides = [1, 1]} : vector<8x384xf32> to vector<8x16xf32>
    %305 = arith.truncf %304 : vector<8x16xf32> to vector<8x16xbf16>
    %306 = vector.extract_strided_slice %301 {offsets = [0, 256], sizes = [8, 16], strides = [1, 1]} : vector<8x384xf32> to vector<8x16xf32>
    %307 = arith.truncf %306 : vector<8x16xf32> to vector<8x16xbf16>
    %cst_98 = arith.constant dense<0.000000e+00> : vector<8x8xf32>
    %308 = tpu.matmul %303, %305, %cst_98 {dimension_numbers = #tpu.dot_dimension_numbers<[1], [1], [0], [0], [0, 0, 1, 0], [], []>} : vector<8x16xbf16>, vector<8x16xbf16>, vector<8x8xf32> -> vector<8x8xf32>
    %cst_99 = arith.constant 2.500000e-01 : f32
    %309 = vector.broadcast %cst_99 : f32 to vector<8x8xf32>
    %310 = arith.mulf %308, %309 : vector<8x8xf32>
    %cst_100 = arith.constant dense<0xFF800000> : vector<8xf32>
    %311 = vector.multi_reduction <maximumf>, %310, %cst_100 [1] : vector<8x8xf32> to vector<8xf32>
    %312 = vector.shape_cast %311 : vector<8xf32> to vector<8x1xf32>
    %313 = vector.broadcast %312 : vector<8x1xf32> to vector<8x8xf32>
    %314 = arith.subf %310, %313 : vector<8x8xf32>
    %315 = math.exp %314 : vector<8x8xf32>
    %cst_101 = arith.constant dense<0.000000e+00> : vector<8xf32>
    %316 = vector.multi_reduction <add>, %315, %cst_101 [1] : vector<8x8xf32> to vector<8xf32>
    %317 = vector.shape_cast %316 : vector<8xf32> to vector<8x1xf32>
    %318 = vector.broadcast %317 : vector<8x1xf32> to vector<8x8xf32>
    %319 = arith.divf %315, %318 : vector<8x8xf32>
    %320 = arith.truncf %319 : vector<8x8xf32> to vector<8x8xbf16>
    %cst_102 = arith.constant dense<0.000000e+00> : vector<8x16xf32>
    %321 = tpu.matmul %320, %307, %cst_102 {dimension_numbers = #tpu.dot_dimension_numbers<[1], [0], [0], [1], [0, 0, 1, 1], [], []>} : vector<8x8xbf16>, vector<8x16xbf16>, vector<8x16xf32> -> vector<8x16xf32>
    %322 = arith.truncf %321 : vector<8x16xf32> to vector<8x16xbf16>
    %323 = vector.extract_strided_slice %1 {offsets = [0, 0], sizes = [16, 128], strides = [1, 1]} : vector<128x128xbf16> to vector<16x128xbf16>
    %cst_103 = arith.constant dense<0.000000e+00> : vector<8x128xf32>
    %324 = tpu.matmul %322, %323, %cst_103 {dimension_numbers = #tpu.dot_dimension_numbers<[1], [0], [0], [1], [0, 0, 1, 1], [], []>} : vector<8x16xbf16>, vector<16x128xbf16>, vector<8x128xf32> -> vector<8x128xf32>
    %325 = arith.addf %12, %324 : vector<8x128xf32>
    %326 = vector.extract_strided_slice %301 {offsets = [0, 16], sizes = [8, 16], strides = [1, 1]} : vector<8x384xf32> to vector<8x16xf32>
    %327 = arith.truncf %326 : vector<8x16xf32> to vector<8x16xbf16>
    %328 = vector.extract_strided_slice %301 {offsets = [0, 144], sizes = [8, 16], strides = [1, 1]} : vector<8x384xf32> to vector<8x16xf32>
    %329 = arith.truncf %328 : vector<8x16xf32> to vector<8x16xbf16>
    %330 = vector.extract_strided_slice %301 {offsets = [0, 272], sizes = [8, 16], strides = [1, 1]} : vector<8x384xf32> to vector<8x16xf32>
    %331 = arith.truncf %330 : vector<8x16xf32> to vector<8x16xbf16>
    %cst_104 = arith.constant dense<0.000000e+00> : vector<8x8xf32>
    %332 = tpu.matmul %327, %329, %cst_104 {dimension_numbers = #tpu.dot_dimension_numbers<[1], [1], [0], [0], [0, 0, 1, 0], [], []>} : vector<8x16xbf16>, vector<8x16xbf16>, vector<8x8xf32> -> vector<8x8xf32>
    %cst_105 = arith.constant 2.500000e-01 : f32
    %333 = vector.broadcast %cst_105 : f32 to vector<8x8xf32>
    %334 = arith.mulf %332, %333 : vector<8x8xf32>
    %cst_106 = arith.constant dense<0xFF800000> : vector<8xf32>
    %335 = vector.multi_reduction <maximumf>, %334, %cst_106 [1] : vector<8x8xf32> to vector<8xf32>
    %336 = vector.shape_cast %335 : vector<8xf32> to vector<8x1xf32>
    %337 = vector.broadcast %336 : vector<8x1xf32> to vector<8x8xf32>
    %338 = arith.subf %334, %337 : vector<8x8xf32>
    %339 = math.exp %338 : vector<8x8xf32>
    %cst_107 = arith.constant dense<0.000000e+00> : vector<8xf32>
    %340 = vector.multi_reduction <add>, %339, %cst_107 [1] : vector<8x8xf32> to vector<8xf32>
    %341 = vector.shape_cast %340 : vector<8xf32> to vector<8x1xf32>
    %342 = vector.broadcast %341 : vector<8x1xf32> to vector<8x8xf32>
    %343 = arith.divf %339, %342 : vector<8x8xf32>
    %344 = arith.truncf %343 : vector<8x8xf32> to vector<8x8xbf16>
    %cst_108 = arith.constant dense<0.000000e+00> : vector<8x16xf32>
    %345 = tpu.matmul %344, %331, %cst_108 {dimension_numbers = #tpu.dot_dimension_numbers<[1], [0], [0], [1], [0, 0, 1, 1], [], []>} : vector<8x8xbf16>, vector<8x16xbf16>, vector<8x16xf32> -> vector<8x16xf32>
    %346 = arith.truncf %345 : vector<8x16xf32> to vector<8x16xbf16>
    %347 = vector.extract_strided_slice %1 {offsets = [16, 0], sizes = [16, 128], strides = [1, 1]} : vector<128x128xbf16> to vector<16x128xbf16>
    %cst_109 = arith.constant dense<0.000000e+00> : vector<8x128xf32>
    %348 = tpu.matmul %346, %347, %cst_109 {dimension_numbers = #tpu.dot_dimension_numbers<[1], [0], [0], [1], [0, 0, 1, 1], [], []>} : vector<8x16xbf16>, vector<16x128xbf16>, vector<8x128xf32> -> vector<8x128xf32>
    %349 = arith.addf %325, %348 : vector<8x128xf32>
    %350 = vector.extract_strided_slice %301 {offsets = [0, 32], sizes = [8, 16], strides = [1, 1]} : vector<8x384xf32> to vector<8x16xf32>
    %351 = arith.truncf %350 : vector<8x16xf32> to vector<8x16xbf16>
    %352 = vector.extract_strided_slice %301 {offsets = [0, 160], sizes = [8, 16], strides = [1, 1]} : vector<8x384xf32> to vector<8x16xf32>
    %353 = arith.truncf %352 : vector<8x16xf32> to vector<8x16xbf16>
    %354 = vector.extract_strided_slice %301 {offsets = [0, 288], sizes = [8, 16], strides = [1, 1]} : vector<8x384xf32> to vector<8x16xf32>
    %355 = arith.truncf %354 : vector<8x16xf32> to vector<8x16xbf16>
    %cst_110 = arith.constant dense<0.000000e+00> : vector<8x8xf32>
    %356 = tpu.matmul %351, %353, %cst_110 {dimension_numbers = #tpu.dot_dimension_numbers<[1], [1], [0], [0], [0, 0, 1, 0], [], []>} : vector<8x16xbf16>, vector<8x16xbf16>, vector<8x8xf32> -> vector<8x8xf32>
    %cst_111 = arith.constant 2.500000e-01 : f32
    %357 = vector.broadcast %cst_111 : f32 to vector<8x8xf32>
    %358 = arith.mulf %356, %357 : vector<8x8xf32>
    %cst_112 = arith.constant dense<0xFF800000> : vector<8xf32>
    %359 = vector.multi_reduction <maximumf>, %358, %cst_112 [1] : vector<8x8xf32> to vector<8xf32>
    %360 = vector.shape_cast %359 : vector<8xf32> to vector<8x1xf32>
    %361 = vector.broadcast %360 : vector<8x1xf32> to vector<8x8xf32>
    %362 = arith.subf %358, %361 : vector<8x8xf32>
    %363 = math.exp %362 : vector<8x8xf32>
    %cst_113 = arith.constant dense<0.000000e+00> : vector<8xf32>
    %364 = vector.multi_reduction <add>, %363, %cst_113 [1] : vector<8x8xf32> to vector<8xf32>
    %365 = vector.shape_cast %364 : vector<8xf32> to vector<8x1xf32>
    %366 = vector.broadcast %365 : vector<8x1xf32> to vector<8x8xf32>
    %367 = arith.divf %363, %366 : vector<8x8xf32>
    %368 = arith.truncf %367 : vector<8x8xf32> to vector<8x8xbf16>
    %cst_114 = arith.constant dense<0.000000e+00> : vector<8x16xf32>
    %369 = tpu.matmul %368, %355, %cst_114 {dimension_numbers = #tpu.dot_dimension_numbers<[1], [0], [0], [1], [0, 0, 1, 1], [], []>} : vector<8x8xbf16>, vector<8x16xbf16>, vector<8x16xf32> -> vector<8x16xf32>
    %370 = arith.truncf %369 : vector<8x16xf32> to vector<8x16xbf16>
    %371 = vector.extract_strided_slice %1 {offsets = [32, 0], sizes = [16, 128], strides = [1, 1]} : vector<128x128xbf16> to vector<16x128xbf16>
    %cst_115 = arith.constant dense<0.000000e+00> : vector<8x128xf32>
    %372 = tpu.matmul %370, %371, %cst_115 {dimension_numbers = #tpu.dot_dimension_numbers<[1], [0], [0], [1], [0, 0, 1, 1], [], []>} : vector<8x16xbf16>, vector<16x128xbf16>, vector<8x128xf32> -> vector<8x128xf32>
    %373 = arith.addf %349, %372 : vector<8x128xf32>
    %374 = vector.extract_strided_slice %301 {offsets = [0, 48], sizes = [8, 16], strides = [1, 1]} : vector<8x384xf32> to vector<8x16xf32>
    %375 = arith.truncf %374 : vector<8x16xf32> to vector<8x16xbf16>
    %376 = vector.extract_strided_slice %301 {offsets = [0, 176], sizes = [8, 16], strides = [1, 1]} : vector<8x384xf32> to vector<8x16xf32>
    %377 = arith.truncf %376 : vector<8x16xf32> to vector<8x16xbf16>
    %378 = vector.extract_strided_slice %301 {offsets = [0, 304], sizes = [8, 16], strides = [1, 1]} : vector<8x384xf32> to vector<8x16xf32>
    %379 = arith.truncf %378 : vector<8x16xf32> to vector<8x16xbf16>
    %cst_116 = arith.constant dense<0.000000e+00> : vector<8x8xf32>
    %380 = tpu.matmul %375, %377, %cst_116 {dimension_numbers = #tpu.dot_dimension_numbers<[1], [1], [0], [0], [0, 0, 1, 0], [], []>} : vector<8x16xbf16>, vector<8x16xbf16>, vector<8x8xf32> -> vector<8x8xf32>
    %cst_117 = arith.constant 2.500000e-01 : f32
    %381 = vector.broadcast %cst_117 : f32 to vector<8x8xf32>
    %382 = arith.mulf %380, %381 : vector<8x8xf32>
    %cst_118 = arith.constant dense<0xFF800000> : vector<8xf32>
    %383 = vector.multi_reduction <maximumf>, %382, %cst_118 [1] : vector<8x8xf32> to vector<8xf32>
    %384 = vector.shape_cast %383 : vector<8xf32> to vector<8x1xf32>
    %385 = vector.broadcast %384 : vector<8x1xf32> to vector<8x8xf32>
    %386 = arith.subf %382, %385 : vector<8x8xf32>
    %387 = math.exp %386 : vector<8x8xf32>
    %cst_119 = arith.constant dense<0.000000e+00> : vector<8xf32>
    %388 = vector.multi_reduction <add>, %387, %cst_119 [1] : vector<8x8xf32> to vector<8xf32>
    %389 = vector.shape_cast %388 : vector<8xf32> to vector<8x1xf32>
    %390 = vector.broadcast %389 : vector<8x1xf32> to vector<8x8xf32>
    %391 = arith.divf %387, %390 : vector<8x8xf32>
    %392 = arith.truncf %391 : vector<8x8xf32> to vector<8x8xbf16>
    %cst_120 = arith.constant dense<0.000000e+00> : vector<8x16xf32>
    %393 = tpu.matmul %392, %379, %cst_120 {dimension_numbers = #tpu.dot_dimension_numbers<[1], [0], [0], [1], [0, 0, 1, 1], [], []>} : vector<8x8xbf16>, vector<8x16xbf16>, vector<8x16xf32> -> vector<8x16xf32>
    %394 = arith.truncf %393 : vector<8x16xf32> to vector<8x16xbf16>
    %395 = vector.extract_strided_slice %1 {offsets = [48, 0], sizes = [16, 128], strides = [1, 1]} : vector<128x128xbf16> to vector<16x128xbf16>
    %cst_121 = arith.constant dense<0.000000e+00> : vector<8x128xf32>
    %396 = tpu.matmul %394, %395, %cst_121 {dimension_numbers = #tpu.dot_dimension_numbers<[1], [0], [0], [1], [0, 0, 1, 1], [], []>} : vector<8x16xbf16>, vector<16x128xbf16>, vector<8x128xf32> -> vector<8x128xf32>
    %397 = arith.addf %373, %396 : vector<8x128xf32>
    %398 = vector.extract_strided_slice %301 {offsets = [0, 64], sizes = [8, 16], strides = [1, 1]} : vector<8x384xf32> to vector<8x16xf32>
    %399 = arith.truncf %398 : vector<8x16xf32> to vector<8x16xbf16>
    %400 = vector.extract_strided_slice %301 {offsets = [0, 192], sizes = [8, 16], strides = [1, 1]} : vector<8x384xf32> to vector<8x16xf32>
    %401 = arith.truncf %400 : vector<8x16xf32> to vector<8x16xbf16>
    %402 = vector.extract_strided_slice %301 {offsets = [0, 320], sizes = [8, 16], strides = [1, 1]} : vector<8x384xf32> to vector<8x16xf32>
    %403 = arith.truncf %402 : vector<8x16xf32> to vector<8x16xbf16>
    %cst_122 = arith.constant dense<0.000000e+00> : vector<8x8xf32>
    %404 = tpu.matmul %399, %401, %cst_122 {dimension_numbers = #tpu.dot_dimension_numbers<[1], [1], [0], [0], [0, 0, 1, 0], [], []>} : vector<8x16xbf16>, vector<8x16xbf16>, vector<8x8xf32> -> vector<8x8xf32>
    %cst_123 = arith.constant 2.500000e-01 : f32
    %405 = vector.broadcast %cst_123 : f32 to vector<8x8xf32>
    %406 = arith.mulf %404, %405 : vector<8x8xf32>
    %cst_124 = arith.constant dense<0xFF800000> : vector<8xf32>
    %407 = vector.multi_reduction <maximumf>, %406, %cst_124 [1] : vector<8x8xf32> to vector<8xf32>
    %408 = vector.shape_cast %407 : vector<8xf32> to vector<8x1xf32>
    %409 = vector.broadcast %408 : vector<8x1xf32> to vector<8x8xf32>
    %410 = arith.subf %406, %409 : vector<8x8xf32>
    %411 = math.exp %410 : vector<8x8xf32>
    %cst_125 = arith.constant dense<0.000000e+00> : vector<8xf32>
    %412 = vector.multi_reduction <add>, %411, %cst_125 [1] : vector<8x8xf32> to vector<8xf32>
    %413 = vector.shape_cast %412 : vector<8xf32> to vector<8x1xf32>
    %414 = vector.broadcast %413 : vector<8x1xf32> to vector<8x8xf32>
    %415 = arith.divf %411, %414 : vector<8x8xf32>
    %416 = arith.truncf %415 : vector<8x8xf32> to vector<8x8xbf16>
    %cst_126 = arith.constant dense<0.000000e+00> : vector<8x16xf32>
    %417 = tpu.matmul %416, %403, %cst_126 {dimension_numbers = #tpu.dot_dimension_numbers<[1], [0], [0], [1], [0, 0, 1, 1], [], []>} : vector<8x8xbf16>, vector<8x16xbf16>, vector<8x16xf32> -> vector<8x16xf32>
    %418 = arith.truncf %417 : vector<8x16xf32> to vector<8x16xbf16>
    %419 = vector.extract_strided_slice %1 {offsets = [64, 0], sizes = [16, 128], strides = [1, 1]} : vector<128x128xbf16> to vector<16x128xbf16>
    %cst_127 = arith.constant dense<0.000000e+00> : vector<8x128xf32>
    %420 = tpu.matmul %418, %419, %cst_127 {dimension_numbers = #tpu.dot_dimension_numbers<[1], [0], [0], [1], [0, 0, 1, 1], [], []>} : vector<8x16xbf16>, vector<16x128xbf16>, vector<8x128xf32> -> vector<8x128xf32>
    %421 = arith.addf %397, %420 : vector<8x128xf32>
    %422 = vector.extract_strided_slice %301 {offsets = [0, 80], sizes = [8, 16], strides = [1, 1]} : vector<8x384xf32> to vector<8x16xf32>
    %423 = arith.truncf %422 : vector<8x16xf32> to vector<8x16xbf16>
    %424 = vector.extract_strided_slice %301 {offsets = [0, 208], sizes = [8, 16], strides = [1, 1]} : vector<8x384xf32> to vector<8x16xf32>
    %425 = arith.truncf %424 : vector<8x16xf32> to vector<8x16xbf16>
    %426 = vector.extract_strided_slice %301 {offsets = [0, 336], sizes = [8, 16], strides = [1, 1]} : vector<8x384xf32> to vector<8x16xf32>
    %427 = arith.truncf %426 : vector<8x16xf32> to vector<8x16xbf16>
    %cst_128 = arith.constant dense<0.000000e+00> : vector<8x8xf32>
    %428 = tpu.matmul %423, %425, %cst_128 {dimension_numbers = #tpu.dot_dimension_numbers<[1], [1], [0], [0], [0, 0, 1, 0], [], []>} : vector<8x16xbf16>, vector<8x16xbf16>, vector<8x8xf32> -> vector<8x8xf32>
    %cst_129 = arith.constant 2.500000e-01 : f32
    %429 = vector.broadcast %cst_129 : f32 to vector<8x8xf32>
    %430 = arith.mulf %428, %429 : vector<8x8xf32>
    %cst_130 = arith.constant dense<0xFF800000> : vector<8xf32>
    %431 = vector.multi_reduction <maximumf>, %430, %cst_130 [1] : vector<8x8xf32> to vector<8xf32>
    %432 = vector.shape_cast %431 : vector<8xf32> to vector<8x1xf32>
    %433 = vector.broadcast %432 : vector<8x1xf32> to vector<8x8xf32>
    %434 = arith.subf %430, %433 : vector<8x8xf32>
    %435 = math.exp %434 : vector<8x8xf32>
    %cst_131 = arith.constant dense<0.000000e+00> : vector<8xf32>
    %436 = vector.multi_reduction <add>, %435, %cst_131 [1] : vector<8x8xf32> to vector<8xf32>
    %437 = vector.shape_cast %436 : vector<8xf32> to vector<8x1xf32>
    %438 = vector.broadcast %437 : vector<8x1xf32> to vector<8x8xf32>
    %439 = arith.divf %435, %438 : vector<8x8xf32>
    %440 = arith.truncf %439 : vector<8x8xf32> to vector<8x8xbf16>
    %cst_132 = arith.constant dense<0.000000e+00> : vector<8x16xf32>
    %441 = tpu.matmul %440, %427, %cst_132 {dimension_numbers = #tpu.dot_dimension_numbers<[1], [0], [0], [1], [0, 0, 1, 1], [], []>} : vector<8x8xbf16>, vector<8x16xbf16>, vector<8x16xf32> -> vector<8x16xf32>
    %442 = arith.truncf %441 : vector<8x16xf32> to vector<8x16xbf16>
    %443 = vector.extract_strided_slice %1 {offsets = [80, 0], sizes = [16, 128], strides = [1, 1]} : vector<128x128xbf16> to vector<16x128xbf16>
    %cst_133 = arith.constant dense<0.000000e+00> : vector<8x128xf32>
    %444 = tpu.matmul %442, %443, %cst_133 {dimension_numbers = #tpu.dot_dimension_numbers<[1], [0], [0], [1], [0, 0, 1, 1], [], []>} : vector<8x16xbf16>, vector<16x128xbf16>, vector<8x128xf32> -> vector<8x128xf32>
    %445 = arith.addf %421, %444 : vector<8x128xf32>
    %446 = vector.extract_strided_slice %301 {offsets = [0, 96], sizes = [8, 16], strides = [1, 1]} : vector<8x384xf32> to vector<8x16xf32>
    %447 = arith.truncf %446 : vector<8x16xf32> to vector<8x16xbf16>
    %448 = vector.extract_strided_slice %301 {offsets = [0, 224], sizes = [8, 16], strides = [1, 1]} : vector<8x384xf32> to vector<8x16xf32>
    %449 = arith.truncf %448 : vector<8x16xf32> to vector<8x16xbf16>
    %450 = vector.extract_strided_slice %301 {offsets = [0, 352], sizes = [8, 16], strides = [1, 1]} : vector<8x384xf32> to vector<8x16xf32>
    %451 = arith.truncf %450 : vector<8x16xf32> to vector<8x16xbf16>
    %cst_134 = arith.constant dense<0.000000e+00> : vector<8x8xf32>
    %452 = tpu.matmul %447, %449, %cst_134 {dimension_numbers = #tpu.dot_dimension_numbers<[1], [1], [0], [0], [0, 0, 1, 0], [], []>} : vector<8x16xbf16>, vector<8x16xbf16>, vector<8x8xf32> -> vector<8x8xf32>
    %cst_135 = arith.constant 2.500000e-01 : f32
    %453 = vector.broadcast %cst_135 : f32 to vector<8x8xf32>
    %454 = arith.mulf %452, %453 : vector<8x8xf32>
    %cst_136 = arith.constant dense<0xFF800000> : vector<8xf32>
    %455 = vector.multi_reduction <maximumf>, %454, %cst_136 [1] : vector<8x8xf32> to vector<8xf32>
    %456 = vector.shape_cast %455 : vector<8xf32> to vector<8x1xf32>
    %457 = vector.broadcast %456 : vector<8x1xf32> to vector<8x8xf32>
    %458 = arith.subf %454, %457 : vector<8x8xf32>
    %459 = math.exp %458 : vector<8x8xf32>
    %cst_137 = arith.constant dense<0.000000e+00> : vector<8xf32>
    %460 = vector.multi_reduction <add>, %459, %cst_137 [1] : vector<8x8xf32> to vector<8xf32>
    %461 = vector.shape_cast %460 : vector<8xf32> to vector<8x1xf32>
    %462 = vector.broadcast %461 : vector<8x1xf32> to vector<8x8xf32>
    %463 = arith.divf %459, %462 : vector<8x8xf32>
    %464 = arith.truncf %463 : vector<8x8xf32> to vector<8x8xbf16>
    %cst_138 = arith.constant dense<0.000000e+00> : vector<8x16xf32>
    %465 = tpu.matmul %464, %451, %cst_138 {dimension_numbers = #tpu.dot_dimension_numbers<[1], [0], [0], [1], [0, 0, 1, 1], [], []>} : vector<8x8xbf16>, vector<8x16xbf16>, vector<8x16xf32> -> vector<8x16xf32>
    %466 = arith.truncf %465 : vector<8x16xf32> to vector<8x16xbf16>
    %467 = vector.extract_strided_slice %1 {offsets = [96, 0], sizes = [16, 128], strides = [1, 1]} : vector<128x128xbf16> to vector<16x128xbf16>
    %cst_139 = arith.constant dense<0.000000e+00> : vector<8x128xf32>
    %468 = tpu.matmul %466, %467, %cst_139 {dimension_numbers = #tpu.dot_dimension_numbers<[1], [0], [0], [1], [0, 0, 1, 1], [], []>} : vector<8x16xbf16>, vector<16x128xbf16>, vector<8x128xf32> -> vector<8x128xf32>
    %469 = arith.addf %445, %468 : vector<8x128xf32>
    %470 = vector.extract_strided_slice %301 {offsets = [0, 112], sizes = [8, 16], strides = [1, 1]} : vector<8x384xf32> to vector<8x16xf32>
    %471 = arith.truncf %470 : vector<8x16xf32> to vector<8x16xbf16>
    %472 = vector.extract_strided_slice %301 {offsets = [0, 240], sizes = [8, 16], strides = [1, 1]} : vector<8x384xf32> to vector<8x16xf32>
    %473 = arith.truncf %472 : vector<8x16xf32> to vector<8x16xbf16>
    %474 = vector.extract_strided_slice %301 {offsets = [0, 368], sizes = [8, 16], strides = [1, 1]} : vector<8x384xf32> to vector<8x16xf32>
    %475 = arith.truncf %474 : vector<8x16xf32> to vector<8x16xbf16>
    %cst_140 = arith.constant dense<0.000000e+00> : vector<8x8xf32>
    %476 = tpu.matmul %471, %473, %cst_140 {dimension_numbers = #tpu.dot_dimension_numbers<[1], [1], [0], [0], [0, 0, 1, 0], [], []>} : vector<8x16xbf16>, vector<8x16xbf16>, vector<8x8xf32> -> vector<8x8xf32>
    %cst_141 = arith.constant 2.500000e-01 : f32
    %477 = vector.broadcast %cst_141 : f32 to vector<8x8xf32>
    %478 = arith.mulf %476, %477 : vector<8x8xf32>
    %cst_142 = arith.constant dense<0xFF800000> : vector<8xf32>
    %479 = vector.multi_reduction <maximumf>, %478, %cst_142 [1] : vector<8x8xf32> to vector<8xf32>
    %480 = vector.shape_cast %479 : vector<8xf32> to vector<8x1xf32>
    %481 = vector.broadcast %480 : vector<8x1xf32> to vector<8x8xf32>
    %482 = arith.subf %478, %481 : vector<8x8xf32>
    %483 = math.exp %482 : vector<8x8xf32>
    %cst_143 = arith.constant dense<0.000000e+00> : vector<8xf32>
    %484 = vector.multi_reduction <add>, %483, %cst_143 [1] : vector<8x8xf32> to vector<8xf32>
    %485 = vector.shape_cast %484 : vector<8xf32> to vector<8x1xf32>
    %486 = vector.broadcast %485 : vector<8x1xf32> to vector<8x8xf32>
    %487 = arith.divf %483, %486 : vector<8x8xf32>
    %488 = arith.truncf %487 : vector<8x8xf32> to vector<8x8xbf16>
    %cst_144 = arith.constant dense<0.000000e+00> : vector<8x16xf32>
    %489 = tpu.matmul %488, %475, %cst_144 {dimension_numbers = #tpu.dot_dimension_numbers<[1], [0], [0], [1], [0, 0, 1, 1], [], []>} : vector<8x8xbf16>, vector<8x16xbf16>, vector<8x16xf32> -> vector<8x16xf32>
    %490 = arith.truncf %489 : vector<8x16xf32> to vector<8x16xbf16>
    %491 = vector.extract_strided_slice %1 {offsets = [112, 0], sizes = [16, 128], strides = [1, 1]} : vector<128x128xbf16> to vector<16x128xbf16>
    %cst_145 = arith.constant dense<0.000000e+00> : vector<8x128xf32>
    %492 = tpu.matmul %490, %491, %cst_145 {dimension_numbers = #tpu.dot_dimension_numbers<[1], [0], [0], [1], [0, 0, 1, 1], [], []>} : vector<8x16xbf16>, vector<16x128xbf16>, vector<8x128xf32> -> vector<8x128xf32>
    %493 = arith.addf %469, %492 : vector<8x128xf32>
    %494 = arith.truncf %493 : vector<8x128xf32> to vector<8x128xbf16>
    %cst_146 = arith.constant dense<0.000000e+00> : vector<8x1024xf32>
    %495 = tpu.matmul %494, %2, %cst_146 {dimension_numbers = #tpu.dot_dimension_numbers<[1], [0], [0], [1], [0, 0, 1, 1], [], []>} : vector<8x128xbf16>, vector<128x1024xbf16>, vector<8x1024xf32> -> vector<8x1024xf32>
    %496 = arith.truncf %256 : vector<8x256xf32> to vector<8x256xbf16>
    %cst_147 = arith.constant dense<0.000000e+00> : vector<8x1024xf32>
    %497 = tpu.matmul %496, %3, %cst_147 {dimension_numbers = #tpu.dot_dimension_numbers<[1], [0], [0], [1], [0, 0, 1, 1], [], []>} : vector<8x256xbf16>, vector<256x1024xbf16>, vector<8x1024xf32> -> vector<8x1024xf32>
    %498 = arith.addf %495, %497 : vector<8x1024xf32>
    %499 = arith.addf %498, %15 : vector<8x1024xf32>
    %500 = vector.extract_strided_slice %499 {offsets = [0, 0], sizes = [8, 256], strides = [1, 1]} : vector<8x1024xf32> to vector<8x256xf32>
    %501 = arith.negf %500 : vector<8x256xf32>
    %502 = math.exp %501 : vector<8x256xf32>
    %cst_148 = arith.constant 1.000000e+00 : f32
    %503 = vector.broadcast %cst_148 : f32 to vector<8x256xf32>
    %504 = arith.addf %503, %502 : vector<8x256xf32>
    %505 = arith.divf %503, %504 : vector<8x256xf32>
    %506 = vector.extract_strided_slice %499 {offsets = [0, 256], sizes = [8, 256], strides = [1, 1]} : vector<8x1024xf32> to vector<8x256xf32>
    %507 = arith.negf %506 : vector<8x256xf32>
    %508 = math.exp %507 : vector<8x256xf32>
    %cst_149 = arith.constant 1.000000e+00 : f32
    %509 = vector.broadcast %cst_149 : f32 to vector<8x256xf32>
    %510 = arith.addf %509, %508 : vector<8x256xf32>
    %511 = arith.divf %509, %510 : vector<8x256xf32>
    %512 = vector.extract_strided_slice %499 {offsets = [0, 512], sizes = [8, 256], strides = [1, 1]} : vector<8x1024xf32> to vector<8x256xf32>
    %513 = math.tanh %512 : vector<8x256xf32>
    %514 = vector.extract_strided_slice %499 {offsets = [0, 768], sizes = [8, 256], strides = [1, 1]} : vector<8x1024xf32> to vector<8x256xf32>
    %515 = arith.negf %514 : vector<8x256xf32>
    %516 = math.exp %515 : vector<8x256xf32>
    %cst_150 = arith.constant 1.000000e+00 : f32
    %517 = vector.broadcast %cst_150 : f32 to vector<8x256xf32>
    %518 = arith.addf %517, %516 : vector<8x256xf32>
    %519 = arith.divf %517, %518 : vector<8x256xf32>
    %520 = arith.mulf %511, %254 : vector<8x256xf32>
    %521 = arith.mulf %505, %513 : vector<8x256xf32>
    %522 = arith.addf %520, %521 : vector<8x256xf32>
    %523 = math.tanh %522 : vector<8x256xf32>
    %524 = arith.mulf %519, %523 : vector<8x256xf32>
    %525 = tpu.concatenate %524, %285 in 1 : vector<8x256xf32>, vector<8x256xf32> -> vector<8x512xf32>
    %526 = arith.truncf %525 : vector<8x512xf32> to vector<8x512xbf16>
    %cst_151 = arith.constant dense<0.000000e+00> : vector<8x1024xf32>
    %527 = tpu.matmul %526, %4, %cst_151 {dimension_numbers = #tpu.dot_dimension_numbers<[1], [0], [0], [1], [0, 0, 1, 1], [], []>} : vector<8x512xbf16>, vector<512x1024xbf16>, vector<8x1024xf32> -> vector<8x1024xf32>
    %528 = arith.addf %527, %18 : vector<8x1024xf32>
    %529 = vector.extract_strided_slice %528 {offsets = [0, 0], sizes = [8, 256], strides = [1, 1]} : vector<8x1024xf32> to vector<8x256xf32>
    %530 = arith.negf %529 : vector<8x256xf32>
    %531 = math.exp %530 : vector<8x256xf32>
    %cst_152 = arith.constant 1.000000e+00 : f32
    %532 = vector.broadcast %cst_152 : f32 to vector<8x256xf32>
    %533 = arith.addf %532, %531 : vector<8x256xf32>
    %534 = arith.divf %532, %533 : vector<8x256xf32>
    %535 = vector.extract_strided_slice %528 {offsets = [0, 256], sizes = [8, 256], strides = [1, 1]} : vector<8x1024xf32> to vector<8x256xf32>
    %536 = arith.negf %535 : vector<8x256xf32>
    %537 = math.exp %536 : vector<8x256xf32>
    %cst_153 = arith.constant 1.000000e+00 : f32
    %538 = vector.broadcast %cst_153 : f32 to vector<8x256xf32>
    %539 = arith.addf %538, %537 : vector<8x256xf32>
    %540 = arith.divf %538, %539 : vector<8x256xf32>
    %541 = vector.extract_strided_slice %528 {offsets = [0, 512], sizes = [8, 256], strides = [1, 1]} : vector<8x1024xf32> to vector<8x256xf32>
    %542 = math.tanh %541 : vector<8x256xf32>
    %543 = vector.extract_strided_slice %528 {offsets = [0, 768], sizes = [8, 256], strides = [1, 1]} : vector<8x1024xf32> to vector<8x256xf32>
    %544 = arith.negf %543 : vector<8x256xf32>
    %545 = math.exp %544 : vector<8x256xf32>
    %cst_154 = arith.constant 1.000000e+00 : f32
    %546 = vector.broadcast %cst_154 : f32 to vector<8x256xf32>
    %547 = arith.addf %546, %545 : vector<8x256xf32>
    %548 = arith.divf %546, %547 : vector<8x256xf32>
    %549 = arith.mulf %540, %283 : vector<8x256xf32>
    %550 = arith.mulf %534, %542 : vector<8x256xf32>
    %551 = arith.addf %549, %550 : vector<8x256xf32>
    %552 = math.tanh %551 : vector<8x256xf32>
    %553 = arith.mulf %548, %552 : vector<8x256xf32>
    %554 = arith.truncf %553 : vector<8x256xf32> to vector<8x256xbf16>
    %cst_155 = arith.constant dense<0.000000e+00> : vector<8x128xf32>
    %555 = tpu.matmul %554, %5, %cst_155 {dimension_numbers = #tpu.dot_dimension_numbers<[1], [0], [0], [1], [0, 0, 1, 1], [], []>} : vector<8x256xbf16>, vector<256x128xbf16>, vector<8x128xf32> -> vector<8x128xf32>
    %556 = arith.addf %555, %21 : vector<8x128xf32>
    %cst_156 = arith.constant 0.000000e+00 : f32
    %557 = vector.broadcast %cst_156 : f32 to vector<8x128xf32>
    %558 = arith.maximumf %556, %557 : vector<8x128xf32>
    %559 = arith.truncf %558 : vector<8x128xf32> to vector<8x128xbf16>
    %cst_157 = arith.constant dense<0.000000e+00> : vector<8x4xf32>
    %560 = tpu.matmul %559, %6, %cst_157 {dimension_numbers = #tpu.dot_dimension_numbers<[1], [0], [0], [1], [0, 0, 1, 1], [], []>} : vector<8x128xbf16>, vector<128x4xbf16>, vector<8x4xf32> -> vector<8x4xf32>
    %561 = arith.addf %560, %24 : vector<8x4xf32>
    %c0_158 = arith.constant 0 : index
    %c1_159 = arith.constant 1 : index
    %c0_160 = arith.constant 0 : index
    %562 = vector.load %arg14[%c0_158, %c1_159, %c0_160] : memref<8x2x4xf32, #tpu.memory_space<vmem>>, vector<8x1x4xf32>
    %563 = vector.shape_cast %562 : vector<8x1x4xf32> to vector<8x4xf32>
    %564 = vector.shape_cast %561 : vector<8x4xf32> to vector<8x1x4xf32>
    tpu.vector_store %arg14[%c0_158, %c1_159, %c0_160], %564 {strides = array<i32>} : memref<8x2x4xf32, #tpu.memory_space<vmem>>, vector<8x1x4xf32>,
    return
  }
}

</mosaic_0001>

<bundles_post_ra>
// kernel: task_head_forward.1
= control target key start
LH: loop header
LB: loop body
LE: loop exit
PB: predicated region body
PF: predicated region fallthrough
CT: control target
= control target key end

     0   :  { %19 = vsyncpa [#allocation3], 0  ;;  %s13165_s0 = inlined_call_operand.hbm [shape: f32[8,2,128], index: 0, kind: input, shape index: {}]   ;;  %s13166_s1 = inlined_call_operand.hbm [shape: bf16[128,384], index: 1, kind: input, shape index: {}]   ;;  %s13167_s2 = inlined_call_operand.vmem [shape: f32[1,384], index: 2, kind: input, shape index: {}]   ;;  %s13168_s3 = inlined_call_operand.vmem [shape: bf16[128,128], index: 3, kind: input, shape index: {}]   ;;  %s13169_s4 = inlined_call_operand.vmem [shape: f32[1,128], index: 4, kind: input, shape index: {}]   ;;  %s13170_s5 = inlined_call_operand.hbm [shape: bf16[128,1024], index: 5, kind: input, shape index: {}]   ;;  %s13171_s6 = inlined_call_operand.hbm [shape: bf16[256,1024], index: 6, kind: input, shape index: {}]   ;;  %s13172_s7 = inlined_call_operand.vmem [shape: f32[1,1024], index: 7, kind: input, shape index: {}]   ;;  %s13173_s8 = inlined_call_operand.hbm [shape: bf16[512,1024], index: 8, kind: input, shape index: {}]   ;;  %s13174_s9 = inlined_call_operand.hbm [shape: f32[1,1024], index: 9, kind: input, shape index: {}]   ;;  %s13175_s10 = inlined_call_operand.hbm [shape: bf16[256,128], index: 10, kind: input, shape index: {}]   ;;  %s13176_s11 = inlined_call_operand.vmem [shape: f32[1,128], index: 11, kind: input, shape index: {}]   ;;  %s13177_s12 = inlined_call_operand.vmem [shape: bf16[128,4], index: 12, kind: input, shape index: {}]   ;;  %s13178_s13 = inlined_call_operand.hbm [shape: f32[1,4], index: 13, kind: input, shape index: {}]   ;;  %s13179_s14 = inlined_call_operand.vmem [shape: f32[8,2,4], index: 14, kind: output, shape index: {}]  }
   0x1   :  { %20 = vsyncpa [#allocation5], 0 }
   0x2   :  { %21 = vsyncpa [#allocation8], 0 }
   0x3   :  { %22 = vsyncpa [#allocation11], 0  ;;  %s41_s15 = sshll.u32 %s13166_s1, 4  ;;  %s42_s15 = int_to_ptr.hbm [resolvable:$true] %s41_s15 }
   0x4   :  { %23 = vsyncpa [#allocation14], 0  ;;  %s10092_s16 = smov [#allocation4]   ;;  %s10093_s18 = smov 192  }
   0x5   :  { %s43_s17 = sshll.u32 %s10092_s16, 4  ;;  %s10094_s19 = smov 12   ;;  %s44_s17 = int_to_ptr.vmem [resolvable:$true] %s43_s17 }
   0x6   :  { %49 = dma.hbm_to_vmem [thread:$0]  %s42_s15, 3072, %s44_s17, [#allocation5], %s10093_s18, %s10093_s18, %s10094_s19  }
   0x7   :  { %s73_s22 = sshll.u32 %s13171_s6, 4  ;;  %s10095_s23 = smov [#allocation7]   ;;  %s74_s22 = int_to_ptr.hbm [resolvable:$true] %s73_s22 }
   0x8   :  { %s75_s24 = sshll.u32 %s10095_s23, 4  ;;  %s102_s27 = sshll.u32 %s13174_s9, 4  ;;  %s76_s24 = int_to_ptr.vmem [resolvable:$true] %s75_s24  ;;  %s103_s27 = int_to_ptr.hbm [resolvable:$true] %s102_s27 }
   0x9   :  { %s10096_s1 = smov 512   ;;  %s10097_s28 = smov 32  }
   0xa   :  { %81 = dma.hbm_to_vmem [thread:$0]  %s74_s22, 16384, %s76_s24, [#allocation8], %s10096_s1, %s10096_s1, %s10097_s28  }
   0xb   :  { %s28_s15 = sshll.u32 %s13165_s0, 4  ;;  %s10098_s6 = smov [#allocation10]   ;;  %s29_s15 = int_to_ptr.hbm [resolvable:$true] %s28_s15 }
   0xc   :  { %s104_s16 = sshll.u32 %s10098_s6, 4  ;;  %s10099_s17 = smov [#allocation2]   ;;  %s105_s16 = int_to_ptr.vmem [resolvable:$true] %s104_s16 }
   0xd   :  { %107 = dma.hbm_to_vmem [thread:$0]  %s103_s27, 128, %s105_s16, [#allocation11]  }
   0xe   :  { %s30_s18 = sshll.u32 %s10099_s17, 4  ;;  %s60_s20 = sshll.u32 %s13170_s5, 4  ;;  %s31_s18 = int_to_ptr.vmem [resolvable:$true] %s30_s18  ;;  %s61_s20 = int_to_ptr.hbm [resolvable:$true] %s60_s20 }
   0xf   :  { %s10100_s21 = smov 2   ;;  %s10101_s22 = smov [#allocation6]  }
  0x10   :  { %36 = dma.hbm_to_vmem [thread:$0]  %s29_s15, 256, %s31_s18, [#allocation3], %s10097_s28, %s10097_s28, %s10100_s21  }
  0x11   :  { %s62_s23 = sshll.u32 %s10101_s22, 4  ;;  %s88_s25 = sshll.u32 %s13173_s8, 4  ;;  %s63_s23 = int_to_ptr.vmem [resolvable:$true] %s62_s23  ;;  %s89_s25 = int_to_ptr.hbm [resolvable:$true] %s88_s25 }
  0x12   :  { %68 = dma.hbm_to_vmem [thread:$0]  %s61_s20, 8192, %s63_s23, [#allocation5], %s10096_s1, %s10096_s1, %s10097_s28  }
  0x13   :  { %s112_s5 = sshll.u32 %s13175_s10, 4  ;;  %s10102_s29 = smov [#allocation9]   ;;  %s113_s5 = int_to_ptr.hbm [resolvable:$true] %s112_s5 }
  0x14   :  { %s90_s30 = sshll.u32 %s10102_s29, 4  ;;  %s10103_s15 = smov [#allocation12]   ;;  %s91_s30 = int_to_ptr.vmem [resolvable:$true] %s90_s30 }
  0x15   :  { %96 = dma.hbm_to_vmem [thread:$0]  %s89_s25, 32768, %s91_s30, [#allocation8], %s10096_s1, %s10096_s1, %s10097_s28  }
  0x16   :  { %s114_s8 = sshll.u32 %s10103_s15, 4  ;;  %s10104_s6 = smov 64   ;;  %s115_s8 = int_to_ptr.vmem [resolvable:$true] %s114_s8 }
  0x17   :  { %s10105_s16 = smov 4   ;;  %s130_s10 = sshll.u32 %s13178_s13, 4  ;;  %s131_s10 = int_to_ptr.hbm [resolvable:$true] %s130_s10 }
  0x18   :  { %120 = dma.hbm_to_vmem [thread:$0]  %s113_s5, 2048, %s115_s8, [#allocation11], %s10104_s6, %s10104_s6, %s10105_s16  }
  0x19   :  { %s10106_s9 = smov [#allocation13]  }
  0x1a   :  { %s132_s19 = sshll.u32 %s10106_s9, 4  ;;  %s133_s19 = int_to_ptr.vmem [resolvable:$true] %s132_s19 }
  0x1b   :  { %135 = dma.hbm_to_vmem [thread:$0]  %s131_s10, 16, %s133_s19, [#allocation14]  }
  0x1c   :  { %10082 = dma.done.wait [#allocation3], 256  }
  0x1d   :  { %10083 = vsyncadd [#allocation3], 4294967040 }
  0x1e   :  { %10084 = dma.done.wait [#allocation5], 11264  }
  0x1f   :  { %10085 = vsyncadd [#allocation5], 4294956032 }
  0x20   :  { %10086 = dma.done.wait [#allocation8], 49152  }
  0x21   :  { %10087 = vsyncadd [#allocation8], 4294918144 }
  0x22   :  { %10088 = dma.done.wait [#allocation11], 2176  }
  0x23   :  { %10089 = vsyncadd [#allocation11], 4294965120 }
  0x24   :  { %10090 = dma.done.wait [#allocation14], 16  }
  0x25   :  { %10091 = vsyncadd [#allocation14], 4294967280  ;;  %v7132_v0 = vld [vmem:[#allocation4 + $0xa8] sm:$0xf]  ;;  %v9156_v1 = vld [vmem:[#allocation4 + $0xb0] sm:$0xf0] }
  0x26   :  { %v9155_v2 = vld [vmem:[#allocation4 + $0xac] sm:$0xf]  ;;  %v10226_v3 = vor.u32 %v9156_v1, %v7132_v0  ;;  %v7134_v4 = vld [vmem:[#allocation4 + $0xb4] sm:$0xf0]  ;;  %v7120_v5 = vld [vmem:[#allocation4 + $0x90] sm:$0xf] }
  0x27   :  { %v9153_v6 = vld [vmem:[#allocation4 + $0x98] sm:$0xf0]  ;;  %v10228_v7 = vor.u32 %v9155_v2, %v7134_v4  ;;  %v9152_v8 = vld [vmem:[#allocation4 + $0x94] sm:$0xf]  ;;  %v7122_v9 = vld [vmem:[#allocation4 + $0x9c] sm:$0xf0] }
  0x28   :  { %952 = vmatpush.bf16.msra.mxu0 %v10226_v3  ;;  %v10231_v10 = vor.u32 %v9153_v6, %v7120_v5  ;;  %v7108_v11 = vld [vmem:[#allocation4 + $0x78] sm:$0xf]  ;;  %v10234_v12 = vor.u32 %v9152_v8, %v7122_v9  ;;  %v9150_v13 = vld [vmem:[#allocation4 + $0x80] sm:$0xf0]  ;;  %v7140_v14 = vld [vmem:[#allocation4 + $0xb0] sm:$0xf] }
  0x29   :  { %965 = vmatpush.bf16.msra.mxu1 %v10228_v7  ;;  %v9157_v15 = vld [vmem:[#allocation4 + $0xb8] sm:$0xf0]  ;;  %v7110_v17 = vld [vmem:[#allocation4 + $0x84] sm:$0xf0]  ;;  %v7096_v19 = vld [vmem:[#allocation4 + $0x60] sm:$0xf]  ;;  %v10239_v22 = vor.u32 %v9150_v13, %v7108_v11 }
  0x2a   :  { %v9149_v16 = vld [vmem:[#allocation4 + $0x7c] sm:$0xf]  ;;  %v10236_v18 = vor.u32 %v9157_v15, %v7140_v14  ;;  %v7128_v20 = vld [vmem:[#allocation4 + $0x98] sm:$0xf]  ;;  %v9154_v21 = vld [vmem:[#allocation4 + $0xa0] sm:$0xf0] }
  0x2b   :  { %v9147_v23 = vld [vmem:[#allocation4 + $0x68] sm:$0xf0]  ;;  %v9146_v24 = vld [vmem:[#allocation4 + $0x64] sm:$0xf]  ;;  %v7098_v25 = vld [vmem:[#allocation4 + $0x6c] sm:$0xf0]  ;;  %v10242_v26 = vor.u32 %v9154_v21, %v7128_v20  ;;  %v10245_v27 = vor.u32 %v9149_v16, %v7110_v17 }
  0x2c   :  { %953 = vmatpush.bf16.msra.mxu0 %v10231_v10  ;;  %978 = vmatpush.bf16.msra.mxu2 %v10236_v18  ;;  %v7084_v28 = vld [vmem:[#allocation4 + $0x48] sm:$0xf]  ;;  %v9144_v29 = vld [vmem:[#allocation4 + $0x50] sm:$0xf0]  ;;  %v9143_v30 = vld [vmem:[#allocation4 + $0x4c] sm:$0xf]  ;;  %v10248_v41 = vor.u32 %v9147_v23, %v7096_v19  ;;  %v10254_v46 = vor.u32 %v9146_v24, %v7098_v25 }
  0x2d   :  { %966 = vmatpush.bf16.msra.mxu1 %v10234_v12  ;;  %v7086_v31 = vld [vmem:[#allocation4 + $0x54] sm:$0xf0]  ;;  %v7116_v32 = vld [vmem:[#allocation4 + $0x80] sm:$0xf]  ;;  %v9151_v33 = vld [vmem:[#allocation4 + $0x88] sm:$0xf0]  ;;  %v10256_v50 = vor.u32 %v9144_v29, %v7084_v28 }
  0x2e   :  { %v7072_v34 = vld [vmem:[#allocation4 + $0x30] sm:$0xf]  ;;  %v9141_v35 = vld [vmem:[#allocation4 + $0x38] sm:$0xf0]  ;;  %v9140_v36 = vld [vmem:[#allocation4 + $0x34] sm:$0xf]  ;;  %v10251_v42 = vor.u32 %v9151_v33, %v7116_v32  ;;  %v10258_v51 = vor.u32 %v9143_v30, %v7086_v31 }
  0x2f   :  { %v7074_v37 = vld [vmem:[#allocation4 + $0x3c] sm:$0xf0]  ;;  %v7104_v38 = vld [vmem:[#allocation4 + $0x68] sm:$0xf]  ;;  %v9148_v39 = vld [vmem:[#allocation4 + $0x70] sm:$0xf0]  ;;  %v10260_v52 = vor.u32 %v9141_v35, %v7072_v34 }
  0x30   :  { %v7060_v40 = vld [vmem:[#allocation4 + $0x18] sm:$0xf]  ;;  %954 = vmatpush.bf16.msra.mxu0 %v10239_v22  ;;  %979 = vmatpush.bf16.msra.mxu2 %v10242_v26  ;;  %v9138_v43 = vld [vmem:[#allocation4 + $0x20] sm:$0xf0]  ;;  %v9137_v44 = vld [vmem:[#allocation4 + $0x1c] sm:$0xf]  ;;  %v10262_v54 = vor.u32 %v9140_v36, %v7074_v37  ;;  %v10264_v55 = vor.u32 %v9148_v39, %v7104_v38 }
  0x31   :  { %v7062_v45 = vld [vmem:[#allocation4 + $0x24] sm:$0xf0]  ;;  %vm802_vm0 = vcmask 1041409   ;;  %967 = vmatpush.bf16.msra.mxu1 %v10245_v27  ;;  %v7092_v47 = vld [vmem:[#allocation4 + $0x50] sm:$0xf]  ;;  %vm805_vm1 = vcmask 1042434   ;;  %v10266_v56 = vor.u32 %v9138_v43, %v7060_v40 }
  0x32   :  { %v9145_v48 = vld [vmem:[#allocation4 + $0x58] sm:$0xf0]  ;;  %v7048_v49 = vld [vmem:[#allocation4] sm:$0xf]  ;;  %v9135_v53 = vld [vmem:[#allocation4 + $0x8] sm:$0xf0]  ;;  %v10268_v57 = vor.u32 %v9137_v44, %v7062_v45 }
  0x33   :  { %vm808_vm2 = vcmask 1043459   ;;  %v7080_v58 = vld [vmem:[#allocation4 + $0x38] sm:$0xf]  ;;  %v9142_v59 = vld [vmem:[#allocation4 + $0x40] sm:$0xf0]  ;;  %vm811_vm3 = vcmask 1044484   ;;  %v10272_v61 = vor.u32 %v9145_v48, %v7092_v47  ;;  %v10274_v62 = vor.u32 %v9135_v53, %v7048_v49 }
  0x34   :  { %v769_v60 = vld [vmem:[#allocation2] sm:$0x1]  ;;  %955 = vmatpush.bf16.msra.mxu0 %v10248_v41  ;;  %980 = vmatpush.bf16.msra.mxu2 %v10251_v42  ;;  %v770_v63 = vld [vmem:[#allocation2 + $0x2] sm:$0x1]  ;;  %v771_v0 = vld [vmem:[#allocation2 + $0x4] sm:$0x1]  ;;  %v10277_v4 = vor.u32 %v9142_v59, %v7080_v58 }
  0x35   :  { %v772_v1 = vld [vmem:[#allocation2 + $0x6] sm:$0x1]  ;;  %v777_v2 = vpack.c.bf16 %v769_v60, %v769_v60  ;;  %vm814_vm4 = vcmask 1045509   ;;  %968 = vmatpush.bf16.msra.mxu1 %v10254_v46  ;;  %v773_v5 = vld [vmem:[#allocation2 + $0x8] sm:$0x1]  ;;  %v778_v9 = vpack.c.bf16 %v770_v63, %v770_v63  ;;  %v779_v11 = vpack.c.bf16 %v771_v0, %v771_v0  ;;  %s10107_s20 = smov 112  }
  0x36   :  { %v774_v6 = vld [vmem:[#allocation2 + $0xa] sm:$0x1]  ;;  %v775_v8 = vld [vmem:[#allocation2 + $0xc] sm:$0x1]  ;;  %v780_v13 = vpack.c.bf16 %v772_v1, %v772_v1  ;;  %vm817_vm5 = vcmask 1046534   ;;  %v781_v15 = vpack.c.bf16 %v773_v5, %v773_v5  ;;  %vm820_vm6 = vcmask 1047559  }
  0x37   :  { %v776_v14 = vld [vmem:[#allocation2 + $0xe] sm:$0x1]  ;;  %v782_v16 = vpack.c.bf16 %v774_v6, %v774_v6  ;;  %v783_v17 = vpack.c.bf16 %v775_v8, %v775_v8  ;;  %v793_v19 = vunpack.c.l.b16 %v777_v2  ;;  %v5189_v20 = vld [vmem:[#allocation2 + $0x1] sm:$0x1]  ;;  %v794_v23 = vunpack.c.l.b16 %v778_v9  ;;  %v5190_v28 = vld [vmem:[#allocation2 + $0x3] sm:$0x1] }
  0x38   :  { %v784_v21 = vpack.c.bf16 %v776_v14, %v776_v14  ;;  %v795_v24 = vunpack.c.l.b16 %v779_v11  ;;  %v796_v25 = vunpack.c.l.b16 %v780_v13  ;;  %v5191_v29 = vld [vmem:[#allocation2 + $0x5] sm:$0x1]  ;;  %956 = vmatpush.bf16.msra.mxu0 %v10256_v50  ;;  %981 = vmatpush.bf16.msra.mxu2 %v10264_v55  ;;  %v797_v30 = vunpack.c.l.b16 %v781_v15  ;;  %v5192_v33 = vld [vmem:[#allocation2 + $0x7] sm:$0x1]  ;;  %v5193_v34 = vld [vmem:[#allocation2 + $0x9] sm:$0x1] }
  0x39   :  { %v798_v31 = vunpack.c.l.b16 %v782_v16  ;;  %v799_v32 = vunpack.c.l.b16 %v783_v17  ;;  %v5194_v35 = vld [vmem:[#allocation2 + $0xb] sm:$0x1]  ;;  %v5197_v36 = vpack.c.bf16 %v5189_v20, %v5189_v20  ;;  %969 = vmatpush.bf16.msra.mxu1 %v10258_v51  ;;  %v801_v38 = vrot.slane %v794_v23, 7  ;;  %v5195_v43 = vld [vmem:[#allocation2 + $0xd] sm:$0x1]  ;;  %s10109_s21 = smov 96  }
  0x3a   :  { %v800_v37 = vunpack.c.l.b16 %v784_v21  ;;  %v804_v39 = vrot.slane %v795_v24, 6  ;;  %v807_v40 = vrot.slane %v796_v25, 5  ;;  %v810_v44 = vrot.slane %v797_v30, 4  ;;  %v5196_v48 = vld [vmem:[#allocation2 + $0xf] sm:$0x1]  ;;  %s10110_s27 = smov 48  }
  0x3b   :  { %v813_v45 = vrot.slane %v798_v31, 3  ;;  %v816_v47 = vrot.slane %v799_v32, 2  ;;  %v5198_v49 = vpack.c.bf16 %v5190_v28, %v5190_v28  ;;  %v803_v53 = vsel %vm802_vm0, %v801_v38, %v793_v19  ;;  %v9134_v11 = vld [vmem:[#allocation4 + $0x4] sm:$0xf]  ;;  %v7050_v13 = vld [vmem:[#allocation4 + $0xc] sm:$0xf0] }
  0x3c   :  { %v819_v58 = vrot.slane %v800_v37, 1  ;;  %v5199_v59 = vpack.c.bf16 %v5191_v29, %v5191_v29  ;;  %v5200_v60 = vpack.c.bf16 %v5192_v33, %v5192_v33  ;;  %957 = vmatpush.bf16.msra.mxu0 %v10260_v52  ;;  %982 = vmatpush.bf16.msra.mxu2 %v10272_v61  ;;  %v806_v63 = vsel %vm805_vm1, %v804_v39, %v803_v53  ;;  %v7068_v24 = vld [vmem:[#allocation4 + $0x20] sm:$0xf]  ;;  %v9139_v25 = vld [vmem:[#allocation4 + $0x28] sm:$0xf0]  ;;  %s10111_s8 = smov 16  }
  0x3d   :  { %v5201_v0 = vpack.c.bf16 %v5193_v34, %v5193_v34  ;;  %v5202_v1 = vpack.c.bf16 %v5194_v35, %v5194_v35  ;;  %v5213_v2 = vunpack.c.l.b16 %v5197_v36  ;;  %970 = vmatpush.bf16.msra.mxu1 %v10262_v54  ;;  %v809_v5 = vsel %vm808_vm2, %v807_v40, %v806_v63  ;;  %v7056_v35 = vld [vmem:[#allocation4 + $0x8] sm:$0xf]  ;;  %v9136_v36 = vld [vmem:[#allocation4 + $0x10] sm:$0xf0] }
  0x3e   :  { %v5203_v6 = vpack.c.bf16 %v5195_v43, %v5195_v43  ;;  %v5204_v8 = vpack.c.bf16 %v5196_v48, %v5196_v48  ;;  %v5214_v9 = vunpack.c.l.b16 %v5198_v49  ;;  %v812_v14 = vsel %vm811_vm3, %v810_v44, %v809_v5 }
  0x3f   :  { %v5215_v15 = vunpack.c.l.b16 %v5199_v59  ;;  %v5216_v16 = vunpack.c.l.b16 %v5200_v60  ;;  %v5217_v17 = vunpack.c.l.b16 %v5201_v0  ;;  %v815_v19 = vsel %vm814_vm4, %v813_v45, %v812_v14  ;;  %v10317_v60 = vld [vmem:[%s13167_s2] sm:$0x7]  ;;  %s10108_s2 = smov 80  }
  0x40   :  { %v5218_v20 = vunpack.c.l.b16 %v5202_v1  ;;  %v5219_v21 = vunpack.c.l.b16 %v5203_v6  ;;  %v5220_v23 = vunpack.c.l.b16 %v5204_v8  ;;  %958 = vmatpush.bf16.msra.mxu0 %v10266_v56  ;;  %983 = vmatpush.bf16.msra.mxu2 %v10277_v4  ;;  %v818_v28 = vsel %vm817_vm5, %v816_v47, %v815_v19 }
  0x41   :  { %v5221_v29 = vrot.slane %v5214_v9, 7  ;;  %v5223_v30 = vrot.slane %v5215_v15, 6  ;;  %v5225_v31 = vrot.slane %v5216_v16, 5  ;;  %971 = vmatpush.bf16.msra.mxu1 %v10268_v57  ;;  %v10294_v32 = vor.u32 %v9134_v11, %v7050_v13 }
  0x42   :  { %v821_v33 = vsel %vm820_vm6, %v819_v58, %v818_v28  ;;  %v5227_v34 = vrot.slane %v5217_v17, 4  ;;  %v5229_v38 = vrot.slane %v5218_v20, 3  ;;  %v10298_v39 = vor.u32 %v9139_v25, %v7068_v24 }
  0x43   :  { %v5222_v37 = vsel %vm802_vm0, %v5221_v29, %v5213_v2  ;;  %v822_v40 = vpack.c.b16 %v821_v33, %v821_v33  ;;  %v5231_v44 = vrot.slane %v5219_v21, 2  ;;  %v5233_v47 = vrot.slane %v5220_v23, 1 }
  0x44   :  { %v5224_v43 = vsel %vm805_vm1, %v5223_v30, %v5222_v37  ;;  %959 = vmatpush.bf16.msra.mxu0 %v10274_v62  ;;  %984 = vmatpush.bf16.msra.mxu2 %v10298_v39  ;;  %v10304_v48 = vor.u32 %v9136_v36, %v7056_v35  ;;  %v13181_v63 = vperm.slane %v10317_v60, 1  ;;  %v13182_v2 = vperm.slane %v10317_v60, 0 }
  0x45   :  { %v5226_v45 = vsel %vm808_vm2, %v5225_v31, %v5224_v43  ;;  %972 = vmatpush.bf16.msra.mxu1 %v10294_v32  ;;  %vm994_vm7 = vcmask 130048   ;;  %v13180_v15 = vperm.slane %v10317_v60, 2  ;;  %vm1015_vm8 = vcmask 64512  }
  0x46   :  { %v5228_v49 = vsel %vm811_vm3, %v5227_v34, %v5226_v45  ;;  %vm1044_vm9 = vcmask 1043456  }
  0x47   :  { %v5230_v53 = vsel %vm814_vm4, %v5229_v38, %v5228_v49  ;;  %960 = vmatmul.bf16.vlgmr.msra.gmra.mxu0 %v822_v40 }
  0x48   :  { %v5232_v58 = vsel %vm817_vm5, %v5231_v44, %v5230_v53  ;;  %973 = vmatmul.bf16.vlgmr.msra.gmra.mxu1 %v822_v40  ;;  %985 = vmatpush.bf16.msra.mxu2 %v10304_v48  ;;  %v9159_v44 = vld [vmem:[%s13168_s3 + $0x8] sm:$0xff] }
  0x49   :  { %v10311_v59 = vsel %vm820_vm6, %v5233_v47, %v5232_v58 }
  0x4b   :  { %986 = vmatmul.bf16.vlgmr.msra.gmra.mxu2 %v822_v40 }
  0x4c   :  { %1175 = vmatpush.bf16.msrb.mxu2 %v9159_v44 }
  0xc4   :  { %v961_v0 = vpop.f32.mrf.mxu0 }
  0xc5   :  { %v974_v1 = vpop.f32.mrf.mxu1  ;;  %v962_v8 = vadd.f32 %v961_v0, %v13182_v2 }
  0xc6   :  { %v975_v5 = vadd.f32 %v974_v1, %v13181_v63 }
  0xc7   :  { %v10331_v14 = vpack.c.bf16 %v962_v8, %v962_v8 }
  0xc8   :  { %v10323_v6 = vpack.c.bf16 %v975_v5, %v975_v5 }
  0xca   :  { %1089 = vrot.lane.b32.xlu0 %v10323_v6, %s10107_s20  ;;  %v999_v9 = vsel %vm994_vm7, %v10323_v6, 0 }
  0xcb   :  { %1008 = vmatpush.bf16.xpose.msrb.mxu0 %v999_v9 }
  0xcc   :  { %v963_v11 = vpop.f32.mrf.mxu0 }
  0xcd   :  { %v976_v13 = vpop.f32.mrf.mxu1 }
  0xce   :  { %v987_v16 = vpop.f32.mrf.mxu2 }
  0xcf   :  { %v988_v17 = vadd.f32 %v987_v16, %v13180_v15  ;;  %v9250_v15 = vld [vmem:[#allocation7 + $0x9c] sm:$0xf0] }
  0xd1   :  { %v10340_v19 = vpack.c.bf16 %v988_v17, %v988_v17 }
  0xd2   :  { %1086 = vrot.lane.b32.xlu0 %v10331_v14, %s10107_s20  ;;  %7142 = vmatmul.msk.bf16.vlgmr.msrb.gmra.mxu0 %vm994_vm7, %v10331_v14 }
  0xd3   :  { %v1046_v45 = vsel %vm1044_vm9, %v10340_v19, 0 }
  0xd4   :  { %1055 = vmatpush.bf16.msra.mxu3 %v1046_v45 }
  0xd6   :  { %v989_v20 = vpop.f32.mrf.mxu2 }
  0xda   :  { %1137 = vrot.lane.b32.xlu0 %v10340_v19, %s10107_s20 }
  0xe2   :  { %1276 = vrot.lane.b32.xlu0 %v10331_v14, %s10108_s2 }
  0xea   :  { %1182 = vrot.lane.b32.xlu0 %v10331_v14, %s10109_s21 }
 0x13c   :  { %v1090_v21 = vpop.permute.xlu0 %1089 }
 0x13d   :  { %v1095_v23 = vsel %vm994_vm7, %v1090_v21, 0 }
 0x13e   :  { %1104 = vmatpush.bf16.xpose.msra.mxu0 %v1095_v23 }
 0x144   :  { %v1087_v24 = vpop.permute.xlu0 %1086 }
 0x145   :  { %7149 = vmatmul.msk.bf16.vlgmr.msra.gmra.mxu0 %vm994_vm7, %v1087_v24 }
 0x14f   :  { %v1010_v25 = vpop.f32.mrf.mxu0 }
 0x150   :  { %v1014_v28 = vmul.f32 0.25, %v1010_v25 }
 0x152   :  { %v1016_v29 = vsel %vm1015_vm8, %v1014_v28, -inf }
 0x153   :  { %1017 = vmax.xlane.f32.xlu1 %v1016_v29 }
 0x157   :  { %v1012_v30 = vpop.f32.mrf.mxu0 }
 0x158   :  { %v9158_v30 = vld [vmem:[%s13168_s3] sm:$0xff] }
 0x159   :  { %1078 = vmatpush.bf16.msrb.mxu3 %v9158_v30  ;;  %v9660_v30 = vld [vmem:[%s13169_s4] ss:$0 sm:$0xff] }
 0x1c2   :  { %v1106_v31 = vpop.f32.mrf.mxu0 }
 0x1c3   :  { %v1110_v33 = vmul.f32 0.25, %v1106_v31  ;;  %v1138_v31 = vpop.permute.xlu0 %1137 }
 0x1c5   :  { %v1111_v34 = vsel %vm1015_vm8, %v1110_v33, -inf }
 0x1c6   :  { %v1018_v35 = vpop.xlane.xlu1 %1017  ;;  %1112 = vmax.xlane.f32.xlu1 %v1111_v34 }
 0x1c7   :  { %v1019_v36 = vsub.f32 %v1014_v28, %v1018_v35 }
 0x1c9   :  { %v1020_v37 = vmul.f32 1.442695, %v1019_v36 }
 0x1ca   :  { %v1108_v38 = vpop.f32.mrf.mxu0 }
 0x1cb   :  { %9663 = vpow2.f32 %v1020_v37 }
 0x1d1   :  { %v9664_v40 = vpop.eup %9663 }
 0x1d2   :  { %v1022_v43 = vsel %vm1015_vm8, %v9664_v40, 0.0 }
 0x1d3   :  { %1023 = vadd.xlane.f32.xlu2 %v1022_v43 }
 0x1df   :  { %1278 = vrot.lane.b32.xlu1 %v10323_v6, %s10108_s2 }
 0x239   :  { %v1113_v47 = vpop.xlane.xlu1 %1112 }
 0x23a   :  { %v1114_v49 = vsub.f32 %v1110_v33, %v1113_v47  ;;  %v1143_v33 = vsel %vm1044_vm9, %v1138_v31, 0 }
 0x23b   :  { %1152 = vmatpush.bf16.msrb.mxu1 %v1143_v33 }
 0x23c   :  { %v1115_v53 = vmul.f32 1.442695, %v1114_v49 }
 0x23e   :  { %9665 = vpow2.f32 %v1115_v53 }
 0x244   :  { %v9666_v58 = vpop.eup %9665 }
 0x245   :  { %v1117_v0 = vsel %vm1015_vm8, %v9666_v58, 0.0 }
 0x246   :  { %v1024_v1 = vpop.xlane.xlu2 %1023  ;;  %1118 = vadd.xlane.f32.xlu2 %v1117_v0 }
 0x247   :  { %9667 = vrcp.f32 %v1024_v1  ;;  %v1036_v11 = vand.u32 2147483648, %v1024_v1  ;;  %v1034_v20 = vand.u32 2147483647, %v1024_v1  ;;  %vm1030_vm11 = vweird.f32 %v1024_v1 }
 0x249   :  { %v1037_v23 = vor.u32 1.1754944e-38, %v1036_v11  ;;  %vm1035_vm13 = vcmp.eq.f32.partialorder %v1034_v20, 8.507059e+37  ;;  %v1277_v11 = vpop.permute.xlu0 %1276 }
 0x24d   :  { %v9668_v5 = vpop.eup %9667 }
 0x24e   :  { %v1026_v8 = vmul.f32 %v9668_v5, %v1024_v1  ;;  %vm1031_vm10 = vweird.f32 %v9668_v5 }
 0x24f   :  { %vm1032_vm12 = vmor %vm1030_vm11, %vm1031_vm10 }
 0x250   :  { %v1027_v9 = vsub.f32 1.0, %v1026_v8 }
 0x251   :  { %v1279_v13 = vpop.permute.xlu1 %1278 }
 0x252   :  { %v1028_v16 = vmul.f32 %v9668_v5, %v1027_v9  ;;  %v1284_v17 = vsel %vm994_vm7, %v1279_v13, 0 }
 0x253   :  { %1293 = vmatpush.bf16.xpose.msra.mxu2 %v1284_v17 }
 0x254   :  { %v1029_v21 = vadd.f32 %v9668_v5, %v1028_v16  ;;  %v1183_v16 = vpop.permute.xlu0 %1182 }
 0x256   :  { %v1033_v24 = vsel %vm1032_vm12, %v9668_v5, %v1029_v21 }
 0x257   :  { %v1038_v25 = vsel %vm1035_vm13, %v1037_v23, %v1033_v24 }
 0x258   :  { %v1039_v28 = vmul.f32 %v9664_v40, %v1038_v25 }
 0x25a   :  { %v1040_v29 = vpack.c.bf16 %v1039_v28, %v1039_v28 }
 0x25c   :  { %7143 = vmatmul.msk.bf16.vlgmr.msra.gmra.mxu3 %vm1015_vm8, %v1040_v29 }
 0x25e   :  { %1184 = vrot.lane.b32.xlu2 %v10323_v6, %s10109_s21 }
 0x2b9   :  { %v1119_v34 = vpop.xlane.xlu2 %1118 }
 0x2ba   :  { %9669 = vrcp.f32 %v1119_v34  ;;  %v1131_v43 = vand.u32 2147483648, %v1119_v34  ;;  %v1129_v45 = vand.u32 2147483647, %v1119_v34  ;;  %vm1125_vm15 = vweird.f32 %v1119_v34 }
 0x2bc   :  { %v1132_v49 = vor.u32 1.1754944e-38, %v1131_v43  ;;  %vm1130_vm1 = vcmp.eq.f32.partialorder %v1129_v45, 8.507059e+37 }
 0x2c0   :  { %v9670_v35 = vpop.eup %9669 }
 0x2c1   :  { %v1121_v36 = vmul.f32 %v9670_v35, %v1119_v34  ;;  %v1185_v37 = vpop.permute.xlu2 %1184  ;;  %vm1126_vm14 = vweird.f32 %v9670_v35 }
 0x2c2   :  { %v1190_v38 = vsel %vm994_vm7, %v1185_v37, 0  ;;  %vm1127_vm0 = vmor %vm1125_vm15, %vm1126_vm14 }
 0x2c3   :  { %v1122_v40 = vsub.f32 1.0, %v1121_v36  ;;  %1199 = vmatpush.bf16.xpose.msra.mxu3 %v1190_v38 }
 0x2c5   :  { %v1123_v44 = vmul.f32 %v9670_v35, %v1122_v40 }
 0x2c7   :  { %v1124_v47 = vadd.f32 %v9670_v35, %v1123_v44 }
 0x2c9   :  { %v1128_v53 = vsel %vm1127_vm0, %v9670_v35, %v1124_v47 }
 0x2ca   :  { %v1133_v0 = vsel %vm1130_vm1, %v1132_v49, %v1128_v53  ;;  %v9160_v53 = vld [vmem:[%s13168_s3 + $0x10] sm:$0xff] }
 0x2cb   :  { %v1134_v1 = vmul.f32 %v9666_v58, %v1133_v0  ;;  %1269 = vmatpush.bf16.msra.mxu1 %v9160_v53 }
 0x2cd   :  { %v1135_v5 = vpack.c.bf16 %v1134_v1, %v1134_v1 }
 0x2cf   :  { %7150 = vmatmul.msk.bf16.vlgmr.msrb.gmra.mxu1 %vm1015_vm8, %v1135_v5 }
 0x2df   :  { %v1057_v8 = vpop.f32.mrf.mxu3 }
 0x2e0   :  { %v1061_v9 = vpack.c.bf16 %v1057_v8, %v1057_v8 }
 0x2e2   :  { %7148 = vmatmul.msk.bf16.vlgmr.msrb.gmra.mxu3 %vm994_vm7, %v1061_v9 }
 0x2e7   :  { %v1059_v13 = vpop.f32.mrf.mxu3 }
 0x2f2   :  { %7156 = vmatmul.msk.bf16.vlgmr.msra.gmra.mxu3 %vm994_vm7, %v1183_v16 }
 0x34c   :  { %v1154_v17 = vpop.f32.mrf.mxu1 }
 0x34d   :  { %v1158_v20 = vpack.c.bf16 %v1154_v17, %v1154_v17 }
 0x34f   :  { %7155 = vmatmul.msk.bf16.vlgmr.msrb.gmra.mxu2 %vm994_vm7, %v1158_v20 }
 0x354   :  { %v1156_v21 = vpop.f32.mrf.mxu1 }
 0x35f   :  { %7163 = vmatmul.msk.bf16.vlgmr.msra.gmra.mxu2 %vm994_vm7, %v1277_v11 }
 0x365   :  { %v1080_v58 = vpop.f32.mrf.mxu3 }
 0x366   :  { %v1084_v31 = vadd.f32 %v9660_v30, %v1080_v58 }
 0x36d   :  { %v1082_v23 = vpop.f32.mrf.mxu3 }
 0x375   :  { %v1201_v24 = vpop.f32.mrf.mxu3 }
 0x376   :  { %v1205_v25 = vmul.f32 0.25, %v1201_v24 }
 0x378   :  { %v1206_v28 = vsel %vm1015_vm8, %v1205_v25, -inf }
 0x379   :  { %1207 = vmax.xlane.f32.xlu2 %v1206_v28 }
 0x37d   :  { %v1203_v29 = vpop.f32.mrf.mxu3 }
 0x3d2   :  { %v1177_v33 = vpop.f32.mrf.mxu2 }
 0x3d3   :  { %v10379_v34 = vadd.f32 %v1177_v33, %v1084_v31 }
 0x3da   :  { %v1179_v35 = vpop.f32.mrf.mxu2 }
 0x3e2   :  { %v1295_v36 = vpop.f32.mrf.mxu2 }
 0x3e3   :  { %v1299_v37 = vmul.f32 0.25, %v1295_v36 }
 0x3e5   :  { %v1300_v38 = vsel %vm1015_vm8, %v1299_v37, -inf }
 0x3e6   :  { %1301 = vmax.xlane.f32.xlu0 %v1300_v38 }
 0x3ea   :  { %v1297_v40 = vpop.f32.mrf.mxu2 }
 0x3ec   :  { %v1208_v43 = vpop.xlane.xlu2 %1207 }
 0x3ed   :  { %v1209_v44 = vsub.f32 %v1205_v25, %v1208_v43 }
 0x3ef   :  { %v1210_v45 = vmul.f32 1.442695, %v1209_v44 }
 0x3f1   :  { %9671 = vpow2.f32 %v1210_v45 }
 0x3f7   :  { %v9672_v47 = vpop.eup %9671 }
 0x3f8   :  { %v1212_v49 = vsel %vm1015_vm8, %v9672_v47, 0.0 }
 0x3f9   :  { %1213 = vadd.xlane.f32.xlu2 %v1212_v49 }
 0x3fa   :  { %1325 = vrot.lane.b32.xlu0 %v10340_v19, %s10108_s2 }
 0x402   :  { %1466 = vrot.lane.b32.xlu0 %v10323_v6, %s10110_s27 }
 0x40a   :  { %1464 = vrot.lane.b32.xlu0 %v10331_v14, %s10110_s27 }
 0x411   :  { %1372 = vrot.lane.b32.xlu2 %v10323_v6, %s10104_s6 }
 0x459   :  { %v1302_v0 = vpop.xlane.xlu0 %1301 }
 0x45a   :  { %v1303_v1 = vsub.f32 %v1299_v37, %v1302_v0 }
 0x45c   :  { %v1304_v5 = vmul.f32 1.442695, %v1303_v1 }
 0x45e   :  { %9673 = vpow2.f32 %v1304_v5 }
 0x464   :  { %v9674_v8 = vpop.eup %9673 }
 0x465   :  { %v1306_v9 = vsel %vm1015_vm8, %v9674_v8, 0.0 }
 0x466   :  { %1307 = vadd.xlane.f32.xlu1 %v1306_v9 }
 0x46c   :  { %v1214_v11 = vpop.xlane.xlu2 %1213  ;;  %v1326_v13 = vpop.permute.xlu0 %1325 }
 0x46d   :  { %v1331_v16 = vsel %vm1044_vm9, %v1326_v13, 0  ;;  %9675 = vrcp.f32 %v1214_v11  ;;  %v1226_v37 = vand.u32 2147483648, %v1214_v11  ;;  %vm1220_vm5 = vweird.f32 %v1214_v11  ;;  %v9161_v13 = vld [vmem:[%s13168_s3 + $0x18] sm:$0xff] }
 0x46e   :  { %1340 = vmatpush.bf16.msrb.mxu3 %v1331_v16  ;;  %v1224_v40 = vand.u32 2147483647, %v1214_v11 }
 0x46f   :  { %v1227_v53 = vor.u32 1.1754944e-38, %v1226_v37 }
 0x470   :  { %vm1225_vm12 = vcmp.eq.f32.partialorder %v1224_v40, 8.507059e+37 }
 0x473   :  { %v9676_v21 = vpop.eup %9675 }
 0x474   :  { %v1373_v17 = vpop.permute.xlu2 %1372  ;;  %v1216_v23 = vmul.f32 %v9676_v21, %v1214_v11  ;;  %vm1221_vm3 = vweird.f32 %v9676_v21 }
 0x475   :  { %v1378_v20 = vsel %vm994_vm7, %v1373_v17, 0  ;;  %vm1222_vm10 = vmor %vm1220_vm5, %vm1221_vm3  ;;  %v1467_v17 = vpop.permute.xlu0 %1466 }
 0x476   :  { %1387 = vmatpush.bf16.xpose.msrb.mxu1 %v1378_v20  ;;  %v1217_v24 = vsub.f32 1.0, %v1216_v23 }
 0x478   :  { %v1218_v29 = vmul.f32 %v9676_v21, %v1217_v24 }
 0x47a   :  { %v1219_v36 = vadd.f32 %v9676_v21, %v1218_v29 }
 0x47c   :  { %v1223_v45 = vsel %vm1222_vm10, %v9676_v21, %v1219_v36  ;;  %v1472_v21 = vsel %vm994_vm7, %v1467_v17, 0 }
 0x47d   :  { %v1228_v1 = vsel %vm1225_vm12, %v1227_v53, %v1223_v45 }
 0x47e   :  { %v1229_v9 = vmul.f32 %v9672_v47, %v1228_v1 }
 0x47f   :  { %1231 = vrot.lane.b32.xlu1 %v10340_v19, %s10109_s21 }
 0x480   :  { %v1230_v20 = vpack.c.bf16 %v1229_v9, %v1229_v9 }
 0x487   :  { %1370 = vrot.lane.b32.xlu1 %v10331_v14, %s10104_s6 }
 0x4d9   :  { %v1308_v58 = vpop.xlane.xlu1 %1307 }
 0x4da   :  { %9677 = vrcp.f32 %v1308_v58  ;;  %v1320_v31 = vand.u32 2147483648, %v1308_v58  ;;  %v1318_v35 = vand.u32 2147483647, %v1308_v58  ;;  %vm1314_vm4 = vweird.f32 %v1308_v58 }
 0x4dc   :  { %v1321_v43 = vor.u32 1.1754944e-38, %v1320_v31  ;;  %vm1319_vm11 = vcmp.eq.f32.partialorder %v1318_v35, 8.507059e+37 }
 0x4e0   :  { %v9678_v25 = vpop.eup %9677 }
 0x4e1   :  { %v1310_v28 = vmul.f32 %v9678_v25, %v1308_v58  ;;  %vm1315_vm2 = vweird.f32 %v9678_v25 }
 0x4e2   :  { %vm1316_vm6 = vmor %vm1314_vm4, %vm1315_vm2 }
 0x4e3   :  { %v1311_v30 = vsub.f32 1.0, %v1310_v28  ;;  %v1465_v28 = vpop.permute.xlu0 %1464 }
 0x4e5   :  { %v1312_v33 = vmul.f32 %v9678_v25, %v1311_v30 }
 0x4e7   :  { %v1313_v38 = vadd.f32 %v9678_v25, %v1312_v33 }
 0x4e9   :  { %v1317_v44 = vsel %vm1316_vm6, %v9678_v25, %v1313_v38 }
 0x4ea   :  { %v1322_v49 = vsel %vm1319_vm11, %v1321_v43, %v1317_v44 }
 0x4eb   :  { %v1323_v0 = vmul.f32 %v9674_v8, %v1322_v49 }
 0x4ed   :  { %v1324_v5 = vpack.c.bf16 %v1323_v0, %v1323_v0 }
 0x4ef   :  { %7164 = vmatmul.msk.bf16.vlgmr.msrb.gmra.mxu3 %vm1015_vm8, %v1324_v5 }
 0x4f1   :  { %v1232_v11 = vpop.permute.xlu1 %1231 }
 0x4f2   :  { %v1237_v16 = vsel %vm1044_vm9, %v1232_v11, 0 }
 0x4f3   :  { %1246 = vmatpush.bf16.msrb.mxu0 %v1237_v16 }
 0x4f6   :  { %7157 = vmatmul.msk.bf16.vlgmr.msrb.gmra.mxu0 %vm1015_vm8, %v1230_v20 }
 0x4f7   :  { %1363 = vmatpush.bf16.msra.mxu0 %v9161_v13 }
 0x4f9   :  { %v1371_v29 = vpop.permute.xlu1 %1370 }
 0x4fb   :  { %1481 = vmatpush.bf16.xpose.msrb.mxu0 %v1472_v21 }
 0x572   :  { %v1342_v8 = vpop.f32.mrf.mxu3 }
 0x573   :  { %v1346_v58 = vpack.c.bf16 %v1342_v8, %v1342_v8  ;;  %v1248_v23 = vpop.f32.mrf.mxu0 }
 0x574   :  { %v1252_v47 = vpack.c.bf16 %v1248_v23, %v1248_v23  ;;  %v9163_v23 = vld [vmem:[%s13168_s3 + $0x28] sm:$0xff] }
 0x575   :  { %7169 = vmatmul.msk.bf16.vlgmr.msra.gmra.mxu0 %vm994_vm7, %v1346_v58 }
 0x576   :  { %7162 = vmatmul.msk.bf16.vlgmr.msra.gmra.mxu1 %vm994_vm7, %v1252_v47  ;;  %v9162_v47 = vld [vmem:[%s13168_s3 + $0x20] sm:$0xff] }
 0x577   :  { %1457 = vmatpush.bf16.msra.mxu3 %v9162_v47 }
 0x57a   :  { %v1344_v24 = vpop.f32.mrf.mxu3 }
 0x57b   :  { %v1250_v25 = vpop.f32.mrf.mxu0 }
 0x585   :  { %7177 = vmatmul.msk.bf16.vlgmr.msrb.gmra.mxu0 %vm994_vm7, %v1465_v28 }
 0x586   :  { %7170 = vmatmul.msk.bf16.vlgmr.msrb.gmra.mxu1 %vm994_vm7, %v1371_v29 }
 0x5f2   :  { %v1365_v30 = vpop.f32.mrf.mxu0 }
 0x5f3   :  { %v1271_v31 = vpop.f32.mrf.mxu1 }
 0x5f4   :  { %v1275_v33 = vadd.f32 %v1271_v31, %v10379_v34 }
 0x5f6   :  { %v10413_v35 = vadd.f32 %v1365_v30, %v1275_v33 }
 0x5fa   :  { %v1367_v36 = vpop.f32.mrf.mxu0 }
 0x5fb   :  { %v1273_v37 = vpop.f32.mrf.mxu1 }
 0x602   :  { %v1483_v38 = vpop.f32.mrf.mxu0 }
 0x603   :  { %v1487_v40 = vmul.f32 0.25, %v1483_v38  ;;  %v1389_v43 = vpop.f32.mrf.mxu1 }
 0x604   :  { %v1393_v44 = vmul.f32 0.25, %v1389_v43 }
 0x605   :  { %v1488_v45 = vsel %vm1015_vm8, %v1487_v40, -inf }
 0x606   :  { %1489 = vmax.xlane.f32.xlu1 %v1488_v45  ;;  %v1394_v49 = vsel %vm1015_vm8, %v1393_v44, -inf }
 0x607   :  { %1395 = vmax.xlane.f32.xlu2 %v1394_v49 }
 0x60a   :  { %v1485_v53 = vpop.f32.mrf.mxu0 }
 0x60b   :  { %v1391_v0 = vpop.f32.mrf.mxu1 }
 0x61f   :  { %1419 = vrot.lane.b32.xlu1 %v10340_v19, %s10104_s6 }
 0x627   :  { %1652 = vrot.lane.b32.xlu1 %v10331_v14, %s10111_s8 }
 0x679   :  { %v1490_v34 = vpop.xlane.xlu1 %1489 }
 0x67a   :  { %v1491_v1 = vsub.f32 %v1487_v40, %v1490_v34  ;;  %v1396_v5 = vpop.xlane.xlu2 %1395 }
 0x67b   :  { %v1397_v9 = vsub.f32 %v1393_v44, %v1396_v5 }
 0x67c   :  { %v1492_v13 = vmul.f32 1.442695, %v1491_v1 }
 0x67d   :  { %v1398_v11 = vmul.f32 1.442695, %v1397_v9 }
 0x67e   :  { %9679 = vpow2.f32 %v1492_v13 }
 0x67f   :  { %9681 = vpow2.f32 %v1398_v11 }
 0x684   :  { %v9680_v16 = vpop.eup %9679 }
 0x685   :  { %v9682_v17 = vpop.eup %9681  ;;  %v1494_v20 = vsel %vm1015_vm8, %v9680_v16, 0.0 }
 0x686   :  { %1495 = vadd.xlane.f32.xlu2 %v1494_v20  ;;  %v1400_v21 = vsel %vm1015_vm8, %v9682_v17, 0.0 }
 0x687   :  { %1401 = vadd.xlane.f32.xlu0 %v1400_v21 }
 0x691   :  { %v1420_v8 = vpop.permute.xlu1 %1419 }
 0x692   :  { %v1425_v58 = vsel %vm1044_vm9, %v1420_v8, 0 }
 0x693   :  { %1434 = vmatpush.bf16.msrb.mxu2 %v1425_v58 }
 0x697   :  { %1551 = vmatpush.bf16.msra.mxu2 %v9163_v23 }
 0x69b   :  { %1513 = vrot.lane.b32.xlu0 %v10340_v19, %s10110_s27 }
 0x69e   :  { %1654 = vrot.lane.b32.xlu2 %v10323_v6, %s10111_s8 }
 0x6a3   :  { %1560 = vrot.lane.b32.xlu0 %v10323_v6, %s10097_s28 }
 0x6a6   :  { %1558 = vrot.lane.b32.xlu2 %v10331_v14, %s10097_s28 }
 0x6f9   :  { %v1496_v24 = vpop.xlane.xlu2 %1495 }
 0x6fa   :  { %9683 = vrcp.f32 %v1496_v24  ;;  %v1402_v25 = vpop.xlane.xlu0 %1401  ;;  %v1508_v14 = vand.u32 2147483648, %v1496_v24  ;;  %v1506_v37 = vand.u32 2147483647, %v1496_v24  ;;  %vm1502_vm15 = vweird.f32 %v1496_v24 }
 0x6fb   :  { %9685 = vrcp.f32 %v1402_v25  ;;  %v1414_v38 = vand.u32 2147483648, %v1402_v25  ;;  %v1412_v43 = vand.u32 2147483647, %v1402_v25  ;;  %vm1408_vm1 = vweird.f32 %v1402_v25 }
 0x6fc   :  { %v1509_v45 = vor.u32 1.1754944e-38, %v1508_v14  ;;  %vm1507_vm2 = vcmp.eq.f32.partialorder %v1506_v37, 8.507059e+37 }
 0x6fd   :  { %v1415_v0 = vor.u32 1.1754944e-38, %v1414_v38  ;;  %vm1413_vm4 = vcmp.eq.f32.partialorder %v1412_v43, 8.507059e+37 }
 0x700   :  { %v9684_v28 = vpop.eup %9683 }
 0x701   :  { %v9686_v29 = vpop.eup %9685  ;;  %v1498_v6 = vmul.f32 %v9684_v28, %v1496_v24  ;;  %vm1503_vm13 = vweird.f32 %v9684_v28  ;;  %v1655_v11 = vpop.permute.xlu2 %1654 }
 0x702   :  { %v1404_v30 = vmul.f32 %v9686_v29, %v1402_v25  ;;  %vm1409_vm14 = vweird.f32 %v9686_v29  ;;  %vm1504_vm0 = vmor %vm1502_vm15, %vm1503_vm13  ;;  %v1660_v58 = vsel %vm994_vm7, %v1655_v11, 0 }
 0x703   :  { %v1499_v31 = vsub.f32 1.0, %v1498_v6  ;;  %vm1410_vm3 = vmor %vm1408_vm1, %vm1409_vm14 }
 0x704   :  { %v1405_v33 = vsub.f32 1.0, %v1404_v30  ;;  %v1653_v30 = vpop.permute.xlu1 %1652 }
 0x705   :  { %v1500_v36 = vmul.f32 %v9684_v28, %v1499_v31 }
 0x706   :  { %v1406_v40 = vmul.f32 %v9686_v29, %v1405_v33 }
 0x707   :  { %v1501_v44 = vadd.f32 %v9684_v28, %v1500_v36 }
 0x708   :  { %v1407_v49 = vadd.f32 %v9686_v29, %v1406_v40 }
 0x709   :  { %v1505_v53 = vsel %vm1504_vm0, %v9684_v28, %v1501_v44  ;;  %v1559_v31 = vpop.permute.xlu2 %1558 }
 0x70a   :  { %v1510_v34 = vsel %vm1507_vm2, %v1509_v45, %v1505_v53  ;;  %v1411_v1 = vsel %vm1410_vm3, %v9686_v29, %v1407_v49 }
 0x70b   :  { %v1416_v5 = vsel %vm1413_vm4, %v1415_v0, %v1411_v1  ;;  %v1511_v9 = vmul.f32 %v9680_v16, %v1510_v34 }
 0x70c   :  { %v1417_v13 = vmul.f32 %v9682_v17, %v1416_v5 }
 0x70d   :  { %v1514_v20 = vpop.permute.xlu0 %1513  ;;  %v1512_v23 = vpack.c.bf16 %v1511_v9, %v1511_v9 }
 0x70e   :  { %v1519_v21 = vsel %vm1044_vm9, %v1514_v20, 0  ;;  %v1418_v8 = vpack.c.bf16 %v1417_v13, %v1417_v13 }
 0x70f   :  { %1528 = vmatpush.bf16.msra.mxu1 %v1519_v21 }
 0x710   :  { %7171 = vmatmul.msk.bf16.vlgmr.msrb.gmra.mxu2 %vm1015_vm8, %v1418_v8 }
 0x711   :  { %1669 = vmatpush.bf16.xpose.msrb.mxu2 %v1660_v58 }
 0x712   :  { %7178 = vmatmul.msk.bf16.vlgmr.msra.gmra.mxu1 %vm1015_vm8, %v1512_v23 }
 0x715   :  { %v1561_v47 = vpop.permute.xlu0 %1560 }
 0x716   :  { %v1566_v24 = vsel %vm994_vm7, %v1561_v47, 0 }
 0x717   :  { %1575 = vmatpush.bf16.xpose.msrb.mxu3 %v1566_v24 }
 0x78f   :  { %v1530_v16 = vpop.f32.mrf.mxu1 }
 0x790   :  { %v1534_v17 = vpack.c.bf16 %v1530_v16, %v1530_v16  ;;  %v9164_v16 = vld [vmem:[%s13168_s3 + $0x30] sm:$0xff] }
 0x791   :  { %1645 = vmatpush.bf16.msrb.mxu1 %v9164_v16  ;;  %v7584_v16 = vld [vmem:[#allocation7 + $0x300] sm:$0xf] }
 0x792   :  { %7183 = vmatmul.msk.bf16.vlgmr.msra.gmra.mxu2 %vm994_vm7, %v1534_v17  ;;  %v7424_v17 = vld [vmem:[#allocation7 + $0x1c0] sm:$0xf] }
 0x793   :  { %v1436_v25 = vpop.f32.mrf.mxu2 }
 0x794   :  { %v1440_v28 = vpack.c.bf16 %v1436_v25, %v1436_v25  ;;  %v9290_v25 = vld [vmem:[#allocation7 + $0x1dc] sm:$0xf0] }
 0x796   :  { %7176 = vmatmul.msk.bf16.vlgmr.msra.gmra.mxu3 %vm994_vm7, %v1440_v28  ;;  %v7680_v28 = vld [vmem:[#allocation7 + $0x3c0] sm:$0xf] }
 0x797   :  { %v1532_v29 = vpop.f32.mrf.mxu1 }
 0x798   :  { %v9354_v29 = vld [vmem:[#allocation7 + $0x3dc] sm:$0xf0] }
 0x79b   :  { %v1438_v6 = vpop.f32.mrf.mxu2 }
 0x79c   :  { %v10468_v6 = vor.u32 %v9290_v25, %v7424_v17  ;;  %v9330_v17 = vld [vmem:[#allocation7 + $0x31c] sm:$0xf0]  ;;  %v9262_v25 = vld [vmem:[#allocation7 + $0x104] sm:$0xf] }
 0x79e   :  { %13627 = vst [vmem:[#allocation20_spill] sm:$0xff] %v10468_v6  ;;  %2387 = vmatpush.bf16.msra.mxu1 %v10468_v6 }
 0x7a2   :  { %7191 = vmatmul.msk.bf16.vlgmr.msrb.gmra.mxu2 %vm994_vm7, %v1653_v30  ;;  %v10470_v30 = vor.u32 %v9354_v29, %v7680_v28  ;;  %v7330_v29 = vld [vmem:[#allocation7 + $0x120] sm:$0xf0] }
 0x7a4   :  { %13628 = vst [vmem:[#allocation21_spill] sm:$0xff] %v10470_v30  ;;  %2400 = vmatpush.bf16.msra.mxu2 %v10470_v30 }
 0x7a6   :  { %7184 = vmatmul.msk.bf16.vlgmr.msrb.gmra.mxu3 %vm994_vm7, %v1559_v31  ;;  %v9286_v31 = vld [vmem:[#allocation7 + $0x1c4] sm:$0xf] }
 0x815   :  { %v1553_v14 = vpop.f32.mrf.mxu2 }
 0x819   :  { %v1459_v33 = vpop.f32.mrf.mxu3 }
 0x81a   :  { %v1463_v36 = vadd.f32 %v1459_v33, %v10413_v35 }
 0x81c   :  { %v10448_v37 = vadd.f32 %v1553_v14, %v1463_v36  ;;  %v7426_v14 = vld [vmem:[#allocation7 + $0x1e0] sm:$0xf0]  ;;  %v7392_v36 = vld [vmem:[#allocation7 + $0x180] sm:$0xf] }
 0x81d   :  { %v1555_v38 = vpop.f32.mrf.mxu2  ;;  %v10472_v33 = vor.u32 %v9286_v31, %v7426_v14  ;;  %v9165_v14 = vld [vmem:[%s13168_s3 + $0x38] sm:$0xff] }
 0x81e   :  { %v9282_v38 = vld [vmem:[#allocation7 + $0x19c] sm:$0xf0] }
 0x81f   :  { %13629 = vst [vmem:[#allocation22_spill] sm:$0xff] %v10472_v33 }
 0x821   :  { %v1461_v40 = vpop.f32.mrf.mxu3 }
 0x822   :  { %v7648_v40 = vld [vmem:[#allocation7 + $0x380] sm:$0xf] }
 0x825   :  { %v1671_v43 = vpop.f32.mrf.mxu2 }
 0x826   :  { %v1675_v44 = vmul.f32 0.25, %v1671_v43  ;;  %v9346_v43 = vld [vmem:[#allocation7 + $0x39c] sm:$0xf0] }
 0x828   :  { %v1676_v45 = vsel %vm1015_vm8, %v1675_v44, -inf }
 0x829   :  { %v1577_v49 = vpop.f32.mrf.mxu3  ;;  %1677 = vmax.xlane.f32.xlu0 %v1676_v45  ;;  %v10479_v45 = vor.u32 %v9346_v43, %v7648_v40  ;;  %v9258_v40 = vld [vmem:[#allocation7 + $0xdc] sm:$0xf0] }
 0x82a   :  { %v1581_v53 = vmul.f32 0.25, %v1577_v49  ;;  %v7394_v49 = vld [vmem:[#allocation7 + $0x1a0] sm:$0xf0] }
 0x82b   :  { %13631 = vst [vmem:[#allocation24_spill] sm:$0xff] %v10479_v45  ;;  %2401 = vmatpush.bf16.msra.mxu2 %v10479_v45  ;;  %v8200_v45 = vld [vmem:[#allocation9 + $0x1e0] sm:$0xf0] }
 0x82c   :  { %v1582_v0 = vsel %vm1015_vm8, %v1581_v53, -inf }
 0x82d   :  { %1583 = vmax.xlane.f32.xlu1 %v1582_v0  ;;  %v1673_v34 = vpop.f32.mrf.mxu2 }
 0x82e   :  { %v7360_v34 = vld [vmem:[#allocation7 + $0x140] sm:$0xf] }
 0x831   :  { %v1579_v1 = vpop.f32.mrf.mxu3 }
 0x832   :  { %v9274_v1 = vld [vmem:[#allocation7 + $0x15c] sm:$0xf0] }
 0x846   :  { %1701 = vrot.lane.b32.xlu1 %v10340_v19, %s10111_s8 }
 0x89c   :  { %v1678_v35 = vpop.xlane.xlu0 %1677 }
 0x89d   :  { %v1679_v5 = vsub.f32 %v1675_v44, %v1678_v35  ;;  %v9278_v44 = vld [vmem:[#allocation7 + $0x184] sm:$0xf]  ;;  %v7616_v35 = vld [vmem:[#allocation7 + $0x340] sm:$0xf] }
 0x89e   :  { %v10483_v0 = vor.u32 %v9278_v44, %v7394_v49 }
 0x89f   :  { %v1680_v9 = vmul.f32 1.442695, %v1679_v5  ;;  %v9338_v5 = vld [vmem:[#allocation7 + $0x35c] sm:$0xf0] }
 0x8a0   :  { %v1584_v13 = vpop.xlane.xlu1 %1583  ;;  %13632 = vst [vmem:[#allocation25_spill] sm:$0xff] %v10483_v0 }
 0x8a1   :  { %9687 = vpow2.f32 %v1680_v9  ;;  %v1585_v11 = vsub.f32 %v1581_v53, %v1584_v13  ;;  %v10488_v9 = vor.u32 %v9274_v1, %v7360_v34  ;;  %v10490_v13 = vor.u32 %v9338_v5, %v7616_v35  ;;  %v7552_v1 = vld [vmem:[#allocation7 + $0x2c0] sm:$0xf] }
 0x8a2   :  { %v10510_v34 = vor.u32 %v9262_v25, %v7330_v29  ;;  %v9322_v35 = vld [vmem:[#allocation7 + $0x2dc] sm:$0xf0] }
 0x8a3   :  { %v1586_v20 = vmul.f32 1.442695, %v1585_v11  ;;  %13633 = vst [vmem:[#allocation26_spill] sm:$0xff] %v10488_v9  ;;  %v9270_v11 = vld [vmem:[#allocation7 + $0x144] sm:$0xf]  ;;  %2402 = vmatpush.bf16.msra.mxu2 %v10490_v13  ;;  %v10518_v25 = vor.u32 %v9322_v35, %v7552_v1 }
 0x8a4   :  { %13634 = vst [vmem:[#allocation27_spill] sm:$0xff] %v10490_v13  ;;  %v7264_v29 = vld [vmem:[#allocation7 + $0x80] sm:$0xf]  ;;  %v9246_v1 = vld [vmem:[#allocation7 + $0x84] sm:$0xf] }
 0x8a5   :  { %9689 = vpow2.f32 %v1586_v20  ;;  %v7362_v20 = vld [vmem:[#allocation7 + $0x160] sm:$0xf0]  ;;  %13638 = vst [vmem:[#allocation31_spill] sm:$0xff] %v10510_v34 }
 0x8a6   :  { %13640 = vst [vmem:[#allocation33_spill] sm:$0xff] %v10518_v25  ;;  %v7266_v35 = vld [vmem:[#allocation7 + $0xa0] sm:$0xf0] }
 0x8a7   :  { %v10454_v21 = vpop.eup %9687  ;;  %v9414_v13 = vld [vmem:[#allocation9 + $0x1c4] sm:$0xf] }
 0x8a8   :  { %v1682_v8 = vsel %vm1015_vm8, %v10454_v21, 0.0 }
 0x8a9   :  { %1683 = vadd.xlane.f32.xlu2 %v1682_v8  ;;  %v10493_v8 = vor.u32 %v9270_v11, %v7362_v20  ;;  %v9254_v11 = vld [vmem:[#allocation7 + $0xc4] sm:$0xf] }
 0x8aa   :  { %v7298_v20 = vld [vmem:[#allocation7 + $0xe0] sm:$0xf0] }
 0x8ab   :  { %v10458_v58 = vpop.eup %9689  ;;  %13635 = vst [vmem:[#allocation28_spill] sm:$0xff] %v10493_v8 }
 0x8ac   :  { %v1588_v23 = vsel %vm1015_vm8, %v10458_v58, 0.0 }
 0x8ad   :  { %1589 = vadd.xlane.f32.xlu0 %v1588_v23  ;;  %v7328_v23 = vld [vmem:[#allocation7 + $0x100] sm:$0xf] }
 0x8b8   :  { %v1702_v47 = vpop.permute.xlu1 %1701 }
 0x8b9   :  { %v1707_v24 = vsel %vm1044_vm9, %v1702_v47, 0 }
 0x8ba   :  { %1716 = vmatpush.bf16.msra.mxu3 %v1707_v24  ;;  %v9266_v24 = vld [vmem:[#allocation7 + $0x11c] sm:$0xf0] }
 0x8bb   :  { %v10500_v28 = vor.u32 %v9266_v24, %v7328_v23 }
 0x8bd   :  { %13636 = vst [vmem:[#allocation29_spill] sm:$0xff] %v10500_v28 }
 0x8be   :  { %2413 = vmatpush.bf16.msrb.mxu3 %v10472_v33  ;;  %v9238_v33 = vld [vmem:[#allocation7 + $0x44] sm:$0xf] }
 0x8c1   :  { %1607 = vrot.lane.b32.xlu2 %v10340_v19, %s10097_s28  ;;  %v10476_v19 = vor.u32 %v9282_v38, %v7392_v36  ;;  %v10506_v36 = vor.u32 %v9330_v17, %v7584_v16  ;;  %v7296_v38 = vld [vmem:[#allocation7 + $0xc0] sm:$0xf] }
 0x8c2   :  { %2414 = vmatpush.bf16.msrb.mxu3 %v10483_v0  ;;  %v10514_v24 = vor.u32 %v9258_v40, %v7296_v38  ;;  %v7520_v38 = vld [vmem:[#allocation7 + $0x280] sm:$0xf] }
 0x8c3   :  { %13630 = vst [vmem:[#allocation23_spill] sm:$0xff] %v10476_v19  ;;  %2388 = vmatpush.bf16.msra.mxu1 %v10476_v19  ;;  %2403 = vmatpush.bf16.msra.mxu2 %v10506_v36  ;;  %v9314_v40 = vld [vmem:[#allocation7 + $0x29c] sm:$0xf0] }
 0x8c4   :  { %13637 = vst [vmem:[#allocation30_spill] sm:$0xff] %v10506_v36  ;;  %v7234_v36 = vld [vmem:[#allocation7 + $0x60] sm:$0xf0] }
 0x8c5   :  { %13639 = vst [vmem:[#allocation32_spill] sm:$0xff] %v10514_v24 }
 0x8c6   :  { %2415 = vmatpush.bf16.msrb.mxu3 %v10493_v8  ;;  %v10531_v8 = vor.u32 %v9250_v15, %v7264_v29  ;;  %v7488_v15 = vld [vmem:[#allocation7 + $0x240] sm:$0xf] }
 0x8c7   :  { %2389 = vmatpush.bf16.msra.mxu1 %v10488_v9  ;;  %2404 = vmatpush.bf16.msra.mxu2 %v10518_v25  ;;  %v9306_v29 = vld [vmem:[#allocation7 + $0x25c] sm:$0xf0] }
 0x8c8   :  { %13644 = vst [vmem:[#allocation35_spill] sm:$0xff] %v10531_v8 }
 0x8ca   :  { %2416 = vmatpush.bf16.msrb.mxu3 %v10510_v34  ;;  %v9242_v34 = vld [vmem:[#allocation7 + $0x5c] sm:$0xf0] }
 0x8cb   :  { %2390 = vmatpush.bf16.msra.mxu1 %v10500_v28 }
 0x8cf   :  { %2391 = vmatpush.bf16.msra.mxu1 %v10514_v24 }
 0x8d3   :  { %2392 = vmatpush.bf16.msra.mxu1 %v10531_v8 }
 0x91c   :  { %v10481_v53 = vpop.xlane.xlu2 %1683 }
 0x91d   :  { %9691 = vrcp.f32 %v10481_v53  ;;  %v1694_v44 = vand.u32 2147483647, %v10481_v53  ;;  %v1696_v17 = vand.u32 2147483648, %v10481_v53  ;;  %vm1690_vm6 = vweird.f32 %v10481_v53 }
 0x91f   :  { %vm10525_vm10 = vcmp.eq.f32.partialorder %v1694_v44, 8.507059e+37  ;;  %v7232_v44 = vld [vmem:[#allocation7 + $0x40] sm:$0xf] }
 0x920   :  { %v10495_v47 = vpop.xlane.xlu0 %1589 }
 0x921   :  { %9693 = vrcp.f32 %v10495_v47  ;;  %vm1596_vm13 = vweird.f32 %v10495_v47 }
 0x923   :  { %v9692_v31 = vpop.eup %9691 }
 0x924   :  { %v1686_v43 = vmul.f32 %v9692_v31, %v10481_v53  ;;  %v1608_v49 = vpop.permute.xlu2 %1607  ;;  %vm1691_vm5 = vweird.f32 %v9692_v31  ;;  %v10536_v53 = vor.u32 %v9314_v40, %v7520_v38  ;;  %v10549_v40 = vor.u32 %v9306_v29, %v7488_v15  ;;  %v9318_v15 = vld [vmem:[#allocation7 + $0x2c4] sm:$0xf] }
 0x925   :  { %v1613_v5 = vsel %vm1044_vm9, %v1608_v49, 0  ;;  %vm1692_vm11 = vmor %vm1690_vm6, %vm1691_vm5  ;;  %v7554_v29 = vld [vmem:[#allocation7 + $0x2e0] sm:$0xf0] }
 0x926   :  { %v1687_v23 = vsub.f32 1.0, %v1686_v43  ;;  %1622 = vmatpush.bf16.msra.mxu0 %v1613_v5  ;;  %v10522_v43 = vor.u32 %v9254_v11, %v7298_v20  ;;  %v1697_v11 = vor.u32 1.1754944e-38, %v1696_v17  ;;  %v1602_v20 = vand.u32 2147483648, %v10495_v47  ;;  %13645 = vst [vmem:[#allocation36_spill] sm:$0xff] %v10536_v53  ;;  %2405 = vmatpush.bf16.msra.mxu2 %v10536_v53 }
 0x927   :  { %v9694_v16 = vpop.eup %9693  ;;  %13648 = vst [vmem:[#allocation39_spill] sm:$0xff] %v10549_v40 }
 0x928   :  { %v1688_v63 = vmul.f32 %v9692_v31, %v1687_v23  ;;  %v1592_v49 = vmul.f32 %v9694_v16, %v10495_v47  ;;  %13641 = vst [vmem:[#allocation34_spill] sm:$0xff] %v10522_v43  ;;  %v1600_v23 = vand.u32 2147483647, %v10495_v47  ;;  %vm1597_vm12 = vweird.f32 %v9694_v16  ;;  %2417 = vmatpush.bf16.msrb.mxu3 %v10522_v43 }
 0x929   :  { %vm1598_vm14 = vmor %vm1596_vm13, %vm1597_vm12 }
 0x92a   :  { %1739 = vmatpush.bf16.msrb.mxu0 %v9165_v14  ;;  %v1689_v5 = vadd.f32 %v9692_v31, %v1688_v63  ;;  %v1593_v2 = vsub.f32 1.0, %v1592_v49  ;;  %v10539_v49 = vor.u32 %v9246_v1, %v7266_v35  ;;  %vm1601_vm15 = vcmp.eq.f32.partialorder %v1600_v23, 8.507059e+37  ;;  %v9350_v14 = vld [vmem:[#allocation7 + $0x3c4] sm:$0xf]  ;;  %2406 = vmatpush.bf16.msra.mxu2 %v10549_v40  ;;  %v7226_v40 = vld [vmem:[#allocation7 + $0x38] sm:$0xf0] }
 0x92b   :  { %v7682_v35 = vld [vmem:[#allocation7 + $0x3e0] sm:$0xf0] }
 0x92c   :  { %v1693_v0 = vsel %vm1692_vm11, %v9692_v31, %v1689_v5  ;;  %v1594_v63 = vmul.f32 %v9694_v16, %v1593_v2  ;;  %13646 = vst [vmem:[#allocation37_spill] sm:$0xff] %v10539_v49  ;;  %v10546_v2 = vor.u32 %v9242_v34, %v7232_v44  ;;  %v1603_v31 = vor.u32 1.1754944e-38, %v1602_v20  ;;  %2418 = vmatpush.bf16.msrb.mxu3 %v10539_v49  ;;  %v9342_v23 = vld [vmem:[#allocation7 + $0x384] sm:$0xf] }
 0x92d   :  { %v1698_v17 = vsel %vm10525_vm10, %v1697_v11, %v1693_v0  ;;  %v10557_v34 = vor.u32 %v9350_v14, %v7682_v35  ;;  %v9326_v20 = vld [vmem:[#allocation7 + $0x304] sm:$0xf] }
 0x92e   :  { %v1699_v25 = vmul.f32 %v10454_v21, %v1698_v17  ;;  %v1595_v38 = vadd.f32 %v9694_v16, %v1594_v63  ;;  %13647 = vst [vmem:[#allocation38_spill] sm:$0xff] %v10546_v2  ;;  %v10552_v21 = vor.u32 %v9238_v33, %v7234_v36  ;;  %2393 = vmatpush.bf16.msra.mxu1 %v10546_v2  ;;  %v7618_v36 = vld [vmem:[#allocation7 + $0x360] sm:$0xf0] }
 0x92f   :  { %13650 = vst [vmem:[#allocation41_spill] sm:$0xff] %v10557_v34  ;;  %v7586_v44 = vld [vmem:[#allocation7 + $0x320] sm:$0xf0]  ;;  %v10572_v17 = vor.u32 %v9318_v15, %v7554_v29 }
 0x930   :  { %v1599_v1 = vsel %vm1598_vm14, %v9694_v16, %v1595_v38  ;;  %v1700_v0 = vpack.c.bf16 %v1699_v25, %v1699_v25  ;;  %13649 = vst [vmem:[#allocation40_spill] sm:$0xff] %v10552_v21  ;;  %v7650_v25 = vld [vmem:[#allocation7 + $0x3a0] sm:$0xf0]  ;;  %2419 = vmatpush.bf16.msrb.mxu3 %v10552_v21  ;;  %v10569_v63 = vor.u32 %v9326_v20, %v7586_v44  ;;  %v7210_v21 = vld [vmem:[#allocation7 + $0x28] sm:$0xf0] }
 0x931   :  { %v1604_v47 = vsel %vm1601_vm15, %v1603_v31, %v1599_v1  ;;  %v10563_v33 = vor.u32 %v9342_v23, %v7650_v25  ;;  %13654 = vst [vmem:[#allocation45_spill] sm:$0xff] %v10572_v17  ;;  %v9310_v38 = vld [vmem:[#allocation7 + $0x284] sm:$0xf]  ;;  %v9298_v25 = vld [vmem:[#allocation7 + $0x21c] sm:$0xf0] }
 0x932   :  { %v1605_v5 = vmul.f32 %v10458_v58, %v1604_v47  ;;  %7192 = vmatmul.msk.bf16.vlgmr.msra.gmra.mxu3 %vm1015_vm8, %v1700_v0  ;;  %v9334_v58 = vld [vmem:[#allocation7 + $0x344] sm:$0xf]  ;;  %13653 = vst [vmem:[#allocation44_spill] sm:$0xff] %v10569_v63  ;;  %v7200_v47 = vld [vmem:[#allocation7] sm:$0xf] }
 0x933   :  { %13651 = vst [vmem:[#allocation42_spill] sm:$0xff] %v10563_v33  ;;  %v10566_v11 = vor.u32 %v9334_v58, %v7618_v36  ;;  %v7522_v31 = vld [vmem:[#allocation7 + $0x2a0] sm:$0xf0] }
 0x934   :  { %v1606_v16 = vpack.c.bf16 %v1605_v5, %v1605_v5  ;;  %v10575_v1 = vor.u32 %v9310_v38, %v7522_v31  ;;  %v9302_v0 = vld [vmem:[#allocation7 + $0x244] sm:$0xf]  ;;  %v9234_v5 = vld [vmem:[#allocation7 + $0x1c] sm:$0xf0]  ;;  %v7688_v31 = vld [vmem:[#allocation7 + $0x3c8] sm:$0xf] }
 0x935   :  { %13652 = vst [vmem:[#allocation43_spill] sm:$0xff] %v10566_v11  ;;  %v7490_v14 = vld [vmem:[#allocation7 + $0x260] sm:$0xf0]  ;;  %v10581_v23 = vor.u32 %v9234_v5, %v7200_v47  ;;  %v9287_v47 = vld [vmem:[#allocation7 + $0x1cc] sm:$0xf] }
 0x936   :  { %7185 = vmatmul.msk.bf16.vlgmr.msra.gmra.mxu0 %vm1015_vm8, %v1606_v16  ;;  %13655 = vst [vmem:[#allocation46_spill] sm:$0xff] %v10575_v1  ;;  %v10578_v35 = vor.u32 %v9302_v0, %v7490_v14  ;;  %v7456_v16 = vld [vmem:[#allocation7 + $0x200] sm:$0xf]  ;;  %v9230_v58 = vld [vmem:[#allocation7 + $0x4] sm:$0xf] }
 0x937   :  { %2426 = vmatpush.bf16.msra.mxu0 %v10557_v34  ;;  %13657 = vst [vmem:[#allocation48_spill] sm:$0xff] %v10581_v23  ;;  %v7202_v36 = vld [vmem:[#allocation7 + $0x20] sm:$0xf0]  ;;  %v10583_v20 = vor.u32 %v9298_v25, %v7456_v16  ;;  %2394 = vmatpush.bf16.msra.mxu1 %v10581_v23  ;;  %v9355_v0 = vld [vmem:[#allocation7 + $0x3e4] sm:$0xf0] }
 0x938   :  { %13656 = vst [vmem:[#allocation47_spill] sm:$0xff] %v10578_v35  ;;  %v10585_v44 = vor.u32 %v9230_v58, %v7202_v36  ;;  %v9294_v15 = vld [vmem:[#allocation7 + $0x204] sm:$0xf]  ;;  %v10592_v14 = vor.u32 %v9355_v0, %v7688_v31  ;;  %v7434_v5 = vld [vmem:[#allocation7 + $0x1e8] sm:$0xf0] }
 0x939   :  { %13658 = vst [vmem:[#allocation49_spill] sm:$0xff] %v10583_v20  ;;  %v7458_v29 = vld [vmem:[#allocation7 + $0x220] sm:$0xf0]  ;;  %2407 = vmatpush.bf16.msra.mxu2 %v10583_v20  ;;  %v10595_v16 = vor.u32 %v9287_v47, %v7434_v5  ;;  %v7656_v25 = vld [vmem:[#allocation7 + $0x388] sm:$0xf] }
 0x93a   :  { %13659 = vst [vmem:[#allocation50_spill] sm:$0xff] %v10585_v44  ;;  %v10588_v38 = vor.u32 %v9294_v15, %v7458_v29  ;;  %2420 = vmatpush.bf16.msrb.mxu3 %v10585_v44  ;;  %v9347_v58 = vld [vmem:[#allocation7 + $0x3a4] sm:$0xf0]  ;;  %v9279_v36 = vld [vmem:[#allocation7 + $0x18c] sm:$0xf] }
 0x93b   :  { %2427 = vmatpush.bf16.msra.mxu0 %v10563_v33  ;;  %13661 = vst [vmem:[#allocation52_spill] sm:$0xff] %v10592_v14  ;;  %v10599_v15 = vor.u32 %v9347_v58, %v7656_v25  ;;  %v7402_v29 = vld [vmem:[#allocation7 + $0x1a8] sm:$0xf0]  ;;  %v7624_v31 = vld [vmem:[#allocation7 + $0x348] sm:$0xf] }
 0x93c   :  { %13660 = vst [vmem:[#allocation51_spill] sm:$0xff] %v10588_v38  ;;  %v9339_v0 = vld [vmem:[#allocation7 + $0x364] sm:$0xf0]  ;;  %v9263_v58 = vld [vmem:[#allocation7 + $0x10c] sm:$0xf] }
 0x93d   :  { %13662 = vst [vmem:[#allocation53_spill] sm:$0xff] %v10595_v16  ;;  %2452 = vmatpush.bf16.msrb.mxu2 %v10592_v14  ;;  %v10605_v47 = vor.u32 %v9339_v0, %v7624_v31  ;;  %v9331_v25 = vld [vmem:[#allocation7 + $0x324] sm:$0xf0]  ;;  %v9255_v31 = vld [vmem:[#allocation7 + $0xcc] sm:$0xf] }
 0x93e   :  { %2465 = vmatpush.bf16.msra.mxu3 %v10595_v16  ;;  %13663 = vst [vmem:[#allocation54_spill] sm:$0xff] %v10599_v15  ;;  %v9323_v33 = vld [vmem:[#allocation7 + $0x2e4] sm:$0xf0]  ;;  %v7306_v0 = vld [vmem:[#allocation7 + $0xe8] sm:$0xf0] }
 0x93f   :  { %2428 = vmatpush.bf16.msra.mxu0 %v10566_v11  ;;  %13665 = vst [vmem:[#allocation56_spill] sm:$0xff] %v10605_v47  ;;  %v7560_v11 = vld [vmem:[#allocation7 + $0x2c8] sm:$0xf]  ;;  %v9231_v44 = vld [vmem:[#allocation7 + $0xc] sm:$0xf] }
 0x940   :  { %v7528_v34 = vld [vmem:[#allocation7 + $0x288] sm:$0xf]  ;;  %v7442_v14 = vld [vmem:[#allocation7 + $0x1f0] sm:$0xf0]  ;;  %v8808_v23 = vld [vmem:[#allocation9 + $0x6a0] sm:$0xf0] }
 0x941   :  { %2453 = vmatpush.bf16.msrb.mxu2 %v10599_v15  ;;  %v7464_v16 = vld [vmem:[#allocation7 + $0x208] sm:$0xf]  ;;  %v9288_v15 = vld [vmem:[#allocation7 + $0x1d4] sm:$0xf] }
 0x943   :  { %2429 = vmatpush.bf16.msra.mxu0 %v10569_v63  ;;  %v7338_v63 = vld [vmem:[#allocation7 + $0x128] sm:$0xf0] }
 0x945   :  { %2454 = vmatpush.bf16.msrb.mxu2 %v10605_v47 }
 0x947   :  { %2430 = vmatpush.bf16.msra.mxu0 %v10572_v17  ;;  %v7592_v17 = vld [vmem:[#allocation7 + $0x308] sm:$0xf] }
 0x94b   :  { %2431 = vmatpush.bf16.msra.mxu0 %v10575_v1  ;;  %v9271_v1 = vld [vmem:[#allocation7 + $0x14c] sm:$0xf] }
 0x94f   :  { %2432 = vmatpush.bf16.msra.mxu0 %v10578_v35  ;;  %v10601_v35 = vor.u32 %v9279_v36, %v7402_v29  ;;  %v10611_v36 = vor.u32 %v9331_v25, %v7592_v17  ;;  %v10613_v29 = vor.u32 %v9263_v58, %v7338_v63  ;;  %v9247_v17 = vld [vmem:[#allocation7 + $0x8c] sm:$0xf] }
 0x950   :  { %v7274_v25 = vld [vmem:[#allocation7 + $0xa8] sm:$0xf0] }
 0x951   :  { %13664 = vst [vmem:[#allocation55_spill] sm:$0xff] %v10601_v35  ;;  %2466 = vmatpush.bf16.msra.mxu3 %v10601_v35  ;;  %2455 = vmatpush.bf16.msrb.mxu2 %v10611_v36  ;;  %v10625_v58 = vor.u32 %v9247_v17, %v7274_v25  ;;  %v13202_v35 = vmov 0   ;;  %v9351_v17 = vld [vmem:[#allocation7 + $0x3cc] sm:$0xf] }
 0x952   :  { %13667 = vst [vmem:[#allocation58_spill] sm:$0xff] %v10611_v36  ;;  %2421 = vmatmul.bf16.vlgmr.msrb.gmra.mxu3 %v13202_v35  ;;  %2408 = vmatmul.bf16.vlgmr.msra.gmra.mxu2 %v13202_v35  ;;  %v7690_v25 = vld [vmem:[#allocation7 + $0x3e8] sm:$0xf0]  ;;  %v9299_v35 = vld [vmem:[#allocation7 + $0x224] sm:$0xf0] }
 0x953   :  { %2433 = vmatpush.bf16.msra.mxu0 %v10588_v38  ;;  %v7370_v38 = vld [vmem:[#allocation7 + $0x168] sm:$0xf0]  ;;  %13668 = vst [vmem:[#allocation59_spill] sm:$0xff] %v10613_v29  ;;  %v10643_v47 = vor.u32 %v9351_v17, %v7690_v25  ;;  %v7410_v17 = vld [vmem:[#allocation7 + $0x1b0] sm:$0xf0] }
 0x954   :  { %v10607_v5 = vor.u32 %v9271_v1, %v7370_v38  ;;  %v10617_v1 = vor.u32 %v9323_v33, %v7560_v11  ;;  %v10619_v38 = vor.u32 %v9255_v31, %v7306_v0  ;;  %13672 = vst [vmem:[#allocation63_spill] sm:$0xff] %v10625_v58  ;;  %v7496_v33 = vld [vmem:[#allocation7 + $0x248] sm:$0xf]  ;;  %v9239_v31 = vld [vmem:[#allocation7 + $0x4c] sm:$0xf] }
 0x955   :  { %v9307_v11 = vld [vmem:[#allocation7 + $0x264] sm:$0xf0]  ;;  %v7242_v0 = vld [vmem:[#allocation7 + $0x68] sm:$0xf0]  ;;  %13678 = vst [vmem:[#allocation69_spill] sm:$0xff] %v10643_v47 }
 0x956   :  { %13666 = vst [vmem:[#allocation57_spill] sm:$0xff] %v10607_v5  ;;  %2467 = vmatpush.bf16.msra.mxu3 %v10607_v5  ;;  %2456 = vmatpush.bf16.msrb.mxu2 %v10617_v1  ;;  %v9315_v5 = vld [vmem:[#allocation7 + $0x2a4] sm:$0xf0]  ;;  %v7626_v25 = vld [vmem:[#allocation7 + $0x368] sm:$0xf0] }
 0x957   :  { %13669 = vst [vmem:[#allocation60_spill] sm:$0xff] %v10617_v1  ;;  %v10623_v63 = vor.u32 %v9315_v5, %v7528_v34  ;;  %v7432_v34 = vld [vmem:[#allocation7 + $0x1c8] sm:$0xf]  ;;  %v9356_v1 = vld [vmem:[#allocation7 + $0x3ec] sm:$0xf0] }
 0x958   :  { %13670 = vst [vmem:[#allocation61_spill] sm:$0xff] %v10619_v38  ;;  %v9291_v5 = vld [vmem:[#allocation7 + $0x1e4] sm:$0xf0] }
 0x959   :  { %13671 = vst [vmem:[#allocation62_spill] sm:$0xff] %v10623_v63  ;;  %v10636_v43 = vor.u32 %v9291_v5, %v7432_v34  ;;  %v9343_v5 = vld [vmem:[#allocation7 + $0x38c] sm:$0xf] }
 0x95a   :  { %2468 = vmatpush.bf16.msra.mxu3 %v10613_v29  ;;  %2457 = vmatpush.bf16.msrb.mxu2 %v10623_v63  ;;  %v10631_v29 = vor.u32 %v9307_v11, %v7496_v33  ;;  %v7400_v63 = vld [vmem:[#allocation7 + $0x188] sm:$0xf]  ;;  %v10639_v33 = vor.u32 %v9299_v35, %v7464_v16  ;;  %v10641_v11 = vor.u32 %v9231_v44, %v7210_v21  ;;  %v7664_v35 = vld [vmem:[#allocation7 + $0x390] sm:$0xf]  ;;  %v9280_v16 = vld [vmem:[#allocation7 + $0x194] sm:$0xf] }
 0x95b   :  { %13675 = vst [vmem:[#allocation66_spill] sm:$0xff] %v10636_v43  ;;  %v10649_v21 = vor.u32 %v9288_v15, %v7442_v14  ;;  %v9348_v44 = vld [vmem:[#allocation7 + $0x3ac] sm:$0xf0]  ;;  %v10663_v15 = vor.u32 %v9280_v16, %v7410_v17 }
 0x95c   :  { %13673 = vst [vmem:[#allocation64_spill] sm:$0xff] %v10631_v29 }
 0x95d   :  { %13676 = vst [vmem:[#allocation67_spill] sm:$0xff] %v10639_v33 }
 0x95e   :  { %2469 = vmatpush.bf16.msra.mxu3 %v10619_v38  ;;  %v10633_v38 = vor.u32 %v9239_v31, %v7242_v0  ;;  %2458 = vmatpush.bf16.msrb.mxu2 %v10631_v29  ;;  %13677 = vst [vmem:[#allocation68_spill] sm:$0xff] %v10641_v11  ;;  %v9283_v0 = vld [vmem:[#allocation7 + $0x1a4] sm:$0xf0] }
 0x95f   :  { %13680 = vst [vmem:[#allocation71_spill] sm:$0xff] %v10649_v21 }
 0x960   :  { %13674 = vst [vmem:[#allocation65_spill] sm:$0xff] %v10633_v38 }
 0x961   :  { %13684 = vst [vmem:[#allocation75_spill] sm:$0xff] %v10663_v15 }
 0x962   :  { %2470 = vmatpush.bf16.msra.mxu3 %v10625_v58  ;;  %v7696_v58 = vld [vmem:[#allocation7 + $0x3d0] sm:$0xf]  ;;  %2459 = vmatpush.bf16.msrb.mxu2 %v10639_v33  ;;  %v9295_v33 = vld [vmem:[#allocation7 + $0x20c] sm:$0xf] }
 0x963   :  { %v10645_v29 = vor.u32 %v9356_v1, %v7696_v58  ;;  %v9275_v1 = vld [vmem:[#allocation7 + $0x164] sm:$0xf0]  ;;  %v10657_v58 = vor.u32 %v9348_v44, %v7664_v35  ;;  %v9272_v35 = vld [vmem:[#allocation7 + $0x154] sm:$0xf] }
 0x964   :  { %v7378_v44 = vld [vmem:[#allocation7 + $0x170] sm:$0xf0] }
 0x965   :  { %13679 = vst [vmem:[#allocation70_spill] sm:$0xff] %v10645_v29 }
 0x966   :  { %2471 = vmatpush.bf16.msra.mxu3 %v10633_v38  ;;  %v7658_v38 = vld [vmem:[#allocation7 + $0x3a8] sm:$0xf0]  ;;  %2504 = vmatpush.bf16.msra.mxu2 %v10645_v29  ;;  %13682 = vst [vmem:[#allocation73_spill] sm:$0xff] %v10657_v58  ;;  %v9267_v29 = vld [vmem:[#allocation7 + $0x124] sm:$0xf0] }
 0x967   :  { %v10660_v14 = vor.u32 %v9343_v5, %v7658_v38  ;;  %v13687_v5 = vmov 0  }
 0x968   :  { %2460 = vmatmul.bf16.vlgmr.msrb.gmra.mxu2 %v13687_v5 }
 0x969   :  { %13683 = vst [vmem:[#allocation74_spill] sm:$0xff] %v10660_v14 }
 0x96a   :  { %2472 = vmatpush.bf16.msra.mxu3 %v10641_v11  ;;  %v7336_v11 = vld [vmem:[#allocation7 + $0x108] sm:$0xf]  ;;  %2505 = vmatpush.bf16.msra.mxu2 %v10657_v58  ;;  %v9256_v58 = vld [vmem:[#allocation7 + $0xd4] sm:$0xf] }
 0x96d   :  { %2473 = vmatmul.bf16.vlgmr.msra.gmra.mxu3 %v13687_v5 }
 0x96e   :  { %2517 = vmatpush.bf16.msrb.mxu3 %v10649_v21  ;;  %v7346_v21 = vld [vmem:[#allocation7 + $0x130] sm:$0xf0] }
 0x972   :  { %2518 = vmatpush.bf16.msrb.mxu3 %v10663_v15  ;;  %v9324_v15 = vld [vmem:[#allocation7 + $0x2ec] sm:$0xf0] }
 0x9b3   :  { %v1624_v49 = vpop.f32.mrf.mxu0 }
 0x9b4   :  { %v1628_v31 = vpack.c.bf16 %v1624_v49, %v1624_v49  ;;  %v10652_v49 = vor.u32 %v9283_v0, %v7400_v63  ;;  %v9335_v63 = vld [vmem:[#allocation7 + $0x34c] sm:$0xf] }
 0x9b5   :  { %v1718_v36 = vpop.f32.mrf.mxu3  ;;  %v10673_v17 = vor.u32 %v9335_v63, %v7626_v25 }
 0x9b6   :  { %v1722_v34 = vpack.c.bf16 %v1718_v36, %v1718_v36  ;;  %7190 = vmatmul.msk.bf16.vlgmr.msrb.gmra.mxu1 %vm994_vm7, %v1628_v31  ;;  %13681 = vst [vmem:[#allocation72_spill] sm:$0xff] %v10652_v49  ;;  %v7368_v36 = vld [vmem:[#allocation7 + $0x148] sm:$0xf]  ;;  %v7632_v31 = vld [vmem:[#allocation7 + $0x350] sm:$0xf] }
 0x9b7   :  { %2439 = vmatpush.bf16.msrb.mxu1 %v10636_v43  ;;  %v9340_v43 = vld [vmem:[#allocation7 + $0x36c] sm:$0xf0]  ;;  %13688 = vst [vmem:[#allocation78_spill] sm:$0xff] %v10673_v17 }
 0x9b8   :  { %7197 = vmatmul.msk.bf16.vlgmr.msrb.gmra.mxu0 %vm994_vm7, %v1722_v34  ;;  %v10666_v34 = vor.u32 %v9275_v1, %v7368_v36  ;;  %v10669_v38 = vor.u32 %v9340_v43, %v7632_v31  ;;  %v10676_v36 = vor.u32 %v9272_v35, %v7378_v44  ;;  %v9327_v1 = vld [vmem:[#allocation7 + $0x30c] sm:$0xf]  ;;  %v10680_v43 = vor.u32 %v9267_v29, %v7336_v11  ;;  %v9332_v31 = vld [vmem:[#allocation7 + $0x32c] sm:$0xf0] }
 0x9b9   :  { %2478 = vmatpush.bf16.msrb.mxu0 %v10643_v47  ;;  %v9264_v47 = vld [vmem:[#allocation7 + $0x114] sm:$0xf]  ;;  %v9319_v44 = vld [vmem:[#allocation7 + $0x2cc] sm:$0xf]  ;;  %v7568_v11 = vld [vmem:[#allocation7 + $0x2d0] sm:$0xf] }
 0x9ba   :  { %13685 = vst [vmem:[#allocation76_spill] sm:$0xff] %v10666_v34  ;;  %2506 = vmatpush.bf16.msra.mxu2 %v10669_v38  ;;  %2519 = vmatpush.bf16.msrb.mxu3 %v10676_v36  ;;  %v10689_v35 = vor.u32 %v9264_v47, %v7346_v21  ;;  %v7562_v29 = vld [vmem:[#allocation7 + $0x2e8] sm:$0xf0] }
 0x9bb   :  { %v1626_v0 = vpop.f32.mrf.mxu0  ;;  %2440 = vmatpush.bf16.msrb.mxu1 %v10652_v49  ;;  %13686 = vst [vmem:[#allocation77_spill] sm:$0xff] %v10669_v38  ;;  %v7600_v49 = vld [vmem:[#allocation7 + $0x310] sm:$0xf]  ;;  %v7314_v38 = vld [vmem:[#allocation7 + $0xf0] sm:$0xf0]  ;;  %v10698_v47 = vor.u32 %v9319_v44, %v7562_v29 }
 0x9bc   :  { %13689 = vst [vmem:[#allocation79_spill] sm:$0xff] %v10676_v36  ;;  %v7594_v0 = vld [vmem:[#allocation7 + $0x328] sm:$0xf0]  ;;  %v10683_v63 = vor.u32 %v9332_v31, %v7600_v49  ;;  %v7272_v49 = vld [vmem:[#allocation7 + $0x88] sm:$0xf]  ;;  %v10701_v21 = vor.u32 %v9256_v58, %v7314_v38 }
 0x9bd   :  { %2479 = vmatpush.bf16.msrb.mxu0 %v10660_v14  ;;  %v1720_v16 = vpop.f32.mrf.mxu3  ;;  %13690 = vst [vmem:[#allocation80_spill] sm:$0xff] %v10680_v43  ;;  %v7304_v14 = vld [vmem:[#allocation7 + $0xc8] sm:$0xf]  ;;  %v10686_v25 = vor.u32 %v9327_v1, %v7594_v0  ;;  %v10695_v1 = vor.u32 %v9324_v15, %v7568_v11  ;;  %v9311_v0 = vld [vmem:[#allocation7 + $0x28c] sm:$0xf] }
 0x9be   :  { %v9259_v16 = vld [vmem:[#allocation7 + $0xe4] sm:$0xf0]  ;;  %13691 = vst [vmem:[#allocation81_spill] sm:$0xff] %v10683_v63  ;;  %2507 = vmatpush.bf16.msra.mxu2 %v10683_v63  ;;  %2520 = vmatpush.bf16.msrb.mxu3 %v10689_v35  ;;  %v9248_v15 = vld [vmem:[#allocation7 + $0x94] sm:$0xf] }
 0x9bf   :  { %2441 = vmatpush.bf16.msrb.mxu1 %v10666_v34  ;;  %13692 = vst [vmem:[#allocation82_spill] sm:$0xff] %v10686_v25  ;;  %v10692_v34 = vor.u32 %v9259_v16, %v7304_v14  ;;  %v9251_v31 = vld [vmem:[#allocation7 + $0xa4] sm:$0xf0]  ;;  %v7530_v14 = vld [vmem:[#allocation7 + $0x2a8] sm:$0xf0] }
 0x9c0   :  { %13693 = vst [vmem:[#allocation83_spill] sm:$0xff] %v10689_v35  ;;  %v7536_v16 = vld [vmem:[#allocation7 + $0x290] sm:$0xf]  ;;  %v7282_v11 = vld [vmem:[#allocation7 + $0xb0] sm:$0xf0]  ;;  %v10712_v38 = vor.u32 %v9311_v0, %v7530_v14 }
 0x9c1   :  { %2480 = vmatpush.bf16.msrb.mxu0 %v10673_v17  ;;  %13694 = vst [vmem:[#allocation84_spill] sm:$0xff] %v10692_v34  ;;  %v9316_v17 = vld [vmem:[#allocation7 + $0x2ac] sm:$0xf0]  ;;  %v7240_v44 = vld [vmem:[#allocation7 + $0x48] sm:$0xf] }
 0x9c2   :  { %13695 = vst [vmem:[#allocation85_spill] sm:$0xff] %v10695_v1  ;;  %v9243_v29 = vld [vmem:[#allocation7 + $0x64] sm:$0xf0]  ;;  %2508 = vmatpush.bf16.msra.mxu2 %v10695_v1  ;;  %v10709_v58 = vor.u32 %v9316_v17, %v7536_v16  ;;  %2521 = vmatpush.bf16.msrb.mxu3 %v10701_v21  ;;  %v9308_v36 = vld [vmem:[#allocation7 + $0x26c] sm:$0xf0] }
 0x9c3   :  { %2442 = vmatpush.bf16.msrb.mxu1 %v10680_v43  ;;  %13696 = vst [vmem:[#allocation86_spill] sm:$0xff] %v10698_v47  ;;  %v10705_v43 = vor.u32 %v9251_v31, %v7272_v49  ;;  %v9303_v49 = vld [vmem:[#allocation7 + $0x24c] sm:$0xf]  ;;  %v10718_v35 = vor.u32 %v9243_v29, %v7240_v44  ;;  %v9240_v63 = vld [vmem:[#allocation7 + $0x54] sm:$0xf] }
 0x9c4   :  { %13697 = vst [vmem:[#allocation87_spill] sm:$0xff] %v10701_v21  ;;  %v7498_v31 = vld [vmem:[#allocation7 + $0x268] sm:$0xf0]  ;;  %v7250_v1 = vld [vmem:[#allocation7 + $0x70] sm:$0xf0] }
 0x9c5   :  { %2481 = vmatpush.bf16.msrb.mxu0 %v10686_v25  ;;  %13698 = vst [vmem:[#allocation88_spill] sm:$0xff] %v10705_v43  ;;  %v7504_v25 = vld [vmem:[#allocation7 + $0x250] sm:$0xf]  ;;  %v7208_v17 = vld [vmem:[#allocation7 + $0x8] sm:$0xf]  ;;  %v10724_v14 = vor.u32 %v9303_v49, %v7498_v31  ;;  %v10727_v44 = vor.u32 %v9240_v63, %v7250_v1 }
 0x9c6   :  { %2395 = vmatmul.bf16.vlgmr.msra.gmra.mxu1 %v13687_v5  ;;  %13699 = vst [vmem:[#allocation89_spill] sm:$0xff] %v10709_v58  ;;  %v9235_v16 = vld [vmem:[#allocation7 + $0x24] sm:$0xf0]  ;;  %2509 = vmatpush.bf16.msra.mxu2 %v10709_v58  ;;  %v10721_v0 = vor.u32 %v9308_v36, %v7504_v25  ;;  %v9352_v29 = vld [vmem:[#allocation7 + $0x3d4] sm:$0xf] }
 0x9c7   :  { %2443 = vmatpush.bf16.msrb.mxu1 %v10692_v34  ;;  %13700 = vst [vmem:[#allocation90_spill] sm:$0xff] %v10712_v38  ;;  %v10715_v34 = vor.u32 %v9248_v15, %v7282_v11  ;;  %v7466_v15 = vld [vmem:[#allocation7 + $0x228] sm:$0xf0]  ;;  %v7440_v11 = vld [vmem:[#allocation7 + $0x1d0] sm:$0xf]  ;;  %v10730_v20 = vor.u32 %v9235_v16, %v7208_v17 }
 0x9c8   :  { %2434 = vmatmul.bf16.vlgmr.msra.gmra.mxu0 %v13687_v5  ;;  %13702 = vst [vmem:[#allocation92_spill] sm:$0xff] %v10718_v35  ;;  %v7472_v21 = vld [vmem:[#allocation7 + $0x210] sm:$0xf]  ;;  %v9232_v25 = vld [vmem:[#allocation7 + $0x14] sm:$0xf]  ;;  %v10738_v63 = vor.u32 %v9295_v33, %v7466_v15 }
 0x9c9   :  { %2482 = vmatpush.bf16.msrb.mxu0 %v10698_v47  ;;  %13701 = vst [vmem:[#allocation91_spill] sm:$0xff] %v10715_v34  ;;  %v9292_v47 = vld [vmem:[#allocation7 + $0x1ec] sm:$0xf0]  ;;  %2522 = vmatpush.bf16.msrb.mxu3 %v10715_v34  ;;  %v7218_v58 = vld [vmem:[#allocation7 + $0x30] sm:$0xf0] }
 0x9ca   :  { %13703 = vst [vmem:[#allocation93_spill] sm:$0xff] %v10721_v0  ;;  %v9300_v36 = vld [vmem:[#allocation7 + $0x22c] sm:$0xf0]  ;;  %2510 = vmatpush.bf16.msra.mxu2 %v10721_v0  ;;  %v7704_v17 = vld [vmem:[#allocation7 + $0x3d8] sm:$0xf] }
 0x9cb   :  { %2444 = vmatpush.bf16.msrb.mxu1 %v10705_v43  ;;  %13704 = vst [vmem:[#allocation94_spill] sm:$0xff] %v10724_v14  ;;  %v7698_v43 = vld [vmem:[#allocation7 + $0x3f0] sm:$0xf0]  ;;  %v7408_v49 = vld [vmem:[#allocation7 + $0x190] sm:$0xf]  ;;  %v10735_v31 = vor.u32 %v9300_v36, %v7472_v21 }
 0x9cc   :  { %13705 = vst [vmem:[#allocation95_spill] sm:$0xff] %v10727_v44  ;;  %v9284_v1 = vld [vmem:[#allocation7 + $0x1ac] sm:$0xf0]  ;;  %v9357_v16 = vld [vmem:[#allocation7 + $0x3f4] sm:$0xf0]  ;;  %v10743_v34 = vor.u32 %v9352_v29, %v7698_v43 }
 0x9cd   :  { %2483 = vmatpush.bf16.msrb.mxu0 %v10712_v38  ;;  %13706 = vst [vmem:[#allocation96_spill] sm:$0xff] %v10730_v20  ;;  %v10732_v38 = vor.u32 %v9292_v47, %v7440_v11  ;;  %2523 = vmatpush.bf16.msrb.mxu3 %v10727_v44  ;;  %v9289_v47 = vld [vmem:[#allocation7 + $0x1dc] sm:$0xf]  ;;  %v9344_v0 = vld [vmem:[#allocation7 + $0x394] sm:$0xf]  ;;  %v10746_v36 = vor.u32 %v9357_v16, %v7704_v17 }
 0x9ce   :  { %13708 = vst [vmem:[#allocation98_spill] sm:$0xff] %v10735_v31  ;;  %v7450_v11 = vld [vmem:[#allocation7 + $0x1f8] sm:$0xf0]  ;;  %v7666_v21 = vld [vmem:[#allocation7 + $0x3b0] sm:$0xf0]  ;;  %v10751_v33 = vor.u32 %v9284_v1, %v7408_v49  ;;  %2511 = vmatpush.bf16.msra.mxu2 %v10735_v31 }
 0x9cf   :  { %2445 = vmatpush.bf16.msrb.mxu1 %v10718_v35  ;;  %13707 = vst [vmem:[#allocation97_spill] sm:$0xff] %v10732_v38  ;;  %v10741_v35 = vor.u32 %v9232_v25, %v7218_v58  ;;  %v7672_v58 = vld [vmem:[#allocation7 + $0x398] sm:$0xf]  ;;  %v9281_v43 = vld [vmem:[#allocation7 + $0x19c] sm:$0xf]  ;;  %v10757_v17 = vor.u32 %v9344_v0, %v7666_v21 }
 0x9d0   :  { %13709 = vst [vmem:[#allocation99_spill] sm:$0xff] %v10738_v63  ;;  %v9349_v15 = vld [vmem:[#allocation7 + $0x3b4] sm:$0xf0]  ;;  %v7376_v29 = vld [vmem:[#allocation7 + $0x150] sm:$0xf] }
 0x9d1   :  { %2484 = vmatpush.bf16.msrb.mxu0 %v10724_v14  ;;  %13710 = vst [vmem:[#allocation100_spill] sm:$0xff] %v10741_v35  ;;  %v10748_v14 = vor.u32 %v9289_v47, %v7450_v11  ;;  %v9276_v25 = vld [vmem:[#allocation7 + $0x16c] sm:$0xf0]  ;;  %2524 = vmatpush.bf16.msrb.mxu3 %v10741_v35  ;;  %v9336_v49 = vld [vmem:[#allocation7 + $0x354] sm:$0xf]  ;;  %v10762_v16 = vor.u32 %v9349_v15, %v7672_v58 }
 0x9d2   :  { %13711 = vst [vmem:[#allocation101_spill] sm:$0xff] %v10743_v34  ;;  %v7634_v1 = vld [vmem:[#allocation7 + $0x370] sm:$0xf0]  ;;  %2556 = vmatpush.bf16.msrb.mxu2 %v10746_v36  ;;  %v7640_v11 = vld [vmem:[#allocation7 + $0x358] sm:$0xf] }
 0x9d3   :  { %2446 = vmatpush.bf16.msrb.mxu1 %v10730_v20  ;;  %13712 = vst [vmem:[#allocation102_spill] sm:$0xff] %v10746_v36  ;;  %v7418_v20 = vld [vmem:[#allocation7 + $0x1b8] sm:$0xf0]  ;;  %v9341_v0 = vld [vmem:[#allocation7 + $0x374] sm:$0xf0]  ;;  %2512 = vmatmul.bf16.vlgmr.msra.gmra.mxu2 %v13687_v5 }
 0x9d4   :  { %13713 = vst [vmem:[#allocation103_spill] sm:$0xff] %v10748_v14  ;;  %v10764_v47 = vor.u32 %v9281_v43, %v7418_v20  ;;  %v9273_v21 = vld [vmem:[#allocation7 + $0x15c] sm:$0xf]  ;;  %v9268_v35 = vld [vmem:[#allocation7 + $0x12c] sm:$0xf0]  ;;  %2525 = vmatmul.bf16.vlgmr.msrb.gmra.mxu3 %v13687_v5  ;;  %v10773_v20 = vor.u32 %v9336_v49, %v7634_v1  ;;  %v10777_v43 = vor.u32 %v9341_v0, %v7640_v11 }
 0x9d5   :  { %13714 = vst [vmem:[#allocation104_spill] sm:$0xff] %v10751_v33  ;;  %2485 = vmatpush.bf16.msrb.mxu0 %v10738_v63  ;;  %2569 = vmatpush.bf16.msra.mxu3 %v10748_v14  ;;  %v7344_v63 = vld [vmem:[#allocation7 + $0x110] sm:$0xf]  ;;  %v9328_v58 = vld [vmem:[#allocation7 + $0x314] sm:$0xf] }
 0x9d6   :  { %13715 = vst [vmem:[#allocation105_spill] sm:$0xff] %v10757_v17  ;;  %2447 = vmatmul.bf16.vlgmr.msrb.gmra.mxu1 %v13687_v5  ;;  %v7602_v15 = vld [vmem:[#allocation7 + $0x330] sm:$0xf0]  ;;  %2557 = vmatpush.bf16.msrb.mxu2 %v10762_v16  ;;  %v9333_v14 = vld [vmem:[#allocation7 + $0x334] sm:$0xf0] }
 0x9d7   :  { %2491 = vmatpush.bf16.msra.mxu1 %v10732_v38  ;;  %13716 = vst [vmem:[#allocation106_spill] sm:$0xff] %v10762_v16  ;;  %v10767_v38 = vor.u32 %v9276_v25, %v7376_v29  ;;  %v7608_v25 = vld [vmem:[#allocation7 + $0x318] sm:$0xf]  ;;  %v9265_v44 = vld [vmem:[#allocation7 + $0x11c] sm:$0xf]  ;;  %v10785_v36 = vor.u32 %v9328_v58, %v7602_v15 }
 0x9d8   :  { %13717 = vst [vmem:[#allocation107_spill] sm:$0xff] %v10764_v47  ;;  %2486 = vmatmul.bf16.vlgmr.msrb.gmra.mxu0 %v13687_v5  ;;  %v7312_v49 = vld [vmem:[#allocation7 + $0xd0] sm:$0xf]  ;;  %v9320_v16 = vld [vmem:[#allocation7 + $0x2d4] sm:$0xf] }
 0x9d9   :  { %2530 = vmatpush.bf16.msra.mxu0 %v10743_v34  ;;  %13718 = vst [vmem:[#allocation108_spill] sm:$0xff] %v10767_v38  ;;  %v7386_v34 = vld [vmem:[#allocation7 + $0x178] sm:$0xf0]  ;;  %2570 = vmatpush.bf16.msra.mxu3 %v10764_v47  ;;  %v9260_v1 = vld [vmem:[#allocation7 + $0xec] sm:$0xf0] }
 0x9da   :  { %13719 = vst [vmem:[#allocation109_spill] sm:$0xff] %v10773_v20  ;;  %v10779_v29 = vor.u32 %v9273_v21, %v7386_v34  ;;  %v7570_v47 = vld [vmem:[#allocation7 + $0x2f0] sm:$0xf0]  ;;  %2558 = vmatpush.bf16.msrb.mxu2 %v10777_v43  ;;  %v10789_v34 = vor.u32 %v9333_v14, %v7608_v25  ;;  %v9325_v0 = vld [vmem:[#allocation7 + $0x2f4] sm:$0xf0] }
 0x9db   :  { %2492 = vmatpush.bf16.msra.mxu1 %v10751_v33  ;;  %13720 = vst [vmem:[#allocation110_spill] sm:$0xff] %v10777_v43  ;;  %v10782_v33 = vor.u32 %v9268_v35, %v7344_v63  ;;  %v7576_v35 = vld [vmem:[#allocation7 + $0x2d8] sm:$0xf]  ;;  %v10794_v63 = vor.u32 %v9260_v1, %v7312_v49  ;;  %v9257_v21 = vld [vmem:[#allocation7 + $0xdc] sm:$0xf] }
 0x9dc   :  { %13721 = vst [vmem:[#allocation111_spill] sm:$0xff] %v10779_v29  ;;  %v7280_v58 = vld [vmem:[#allocation7 + $0x90] sm:$0xf]  ;;  %v9312_v43 = vld [vmem:[#allocation7 + $0x294] sm:$0xf]  ;;  %v10801_v14 = vor.u32 %v9325_v0, %v7576_v35 }
 0x9dd   :  { %2531 = vmatpush.bf16.msra.mxu0 %v10757_v17  ;;  %13722 = vst [vmem:[#allocation112_spill] sm:$0xff] %v10782_v33  ;;  %v7354_v17 = vld [vmem:[#allocation7 + $0x138] sm:$0xf0]  ;;  %2571 = vmatpush.bf16.msra.mxu3 %v10779_v29  ;;  %v9252_v15 = vld [vmem:[#allocation7 + $0xac] sm:$0xf0] }
 0x9de   :  { %13723 = vst [vmem:[#allocation113_spill] sm:$0xff] %v10785_v36  ;;  %v10791_v11 = vor.u32 %v9265_v44, %v7354_v17  ;;  %v7538_v29 = vld [vmem:[#allocation7 + $0x2b0] sm:$0xf0]  ;;  %2559 = vmatpush.bf16.msrb.mxu2 %v10789_v34  ;;  %v7544_v17 = vld [vmem:[#allocation7 + $0x298] sm:$0xf]  ;;  %v10806_v25 = vor.u32 %v9252_v15, %v7280_v58 }
 0x9df   :  { %2493 = vmatpush.bf16.msra.mxu1 %v10767_v38  ;;  %13724 = vst [vmem:[#allocation114_spill] sm:$0xff] %v10789_v34  ;;  %v7322_v38 = vld [vmem:[#allocation7 + $0xf8] sm:$0xf0]  ;;  %v9317_v49 = vld [vmem:[#allocation7 + $0x2b4] sm:$0xf0] }
 0x9e0   :  { %13725 = vst [vmem:[#allocation115_spill] sm:$0xff] %v10791_v11  ;;  %v10803_v44 = vor.u32 %v9257_v21, %v7322_v38  ;;  %v9249_v1 = vld [vmem:[#allocation7 + $0x9c] sm:$0xf]  ;;  %v9304_v34 = vld [vmem:[#allocation7 + $0x254] sm:$0xf]  ;;  %v10813_v38 = vor.u32 %v9317_v49, %v7544_v17 }
 0x9e1   :  { %2532 = vmatpush.bf16.msra.mxu0 %v10773_v20  ;;  %13726 = vst [vmem:[#allocation116_spill] sm:$0xff] %v10794_v63  ;;  %v10797_v20 = vor.u32 %v9320_v16, %v7570_v47  ;;  %2572 = vmatpush.bf16.msra.mxu3 %v10791_v11  ;;  %v7248_v16 = vld [vmem:[#allocation7 + $0x50] sm:$0xf]  ;;  %v7506_v11 = vld [vmem:[#allocation7 + $0x270] sm:$0xf0] }
 0x9e2   :  { %13728 = vst [vmem:[#allocation118_spill] sm:$0xff] %v10801_v14  ;;  %v9244_v47 = vld [vmem:[#allocation7 + $0x6c] sm:$0xf0]  ;;  %2560 = vmatpush.bf16.msrb.mxu2 %v10801_v14  ;;  %v7512_v0 = vld [vmem:[#allocation7 + $0x258] sm:$0xf] }
 0x9e3   :  { %2494 = vmatpush.bf16.msra.mxu1 %v10782_v33  ;;  %13727 = vst [vmem:[#allocation117_spill] sm:$0xff] %v10797_v20  ;;  %v7290_v33 = vld [vmem:[#allocation7 + $0xb8] sm:$0xf0]  ;;  %v10818_v21 = vor.u32 %v9244_v47, %v7248_v16  ;;  %v9309_v58 = vld [vmem:[#allocation7 + $0x274] sm:$0xf0] }
 0x9e4   :  { %13729 = vst [vmem:[#allocation119_spill] sm:$0xff] %v10803_v44  ;;  %v10815_v35 = vor.u32 %v9249_v1, %v7290_v33  ;;  %v9241_v15 = vld [vmem:[#allocation7 + $0x5c] sm:$0xf]  ;;  %v7448_v14 = vld [vmem:[#allocation7 + $0x1d8] sm:$0xf]  ;;  %v10825_v1 = vor.u32 %v9309_v58, %v7512_v0 }
 0x9e5   :  { %2533 = vmatpush.bf16.msra.mxu0 %v10785_v36  ;;  %13730 = vst [vmem:[#allocation120_spill] sm:$0xff] %v10806_v25  ;;  %v10809_v36 = vor.u32 %v9312_v43, %v7538_v29  ;;  %2573 = vmatpush.bf16.msra.mxu3 %v10803_v44  ;;  %v7216_v43 = vld [vmem:[#allocation7 + $0x10] sm:$0xf]  ;;  %v9293_v44 = vld [vmem:[#allocation7 + $0x1f4] sm:$0xf0] }
 0x9e6   :  { %13732 = vst [vmem:[#allocation122_spill] sm:$0xff] %v10813_v38  ;;  %v9236_v29 = vld [vmem:[#allocation7 + $0x2c] sm:$0xf0]  ;;  %v9296_v17 = vld [vmem:[#allocation7 + $0x214] sm:$0xf]  ;;  %2561 = vmatpush.bf16.msrb.mxu2 %v10813_v38 }
 0x9e7   :  { %2495 = vmatpush.bf16.msra.mxu1 %v10794_v63  ;;  %13731 = vst [vmem:[#allocation121_spill] sm:$0xff] %v10809_v36  ;;  %v7258_v63 = vld [vmem:[#allocation7 + $0x78] sm:$0xf0]  ;;  %v7474_v49 = vld [vmem:[#allocation7 + $0x230] sm:$0xf0]  ;;  %v10830_v47 = vor.u32 %v9236_v29, %v7216_v43 }
 0x9e8   :  { %13733 = vst [vmem:[#allocation123_spill] sm:$0xff] %v10815_v35  ;;  %v9353_v33 = vld [vmem:[#allocation7 + $0x3dc] sm:$0xf]  ;;  %v10827_v16 = vor.u32 %v9241_v15, %v7258_v63  ;;  %v10835_v38 = vor.u32 %v9296_v17, %v7474_v49  ;;  %v9285_v0 = vld [vmem:[#allocation7 + $0x1b4] sm:$0xf0] }
 0x9e9   :  { %2534 = vmatpush.bf16.msra.mxu0 %v10797_v20  ;;  %13734 = vst [vmem:[#allocation124_spill] sm:$0xff] %v10818_v21  ;;  %v10821_v20 = vor.u32 %v9304_v34, %v7506_v11  ;;  %2574 = vmatpush.bf16.msra.mxu3 %v10815_v35  ;;  %v7480_v34 = vld [vmem:[#allocation7 + $0x218] sm:$0xf]  ;;  %v9233_v31 = vld [vmem:[#allocation7 + $0x1c] sm:$0xf] }
 0x9ea   :  { %13736 = vst [vmem:[#allocation126_spill] sm:$0xff] %v10825_v1  ;;  %v9301_v11 = vld [vmem:[#allocation7 + $0x234] sm:$0xf0]  ;;  %v9222_v58 = vld [vmem:[#allocation6 + $0x1c4] sm:$0xf]  ;;  %2562 = vmatpush.bf16.msrb.mxu2 %v10825_v1  ;;  %v10844_v17 = vor.u32 %v9233_v31, %v7226_v40 }
 0x9eb   :  { %2496 = vmatpush.bf16.msra.mxu1 %v10806_v25  ;;  %13735 = vst [vmem:[#allocation125_spill] sm:$0xff] %v10821_v20  ;;  %v7706_v25 = vld [vmem:[#allocation7 + $0x3f8] sm:$0xf0]  ;;  %v7416_v35 = vld [vmem:[#allocation7 + $0x198] sm:$0xf]  ;;  %v10841_v15 = vor.u32 %v9301_v11, %v7480_v34 }
 0x9ec   :  { %13737 = vst [vmem:[#allocation127_spill] sm:$0xff] %v10827_v16  ;;  %v10837_v63 = vor.u32 %v9353_v33, %v7706_v25  ;;  %v7938_v43 = vld [vmem:[#allocation6 + $0x1e0] sm:$0xf0]  ;;  %v9345_v29 = vld [vmem:[#allocation7 + $0x39c] sm:$0xf]  ;;  %v10847_v49 = vor.u32 %v9285_v0, %v7416_v35 }
 0x9ed   :  { %2535 = vmatpush.bf16.msra.mxu0 %v10809_v36  ;;  %13738 = vst [vmem:[#allocation128_spill] sm:$0xff] %v10830_v47  ;;  %v10832_v36 = vor.u32 %v9293_v44, %v7448_v14  ;;  %2575 = vmatpush.bf16.msra.mxu3 %v10827_v16  ;;  %v7944_v14 = vld [vmem:[#allocation6 + $0x1c8] sm:$0xf]  ;;  %v7384_v25 = vld [vmem:[#allocation7 + $0x158] sm:$0xf] }
 0x9ee   :  { %13740 = vst [vmem:[#allocation130_spill] sm:$0xff] %v10835_v38  ;;  %v9227_v44 = vld [vmem:[#allocation6 + $0x1e4] sm:$0xf0]  ;;  %v9277_v33 = vld [vmem:[#allocation7 + $0x174] sm:$0xf0]  ;;  %2563 = vmatpush.bf16.msrb.mxu2 %v10841_v15 }
 0x9ef   :  { %2497 = vmatpush.bf16.msra.mxu1 %v10818_v21  ;;  %13739 = vst [vmem:[#allocation129_spill] sm:$0xff] %v10832_v36  ;;  %v7674_v21 = vld [vmem:[#allocation7 + $0x3b8] sm:$0xf0]  ;;  %v10852_v34 = vor.u32 %v9227_v44, %v7944_v14  ;;  %v9214_v11 = vld [vmem:[#allocation6 + $0x184] sm:$0xf] }
 0x9f0   :  { %13741 = vst [vmem:[#allocation131_spill] sm:$0xff] %v10837_v63  ;;  %v7906_v40 = vld [vmem:[#allocation6 + $0x1a0] sm:$0xf0]  ;;  %v7912_v31 = vld [vmem:[#allocation6 + $0x188] sm:$0xf] }
 0x9f1   :  { %2536 = vmatpush.bf16.msra.mxu0 %v10821_v20  ;;  %13742 = vst [vmem:[#allocation132_spill] sm:$0xff] %v10841_v15  ;;  %v10850_v20 = vor.u32 %v9222_v58, %v7938_v43  ;;  %v9337_v35 = vld [vmem:[#allocation7 + $0x35c] sm:$0xf]  ;;  %2576 = vmatpush.bf16.msra.mxu3 %v10844_v17  ;;  %v10861_v58 = vor.u32 %v9277_v33, %v7384_v25  ;;  %v7352_v43 = vld [vmem:[#allocation7 + $0x118] sm:$0xf] }
 0x9f2   :  { %13743 = vst [vmem:[#allocation133_spill] sm:$0xff] %v10844_v17  ;;  %v7642_v0 = vld [vmem:[#allocation7 + $0x378] sm:$0xf0]  ;;  %v10866_v14 = vor.u32 %v9214_v11, %v7906_v40  ;;  %v7880_v25 = vld [vmem:[#allocation6 + $0x148] sm:$0xf]  ;;  %2564 = vmatmul.bf16.vlgmr.msrb.gmra.mxu2 %v13687_v5 }
 0x9f3   :  { %2498 = vmatpush.bf16.msra.mxu1 %v10830_v47  ;;  %13744 = vst [vmem:[#allocation134_spill] sm:$0xff] %v10847_v49  ;;  %v10855_v47 = vor.u32 %v9345_v29, %v7674_v21  ;;  %v9269_v21 = vld [vmem:[#allocation7 + $0x134] sm:$0xf0]  ;;  %2928 = vmatpush.bf16.msra.mxu2 %v10850_v20  ;;  %v9206_v29 = vld [vmem:[#allocation6 + $0x144] sm:$0xf] }
 0x9f4   :  { %13745 = vst [vmem:[#allocation135_spill] sm:$0xff] %v10850_v20  ;;  %v9211_v33 = vld [vmem:[#allocation6 + $0x164] sm:$0xf0]  ;;  %2577 = vmatmul.bf16.vlgmr.msra.gmra.mxu3 %v13687_v5  ;;  %v7610_v17 = vld [vmem:[#allocation7 + $0x338] sm:$0xf0]  ;;  %v10876_v11 = vor.u32 %v9269_v21, %v7352_v43 }
 0x9f5   :  { %2537 = vmatpush.bf16.msra.mxu0 %v10835_v38  ;;  %13746 = vst [vmem:[#allocation136_spill] sm:$0xff] %v10852_v34  ;;  %2941 = vmatpush.bf16.msrb.mxu3 %v10852_v34  ;;  %v9329_v38 = vld [vmem:[#allocation7 + $0x31c] sm:$0xf]  ;;  %v9261_v40 = vld [vmem:[#allocation7 + $0xf4] sm:$0xf0] }
 0x9f6   :  { %13747 = vst [vmem:[#allocation137_spill] sm:$0xff] %v10855_v47  ;;  %2499 = vmatmul.bf16.vlgmr.msra.gmra.mxu1 %v13687_v5  ;;  %v7842_v34 = vld [vmem:[#allocation6 + $0x120] sm:$0xf0]  ;;  %v7848_v16 = vld [vmem:[#allocation6 + $0x108] sm:$0xf] }
 0x9f7   :  { %2543 = vmatpush.bf16.msrb.mxu1 %v10832_v36  ;;  %v9219_v36 = vld [vmem:[#allocation6 + $0x1a4] sm:$0xf0]  ;;  %13748 = vst [vmem:[#allocation138_spill] sm:$0xff] %v10861_v58  ;;  %2929 = vmatpush.bf16.msra.mxu2 %v10866_v14  ;;  %v9321_v43 = vld [vmem:[#allocation7 + $0x2dc] sm:$0xf] }
 0x9f8   :  { %2538 = vmatmul.bf16.vlgmr.msra.gmra.mxu0 %v13687_v5  ;;  %13749 = vst [vmem:[#allocation139_spill] sm:$0xff] %v10866_v14  ;;  %v10868_v44 = vor.u32 %v9219_v36, %v7912_v31  ;;  %v7320_v36 = vld [vmem:[#allocation7 + $0xd8] sm:$0xf]  ;;  %v7578_v21 = vld [vmem:[#allocation7 + $0x2f8] sm:$0xf0] }
 0x9f9   :  { %2582 = vmatpush.bf16.msrb.mxu0 %v10837_v63  ;;  %v10871_v63 = vor.u32 %v9337_v35, %v7642_v0  ;;  %13752 = vst [vmem:[#allocation142_spill] sm:$0xff] %v10876_v11  ;;  %v10882_v35 = vor.u32 %v9211_v33, %v7880_v25  ;;  %v9198_v0 = vld [vmem:[#allocation6 + $0x104] sm:$0xf]  ;;  %v10888_v20 = vor.u32 %v9261_v40, %v7320_v36  ;;  %v7288_v14 = vld [vmem:[#allocation7 + $0x98] sm:$0xf] }
 0x9fa   :  { %13750 = vst [vmem:[#allocation140_spill] sm:$0xff] %v10868_v44  ;;  %2942 = vmatpush.bf16.msrb.mxu3 %v10868_v44  ;;  %v9253_v44 = vld [vmem:[#allocation7 + $0xb4] sm:$0xf0]  ;;  %v7810_v25 = vld [vmem:[#allocation6 + $0xe0] sm:$0xf0] }
 0x9fb   :  { %2544 = vmatpush.bf16.msrb.mxu1 %v10847_v49  ;;  %13751 = vst [vmem:[#allocation141_spill] sm:$0xff] %v10871_v63  ;;  %v7874_v49 = vld [vmem:[#allocation6 + $0x160] sm:$0xf0]  ;;  %v7816_v33 = vld [vmem:[#allocation6 + $0xc8] sm:$0xf] }
 0x9fc   :  { %v10880_v31 = vor.u32 %v9206_v29, %v7874_v49  ;;  %13754 = vst [vmem:[#allocation144_spill] sm:$0xff] %v10882_v35  ;;  %v10892_v49 = vor.u32 %v9198_v0, %v7842_v34  ;;  %v9313_v36 = vld [vmem:[#allocation7 + $0x29c] sm:$0xf]  ;;  %v9179_v15 = vld [vmem:[#allocation6 + $0x64] sm:$0xf0] }
 0x9fd   :  { %2583 = vmatpush.bf16.msrb.mxu0 %v10855_v47  ;;  %v10885_v47 = vor.u32 %v9329_v38, %v7610_v17  ;;  %13756 = vst [vmem:[#allocation146_spill] sm:$0xff] %v10888_v20  ;;  %v9190_v38 = vld [vmem:[#allocation6 + $0xc4] sm:$0xf]  ;;  %v10897_v17 = vor.u32 %v9321_v43, %v7578_v21  ;;  %v7546_v40 = vld [vmem:[#allocation7 + $0x2b8] sm:$0xf0] }
 0x9fe   :  { %13753 = vst [vmem:[#allocation143_spill] sm:$0xff] %v10880_v31  ;;  %2930 = vmatpush.bf16.msra.mxu2 %v10880_v31  ;;  %2943 = vmatpush.bf16.msrb.mxu3 %v10882_v35  ;;  %v7256_v31 = vld [vmem:[#allocation7 + $0x58] sm:$0xf]  ;;  %v10909_v0 = vor.u32 %v9313_v36, %v7546_v40  ;;  %v7778_v43 = vld [vmem:[#allocation6 + $0xa0] sm:$0xf0] }
 0x9ff   :  { %2545 = vmatpush.bf16.msrb.mxu1 %v10861_v58  ;;  %13755 = vst [vmem:[#allocation145_spill] sm:$0xff] %v10885_v47  ;;  %v9203_v58 = vld [vmem:[#allocation6 + $0x124] sm:$0xf0]  ;;  %v9245_v35 = vld [vmem:[#allocation7 + $0x74] sm:$0xf0] }
 0xa00   :  { %13757 = vst [vmem:[#allocation147_spill] sm:$0xff] %v10892_v49  ;;  %v10894_v29 = vor.u32 %v9203_v58, %v7848_v16  ;;  %v10904_v16 = vor.u32 %v9190_v38, %v7810_v25  ;;  %v9182_v58 = vld [vmem:[#allocation6 + $0x84] sm:$0xf]  ;;  %v7784_v21 = vld [vmem:[#allocation6 + $0x88] sm:$0xf] }
 0xa01   :  { %2584 = vmatpush.bf16.msrb.mxu0 %v10871_v63  ;;  %13759 = vst [vmem:[#allocation149_spill] sm:$0xff] %v10897_v17  ;;  %v10900_v63 = vor.u32 %v9253_v44, %v7288_v14  ;;  %v9305_v14 = vld [vmem:[#allocation7 + $0x25c] sm:$0xf]  ;;  %v7936_v25 = vld [vmem:[#allocation6 + $0x1c0] sm:$0xf] }
 0xa02   :  { %13758 = vst [vmem:[#allocation148_spill] sm:$0xff] %v10894_v29  ;;  %2931 = vmatpush.bf16.msra.mxu2 %v10892_v49  ;;  %2944 = vmatpush.bf16.msrb.mxu3 %v10894_v29  ;;  %v7514_v44 = vld [vmem:[#allocation7 + $0x278] sm:$0xf0]  ;;  %v7224_v49 = vld [vmem:[#allocation7 + $0x18] sm:$0xf] }
 0xa03   :  { %2546 = vmatpush.bf16.msrb.mxu1 %v10876_v11  ;;  %v9195_v11 = vld [vmem:[#allocation6 + $0xe4] sm:$0xf0]  ;;  %13760 = vst [vmem:[#allocation150_spill] sm:$0xff] %v10900_v63  ;;  %v9237_v29 = vld [vmem:[#allocation7 + $0x34] sm:$0xf0]  ;;  %v10921_v36 = vor.u32 %v9305_v14, %v7514_v44 }
 0xa04   :  { %13761 = vst [vmem:[#allocation151_spill] sm:$0xff] %v10904_v16  ;;  %v10906_v34 = vor.u32 %v9195_v11, %v7816_v33  ;;  %v9297_v38 = vld [vmem:[#allocation7 + $0x21c] sm:$0xf]  ;;  %v10916_v11 = vor.u32 %v9182_v58, %v7778_v43  ;;  %v9226_v40 = vld [vmem:[#allocation6 + $0x1dc] sm:$0xf0]  ;;  %v10924_v1 = vor.u32 %v9237_v29, %v7224_v49 }
 0xa05   :  { %2585 = vmatpush.bf16.msrb.mxu0 %v10885_v47  ;;  %13763 = vst [vmem:[#allocation153_spill] sm:$0xff] %v10909_v0  ;;  %v10912_v47 = vor.u32 %v9245_v35, %v7256_v31  ;;  %v7746_v31 = vld [vmem:[#allocation6 + $0x60] sm:$0xf0]  ;;  %v7482_v35 = vld [vmem:[#allocation7 + $0x238] sm:$0xf0]  ;;  %v10926_v58 = vor.u32 %v9226_v40, %v7936_v25 }
 0xa06   :  { %13762 = vst [vmem:[#allocation152_spill] sm:$0xff] %v10906_v34  ;;  %2932 = vmatpush.bf16.msra.mxu2 %v10904_v16  ;;  %2945 = vmatpush.bf16.msrb.mxu3 %v10906_v34  ;;  %v9223_v16 = vld [vmem:[#allocation6 + $0x1cc] sm:$0xf]  ;;  %v9218_v14 = vld [vmem:[#allocation6 + $0x19c] sm:$0xf0] }
 0xa07   :  { %2547 = vmatpush.bf16.msrb.mxu1 %v10888_v20  ;;  %v9187_v20 = vld [vmem:[#allocation6 + $0xa4] sm:$0xf0]  ;;  %13764 = vst [vmem:[#allocation154_spill] sm:$0xff] %v10912_v47  ;;  %v7946_v34 = vld [vmem:[#allocation6 + $0x1e8] sm:$0xf0] }
 0xa08   :  { %13765 = vst [vmem:[#allocation155_spill] sm:$0xff] %v10916_v11  ;;  %v10918_v33 = vor.u32 %v9187_v20, %v7784_v21  ;;  %v7904_v20 = vld [vmem:[#allocation6 + $0x180] sm:$0xf]  ;;  %v10933_v21 = vor.u32 %v9297_v38, %v7482_v35  ;;  %v9215_v44 = vld [vmem:[#allocation6 + $0x18c] sm:$0xf]  ;;  %v10937_v29 = vor.u32 %v9223_v16, %v7946_v34 }
 0xa09   :  { %2586 = vmatpush.bf16.msrb.mxu0 %v10897_v17  ;;  %13767 = vst [vmem:[#allocation157_spill] sm:$0xff] %v10921_v36  ;;  %v7752_v17 = vld [vmem:[#allocation6 + $0x48] sm:$0xf]  ;;  %v9166_v49 = vld [vmem:[#allocation6 + $0x4] sm:$0xf] }
 0xa0a   :  { %13766 = vst [vmem:[#allocation156_spill] sm:$0xff] %v10918_v33  ;;  %2933 = vmatpush.bf16.msra.mxu2 %v10916_v11  ;;  %2946 = vmatpush.bf16.msrb.mxu3 %v10918_v33  ;;  %v7714_v25 = vld [vmem:[#allocation6 + $0x20] sm:$0xf0]  ;;  %v7720_v40 = vld [vmem:[#allocation6 + $0x8] sm:$0xf] }
 0xa0b   :  { %2548 = vmatpush.bf16.msrb.mxu1 %v10900_v63  ;;  %v9174_v63 = vld [vmem:[#allocation6 + $0x44] sm:$0xf]  ;;  %13768 = vst [vmem:[#allocation158_spill] sm:$0xff] %v10924_v1  ;;  %v7914_v11 = vld [vmem:[#allocation6 + $0x1a8] sm:$0xf0]  ;;  %v10946_v34 = vor.u32 %v9166_v49, %v7714_v25 }
 0xa0c   :  { %13769 = vst [vmem:[#allocation159_spill] sm:$0xff] %v10926_v58  ;;  %v10930_v43 = vor.u32 %v9174_v63, %v7746_v31  ;;  %v9224_v33 = vld [vmem:[#allocation6 + $0x1d4] sm:$0xf]  ;;  %v10941_v31 = vor.u32 %v9218_v14, %v7904_v20  ;;  %v7960_v38 = vld [vmem:[#allocation6 + $0x1d8] sm:$0xf] }
 0xa0d   :  { %2587 = vmatpush.bf16.msrb.mxu0 %v10909_v0  ;;  %13771 = vst [vmem:[#allocation161_spill] sm:$0xff] %v10933_v21  ;;  %v9171_v0 = vld [vmem:[#allocation6 + $0x24] sm:$0xf0]  ;;  %v7954_v63 = vld [vmem:[#allocation6 + $0x1f0] sm:$0xf0] }
 0xa0e   :  { %13770 = vst [vmem:[#allocation160_spill] sm:$0xff] %v10930_v43  ;;  %2934 = vmatpush.bf16.msra.mxu2 %v10930_v43  ;;  %v9210_v16 = vld [vmem:[#allocation6 + $0x15c] sm:$0xf0]  ;;  %v10948_v35 = vor.u32 %v9171_v0, %v7720_v40  ;;  %v9207_v20 = vld [vmem:[#allocation6 + $0x14c] sm:$0xf]  ;;  %v10954_v14 = vor.u32 %v9224_v33, %v7954_v63 }
 0xa0f   :  { %2549 = vmatpush.bf16.msrb.mxu1 %v10912_v47  ;;  %v10935_v47 = vor.u32 %v9179_v15, %v7752_v17  ;;  %13773 = vst [vmem:[#allocation163_spill] sm:$0xff] %v10937_v29  ;;  %v9229_v15 = vld [vmem:[#allocation6 + $0x1f4] sm:$0xf0]  ;;  %v7872_v17 = vld [vmem:[#allocation6 + $0x140] sm:$0xf] }
 0xa10   :  { %13774 = vst [vmem:[#allocation164_spill] sm:$0xff] %v10941_v31  ;;  %v7922_v43 = vld [vmem:[#allocation6 + $0x1b0] sm:$0xf0]  ;;  %v10959_v49 = vor.u32 %v9210_v16, %v7872_v17  ;;  %v7928_v0 = vld [vmem:[#allocation6 + $0x198] sm:$0xf] }
 0xa11   :  { %2588 = vmatpush.bf16.msrb.mxu0 %v10921_v36  ;;  %13772 = vst [vmem:[#allocation162_spill] sm:$0xff] %v10935_v47  ;;  %2947 = vmatpush.bf16.msrb.mxu3 %v10935_v47  ;;  %v10956_v36 = vor.u32 %v9229_v15, %v7960_v38  ;;  %v9221_v25 = vld [vmem:[#allocation6 + $0x1b4] sm:$0xf0]  ;;  %v9199_v40 = vld [vmem:[#allocation6 + $0x10c] sm:$0xf] }
 0xa12   :  { %13775 = vst [vmem:[#allocation165_spill] sm:$0xff] %v10946_v34  ;;  %2935 = vmatpush.bf16.msra.mxu2 %v10946_v34  ;;  %v7850_v38 = vld [vmem:[#allocation6 + $0x128] sm:$0xf0]  ;;  %v9208_v15 = vld [vmem:[#allocation6 + $0x154] sm:$0xf] }
 0xa13   :  { %2550 = vmatpush.bf16.msrb.mxu1 %v10924_v1  ;;  %13776 = vst [vmem:[#allocation166_spill] sm:$0xff] %v10948_v35  ;;  %v10951_v1 = vor.u32 %v9215_v44, %v7914_v11  ;;  %v7840_v11 = vld [vmem:[#allocation6 + $0x100] sm:$0xf]  ;;  %v7890_v17 = vld [vmem:[#allocation6 + $0x170] sm:$0xf0] }
 0xa14   :  { %13778 = vst [vmem:[#allocation168_spill] sm:$0xff] %v10954_v14  ;;  %v9202_v44 = vld [vmem:[#allocation6 + $0x11c] sm:$0xf0] }
 0xa15   :  { %2589 = vmatpush.bf16.msrb.mxu0 %v10933_v21  ;;  %13777 = vst [vmem:[#allocation167_spill] sm:$0xff] %v10951_v1  ;;  %v9216_v21 = vld [vmem:[#allocation6 + $0x194] sm:$0xf]  ;;  %2948 = vmatpush.bf16.msrb.mxu3 %v10948_v35  ;;  %v10974_v16 = vor.u32 %v9202_v44, %v7840_v11 }
 0xa16   :  { %2551 = vmatmul.bf16.vlgmr.msrb.gmra.mxu1 %v13687_v5  ;;  %13779 = vst [vmem:[#allocation169_spill] sm:$0xff] %v10956_v36  ;;  %2980 = vmatpush.bf16.msrb.mxu2 %v10954_v14  ;;  %v10968_v63 = vor.u32 %v9216_v21, %v7922_v43  ;;  %v9191_v43 = vld [vmem:[#allocation6 + $0xcc] sm:$0xf]  ;;  %v10980_v21 = vor.u32 %v9208_v15, %v7890_v17  ;;  %v9200_v11 = vld [vmem:[#allocation6 + $0x114] sm:$0xf] }
 0xa17   :  { %2915 = vmatpush.bf16.msra.mxu1 %v10926_v58  ;;  %v7882_v58 = vld [vmem:[#allocation6 + $0x168] sm:$0xf0]  ;;  %13780 = vst [vmem:[#allocation170_spill] sm:$0xff] %v10959_v49  ;;  %v7858_v44 = vld [vmem:[#allocation6 + $0x130] sm:$0xf0] }
 0xa18   :  { %2590 = vmatmul.bf16.vlgmr.msrb.gmra.mxu0 %v13687_v5  ;;  %v10965_v33 = vor.u32 %v9207_v20, %v7882_v58  ;;  %13782 = vst [vmem:[#allocation172_spill] sm:$0xff] %v10968_v63  ;;  %v10971_v5 = vor.u32 %v9221_v25, %v7928_v0  ;;  %v7808_v58 = vld [vmem:[#allocation6 + $0xc0] sm:$0xf]  ;;  %v7818_v0 = vld [vmem:[#allocation6 + $0xe8] sm:$0xf0]  ;;  %v10992_v17 = vor.u32 %v9200_v11, %v7858_v44 }
 0xa19   :  { %2954 = vmatpush.bf16.msra.mxu0 %v10937_v29  ;;  %2993 = vmatpush.bf16.msra.mxu3 %v10956_v36  ;;  %13784 = vst [vmem:[#allocation174_spill] sm:$0xff] %v10974_v16  ;;  %v9194_v20 = vld [vmem:[#allocation6 + $0xdc] sm:$0xf0]  ;;  %v10977_v29 = vor.u32 %v9199_v40, %v7850_v38  ;;  %v7864_v36 = vld [vmem:[#allocation6 + $0x118] sm:$0xf]  ;;  %v10989_v35 = vor.u32 %v9191_v43, %v7818_v0 }
 0xa1a   :  { %13781 = vst [vmem:[#allocation171_spill] sm:$0xff] %v10965_v33  ;;  %2981 = vmatpush.bf16.msrb.mxu2 %v10968_v63  ;;  %v7776_v40 = vld [vmem:[#allocation6 + $0x80] sm:$0xf]  ;;  %v9183_v15 = vld [vmem:[#allocation6 + $0x8c] sm:$0xf] }
 0xa1b   :  { %2916 = vmatpush.bf16.msra.mxu1 %v10941_v31  ;;  %13783 = vst [vmem:[#allocation173_spill] sm:$0xff] %v10971_v5  ;;  %v7896_v31 = vld [vmem:[#allocation6 + $0x158] sm:$0xf]  ;;  %v9186_v38 = vld [vmem:[#allocation6 + $0x9c] sm:$0xf0] }
 0xa1c   :  { %13785 = vst [vmem:[#allocation175_spill] sm:$0xff] %v10977_v29  ;;  %v7744_v43 = vld [vmem:[#allocation6 + $0x40] sm:$0xf]  ;;  %v9175_v11 = vld [vmem:[#allocation6 + $0x4c] sm:$0xf] }
 0xa1d   :  { %2955 = vmatpush.bf16.msra.mxu0 %v10951_v1  ;;  %v9213_v1 = vld [vmem:[#allocation6 + $0x174] sm:$0xf0]  ;;  %13786 = vst [vmem:[#allocation176_spill] sm:$0xff] %v10980_v21  ;;  %2994 = vmatpush.bf16.msra.mxu3 %v10971_v5  ;;  %v9178_v0 = vld [vmem:[#allocation6 + $0x5c] sm:$0xf0] }
 0xa1e   :  { %v10983_v25 = vor.u32 %v9213_v1, %v7896_v31  ;;  %13789 = vst [vmem:[#allocation179_spill] sm:$0xff] %v10989_v35  ;;  %2982 = vmatpush.bf16.msrb.mxu2 %v10980_v21  ;;  %v7786_v1 = vld [vmem:[#allocation6 + $0xa8] sm:$0xf0]  ;;  %v7832_v5 = vld [vmem:[#allocation6 + $0xd8] sm:$0xf] }
 0xa1f   :  { %2917 = vmatpush.bf16.msra.mxu1 %v10959_v49  ;;  %v10986_v49 = vor.u32 %v9194_v20, %v7808_v58  ;;  %13790 = vst [vmem:[#allocation180_spill] sm:$0xff] %v10992_v17  ;;  %v9192_v58 = vld [vmem:[#allocation6 + $0xd4] sm:$0xf]  ;;  %v11001_v47 = vor.u32 %v9183_v15, %v7786_v1  ;;  %v7712_v15 = vld [vmem:[#allocation6] sm:$0xf] }
 0xa20   :  { %13787 = vst [vmem:[#allocation177_spill] sm:$0xff] %v10983_v25  ;;  %v7826_v20 = vld [vmem:[#allocation6 + $0xf0] sm:$0xf0]  ;;  %v9170_v1 = vld [vmem:[#allocation6 + $0x1c] sm:$0xf0] }
 0xa21   :  { %2956 = vmatpush.bf16.msra.mxu0 %v10965_v33  ;;  %13788 = vst [vmem:[#allocation178_spill] sm:$0xff] %v10986_v49  ;;  %v9205_v33 = vld [vmem:[#allocation6 + $0x134] sm:$0xf0]  ;;  %2995 = vmatpush.bf16.msra.mxu3 %v10983_v25  ;;  %v11004_v44 = vor.u32 %v9192_v58, %v7826_v20  ;;  %v9167_v21 = vld [vmem:[#allocation6 + $0xc] sm:$0xf]  ;;  %v11022_v63 = vor.u32 %v9170_v1, %v7712_v15 }
 0xa22   :  { %v10995_v31 = vor.u32 %v9205_v33, %v7864_v36  ;;  %13793 = vst [vmem:[#allocation183_spill] sm:$0xff] %v11001_v47  ;;  %2983 = vmatpush.bf16.msrb.mxu2 %v10992_v17  ;;  %v7754_v36 = vld [vmem:[#allocation6 + $0x68] sm:$0xf0]  ;;  %v7800_v25 = vld [vmem:[#allocation6 + $0x98] sm:$0xf] }
 0xa23   :  { %2918 = vmatpush.bf16.msra.mxu1 %v10974_v16  ;;  %v10998_v16 = vor.u32 %v9186_v38, %v7776_v40  ;;  %13794 = vst [vmem:[#allocation184_spill] sm:$0xff] %v11004_v44  ;;  %v9184_v40 = vld [vmem:[#allocation6 + $0x94] sm:$0xf]  ;;  %v11013_v58 = vor.u32 %v9175_v11, %v7754_v36  ;;  %v7722_v20 = vld [vmem:[#allocation6 + $0x28] sm:$0xf0] }
 0xa24   :  { %13791 = vst [vmem:[#allocation181_spill] sm:$0xff] %v10995_v31  ;;  %v7794_v38 = vld [vmem:[#allocation6 + $0xb0] sm:$0xf0]  ;;  %v7952_v17 = vld [vmem:[#allocation6 + $0x1d0] sm:$0xf] }
 0xa25   :  { %2957 = vmatpush.bf16.msra.mxu0 %v10977_v29  ;;  %13792 = vst [vmem:[#allocation182_spill] sm:$0xff] %v10998_v16  ;;  %v9197_v29 = vld [vmem:[#allocation6 + $0xf4] sm:$0xf0]  ;;  %2996 = vmatpush.bf16.msra.mxu3 %v10995_v31  ;;  %v9228_v31 = vld [vmem:[#allocation6 + $0x1ec] sm:$0xf0] }
 0xa26   :  { %v11007_v33 = vor.u32 %v9197_v29, %v7832_v5  ;;  %13797 = vst [vmem:[#allocation187_spill] sm:$0xff] %v11013_v58  ;;  %2984 = vmatpush.bf16.msrb.mxu2 %v11004_v44  ;;  %v11016_v29 = vor.u32 %v9184_v40, %v7794_v38  ;;  %v9225_v5 = vld [vmem:[#allocation6 + $0x1dc] sm:$0xf]  ;;  %v7768_v36 = vld [vmem:[#allocation6 + $0x58] sm:$0xf]  ;;  %v11024_v14 = vor.u32 %v9228_v31, %v7952_v17 }
 0xa27   :  { %2919 = vmatpush.bf16.msra.mxu1 %v10986_v49  ;;  %v11010_v49 = vor.u32 %v9178_v0, %v7744_v43  ;;  %v9176_v0 = vld [vmem:[#allocation6 + $0x54] sm:$0xf]  ;;  %13800 = vst [vmem:[#allocation190_spill] sm:$0xff] %v11022_v63  ;;  %v7962_v11 = vld [vmem:[#allocation6 + $0x1f8] sm:$0xf0]  ;;  %v11027_v40 = vor.u32 %v9167_v21, %v7722_v20 }
 0xa28   :  { %13795 = vst [vmem:[#allocation185_spill] sm:$0xff] %v11007_v33  ;;  %v7920_v38 = vld [vmem:[#allocation6 + $0x190] sm:$0xf]  ;;  %v9168_v1 = vld [vmem:[#allocation6 + $0x14] sm:$0xf] }
 0xa29   :  { %2958 = vmatpush.bf16.msra.mxu0 %v10989_v35  ;;  %13796 = vst [vmem:[#allocation186_spill] sm:$0xff] %v11010_v49  ;;  %v9189_v35 = vld [vmem:[#allocation6 + $0xb4] sm:$0xf0]  ;;  %2997 = vmatpush.bf16.msra.mxu3 %v11007_v33  ;;  %v9220_v44 = vld [vmem:[#allocation6 + $0x1ac] sm:$0xf0] }
 0xa2a   :  { %13798 = vst [vmem:[#allocation188_spill] sm:$0xff] %v11016_v29  ;;  %v11019_v43 = vor.u32 %v9189_v35, %v7800_v25  ;;  %2985 = vmatpush.bf16.msrb.mxu2 %v11016_v29  ;;  %v11032_v25 = vor.u32 %v9225_v5, %v7962_v11  ;;  %v7730_v17 = vld [vmem:[#allocation6 + $0x30] sm:$0xf0]  ;;  %v7930_v31 = vld [vmem:[#allocation6 + $0x1b8] sm:$0xf0] }
 0xa2b   :  { %2920 = vmatpush.bf16.msra.mxu1 %v10998_v16  ;;  %v7762_v16 = vld [vmem:[#allocation6 + $0x70] sm:$0xf0]  ;;  %13801 = vst [vmem:[#allocation191_spill] sm:$0xff] %v11024_v14  ;;  %v7736_v21 = vld [vmem:[#allocation6 + $0x18] sm:$0xf] }
 0xa2c   :  { %13799 = vst [vmem:[#allocation189_spill] sm:$0xff] %v11019_v43  ;;  %v11030_v35 = vor.u32 %v9176_v0, %v7762_v16  ;;  %v9173_v20 = vld [vmem:[#allocation6 + $0x34] sm:$0xf0]  ;;  %v7888_v16 = vld [vmem:[#allocation6 + $0x150] sm:$0xf]  ;;  %v11043_v0 = vor.u32 %v9168_v1, %v7730_v17 }
 0xa2d   :  { %2959 = vmatpush.bf16.msra.mxu0 %v11001_v47  ;;  %v9181_v47 = vld [vmem:[#allocation6 + $0x74] sm:$0xf0]  ;;  %13802 = vst [vmem:[#allocation192_spill] sm:$0xff] %v11027_v40  ;;  %2998 = vmatpush.bf16.msra.mxu3 %v11019_v43  ;;  %v9212_v5 = vld [vmem:[#allocation6 + $0x16c] sm:$0xf0]  ;;  %v11049_v11 = vor.u32 %v9173_v20, %v7736_v21 }
 0xa2e   :  { %13803 = vst [vmem:[#allocation193_spill] sm:$0xff] %v11030_v35  ;;  %v11035_v15 = vor.u32 %v9181_v47, %v7768_v36  ;;  %2986 = vmatpush.bf16.msrb.mxu2 %v11030_v35  ;;  %v9209_v36 = vld [vmem:[#allocation6 + $0x15c] sm:$0xf]  ;;  %v9204_v1 = vld [vmem:[#allocation6 + $0x12c] sm:$0xf0] }
 0xa2f   :  { %2921 = vmatpush.bf16.msra.mxu1 %v11010_v49  ;;  %13804 = vst [vmem:[#allocation194_spill] sm:$0xff] %v11032_v25  ;;  %v9217_v49 = vld [vmem:[#allocation6 + $0x19c] sm:$0xf] }
 0xa30   :  { %13805 = vst [vmem:[#allocation195_spill] sm:$0xff] %v11035_v15  ;;  %v11046_v47 = vor.u32 %v9217_v49, %v7930_v31  ;;  %v9201_v17 = vld [vmem:[#allocation6 + $0x11c] sm:$0xf] }
 0xa31   :  { %2960 = vmatpush.bf16.msra.mxu0 %v11013_v58  ;;  %v11039_v58 = vor.u32 %v9220_v44, %v7920_v38  ;;  %13807 = vst [vmem:[#allocation197_spill] sm:$0xff] %v11043_v0  ;;  %2999 = vmatpush.bf16.msra.mxu3 %v11035_v15  ;;  %v11052_v44 = vor.u32 %v9212_v5, %v7888_v16  ;;  %v11054_v38 = vpop.f32.mrf.mxu3  ;;  %v7866_v31 = vld [vmem:[#allocation6 + $0x138] sm:$0xf0] }
 0xa32   :  { %13808 = vst [vmem:[#allocation198_spill] sm:$0xff] %v11046_v47  ;;  %2987 = vmatpush.bf16.msrb.mxu2 %v11043_v0  ;;  %v7834_v15 = vld [vmem:[#allocation6 + $0xf8] sm:$0xf0]  ;;  %v9474_v0 = vld [vmem:[#allocation9 + $0x39c] sm:$0xf0] }
 0xa33   :  { %2922 = vmatpush.bf16.msra.mxu1 %v11022_v63  ;;  %13806 = vst [vmem:[#allocation196_spill] sm:$0xff] %v11039_v58  ;;  %v2409_v63 = vpop.f32.mrf.mxu2  ;;  %v1647_v21 = vpop.f32.mrf.mxu1 }
 0xa34   :  { %13809 = vst [vmem:[#allocation199_spill] sm:$0xff] %v11049_v11  ;;  %v1651_v16 = vadd.f32 %v1647_v21, %v10448_v37 }
 0xa35   :  { %2961 = vmatpush.bf16.msra.mxu0 %v11027_v40  ;;  %13810 = vst [vmem:[#allocation200_spill] sm:$0xff] %v11052_v44  ;;  %v7856_v40 = vld [vmem:[#allocation6 + $0x110] sm:$0xf]  ;;  %3000 = vmatpush.bf16.msra.mxu3 %v11049_v11  ;;  %v1741_v5 = vpop.f32.mrf.mxu0 }
 0xa36   :  { %v11062_v20 = vor.u32 %v9204_v1, %v7856_v40  ;;  %v7792_v40 = vld [vmem:[#allocation6 + $0x90] sm:$0xf] }
 0xa37   :  { %2967 = vmatpush.bf16.msrb.mxu1 %v11024_v14  ;;  %v7898_v14 = vld [vmem:[#allocation6 + $0x178] sm:$0xf0]  ;;  %v9188_v1 = vld [vmem:[#allocation6 + $0xac] sm:$0xf0] }
 0xa38   :  { %v11058_v49 = vor.u32 %v9209_v36, %v7898_v14  ;;  %13812 = vst [vmem:[#allocation202_spill] sm:$0xff] %v11062_v20  ;;  %v1745_v14 = vadd.f32 %v1741_v5, %v1651_v16  ;;  %v9193_v36 = vld [vmem:[#allocation6 + $0xdc] sm:$0xf] }
 0xa39   :  { %3006 = vmatpush.bf16.msrb.mxu0 %v11032_v25  ;;  %v7824_v25 = vld [vmem:[#allocation6 + $0xd0] sm:$0xf]  ;;  %v2424_v11 = vpop.f32.mrf.mxu3  ;;  %v11072_v37 = vor.u32 %v9193_v36, %v7834_v15  ;;  %v9177_v16 = vld [vmem:[#allocation6 + $0x5c] sm:$0xf] }
 0xa3a   :  { %13811 = vst [vmem:[#allocation201_spill] sm:$0xff] %v11058_v49  ;;  %v1746_v33 = vpack.c.bf16 %v1745_v14, %v1745_v14  ;;  %v11075_v11 = vor.u32 %v9188_v1, %v7792_v40  ;;  %v7760_v15 = vld [vmem:[#allocation6 + $0x50] sm:$0xf]  ;;  %v7770_v5 = vld [vmem:[#allocation6 + $0x78] sm:$0xf0] }
 0xa3b   :  { %2968 = vmatpush.bf16.msrb.mxu1 %v11039_v58  ;;  %v11066_v58 = vor.u32 %v9201_v17, %v7866_v31  ;;  %v2411_v43 = vpop.f32.mrf.mxu2  ;;  %13815 = vst [vmem:[#allocation205_spill] sm:$0xff] %v11072_v37  ;;  %v9185_v17 = vld [vmem:[#allocation6 + $0x9c] sm:$0xf]  ;;  %v1649_v21 = vpop.f32.mrf.mxu1  ;;  %v7728_v40 = vld [vmem:[#allocation6 + $0x10] sm:$0xf] }
 0xa3c   :  { %2923 = vmatmul.bf16.vlgmr.msra.gmra.mxu1 %v1746_v33  ;;  %2936 = vmatmul.bf16.vlgmr.msra.gmra.mxu2 %v1746_v33  ;;  %v7802_v31 = vld [vmem:[#allocation6 + $0xb8] sm:$0xf0]  ;;  %13816 = vst [vmem:[#allocation206_spill] sm:$0xff] %v11075_v11  ;;  %v11084_v21 = vor.u32 %v9177_v16, %v7770_v5  ;;  %v9172_v1 = vld [vmem:[#allocation6 + $0x2c] sm:$0xf0] }
 0xa3d   :  { %3007 = vmatpush.bf16.msrb.mxu0 %v11046_v47  ;;  %13813 = vst [vmem:[#allocation203_spill] sm:$0xff] %v11066_v58  ;;  %v9196_v47 = vld [vmem:[#allocation6 + $0xec] sm:$0xf0]  ;;  %2949 = vmatmul.bf16.vlgmr.msrb.gmra.mxu3 %v1746_v33  ;;  %v1743_v43 = vpop.f32.mrf.mxu0 }
 0xa3e   :  { %2962 = vmatmul.bf16.vlgmr.msra.gmra.mxu0 %v1746_v33  ;;  %13819 = vst [vmem:[#allocation209_spill] sm:$0xff] %v11084_v21  ;;  %v7738_v43 = vld [vmem:[#allocation6 + $0x38] sm:$0xf0] }
 0xa3f   :  { %2969 = vmatpush.bf16.msrb.mxu1 %v11052_v44  ;;  %v11069_v44 = vor.u32 %v9196_v47, %v7824_v25  ;;  %v11078_v25 = vor.u32 %v9185_v17, %v7802_v31  ;;  %v9180_v47 = vld [vmem:[#allocation6 + $0x6c] sm:$0xf0]  ;;  %v11087_v31 = vor.u32 %v9172_v1, %v7728_v40 }
 0xa40   :  { %v11081_v36 = vor.u32 %v9180_v47, %v7760_v15 }
 0xa41   :  { %3008 = vmatpush.bf16.msrb.mxu0 %v11058_v49  ;;  %13814 = vst [vmem:[#allocation204_spill] sm:$0xff] %v11069_v44  ;;  %v2474_v14 = vpop.f32.mrf.mxu3 }
 0xa42   :  { %13817 = vst [vmem:[#allocation207_spill] sm:$0xff] %v11078_v25 }
 0xa43   :  { %2970 = vmatpush.bf16.msrb.mxu1 %v11062_v20  ;;  %13818 = vst [vmem:[#allocation208_spill] sm:$0xff] %v11081_v36  ;;  %v2396_v17 = vpop.f32.mrf.mxu1 }
 0xa44   :  { %13820 = vst [vmem:[#allocation210_spill] sm:$0xff] %v11087_v31  ;;  %v11089_v20 = vadd.f32 %v2409_v63, %v2396_v17 }
 0xa45   :  { %3009 = vmatpush.bf16.msrb.mxu0 %v11066_v58  ;;  %v2435_v47 = vpop.f32.mrf.mxu0 }
 0xa46   :  { %v11095_v16 = vadd.f32 %v2435_v47, %v11054_v38 }
 0xa47   :  { %2971 = vmatpush.bf16.msrb.mxu1 %v11069_v44  ;;  %v2461_v44 = vpop.f32.mrf.mxu2 }
 0xa49   :  { %3010 = vmatpush.bf16.msrb.mxu0 %v11072_v37  ;;  %v9169_v37 = vld [vmem:[#allocation6 + $0x1c] sm:$0xf]  ;;  %v2476_v5 = vpop.f32.mrf.mxu3 }
 0xa4a   :  { %v11092_v15 = vor.u32 %v9169_v37, %v7738_v43 }
 0xa4b   :  { %2972 = vmatpush.bf16.msrb.mxu1 %v11075_v11  ;;  %v2398_v40 = vpop.f32.mrf.mxu1 }
 0xa4c   :  { %13821 = vst [vmem:[#allocation211_spill] sm:$0xff] %v11092_v15  ;;  %2988 = vmatmul.bf16.vlgmr.msrb.gmra.mxu2 %v1746_v33  ;;  %v9546_v40 = vld [vmem:[#allocation9 + $0x5dc] sm:$0xf0] }
 0xa4d   :  { %3011 = vmatpush.bf16.msrb.mxu0 %v11078_v25  ;;  %3001 = vmatmul.bf16.vlgmr.msra.gmra.mxu3 %v1746_v33  ;;  %v2437_v63 = vpop.f32.mrf.mxu0 }
 0xa4e   :  { %v8678_v63 = vld [vmem:[#allocation9 + $0x580] sm:$0xf] }
 0xa4f   :  { %2973 = vmatpush.bf16.msrb.mxu1 %v11081_v36  ;;  %v2463_v11 = vpop.f32.mrf.mxu2 }
 0xa51   :  { %3012 = vmatpush.bf16.msrb.mxu0 %v11084_v21 }
 0xa53   :  { %2974 = vmatpush.bf16.msrb.mxu1 %v11087_v31  ;;  %v2448_v1 = vpop.f32.mrf.mxu1 }
 0xa54   :  { %v11099_v17 = vadd.f32 %v2461_v44, %v2448_v1  ;;  %v9538_v1 = vld [vmem:[#allocation9 + $0x59c] sm:$0xf0] }
 0xa55   :  { %3013 = vmatpush.bf16.msrb.mxu0 %v11092_v15  ;;  %v2487_v37 = vpop.f32.mrf.mxu0 }
 0xa56   :  { %2975 = vmatmul.bf16.vlgmr.msrb.gmra.mxu1 %v1746_v33  ;;  %v11101_v43 = vadd.f32 %v2487_v37, %v2474_v14  ;;  %v8454_v14 = vld [vmem:[#allocation9 + $0x3c0] sm:$0xf] }
 0xa57   :  { %v2526_v47 = vpop.f32.mrf.mxu3  ;;  %v2513_v5 = vpop.f32.mrf.mxu2  ;;  %v9482_v37 = vld [vmem:[#allocation9 + $0x3dc] sm:$0xf0] }
 0xa58   :  { %3014 = vmatmul.bf16.vlgmr.msrb.gmra.mxu0 %v1746_v33  ;;  %v8710_v33 = vld [vmem:[#allocation9 + $0x5c0] sm:$0xf]  ;;  %v11109_v49 = vor.u32 %v9482_v37, %v8454_v14 }
 0xa59   :  { %v11107_v44 = vor.u32 %v9546_v40, %v8710_v33  ;;  %v9530_v33 = vld [vmem:[#allocation9 + $0x55c] sm:$0xf0] }
 0xa5a   :  { %13823 = vst [vmem:[#allocation213_spill] sm:$0xff] %v11109_v49  ;;  %4449 = vmatpush.bf16.msra.mxu2 %v11109_v49 }
 0xa5b   :  { %v2450_v38 = vpop.f32.mrf.mxu1  ;;  %13822 = vst [vmem:[#allocation212_spill] sm:$0xff] %v11107_v44  ;;  %4462 = vmatpush.bf16.msrb.mxu3 %v11107_v44  ;;  %v8422_v44 = vld [vmem:[#allocation9 + $0x380] sm:$0xf] }
 0xa5d   :  { %v2489_v36 = vpop.f32.mrf.mxu0 }
 0xa5e   :  { %v8966_v36 = vld [vmem:[#allocation9 + $0x7c0] sm:$0xf] }
 0xa5f   :  { %v2528_v31 = vpop.f32.mrf.mxu3  ;;  %v2515_v21 = vpop.f32.mrf.mxu2 }
 0xa73   :  { %v2500_v15 = vpop.f32.mrf.mxu1 }
 0xa74   :  { %v11103_v25 = vadd.f32 %v2513_v5, %v2500_v15  ;;  %v11114_v15 = vor.u32 %v9538_v1, %v8678_v63 }
 0xa75   :  { %v2539_v11 = vpop.f32.mrf.mxu0  ;;  %v2565_v5 = vpop.f32.mrf.mxu2 }
 0xa76   :  { %v11105_v58 = vadd.f32 %v2539_v11, %v2526_v47  ;;  %13824 = vst [vmem:[#allocation214_spill] sm:$0xff] %v11114_v15  ;;  %v9610_v47 = vld [vmem:[#allocation9 + $0x7dc] sm:$0xf0]  ;;  %4463 = vmatpush.bf16.msrb.mxu3 %v11114_v15 }
 0xa77   :  { %v11111_v21 = vpop.f32.mrf.mxu3  ;;  %v8646_v11 = vld [vmem:[#allocation9 + $0x540] sm:$0xf]  ;;  %v11117_v40 = vor.u32 %v9610_v47, %v8966_v36  ;;  %v11128_v36 = vor.u32 %v9474_v0, %v8422_v44 }
 0xa78   :  { %v11121_v14 = vor.u32 %v9530_v33, %v8646_v11  ;;  %v8198_v47 = vld [vmem:[#allocation9 + $0x1c0] sm:$0xf] }
 0xa79   :  { %13825 = vst [vmem:[#allocation215_spill] sm:$0xff] %v11117_v40  ;;  %4475 = vmatpush.bf16.msra.mxu0 %v11117_v40  ;;  %v9418_v40 = vld [vmem:[#allocation9 + $0x1dc] sm:$0xf0]  ;;  %4450 = vmatpush.bf16.msra.mxu2 %v11128_v36 }
 0xa7a   :  { %13826 = vst [vmem:[#allocation216_spill] sm:$0xff] %v11121_v14  ;;  %4464 = vmatpush.bf16.msrb.mxu3 %v11121_v14  ;;  %v11130_v15 = vor.u32 %v9418_v40, %v8198_v47  ;;  %v8614_v11 = vld [vmem:[#allocation9 + $0x500] sm:$0xf] }
 0xa7b   :  { %v2502_v38 = vpop.f32.mrf.mxu1  ;;  %13827 = vst [vmem:[#allocation217_spill] sm:$0xff] %v11128_v36  ;;  %v9522_v33 = vld [vmem:[#allocation9 + $0x51c] sm:$0xf0] }
 0xa7c   :  { %13828 = vst [vmem:[#allocation218_spill] sm:$0xff] %v11130_v15  ;;  %4436 = vmatpush.bf16.msra.mxu1 %v11130_v15  ;;  %v9466_v0 = vld [vmem:[#allocation9 + $0x35c] sm:$0xf0] }
 0xa7d   :  { %v2541_v31 = vpop.f32.mrf.mxu0  ;;  %v2567_v38 = vpop.f32.mrf.mxu2  ;;  %v8166_v44 = vld [vmem:[#allocation9 + $0x180] sm:$0xf] }
 0xa7e   :  { %v9602_v38 = vld [vmem:[#allocation9 + $0x79c] sm:$0xf0] }
 0xa7f   :  { %v2580_v37 = vpop.f32.mrf.mxu3  ;;  %v9410_v14 = vld [vmem:[#allocation9 + $0x19c] sm:$0xf0] }
 0xa80   :  { %v8934_v37 = vld [vmem:[#allocation9 + $0x780] sm:$0xf]  ;;  %v11141_v40 = vor.u32 %v9410_v14, %v8166_v44 }
 0xa81   :  { %v8582_v47 = vld [vmem:[#allocation9 + $0x4c0] sm:$0xf] }
 0xa82   :  { %13832 = vst [vmem:[#allocation222_spill] sm:$0xff] %v11141_v40  ;;  %v9514_v36 = vld [vmem:[#allocation9 + $0x4dc] sm:$0xf0]  ;;  %4437 = vmatpush.bf16.msra.mxu1 %v11141_v40 }
 0xa83   :  { %v8902_v15 = vld [vmem:[#allocation9 + $0x740] sm:$0xf] }
 0xa84   :  { %v8134_v14 = vld [vmem:[#allocation9 + $0x140] sm:$0xf] }
 0xa85   :  { %v8870_v40 = vld [vmem:[#allocation9 + $0x700] sm:$0xf] }
 0xa93   :  { %v2552_v63 = vpop.f32.mrf.mxu1 }
 0xa94   :  { %v11124_v1 = vadd.f32 %v2565_v5, %v2552_v63  ;;  %v11134_v5 = vor.u32 %v9522_v33, %v8614_v11  ;;  %v11136_v63 = vor.u32 %v9602_v38, %v8934_v37  ;;  %v11146_v11 = vor.u32 %v9514_v36, %v8582_v47  ;;  %v9594_v33 = vld [vmem:[#allocation9 + $0x75c] sm:$0xf0] }
 0xa95   :  { %v11126_v31 = vpop.f32.mrf.mxu0  ;;  %v8358_v37 = vld [vmem:[#allocation9 + $0x300] sm:$0xf]  ;;  %v11148_v29 = vor.u32 %v9594_v33, %v8902_v15 }
 0xa96   :  { %13829 = vst [vmem:[#allocation219_spill] sm:$0xff] %v11134_v5  ;;  %4465 = vmatpush.bf16.msrb.mxu3 %v11134_v5  ;;  %4476 = vmatpush.bf16.msra.mxu0 %v11136_v63  ;;  %v9458_v38 = vld [vmem:[#allocation9 + $0x31c] sm:$0xf0] }
 0xa97   :  { %13830 = vst [vmem:[#allocation220_spill] sm:$0xff] %v11136_v63  ;;  %v8550_v63 = vld [vmem:[#allocation9 + $0x480] sm:$0xf] }
 0xa98   :  { %13833 = vst [vmem:[#allocation223_spill] sm:$0xff] %v11146_v11  ;;  %v9506_v5 = vld [vmem:[#allocation9 + $0x49c] sm:$0xf0] }
 0xa99   :  { %13834 = vst [vmem:[#allocation224_spill] sm:$0xff] %v11148_v29  ;;  %v11158_v36 = vor.u32 %v9506_v5, %v8550_v63  ;;  %v9586_v15 = vld [vmem:[#allocation9 + $0x71c] sm:$0xf0] }
 0xa9a   :  { %4466 = vmatpush.bf16.msrb.mxu3 %v11146_v11  ;;  %4477 = vmatpush.bf16.msra.mxu0 %v11148_v29  ;;  %v8326_v47 = vld [vmem:[#allocation9 + $0x2c0] sm:$0xf] }
 0xa9b   :  { %v2554_v49 = vpop.f32.mrf.mxu1  ;;  %13837 = vst [vmem:[#allocation227_spill] sm:$0xff] %v11158_v36  ;;  %v9450_v33 = vld [vmem:[#allocation9 + $0x2dc] sm:$0xf0] }
 0xa9c   :  { %v8390_v49 = vld [vmem:[#allocation9 + $0x340] sm:$0xf] }
 0xa9d   :  { %v2593_v35 = vpop.f32.mrf.mxu0  ;;  %v8518_v11 = vld [vmem:[#allocation9 + $0x440] sm:$0xf] }
 0xa9e   :  { %v11139_v35 = vor.u32 %v9466_v0, %v8390_v49  ;;  %v11150_v49 = vor.u32 %v9458_v38, %v8358_v37  ;;  %v9402_v0 = vld [vmem:[#allocation9 + $0x15c] sm:$0xf0]  ;;  %v11160_v37 = vor.u32 %v9586_v15, %v8870_v40  ;;  %v11162_v38 = vor.u32 %v9450_v33, %v8326_v47  ;;  %4467 = vmatpush.bf16.msrb.mxu3 %v11158_v36 }
 0xa9f   :  { %v11153_v44 = vor.u32 %v9402_v0, %v8134_v14  ;;  %v8102_v14 = vld [vmem:[#allocation9 + $0x100] sm:$0xf] }
 0xaa0   :  { %13831 = vst [vmem:[#allocation221_spill] sm:$0xff] %v11139_v35  ;;  %4451 = vmatpush.bf16.msra.mxu2 %v11139_v35  ;;  %v9394_v0 = vld [vmem:[#allocation9 + $0x11c] sm:$0xf0]  ;;  %4478 = vmatpush.bf16.msra.mxu0 %v11160_v37 }
 0xaa1   :  { %13835 = vst [vmem:[#allocation225_spill] sm:$0xff] %v11150_v49  ;;  %4438 = vmatpush.bf16.msra.mxu1 %v11153_v44  ;;  %v11165_v29 = vor.u32 %v9394_v0, %v8102_v14  ;;  %v9578_v63 = vld [vmem:[#allocation9 + $0x6dc] sm:$0xf0] }
 0xaa2   :  { %13836 = vst [vmem:[#allocation226_spill] sm:$0xff] %v11153_v44  ;;  %v8838_v44 = vld [vmem:[#allocation9 + $0x6c0] sm:$0xf] }
 0xaa3   :  { %13838 = vst [vmem:[#allocation228_spill] sm:$0xff] %v11160_v37  ;;  %v11172_v40 = vor.u32 %v9578_v63, %v8838_v44  ;;  %v8294_v15 = vld [vmem:[#allocation9 + $0x280] sm:$0xf] }
 0xaa4   :  { %4452 = vmatpush.bf16.msra.mxu2 %v11150_v49  ;;  %13839 = vst [vmem:[#allocation229_spill] sm:$0xff] %v11162_v38  ;;  %v9498_v49 = vld [vmem:[#allocation9 + $0x45c] sm:$0xf0] }
 0xaa5   :  { %13840 = vst [vmem:[#allocation230_spill] sm:$0xff] %v11165_v29  ;;  %4439 = vmatpush.bf16.msra.mxu1 %v11165_v29  ;;  %v11170_v5 = vor.u32 %v9498_v49, %v8518_v11  ;;  %v9442_v47 = vld [vmem:[#allocation9 + $0x29c] sm:$0xf0]  ;;  %4479 = vmatpush.bf16.msra.mxu0 %v11172_v40 }
 0xaa6   :  { %13842 = vst [vmem:[#allocation232_spill] sm:$0xff] %v11172_v40  ;;  %v11176_v33 = vor.u32 %v9442_v47, %v8294_v15  ;;  %v8070_v14 = vld [vmem:[#allocation9 + $0xc0] sm:$0xf]  ;;  %v9542_v15 = vld [vmem:[#allocation9 + $0x5c4] sm:$0xf] }
 0xaa7   :  { %13841 = vst [vmem:[#allocation231_spill] sm:$0xff] %v11170_v5  ;;  %4468 = vmatpush.bf16.msrb.mxu3 %v11170_v5  ;;  %v9386_v0 = vld [vmem:[#allocation9 + $0xdc] sm:$0xf0]  ;;  %v8712_v47 = vld [vmem:[#allocation9 + $0x5e0] sm:$0xf0] }
 0xaa8   :  { %4453 = vmatpush.bf16.msra.mxu2 %v11162_v38  ;;  %13843 = vst [vmem:[#allocation233_spill] sm:$0xff] %v11176_v33  ;;  %v11179_v37 = vor.u32 %v9386_v0, %v8070_v14  ;;  %v8486_v29 = vld [vmem:[#allocation9 + $0x400] sm:$0xf]  ;;  %v11189_v14 = vor.u32 %v9542_v15, %v8712_v47  ;;  %v9534_v15 = vld [vmem:[#allocation9 + $0x584] sm:$0xf] }
 0xaa9   :  { %v9490_v11 = vld [vmem:[#allocation9 + $0x41c] sm:$0xf0]  ;;  %v8680_v47 = vld [vmem:[#allocation9 + $0x5a0] sm:$0xf0] }
 0xaaa   :  { %13844 = vst [vmem:[#allocation234_spill] sm:$0xff] %v11179_v37  ;;  %v8806_v49 = vld [vmem:[#allocation9 + $0x680] sm:$0xf]  ;;  %4440 = vmatpush.bf16.msra.mxu1 %v11179_v37  ;;  %v11182_v44 = vor.u32 %v9490_v11, %v8486_v29  ;;  %v11200_v29 = vld [vmem:[%s13172_s7] sm:$0xff] }
 0xaab   :  { %v9570_v63 = vld [vmem:[#allocation9 + $0x69c] sm:$0xf0]  ;;  %13848 = vst [vmem:[#allocation238_spill] sm:$0xff] %v11189_v14 }
 0xaac   :  { %4454 = vmatpush.bf16.msra.mxu2 %v11176_v33  ;;  %13845 = vst [vmem:[#allocation235_spill] sm:$0xff] %v11182_v44  ;;  %v8262_v5 = vld [vmem:[#allocation9 + $0x240] sm:$0xf]  ;;  %v11184_v36 = vor.u32 %v9570_v63, %v8806_v49  ;;  %4469 = vmatpush.bf16.msrb.mxu3 %v11182_v44  ;;  %v9478_v44 = vld [vmem:[#allocation9 + $0x3c4] sm:$0xf] }
 0xaad   :  { %v9434_v40 = vld [vmem:[#allocation9 + $0x25c] sm:$0xf0]  ;;  %13850 = vst [vmem:[#allocation240_spill] sm:$0xff] %v11200_v29 }
 0xaae   :  { %13846 = vst [vmem:[#allocation236_spill] sm:$0xff] %v11184_v36  ;;  %v11187_v38 = vor.u32 %v9434_v40, %v8262_v5  ;;  %v8038_v0 = vld [vmem:[#allocation9 + $0x80] sm:$0xf]  ;;  %4480 = vmatpush.bf16.msra.mxu0 %v11184_v36 }
 0xaaf   :  { %v9378_v33 = vld [vmem:[#allocation9 + $0x9c] sm:$0xf0] }
 0xab0   :  { %13847 = vst [vmem:[#allocation237_spill] sm:$0xff] %v11187_v38  ;;  %v11192_v37 = vor.u32 %v9378_v33, %v8038_v0  ;;  %4455 = vmatpush.bf16.msra.mxu2 %v11187_v38  ;;  %4514 = vmatpush.bf16.msra.mxu3 %v11189_v14  ;;  %v8774_v5 = vld [vmem:[#allocation9 + $0x640] sm:$0xf]  ;;  %v8456_v38 = vld [vmem:[#allocation9 + $0x3e0] sm:$0xf0] }
 0xab1   :  { %v9562_v40 = vld [vmem:[#allocation9 + $0x65c] sm:$0xf0] }
 0xab2   :  { %13849 = vst [vmem:[#allocation239_spill] sm:$0xff] %v11192_v37  ;;  %4441 = vmatpush.bf16.msra.mxu1 %v11192_v37  ;;  %v11202_v11 = vor.u32 %v9562_v40, %v8774_v5  ;;  %v8230_v49 = vld [vmem:[#allocation9 + $0x200] sm:$0xf]  ;;  %v11207_v37 = vor.u32 %v9534_v15, %v8680_v47  ;;  %v11214_v40 = vor.u32 %v9478_v44, %v8456_v38  ;;  %v8648_v47 = vld [vmem:[#allocation9 + $0x560] sm:$0xf0] }
 0xab3   :  { %v9426_v63 = vld [vmem:[#allocation9 + $0x21c] sm:$0xf0]  ;;  %v8968_v38 = vld [vmem:[#allocation9 + $0x7e0] sm:$0xf0] }
 0xab4   :  { %13851 = vst [vmem:[#allocation241_spill] sm:$0xff] %v11202_v11  ;;  %v11204_v33 = vor.u32 %v9426_v63, %v8230_v49  ;;  %v8006_v0 = vld [vmem:[#allocation9 + $0x40] sm:$0xf]  ;;  %4481 = vmatpush.bf16.msra.mxu0 %v11202_v11  ;;  %4515 = vmatpush.bf16.msra.mxu3 %v11207_v37 }
 0xab5   :  { %v9370_v36 = vld [vmem:[#allocation9 + $0x5c] sm:$0xf0]  ;;  %13853 = vst [vmem:[#allocation243_spill] sm:$0xff] %v11207_v37  ;;  %v8424_v37 = vld [vmem:[#allocation9 + $0x3a0] sm:$0xf0] }
 0xab6   :  { %13852 = vst [vmem:[#allocation242_spill] sm:$0xff] %v11204_v33  ;;  %v11209_v14 = vor.u32 %v9370_v36, %v8006_v0  ;;  %4456 = vmatpush.bf16.msra.mxu2 %v11204_v33  ;;  %v8742_v49 = vld [vmem:[#allocation9 + $0x600] sm:$0xf]  ;;  %v9526_v36 = vld [vmem:[#allocation9 + $0x544] sm:$0xf] }
 0xab7   :  { %13855 = vst [vmem:[#allocation245_spill] sm:$0xff] %v11214_v40  ;;  %v9554_v63 = vld [vmem:[#allocation9 + $0x61c] sm:$0xf0]  ;;  %v9606_v0 = vld [vmem:[#allocation9 + $0x7c4] sm:$0xf]  ;;  %v11222_v5 = vor.u32 %v9526_v36, %v8648_v47 }
 0xab8   :  { %13854 = vst [vmem:[#allocation244_spill] sm:$0xff] %v11209_v14  ;;  %4442 = vmatpush.bf16.msra.mxu1 %v11209_v14  ;;  %v11218_v15 = vor.u32 %v9554_v63, %v8742_v49  ;;  %v7974_v44 = vld [vmem:[#allocation9] sm:$0xf]  ;;  %v11226_v14 = vor.u32 %v9606_v0, %v8968_v38  ;;  %v9470_v63 = vld [vmem:[#allocation9 + $0x384] sm:$0xf] }
 0xab9   :  { %v2924_v34 = vpop.f32.mrf.mxu1  ;;  %13857 = vst [vmem:[#allocation247_spill] sm:$0xff] %v11222_v5  ;;  %v9362_v33 = vld [vmem:[#allocation9 + $0x1c] sm:$0xf0]  ;;  %4516 = vmatpush.bf16.msra.mxu3 %v11222_v5  ;;  %v9518_v0 = vld [vmem:[#allocation9 + $0x504] sm:$0xf] }
 0xaba   :  { %13856 = vst [vmem:[#allocation246_spill] sm:$0xff] %v11218_v15  ;;  %v2925_v35 = vadd.f32 %v2924_v34, %v11089_v20  ;;  %4501 = vmatpush.bf16.msrb.mxu2 %v11214_v40  ;;  %4482 = vmatpush.bf16.msra.mxu0 %v11218_v15  ;;  %v11228_v49 = vor.u32 %v9362_v33, %v7974_v44  ;;  %v13860_v34 = vperm.slane %v11200_v29, 0  ;;  %v8616_v38 = vld [vmem:[#allocation9 + $0x520] sm:$0xf0] }
 0xabb   :  { %v2963_v11 = vpop.f32.mrf.mxu0  ;;  %13858 = vst [vmem:[#allocation248_spill] sm:$0xff] %v11226_v14  ;;  %v11234_v40 = vor.u32 %v9470_v63, %v8424_v37  ;;  %v11240_v33 = vor.u32 %v9414_v13, %v8200_v45  ;;  %v9598_v44 = vld [vmem:[#allocation9 + $0x784] sm:$0xf]  ;;  %v11244_v37 = vor.u32 %v9518_v0, %v8616_v38 }
 0xabc   :  { %v2964_v53 = vadd.f32 %v2963_v11, %v11101_v43  ;;  %13859 = vst [vmem:[#allocation249_spill] sm:$0xff] %v11228_v49  ;;  %v3019_v20 = vadd.f32 %v2925_v35, %v13860_v34  ;;  %v13862_v43 = vperm.slane %v11200_v29, 3  ;;  %4443 = vmatpush.bf16.msra.mxu1 %v11228_v49  ;;  %v8936_v63 = vld [vmem:[#allocation9 + $0x7a0] sm:$0xf0] }
 0xabd   :  { %13861 = vst [vmem:[#allocation250_spill] sm:$0xff] %v11234_v40  ;;  %v9462_v34 = vld [vmem:[#allocation9 + $0x344] sm:$0xf]  ;;  %4517 = vmatpush.bf16.msra.mxu3 %v11244_v37 }
 0xabe   :  { %v3022_v11 = vadd.f32 %v2964_v53, %v13862_v43  ;;  %4527 = vmatpush.bf16.msrb.mxu0 %v11226_v14  ;;  %13863 = vst [vmem:[#allocation251_spill] sm:$0xff] %v11240_v33  ;;  %v7966_v35 = vmul.f32 -1.442695, %v3019_v20  ;;  %4502 = vmatpush.bf16.msrb.mxu2 %v11234_v40  ;;  %v11247_v43 = vor.u32 %v9598_v44, %v8936_v63  ;;  %v8392_v45 = vld [vmem:[#allocation9 + $0x360] sm:$0xf0] }
 0xabf   :  { %13864 = vst [vmem:[#allocation252_spill] sm:$0xff] %v11244_v37  ;;  %v2937_v53 = vpop.f32.mrf.mxu2  ;;  %v9406_v13 = vld [vmem:[#allocation9 + $0x184] sm:$0xf]  ;;  %v11250_v14 = vor.u32 %v9462_v34, %v8392_v45 }
 0xac0   :  { %v7969_v47 = vmul.f32 -1.442695, %v3022_v11  ;;  %4488 = vmatpush.bf16.msrb.mxu1 %v11240_v33  ;;  %13865 = vst [vmem:[#allocation253_spill] sm:$0xff] %v11247_v43  ;;  %9695 = vpow2.f32 %v7966_v35  ;;  %v2938_v36 = vadd.f32 %v2937_v53, %v11095_v16  ;;  %v2950_v20 = vpop.f32.mrf.mxu3  ;;  %v8168_v49 = vld [vmem:[#allocation9 + $0x1a0] sm:$0xf0]  ;;  %v13868_v35 = vperm.slane %v11200_v29, 1 }
 0xac1   :  { %13866 = vst [vmem:[#allocation254_spill] sm:$0xff] %v11250_v14  ;;  %v2951_v0 = vadd.f32 %v2950_v20, %v11099_v17  ;;  %v2926_v38 = vpop.f32.mrf.mxu1  ;;  %v11255_v11 = vor.u32 %v9406_v13, %v8168_v49  ;;  %v9510_v44 = vld [vmem:[#allocation9 + $0x4c4] sm:$0xf]  ;;  %v13870_v20 = vperm.slane %v11200_v29, 2 }
 0xac2   :  { %9697 = vpow2.f32 %v7969_v47  ;;  %4528 = vmatpush.bf16.msrb.mxu0 %v11247_v43  ;;  %v8584_v63 = vld [vmem:[#allocation9 + $0x4e0] sm:$0xf0]  ;;  %v3020_v16 = vadd.f32 %v2938_v36, %v13868_v35  ;;  %4503 = vmatpush.bf16.msrb.mxu2 %v11250_v14 }
 0xac3   :  { %13867 = vst [vmem:[#allocation255_spill] sm:$0xff] %v11255_v11  ;;  %v9590_v33 = vld [vmem:[#allocation9 + $0x744] sm:$0xf]  ;;  %v2965_v53 = vpop.f32.mrf.mxu0  ;;  %v11260_v34 = vor.u32 %v9510_v44, %v8584_v63  ;;  %v3021_v38 = vadd.f32 %v2951_v0, %v13870_v20 }
 0xac4   :  { %v8904_v47 = vld [vmem:[#allocation9 + $0x760] sm:$0xf0]  ;;  %4489 = vmatpush.bf16.msrb.mxu1 %v11255_v11  ;;  %v7967_v36 = vmul.f32 -1.442695, %v3020_v16 }
 0xac5   :  { %13869 = vst [vmem:[#allocation256_spill] sm:$0xff] %v11260_v34  ;;  %v9454_v17 = vld [vmem:[#allocation9 + $0x304] sm:$0xf]  ;;  %v11265_v49 = vor.u32 %v9590_v33, %v8904_v47  ;;  %v7968_v53 = vmul.f32 -1.442695, %v3021_v38  ;;  %4518 = vmatpush.bf16.msra.mxu3 %v11260_v34 }
 0xac6   :  { %v8360_v45 = vld [vmem:[#allocation9 + $0x320] sm:$0xf0]  ;;  %v9696_v15 = vpop.eup %9695  ;;  %9699 = vpow2.f32 %v7967_v36 }
 0xac7   :  { %13871 = vst [vmem:[#allocation257_spill] sm:$0xff] %v11265_v49  ;;  %v11267_v13 = vor.u32 %v9454_v17, %v8360_v45  ;;  %v9398_v43 = vld [vmem:[#allocation9 + $0x144] sm:$0xf]  ;;  %4529 = vmatpush.bf16.msrb.mxu0 %v11265_v49  ;;  %v11276_v16 = vadd.f32 1.0, %v9696_v15  ;;  %9701 = vpow2.f32 %v7968_v53  ;;  %v2592_v53 = vadd.f32 %v11126_v31, %v11111_v21 }
 0xac8   :  { %v8136_v37 = vld [vmem:[#allocation9 + $0x160] sm:$0xf0]  ;;  %v9698_v45 = vpop.eup %9697  ;;  %v2952_v36 = vpop.f32.mrf.mxu3 }
 0xac9   :  { %13872 = vst [vmem:[#allocation258_spill] sm:$0xff] %v11267_v13  ;;  %v11269_v35 = vor.u32 %v9398_v43, %v8136_v37  ;;  %v9502_v44 = vld [vmem:[#allocation9 + $0x484] sm:$0xf]  ;;  %4504 = vmatpush.bf16.msrb.mxu2 %v11267_v13  ;;  %v2939_v37 = vpop.f32.mrf.mxu2  ;;  %v11281_v38 = vadd.f32 1.0, %v9698_v45  ;;  %9703 = vrcp.f32 %v11276_v16  ;;  %v3046_v36 = vand.u32 2147483648, %v11276_v16 }
 0xaca   :  { %v8552_v63 = vld [vmem:[#allocation9 + $0x4a0] sm:$0xf0]  ;;  %vm3040_vm2 = vweird.f32 %v11276_v16 }
 0xacb   :  { %13873 = vst [vmem:[#allocation259_spill] sm:$0xff] %v11269_v35  ;;  %v11274_v33 = vor.u32 %v9502_v44, %v8552_v63  ;;  %v9582_v0 = vld [vmem:[#allocation9 + $0x704] sm:$0xf]  ;;  %4490 = vmatpush.bf16.msrb.mxu1 %v11269_v35  ;;  %9705 = vrcp.f32 %v11281_v38  ;;  %v3099_v11 = vand.u32 2147483648, %v11281_v38  ;;  %vm3093_vm1 = vweird.f32 %v11281_v38 }
 0xacc   :  { %v8872_v47 = vld [vmem:[#allocation9 + $0x720] sm:$0xf0] }
 0xacd   :  { %13874 = vst [vmem:[#allocation260_spill] sm:$0xff] %v11274_v33  ;;  %v9446_v17 = vld [vmem:[#allocation9 + $0x2c4] sm:$0xf]  ;;  %v11279_v43 = vor.u32 %v9582_v0, %v8872_v47  ;;  %4519 = vmatpush.bf16.msra.mxu3 %v11274_v33  ;;  %v3044_v47 = vand.u32 2147483647, %v11276_v16  ;;  %v9700_v33 = vpop.eup %9699 }
 0xace   :  { %v8328_v20 = vld [vmem:[#allocation9 + $0x2e0] sm:$0xf0]  ;;  %v9702_v14 = vpop.eup %9701  ;;  %v11302_v5 = vadd.f32 1.0, %v9700_v33 }
 0xacf   :  { %13875 = vst [vmem:[#allocation261_spill] sm:$0xff] %v11279_v43  ;;  %v11283_v49 = vor.u32 %v9446_v17, %v8328_v20  ;;  %v9390_v44 = vld [vmem:[#allocation9 + $0x104] sm:$0xf]  ;;  %4530 = vmatpush.bf16.msrb.mxu0 %v11279_v43  ;;  %v11310_v40 = vadd.f32 1.0, %v9702_v14  ;;  %vm11336_vm0 = vcmp.eq.f32.partialorder %v3044_v47, 8.507059e+37 }
 0xad0   :  { %v8104_v63 = vld [vmem:[#allocation9 + $0x120] sm:$0xf0]  ;;  %9707 = vrcp.f32 %v11302_v5  ;;  %vm3055_vm3 = vweird.f32 %v11302_v5 }
 0xad1   :  { %13876 = vst [vmem:[#allocation262_spill] sm:$0xff] %v11283_v49  ;;  %v9494_v15 = vld [vmem:[#allocation9 + $0x444] sm:$0xf]  ;;  %4505 = vmatpush.bf16.msrb.mxu2 %v11283_v49  ;;  %v11297_v35 = vor.u32 %v9390_v44, %v8104_v63  ;;  %v2989_v14 = vpop.f32.mrf.mxu2  ;;  %9709 = vrcp.f32 %v11310_v40  ;;  %vm3078_vm4 = vweird.f32 %v11310_v40 }
 0xad2   :  { %v8520_v45 = vld [vmem:[#allocation9 + $0x460] sm:$0xf0] }
 0xad3   :  { %v2976_v0 = vpop.f32.mrf.mxu1  ;;  %13877 = vst [vmem:[#allocation263_spill] sm:$0xff] %v11297_v35  ;;  %v9574_v21 = vld [vmem:[#allocation9 + $0x6c4] sm:$0xf]  ;;  %v11300_v13 = vor.u32 %v9494_v15, %v8520_v45  ;;  %4491 = vmatpush.bf16.msrb.mxu1 %v11297_v35  ;;  %v11318_v45 = vpop.eup %9703 }
 0xad4   :  { %v2977_v20 = vadd.f32 %v2976_v0, %v11103_v25  ;;  %v8840_v31 = vld [vmem:[#allocation9 + $0x6e0] sm:$0xf0]  ;;  %vm3041_vm5 = vweird.f32 %v11318_v45 }
 0xad5   :  { %v3015_v43 = vpop.f32.mrf.mxu0  ;;  %13878 = vst [vmem:[#allocation264_spill] sm:$0xff] %v11300_v13  ;;  %v9438_v17 = vld [vmem:[#allocation9 + $0x284] sm:$0xf]  ;;  %v11306_v0 = vor.u32 %v9574_v21, %v8840_v31  ;;  %4520 = vmatpush.bf16.msra.mxu3 %v11300_v13  ;;  %v11323_v21 = vor.u32 1.1754944e-38, %v3046_v36  ;;  %v3097_v31 = vand.u32 2147483647, %v11281_v38  ;;  %v2990_v13 = vadd.f32 %v2989_v14, %v11105_v58  ;;  %vm11378_vm10 = vmor %vm3040_vm2, %vm3041_vm5 }
 0xad6   :  { %v3016_v34 = vadd.f32 %v3015_v43, %v2592_v53  ;;  %v8296_v49 = vld [vmem:[#allocation9 + $0x2a0] sm:$0xf0]  ;;  %v13881_v43 = vperm.slane %v11200_v29, 7  ;;  %v13886_v58 = vperm.slane %v11200_v29, 5 }
 0xad7   :  { %13879 = vst [vmem:[#allocation265_spill] sm:$0xff] %v11306_v0  ;;  %v11308_v44 = vor.u32 %v9438_v17, %v8296_v49  ;;  %v9382_v63 = vld [vmem:[#allocation9 + $0xc4] sm:$0xf]  ;;  %v13883_v49 = vperm.slane %v11200_v29, 4  ;;  %4531 = vmatpush.bf16.msrb.mxu0 %v11306_v0  ;;  %vm11357_vm6 = vcmp.eq.f32.partialorder %v3097_v31, 8.507059e+37 }
 0xad8   :  { %v8072_v37 = vld [vmem:[#allocation9 + $0xe0] sm:$0xf0]  ;;  %v3026_v15 = vadd.f32 %v3016_v34, %v13881_v43  ;;  %v11328_v34 = vpop.eup %9705  ;;  %v3002_v43 = vpop.f32.mrf.mxu3  ;;  %v3024_v14 = vadd.f32 %v2990_v13, %v13886_v58 }
 0xad9   :  { %13880 = vst [vmem:[#allocation266_spill] sm:$0xff] %v11308_v44  ;;  %v11316_v33 = vor.u32 %v9382_v63, %v8072_v37  ;;  %v3023_v17 = vadd.f32 %v2977_v20, %v13883_v49  ;;  %4506 = vmatpush.bf16.msrb.mxu2 %v11308_v44  ;;  %v3036_v37 = vmul.f32 %v11318_v45, %v11276_v16  ;;  %v11332_v63 = vor.u32 1.1754944e-38, %v3099_v11  ;;  %v9486_v49 = vld [vmem:[#allocation9 + $0x404] sm:$0xf] }
 0xada   :  { %v3084_v20 = vand.u32 2147483648, %v11310_v40  ;;  %v3089_v53 = vmul.f32 %v11328_v34, %v11281_v38  ;;  %v3059_v11 = vand.u32 2147483647, %v11302_v5  ;;  %v8488_v25 = vld [vmem:[#allocation9 + $0x420] sm:$0xf0]  ;;  %v3003_v8 = vadd.f32 %v3002_v43, %v11124_v1 }
 0xadb   :  { %13882 = vst [vmem:[#allocation267_spill] sm:$0xff] %v11316_v33  ;;  %4492 = vmatpush.bf16.msrb.mxu1 %v11316_v33  ;;  %v9566_v0 = vld [vmem:[#allocation9 + $0x684] sm:$0xf]  ;;  %v3037_v35 = vsub.f32 1.0, %v3036_v37  ;;  %v7971_v47 = vmul.f32 -1.442695, %v3026_v15  ;;  %v2978_v30 = vpop.f32.mrf.mxu1  ;;  %9711 = vtanh.f32 %v3023_v17  ;;  %v11365_v17 = vor.u32 %v9486_v49, %v8488_v25 }
 0xadc   :  { %v3090_v2 = vsub.f32 1.0, %v3089_v53  ;;  %v11352_v24 = vor.u32 1.1754944e-38, %v3084_v20  ;;  %v11361_v53 = vpop.eup %9707  ;;  %v9430_v20 = vld [vmem:[#allocation9 + $0x244] sm:$0xf]  ;;  %vm11383_vm12 = vcmp.eq.f32.partialorder %v3059_v11, 8.507059e+37  ;;  %vm3094_vm13 = vweird.f32 %v11328_v34 }
 0xadd   :  { %v3017_v33 = vpop.f32.mrf.mxu0  ;;  %v3038_v15 = vmul.f32 %v11318_v45, %v3037_v35  ;;  %9713 = vpow2.f32 %v7971_v47  ;;  %v8264_v35 = vld [vmem:[#allocation9 + $0x260] sm:$0xf0]  ;;  %v11369_v47 = vpop.eup %9709  ;;  %v3051_v13 = vmul.f32 %v11361_v53, %v11302_v5  ;;  %vm3056_vm11 = vweird.f32 %v11361_v53  ;;  %v8718_v1 = vld [vmem:[#allocation9 + $0x5c8] sm:$0xf]  ;;  %4521 = vmatpush.bf16.msra.mxu3 %v11365_v17  ;;  %vm11408_vm15 = vmor %vm3093_vm1, %vm3094_vm13 }
 0xade   :  { %v3091_v37 = vmul.f32 %v11328_v34, %v3090_v2  ;;  %v11367_v33 = vor.u32 %v9566_v0, %v8808_v23  ;;  %v9547_v25 = vld [vmem:[#allocation9 + $0x5e4] sm:$0xf0]  ;;  %v3074_v0 = vmul.f32 %v11369_v47, %v11310_v40  ;;  %9715 = vtanh.f32 %v3024_v14  ;;  %v9374_v11 = vld [vmem:[#allocation9 + $0x84] sm:$0xf] }
 0xadf   :  { %v3039_v31 = vadd.f32 %v11318_v45, %v3038_v15  ;;  %v13893_v16 = vperm.slane %v11200_v29, 6  ;;  %v2991_v15 = vpop.f32.mrf.mxu2  ;;  %v8040_v58 = vld [vmem:[#allocation9 + $0xa0] sm:$0xf0]  ;;  %v3052_v28 = vsub.f32 1.0, %v3051_v13  ;;  %v11398_v6 = vor.u32 %v9430_v20, %v8264_v35  ;;  %v9539_v2 = vld [vmem:[#allocation9 + $0x5a4] sm:$0xf0] }
 0xae0   :  { %v3092_v43 = vadd.f32 %v11328_v34, %v3091_v37  ;;  %4532 = vmatpush.bf16.msrb.mxu0 %v11367_v33  ;;  %v9558_v44 = vld [vmem:[#allocation9 + $0x644] sm:$0xf]  ;;  %v3004_v19 = vpop.f32.mrf.mxu3  ;;  %vm3079_vm14 = vweird.f32 %v11369_v47  ;;  %v11419_v38 = vor.u32 %v9547_v25, %v8718_v1  ;;  %v13905_v30 = vand.u32 2147483647, %v11310_v40 }
 0xae1   :  { %v3025_v49 = vadd.f32 %v3003_v8, %v13893_v16  ;;  %v3043_v9 = vsel %vm11378_vm10, %v11318_v45, %v3039_v31  ;;  %v8776_v14 = vld [vmem:[#allocation9 + $0x660] sm:$0xf0]  ;;  %v9712_v29 = vpop.eup %9711  ;;  %v3075_v8 = vsub.f32 1.0, %v3074_v0  ;;  %v13434_v45 = vmov 0.0|0.0   ;;  %4507 = vmatpush.bf16.msrb.mxu2 %v11398_v6  ;;  %v8686_v31 = vld [vmem:[#allocation9 + $0x588] sm:$0xf]  ;;  %vm11438_vm1 = vmor %vm3078_vm4, %vm3079_vm14 }
 0xae2   :  { %v9422_v37 = vld [vmem:[#allocation9 + $0x204] sm:$0xf]  ;;  %v3048_v16 = vsel %vm11336_vm0, %v11323_v21, %v3043_v9  ;;  %4470 = vmatmul.bf16.vlgmr.msrb.gmra.mxu3 %v13434_v45  ;;  %4483 = vmatmul.bf16.vlgmr.msra.gmra.mxu0 %v13434_v45  ;;  %v3053_v9 = vmul.f32 %v11361_v53, %v3052_v28  ;;  %v3096_v21 = vsel %vm11408_vm15, %v11328_v34, %v3092_v43  ;;  %vm11428_vm0 = vmor %vm3055_vm3, %vm3056_vm11  ;;  %vm3083_vm2 = vcmp.eq.f32.partialorder %v13905_v30, 8.507059e+37 }
 0xae3   :  { %v7970_v19 = vmul.f32 -1.442695, %v3025_v49  ;;  %v8232_v20 = vld [vmem:[#allocation9 + $0x220] sm:$0xf0]  ;;  %v9714_v35 = vpop.eup %9713  ;;  %v3145_v36 = vmul.f32 %v9712_v29, %v3048_v16  ;;  %v3076_v0 = vmul.f32 %v11369_v47, %v3075_v8  ;;  %v13898_v29 = vand.u32 2147483648, %v11302_v5  ;;  %4566 = vmatpush.bf16.msrb.mxu3 %v11419_v38 }
 0xae4   :  { %v11422_v49 = vadd.f32 1.0, %v9714_v35  ;;  %v9366_v1 = vld [vmem:[#allocation9 + $0x44] sm:$0xf]  ;;  %v3054_v15 = vadd.f32 %v11361_v53, %v3053_v9  ;;  %v11444_v8 = vor.u32 %v9374_v11, %v8040_v58  ;;  %v11446_v16 = vor.u32 %v9558_v44, %v8776_v14  ;;  %v9716_v13 = vpop.eup %9715  ;;  %v8654_v9 = vld [vmem:[#allocation9 + $0x548] sm:$0xf] }
 0xae5   :  { %v3062_v34 = vor.u32 1.1754944e-38, %v13898_v29  ;;  %9717 = vpow2.f32 %v7970_v19  ;;  %v8008_v25 = vld [vmem:[#allocation9 + $0x60] sm:$0xf0]  ;;  %v11448_v5 = vor.u32 %v9422_v37, %v8232_v20  ;;  %v3077_v19 = vadd.f32 %v11369_v47, %v3076_v0  ;;  %v9531_v14 = vld [vmem:[#allocation9 + $0x564] sm:$0xf0] }
 0xae6   :  { %13901 = vst [vmem:[#allocation268_spill] sm:$0xff] %v11444_v8  ;;  %9719 = vrcp.f32 %v11422_v49  ;;  %v3101_v35 = vsel %vm11357_vm6, %v11332_v63, %v3096_v21  ;;  %v9550_v29 = vld [vmem:[#allocation9 + $0x604] sm:$0xf]  ;;  %v3058_v11 = vsel %vm11428_vm0, %v11361_v53, %v3054_v15  ;;  %4493 = vmatpush.bf16.msrb.mxu1 %v11444_v8  ;;  %4533 = vmatpush.bf16.msrb.mxu0 %v11446_v16  ;;  %v8974_v37 = vld [vmem:[#allocation9 + $0x7c8] sm:$0xf]  ;;  %vm3133_vm4 = vweird.f32 %v11422_v49 }
 0xae7   :  { %13902 = vst [vmem:[#allocation269_spill] sm:$0xff] %v11446_v16  ;;  %v8744_v45 = vld [vmem:[#allocation9 + $0x620] sm:$0xf0]  ;;  %v11460_v44 = vor.u32 %v9539_v2, %v8686_v31  ;;  %v11462_v58 = vor.u32 %v9366_v1, %v8008_v25  ;;  %v9611_v20 = vld [vmem:[#allocation9 + $0x7e4] sm:$0xf0]  ;;  %v3081_v63 = vsel %vm11438_vm1, %v11369_v47, %v3077_v19  ;;  %v3063_v53 = vsel %vm11383_vm12, %v3062_v34, %v3058_v11 }
 0xae8   :  { %4508 = vmatpush.bf16.msrb.mxu2 %v11448_v5  ;;  %v9358_v21 = vld [vmem:[#allocation9 + $0x4] sm:$0xf]  ;;  %v3086_v2 = vsel %vm3083_vm2, %v11352_v24, %v3081_v63  ;;  %v3144_v0 = vmul.f32 0.0, %v3101_v35  ;;  %v3146_v28 = vmul.f32 %v9716_v13, %v3063_v53  ;;  %v11474_v1 = vor.u32 %v9550_v29, %v8744_v45  ;;  %v8942_v25 = vld [vmem:[#allocation9 + $0x788] sm:$0xf] }
 0xae9   :  { %13903 = vst [vmem:[#allocation270_spill] sm:$0xff] %v11460_v44  ;;  %v7976_v31 = vld [vmem:[#allocation9 + $0x20] sm:$0xf0]  ;;  %4567 = vmatpush.bf16.msrb.mxu3 %v11460_v44  ;;  %v9603_v47 = vld [vmem:[#allocation9 + $0x7a4] sm:$0xf0]  ;;  %v3143_v40 = vmul.f32 0.0, %v3086_v2  ;;  %v11476_v15 = vor.u32 %v9531_v14, %v8654_v9  ;;  %v11478_v23 = vor.u32 %v9611_v20, %v8974_v37 }
 0xaea   :  { %13904 = vst [vmem:[#allocation271_spill] sm:$0xff] %v11462_v58  ;;  %v8622_v34 = vld [vmem:[#allocation9 + $0x508] sm:$0xf]  ;;  %v11480_v11 = vadd.f32 %v3146_v28, %v3144_v0  ;;  %4494 = vmatpush.bf16.msrb.mxu1 %v11462_v58  ;;  %4534 = vmatpush.bf16.msrb.mxu0 %v11474_v1  ;;  %v11486_v24 = vor.u32 %v9358_v21, %v7976_v31  ;;  %v3137_v2 = vand.u32 2147483647, %v11422_v49 }
 0xaeb   :  { %13906 = vst [vmem:[#allocation272_spill] sm:$0xff] %v11474_v1  ;;  %v9718_v43 = vpop.eup %9717  ;;  %v9523_v19 = vld [vmem:[#allocation9 + $0x524] sm:$0xf0]  ;;  %v11488_v13 = vadd.f32 %v3145_v36, %v3143_v40  ;;  %v11491_v35 = vor.u32 %v9603_v47, %v8942_v25  ;;  %v3139_v36 = vand.u32 2147483648, %v11422_v49  ;;  %v13916_v40 = vmov 0.0|0.0  }
 0xaec   :  { %13907 = vst [vmem:[#allocation273_spill] sm:$0xff] %v11476_v15  ;;  %v11482_v30 = vadd.f32 1.0, %v9718_v43  ;;  %v9720_v45 = vpop.eup %9719  ;;  %v11495_v9 = vor.u32 %v9523_v19, %v8622_v34  ;;  %v8910_v14 = vld [vmem:[#allocation9 + $0x748] sm:$0xf]  ;;  %9721 = vtanh.f32 %v11480_v11  ;;  %vm3138_vm6 = vcmp.eq.f32.partialorder %v3137_v2, 8.507059e+37 }
 0xaed   :  { %13908 = vst [vmem:[#allocation274_spill] sm:$0xff] %v11478_v23  ;;  %v3129_v29 = vmul.f32 %v9720_v45, %v11422_v49  ;;  %4568 = vmatpush.bf16.msrb.mxu3 %v11476_v15  ;;  %v9595_v37 = vld [vmem:[#allocation9 + $0x764] sm:$0xf0]  ;;  %vm3134_vm3 = vweird.f32 %v9720_v45  ;;  %v11978_v15 = vld [vmem:[#allocation10] sm:$0xff]  ;;  %v9389_v16 = vld [vmem:[#allocation9 + $0xf4] sm:$0xf0] }
 0xaee   :  { %13909 = vst [vmem:[#allocation275_spill] sm:$0xff] %v11480_v11  ;;  %4579 = vmatpush.bf16.msra.mxu0 %v11478_v23  ;;  %v8590_v20 = vld [vmem:[#allocation9 + $0x4c8] sm:$0xf]  ;;  %9723 = vrcp.f32 %v11482_v30  ;;  %4495 = vmatpush.bf16.msrb.mxu1 %v11486_v24  ;;  %v11502_v21 = vor.u32 %v9595_v37, %v8910_v14  ;;  %vm3135_vm5 = vmor %vm3133_vm4, %vm3134_vm3  ;;  %vm3118_vm11 = vweird.f32 %v11482_v30  ;;  %v8480_v44 = vld [vmem:[#allocation9 + $0x3f8] sm:$0xf0] }
 0xaef   :  { %13910 = vst [vmem:[#allocation276_spill] sm:$0xff] %v11486_v24  ;;  %v9515_v63 = vld [vmem:[#allocation9 + $0x4e4] sm:$0xf0]  ;;  %v3130_v53 = vsub.f32 1.0, %v3129_v29  ;;  %v3140_v29 = vor.u32 1.1754944e-38, %v3139_v36  ;;  %9725 = vtanh.f32 %v11488_v13 }
 0xaf0   :  { %13911 = vst [vmem:[#allocation277_spill] sm:$0xff] %v11488_v13  ;;  %v11506_v0 = vor.u32 %v9515_v63, %v8590_v20  ;;  %v8878_v28 = vld [vmem:[#allocation9 + $0x708] sm:$0xf] }
 0xaf1   :  { %13912 = vst [vmem:[#allocation278_spill] sm:$0xff] %v11491_v35  ;;  %v3131_v31 = vmul.f32 %v9720_v45, %v3130_v53  ;;  %4569 = vmatpush.bf16.msrb.mxu3 %v11495_v9  ;;  %v9587_v25 = vld [vmem:[#allocation9 + $0x724] sm:$0xf0] }
 0xaf2   :  { %13913 = vst [vmem:[#allocation279_spill] sm:$0xff] %v11495_v9  ;;  %4580 = vmatpush.bf16.msra.mxu0 %v11491_v35  ;;  %v8558_v47 = vld [vmem:[#allocation9 + $0x488] sm:$0xf]  ;;  %4522 = vmatmul.bf16.vlgmr.msra.gmra.mxu3 %v13916_v40  ;;  %v9722_v19 = vpop.eup %9721  ;;  %v11512_v20 = vor.u32 %v9587_v25, %v8878_v28 }
 0xaf3   :  { %13914 = vst [vmem:[#allocation280_spill] sm:$0xff] %v11502_v21  ;;  %v9507_v43 = vld [vmem:[#allocation9 + $0x4a4] sm:$0xf0]  ;;  %4535 = vmatmul.bf16.vlgmr.msrb.gmra.mxu0 %v13916_v40  ;;  %v3132_v34 = vadd.f32 %v9720_v45, %v3131_v31 }
 0xaf4   :  { %13915 = vst [vmem:[#allocation281_spill] sm:$0xff] %v11506_v0  ;;  %v8462_v14 = vld [vmem:[#allocation9 + $0x3c8] sm:$0xf]  ;;  %v9724_v63 = vpop.eup %9723  ;;  %v11515_v11 = vor.u32 %v9507_v43, %v8558_v47  ;;  %v3124_v47 = vand.u32 2147483648, %v11482_v30 }
 0xaf5   :  { %v9483_v37 = vld [vmem:[#allocation9 + $0x3e4] sm:$0xf0]  ;;  %13917 = vst [vmem:[#allocation282_spill] sm:$0xff] %v11512_v20  ;;  %v3136_v53 = vsel %vm3135_vm5, %v9720_v45, %v3132_v34  ;;  %4570 = vmatpush.bf16.msrb.mxu3 %v11506_v0  ;;  %v3114_v49 = vmul.f32 %v9724_v63, %v11482_v30  ;;  %vm3119_vm10 = vweird.f32 %v9724_v63 }
 0xaf6   :  { %4581 = vmatpush.bf16.msra.mxu0 %v11502_v21  ;;  %13918 = vst [vmem:[#allocation283_spill] sm:$0xff] %v11515_v11  ;;  %v8846_v35 = vld [vmem:[#allocation9 + $0x6c8] sm:$0xf]  ;;  %v3141_v24 = vsel %vm3138_vm6, %v3140_v29, %v3136_v53  ;;  %v11518_v58 = vor.u32 %v9483_v37, %v8462_v14  ;;  %v3122_v29 = vand.u32 2147483647, %v11482_v30  ;;  %vm3120_vm12 = vmor %vm3118_vm11, %vm3119_vm10  ;;  %v9726_v21 = vpop.eup %9725 }
 0xaf7   :  { %v9579_v31 = vld [vmem:[#allocation9 + $0x6e4] sm:$0xf0]  ;;  %v3152_v9 = vmul.f32 %v9722_v19, %v3141_v24  ;;  %v3115_v1 = vsub.f32 1.0, %v3114_v49  ;;  %v8720_v53 = vld [vmem:[#allocation9 + $0x5e8] sm:$0xf0] }
 0xaf8   :  { %v8526_v23 = vld [vmem:[#allocation9 + $0x448] sm:$0xf]  ;;  %13919 = vst [vmem:[#allocation284_spill] sm:$0xff] %v11518_v58  ;;  %v11521_v45 = vor.u32 %v9579_v31, %v8846_v35  ;;  %v9543_v35 = vld [vmem:[#allocation9 + $0x5cc] sm:$0xf]  ;;  %vm3123_vm13 = vcmp.eq.f32.partialorder %v3122_v29, 8.507059e+37 }
 0xaf9   :  { %v9499_v36 = vld [vmem:[#allocation9 + $0x464] sm:$0xf0]  ;;  %v11524_v2 = vpack.c.bf16 %v3152_v9, %v3152_v9  ;;  %4571 = vmatpush.bf16.msrb.mxu3 %v11515_v11  ;;  %v3116_v19 = vmul.f32 %v9724_v63, %v3115_v1 }
 0xafa   :  { %v8430_v28 = vld [vmem:[#allocation9 + $0x388] sm:$0xf]  ;;  %4582 = vmatpush.bf16.msra.mxu0 %v11512_v20  ;;  %13920 = vst [vmem:[#allocation285_spill] sm:$0xff] %v11521_v45  ;;  %v11528_v43 = vor.u32 %v9499_v36, %v8526_v23  ;;  %v3125_v36 = vor.u32 1.1754944e-38, %v3124_v47 }
 0xafb   :  { %v9475_v25 = vld [vmem:[#allocation9 + $0x3a4] sm:$0xf0]  ;;  %4457 = vmatmul.bf16.vlgmr.msra.gmra.mxu2 %v11524_v2  ;;  %v3117_v9 = vadd.f32 %v9724_v63, %v3116_v19 }
 0xafc   :  { %13921 = vst [vmem:[#allocation286_spill] sm:$0xff] %v11528_v43  ;;  %v8814_v24 = vld [vmem:[#allocation9 + $0x688] sm:$0xf]  ;;  %4553 = vmatpush.bf16.msra.mxu2 %v11518_v58  ;;  %v11534_v31 = vor.u32 %v9475_v25, %v8430_v28  ;;  %v11543_v58 = vor.u32 %v9543_v35, %v8720_v53 }
 0xafd   :  { %v9571_v34 = vld [vmem:[#allocation9 + $0x6a4] sm:$0xf0]  ;;  %4572 = vmatpush.bf16.msrb.mxu3 %v11528_v43  ;;  %v3121_v30 = vsel %vm3120_vm12, %v9724_v63, %v3117_v9  ;;  %v8656_v9 = vld [vmem:[#allocation9 + $0x568] sm:$0xf0] }
 0xafe   :  { %v8494_v14 = vld [vmem:[#allocation9 + $0x408] sm:$0xf]  ;;  %13922 = vst [vmem:[#allocation287_spill] sm:$0xff] %v11534_v31  ;;  %4583 = vmatpush.bf16.msra.mxu0 %v11521_v45  ;;  %v11537_v1 = vor.u32 %v9571_v34, %v8814_v24  ;;  %v3126_v11 = vsel %vm3123_vm13, %v3125_v36, %v3121_v30  ;;  %v9535_v45 = vld [vmem:[#allocation9 + $0x58c] sm:$0xf] }
 0xaff   :  { %v9491_v37 = vld [vmem:[#allocation9 + $0x424] sm:$0xf0]  ;;  %13925 = vst [vmem:[#allocation290_spill] sm:$0xff] %v11543_v58  ;;  %v8688_v24 = vld [vmem:[#allocation9 + $0x5a8] sm:$0xf0]  ;;  %v3151_v34 = vmul.f32 %v9726_v21, %v3126_v11 }
 0xb00   :  { %v8206_v23 = vld [vmem:[#allocation9 + $0x1c8] sm:$0xf]  ;;  %13923 = vst [vmem:[#allocation288_spill] sm:$0xff] %v11537_v1  ;;  %v11541_v19 = vor.u32 %v9491_v37, %v8494_v14  ;;  %4554 = vmatpush.bf16.msra.mxu2 %v11534_v31  ;;  %v11557_v11 = vor.u32 %v9535_v45, %v8688_v24  ;;  %v9607_v36 = vld [vmem:[#allocation9 + $0x7cc] sm:$0xf] }
 0xb01   :  { %v9419_v49 = vld [vmem:[#allocation9 + $0x1e4] sm:$0xf0]  ;;  %v11554_v53 = vpack.c.bf16 %v3151_v34, %v3151_v34 }
 0xb02   :  { %v8398_v13 = vld [vmem:[#allocation9 + $0x348] sm:$0xf]  ;;  %13924 = vst [vmem:[#allocation289_spill] sm:$0xff] %v11541_v19  ;;  %4584 = vmatpush.bf16.msra.mxu0 %v11537_v1  ;;  %v11549_v14 = vor.u32 %v9419_v49, %v8206_v23  ;;  %4573 = vmatpush.bf16.msrb.mxu3 %v11541_v19  ;;  %v8976_v23 = vld [vmem:[#allocation9 + $0x7e8] sm:$0xf0] }
 0xb03   :  { %v9467_v20 = vld [vmem:[#allocation9 + $0x364] sm:$0xf0]  ;;  %13929 = vst [vmem:[#allocation294_spill] sm:$0xff] %v11557_v11  ;;  %4444 = vmatmul.bf16.vlgmr.msra.gmra.mxu1 %v11554_v53  ;;  %v11572_v1 = vor.u32 %v9607_v36, %v8976_v23  ;;  %v9581_v19 = vld [vmem:[#allocation9 + $0x6f4] sm:$0xf0] }
 0xb04   :  { %v8782_v28 = vld [vmem:[#allocation9 + $0x648] sm:$0xf]  ;;  %v11546_v47 = vor.u32 %v9467_v20, %v8398_v13  ;;  %13927 = vst [vmem:[#allocation292_spill] sm:$0xff] %v11549_v14  ;;  %v9527_v20 = vld [vmem:[#allocation9 + $0x54c] sm:$0xf]  ;;  %4540 = vmatpush.bf16.msra.mxu1 %v11549_v14 }
 0xb05   :  { %v9563_v25 = vld [vmem:[#allocation9 + $0x664] sm:$0xf0]  ;;  %v11570_v31 = vor.u32 %v9527_v20, %v8656_v9  ;;  %13934 = vst [vmem:[#allocation299_spill] sm:$0xff] %v11572_v1  ;;  %4574 = vmatmul.bf16.vlgmr.msrb.gmra.mxu3 %v13916_v40 }
 0xb06   :  { %13926 = vst [vmem:[#allocation291_spill] sm:$0xff] %v11546_v47  ;;  %v8174_v0 = vld [vmem:[#allocation9 + $0x188] sm:$0xf]  ;;  %v11552_v35 = vor.u32 %v9563_v25, %v8782_v28  ;;  %4618 = vmatpush.bf16.msra.mxu3 %v11543_v58  ;;  %4555 = vmatpush.bf16.msra.mxu2 %v11546_v47 }
 0xb07   :  { %v9411_v63 = vld [vmem:[#allocation9 + $0x1a4] sm:$0xf0]  ;;  %13933 = vst [vmem:[#allocation298_spill] sm:$0xff] %v11570_v31 }
 0xb08   :  { %v8366_v29 = vld [vmem:[#allocation9 + $0x308] sm:$0xf]  ;;  %13928 = vst [vmem:[#allocation293_spill] sm:$0xff] %v11552_v35  ;;  %v11564_v30 = vor.u32 %v9411_v63, %v8174_v0  ;;  %4585 = vmatpush.bf16.msra.mxu0 %v11552_v35  ;;  %v9599_v0 = vld [vmem:[#allocation9 + $0x78c] sm:$0xf] }
 0xb09   :  { %v9459_v37 = vld [vmem:[#allocation9 + $0x324] sm:$0xf0]  ;;  %v8944_v63 = vld [vmem:[#allocation9 + $0x7a8] sm:$0xf0] }
 0xb0a   :  { %v8750_v13 = vld [vmem:[#allocation9 + $0x608] sm:$0xf]  ;;  %v11561_v49 = vor.u32 %v9459_v37, %v8366_v29  ;;  %13931 = vst [vmem:[#allocation296_spill] sm:$0xff] %v11564_v30  ;;  %4619 = vmatpush.bf16.msra.mxu3 %v11557_v11  ;;  %v9519_v29 = vld [vmem:[#allocation9 + $0x50c] sm:$0xf]  ;;  %4541 = vmatpush.bf16.msra.mxu1 %v11564_v30  ;;  %v11586_v23 = vor.u32 %v9599_v0, %v8944_v63 }
 0xb0b   :  { %v9555_v21 = vld [vmem:[#allocation9 + $0x624] sm:$0xf0]  ;;  %v8624_v37 = vld [vmem:[#allocation9 + $0x528] sm:$0xf0]  ;;  %4509 = vmatmul.bf16.vlgmr.msrb.gmra.mxu2 %v11524_v2 }
 0xb0c   :  { %13930 = vst [vmem:[#allocation295_spill] sm:$0xff] %v11561_v49  ;;  %v8334_v28 = vld [vmem:[#allocation9 + $0x2c8] sm:$0xf]  ;;  %v11567_v45 = vor.u32 %v9555_v21, %v8750_v13  ;;  %4556 = vmatpush.bf16.msra.mxu2 %v11561_v49  ;;  %v11584_v36 = vor.u32 %v9519_v29, %v8624_v37  ;;  %v8848_v11 = vld [vmem:[#allocation9 + $0x6e8] sm:$0xf0] }
 0xb0d   :  { %v9451_v25 = vld [vmem:[#allocation9 + $0x2e4] sm:$0xf0]  ;;  %13938 = vst [vmem:[#allocation303_spill] sm:$0xff] %v11586_v23 }
 0xb0e   :  { %13932 = vst [vmem:[#allocation297_spill] sm:$0xff] %v11567_v45  ;;  %v8142_v24 = vld [vmem:[#allocation9 + $0x148] sm:$0xf]  ;;  %v11576_v14 = vor.u32 %v9451_v25, %v8334_v28  ;;  %4586 = vmatpush.bf16.msra.mxu0 %v11567_v45  ;;  %4620 = vmatpush.bf16.msra.mxu3 %v11570_v31  ;;  %v9511_v28 = vld [vmem:[#allocation9 + $0x4cc] sm:$0xf] }
 0xb0f   :  { %v9403_v34 = vld [vmem:[#allocation9 + $0x164] sm:$0xf0]  ;;  %13937 = vst [vmem:[#allocation302_spill] sm:$0xff] %v11584_v36  ;;  %v8592_v25 = vld [vmem:[#allocation9 + $0x4e8] sm:$0xf0] }
 0xb10   :  { %13935 = vst [vmem:[#allocation300_spill] sm:$0xff] %v11576_v14  ;;  %v11579_v13 = vor.u32 %v9403_v34, %v8142_v24  ;;  %v8302_v21 = vld [vmem:[#allocation9 + $0x288] sm:$0xf]  ;;  %v9591_v24 = vld [vmem:[#allocation9 + $0x74c] sm:$0xf]  ;;  %4557 = vmatpush.bf16.msra.mxu2 %v11576_v14 }
 0xb11   :  { %v9443_v47 = vld [vmem:[#allocation9 + $0x2a4] sm:$0xf0]  ;;  %v8912_v34 = vld [vmem:[#allocation9 + $0x768] sm:$0xf0]  ;;  %4587 = vmatmul.bf16.vlgmr.msra.gmra.mxu0 %v13916_v40 }
 0xb12   :  { %13936 = vst [vmem:[#allocation301_spill] sm:$0xff] %v11579_v13  ;;  %v8110_v20 = vld [vmem:[#allocation9 + $0x108] sm:$0xf]  ;;  %4631 = vmatpush.bf16.msrb.mxu0 %v11572_v1  ;;  %v11590_v30 = vor.u32 %v9443_v47, %v8302_v21  ;;  %4542 = vmatpush.bf16.msra.mxu1 %v11579_v13  ;;  %v11598_v1 = vor.u32 %v9511_v28, %v8592_v25  ;;  %v9503_v47 = vld [vmem:[#allocation9 + $0x48c] sm:$0xf] }
 0xb13   :  { %v9395_v9 = vld [vmem:[#allocation9 + $0x124] sm:$0xf0]  ;;  %4621 = vmatpush.bf16.msra.mxu3 %v11584_v36  ;;  %v11600_v45 = vor.u32 %v9591_v24, %v8912_v34  ;;  %v8560_v21 = vld [vmem:[#allocation9 + $0x4a8] sm:$0xf0]  ;;  %4496 = vmatmul.bf16.vlgmr.msrb.gmra.mxu1 %v11554_v53 }
 0xb14   :  { %13939 = vst [vmem:[#allocation304_spill] sm:$0xff] %v11590_v30  ;;  %v11594_v49 = vor.u32 %v9395_v9, %v8110_v20  ;;  %v8270_v29 = vld [vmem:[#allocation9 + $0x248] sm:$0xf]  ;;  %v9583_v14 = vld [vmem:[#allocation9 + $0x70c] sm:$0xf]  ;;  %4558 = vmatpush.bf16.msra.mxu2 %v11590_v30  ;;  %v11610_v24 = vor.u32 %v9503_v47, %v8560_v21 }
 0xb15   :  { %v9435_v37 = vld [vmem:[#allocation9 + $0x264] sm:$0xf0]  ;;  %13941 = vst [vmem:[#allocation306_spill] sm:$0xff] %v11598_v1  ;;  %v8880_v31 = vld [vmem:[#allocation9 + $0x728] sm:$0xf0] }
 0xb16   :  { %13940 = vst [vmem:[#allocation305_spill] sm:$0xff] %v11594_v49  ;;  %v8078_v0 = vld [vmem:[#allocation9 + $0xc8] sm:$0xf]  ;;  %4632 = vmatpush.bf16.msrb.mxu0 %v11586_v23  ;;  %v11603_v20 = vor.u32 %v9435_v37, %v8270_v29  ;;  %4543 = vmatpush.bf16.msra.mxu1 %v11594_v49  ;;  %v9479_v28 = vld [vmem:[#allocation9 + $0x3cc] sm:$0xf]  ;;  %v11612_v34 = vor.u32 %v9583_v14, %v8880_v31 }
 0xb17   :  { %v9387_v63 = vld [vmem:[#allocation9 + $0xe4] sm:$0xf0]  ;;  %13942 = vst [vmem:[#allocation307_spill] sm:$0xff] %v11600_v45  ;;  %v8464_v25 = vld [vmem:[#allocation9 + $0x3e8] sm:$0xf0]  ;;  %4622 = vmatpush.bf16.msra.mxu3 %v11598_v1 }
 0xb18   :  { %13943 = vst [vmem:[#allocation308_spill] sm:$0xff] %v11603_v20  ;;  %v8046_v9 = vld [vmem:[#allocation9 + $0x88] sm:$0xf]  ;;  %v11606_v13 = vor.u32 %v9387_v63, %v8078_v0  ;;  %v9495_v29 = vld [vmem:[#allocation9 + $0x44c] sm:$0xf]  ;;  %4559 = vmatpush.bf16.msra.mxu2 %v11603_v20  ;;  %v11621_v47 = vor.u32 %v9479_v28, %v8464_v25 }
 0xb19   :  { %v9379_v36 = vld [vmem:[#allocation9 + $0xa4] sm:$0xf0]  ;;  %13945 = vst [vmem:[#allocation310_spill] sm:$0xff] %v11610_v24  ;;  %v8528_v37 = vld [vmem:[#allocation9 + $0x468] sm:$0xf0] }
 0xb1a   :  { %13944 = vst [vmem:[#allocation309_spill] sm:$0xff] %v11606_v13  ;;  %v8238_v35 = vld [vmem:[#allocation9 + $0x208] sm:$0xf]  ;;  %4633 = vmatpush.bf16.msrb.mxu0 %v11600_v45  ;;  %v9575_v30 = vld [vmem:[#allocation9 + $0x6cc] sm:$0xf]  ;;  %4544 = vmatpush.bf16.msra.mxu1 %v11606_v13  ;;  %v11619_v63 = vor.u32 %v9379_v36, %v8046_v9  ;;  %v11625_v21 = vor.u32 %v9495_v29, %v8528_v37 }
 0xb1b   :  { %v9427_v23 = vld [vmem:[#allocation9 + $0x224] sm:$0xf0]  ;;  %13946 = vst [vmem:[#allocation311_spill] sm:$0xff] %v11612_v34  ;;  %v9471_v31 = vld [vmem:[#allocation9 + $0x38c] sm:$0xf]  ;;  %4623 = vmatpush.bf16.msra.mxu3 %v11610_v24  ;;  %v11627_v1 = vor.u32 %v9575_v30, %v8848_v11 }
 0xb1c   :  { %v11616_v0 = vor.u32 %v9427_v23, %v8238_v35  ;;  %13948 = vst [vmem:[#allocation313_spill] sm:$0xff] %v11619_v63  ;;  %v8014_v49 = vld [vmem:[#allocation9 + $0x48] sm:$0xf]  ;;  %v8432_v14 = vld [vmem:[#allocation9 + $0x3a8] sm:$0xf0] }
 0xb1d   :  { %v9371_v45 = vld [vmem:[#allocation9 + $0x64] sm:$0xf0]  ;;  %13949 = vst [vmem:[#allocation314_spill] sm:$0xff] %v11621_v47  ;;  %v9487_v35 = vld [vmem:[#allocation9 + $0x40c] sm:$0xf]  ;;  %v11634_v29 = vor.u32 %v9471_v31, %v8432_v14 }
 0xb1e   :  { %13947 = vst [vmem:[#allocation312_spill] sm:$0xff] %v11616_v0  ;;  %4634 = vmatpush.bf16.msrb.mxu0 %v11612_v34  ;;  %v8496_v23 = vld [vmem:[#allocation9 + $0x428] sm:$0xf0]  ;;  %4560 = vmatpush.bf16.msra.mxu2 %v11616_v0  ;;  %v8726_v36 = vld [vmem:[#allocation9 + $0x5d0] sm:$0xf]  ;;  %v11631_v28 = vor.u32 %v9371_v45, %v8014_v49 }
 0xb1f   :  { %13950 = vst [vmem:[#allocation315_spill] sm:$0xff] %v11625_v21  ;;  %v9567_v20 = vld [vmem:[#allocation9 + $0x68c] sm:$0xf]  ;;  %v9548_v9 = vld [vmem:[#allocation9 + $0x5ec] sm:$0xf0]  ;;  %4545 = vmatpush.bf16.msra.mxu1 %v11619_v63  ;;  %4624 = vmatpush.bf16.msra.mxu3 %v11625_v21  ;;  %v11638_v0 = vor.u32 %v9487_v35, %v8496_v23 }
 0xb20   :  { %13951 = vst [vmem:[#allocation316_spill] sm:$0xff] %v11627_v1  ;;  %v8816_v13 = vld [vmem:[#allocation9 + $0x6a8] sm:$0xf0]  ;;  %v7982_v25 = vld [vmem:[#allocation9 + $0x8] sm:$0xf]  ;;  %v11643_v45 = vor.u32 %v9548_v9, %v8726_v36 }
 0xb21   :  { %13952 = vst [vmem:[#allocation317_spill] sm:$0xff] %v11631_v28  ;;  %v9363_v34 = vld [vmem:[#allocation9 + $0x24] sm:$0xf0]  ;;  %v9415_v11 = vld [vmem:[#allocation9 + $0x1cc] sm:$0xf]  ;;  %v11640_v24 = vor.u32 %v9567_v20, %v8816_v13  ;;  %4561 = vmatmul.bf16.vlgmr.msra.gmra.mxu2 %v11524_v2 }
 0xb22   :  { %4605 = vmatpush.bf16.msrb.mxu2 %v11621_v47  ;;  %13953 = vst [vmem:[#allocation318_spill] sm:$0xff] %v11634_v29  ;;  %v9463_v30 = vld [vmem:[#allocation9 + $0x34c] sm:$0xf]  ;;  %4635 = vmatpush.bf16.msrb.mxu0 %v11627_v1  ;;  %v8694_v31 = vld [vmem:[#allocation9 + $0x590] sm:$0xf]  ;;  %v11646_v58 = vor.u32 %v9363_v34, %v7982_v25 }
 0xb23   :  { %v8400_v37 = vld [vmem:[#allocation9 + $0x368] sm:$0xf0]  ;;  %13954 = vst [vmem:[#allocation319_spill] sm:$0xff] %v11638_v0  ;;  %v9540_v14 = vld [vmem:[#allocation9 + $0x5ac] sm:$0xf0]  ;;  %4546 = vmatpush.bf16.msra.mxu1 %v11631_v28  ;;  %4625 = vmatpush.bf16.msra.mxu3 %v11638_v0 }
 0xb24   :  { %13955 = vst [vmem:[#allocation320_spill] sm:$0xff] %v11640_v24  ;;  %v8208_v49 = vld [vmem:[#allocation9 + $0x1e8] sm:$0xf0]  ;;  %v11649_v1 = vor.u32 %v9463_v30, %v8400_v37  ;;  %v11658_v34 = vor.u32 %v9540_v14, %v8694_v31  ;;  %v8662_v30 = vld [vmem:[#allocation9 + $0x550] sm:$0xf] }
 0xb25   :  { %13956 = vst [vmem:[#allocation321_spill] sm:$0xff] %v11643_v45  ;;  %v9559_v63 = vld [vmem:[#allocation9 + $0x64c] sm:$0xf]  ;;  %v11651_v13 = vor.u32 %v9415_v11, %v8208_v49  ;;  %v9532_v37 = vld [vmem:[#allocation9 + $0x56c] sm:$0xf0] }
 0xb26   :  { %v8784_v47 = vld [vmem:[#allocation9 + $0x668] sm:$0xf0]  ;;  %13957 = vst [vmem:[#allocation322_spill] sm:$0xff] %v11646_v58  ;;  %4606 = vmatpush.bf16.msrb.mxu2 %v11634_v29  ;;  %4636 = vmatpush.bf16.msrb.mxu0 %v11640_v24  ;;  %v8982_v28 = vld [vmem:[#allocation9 + $0x7d0] sm:$0xf] }
 0xb27   :  { %13958 = vst [vmem:[#allocation323_spill] sm:$0xff] %v11649_v1  ;;  %v9407_v35 = vld [vmem:[#allocation9 + $0x18c] sm:$0xf]  ;;  %v11655_v36 = vor.u32 %v9559_v63, %v8784_v47  ;;  %4670 = vmatpush.bf16.msrb.mxu3 %v11643_v45  ;;  %v9612_v11 = vld [vmem:[#allocation9 + $0x7ec] sm:$0xf0]  ;;  %4547 = vmatpush.bf16.msra.mxu1 %v11646_v58  ;;  %v11671_v45 = vor.u32 %v9532_v37, %v8662_v30 }
 0xb28   :  { %13959 = vst [vmem:[#allocation324_spill] sm:$0xff] %v11651_v13  ;;  %v8176_v20 = vld [vmem:[#allocation9 + $0x1a8] sm:$0xf0]  ;;  %v11673_v58 = vor.u32 %v9612_v11, %v8982_v28  ;;  %4626 = vmatmul.bf16.vlgmr.msra.gmra.mxu3 %v13916_v40 }
 0xb29   :  { %v9455_v23 = vld [vmem:[#allocation9 + $0x30c] sm:$0xf]  ;;  %13960 = vst [vmem:[#allocation325_spill] sm:$0xff] %v11655_v36  ;;  %v11665_v63 = vor.u32 %v9407_v35, %v8176_v20  ;;  %v9524_v35 = vld [vmem:[#allocation9 + $0x52c] sm:$0xf0] }
 0xb2a   :  { %v8368_v21 = vld [vmem:[#allocation9 + $0x328] sm:$0xf0]  ;;  %13961 = vst [vmem:[#allocation326_spill] sm:$0xff] %v11658_v34  ;;  %4607 = vmatpush.bf16.msrb.mxu2 %v11649_v1  ;;  %4637 = vmatpush.bf16.msrb.mxu0 %v11655_v36  ;;  %v8950_v20 = vld [vmem:[#allocation9 + $0x790] sm:$0xf] }
 0xb2b   :  { %v9551_v9 = vld [vmem:[#allocation9 + $0x60c] sm:$0xf]  ;;  %v11662_v49 = vor.u32 %v9455_v23, %v8368_v21  ;;  %4592 = vmatpush.bf16.msrb.mxu1 %v11651_v13  ;;  %13963 = vst [vmem:[#allocation328_spill] sm:$0xff] %v11665_v63  ;;  %4671 = vmatpush.bf16.msrb.mxu3 %v11658_v34  ;;  %v8630_v21 = vld [vmem:[#allocation9 + $0x510] sm:$0xf] }
 0xb2c   :  { %v8752_v25 = vld [vmem:[#allocation9 + $0x628] sm:$0xf0]  ;;  %13965 = vst [vmem:[#allocation330_spill] sm:$0xff] %v11671_v45  ;;  %4548 = vmatmul.bf16.vlgmr.msra.gmra.mxu1 %v11554_v53  ;;  %v9604_v23 = vld [vmem:[#allocation9 + $0x7ac] sm:$0xf0]  ;;  %v11686_v13 = vor.u32 %v9524_v35, %v8630_v21 }
 0xb2d   :  { %13962 = vst [vmem:[#allocation327_spill] sm:$0xff] %v11662_v49  ;;  %v9447_v47 = vld [vmem:[#allocation9 + $0x2cc] sm:$0xf]  ;;  %v11668_v31 = vor.u32 %v9551_v9, %v8752_v25  ;;  %v11688_v1 = vor.u32 %v9604_v23, %v8950_v20  ;;  %v9580_v34 = vld [vmem:[#allocation9 + $0x6ec] sm:$0xf0] }
 0xb2e   :  { %v8336_v29 = vld [vmem:[#allocation9 + $0x2e8] sm:$0xf0]  ;;  %13966 = vst [vmem:[#allocation331_spill] sm:$0xff] %v11673_v58  ;;  %4608 = vmatpush.bf16.msrb.mxu2 %v11662_v49  ;;  %v8918_v49 = vld [vmem:[#allocation9 + $0x750] sm:$0xf] }
 0xb2f   :  { %13964 = vst [vmem:[#allocation329_spill] sm:$0xff] %v11668_v31  ;;  %v9399_v14 = vld [vmem:[#allocation9 + $0x14c] sm:$0xf]  ;;  %v11678_v9 = vor.u32 %v9447_v47, %v8336_v29  ;;  %4593 = vmatpush.bf16.msrb.mxu1 %v11665_v63  ;;  %4638 = vmatpush.bf16.msrb.mxu0 %v11668_v31  ;;  %v8598_v29 = vld [vmem:[#allocation9 + $0x4d0] sm:$0xf] }
 0xb30   :  { %v8144_v24 = vld [vmem:[#allocation9 + $0x168] sm:$0xf0]  ;;  %4672 = vmatpush.bf16.msrb.mxu3 %v11671_v45  ;;  %13969 = vst [vmem:[#allocation334_spill] sm:$0xff] %v11686_v13  ;;  %v9516_v47 = vld [vmem:[#allocation9 + $0x4ec] sm:$0xf0] }
 0xb31   :  { %13967 = vst [vmem:[#allocation332_spill] sm:$0xff] %v11678_v9  ;;  %v11681_v25 = vor.u32 %v9399_v14, %v8144_v24  ;;  %v9439_v30 = vld [vmem:[#allocation9 + $0x28c] sm:$0xf]  ;;  %v9596_v63 = vld [vmem:[#allocation9 + $0x76c] sm:$0xf0]  ;;  %v11699_v20 = vor.u32 %v9516_v47, %v8598_v29 }
 0xb32   :  { %v8304_v37 = vld [vmem:[#allocation9 + $0x2a8] sm:$0xf0]  ;;  %13970 = vst [vmem:[#allocation335_spill] sm:$0xff] %v11688_v1  ;;  %4609 = vmatpush.bf16.msrb.mxu2 %v11678_v9  ;;  %4639 = vmatmul.bf16.vlgmr.msrb.gmra.mxu0 %v13916_v40  ;;  %v11701_v23 = vor.u32 %v9596_v63, %v8918_v49  ;;  %v8886_v9 = vld [vmem:[#allocation9 + $0x710] sm:$0xf] }
 0xb33   :  { %13968 = vst [vmem:[#allocation333_spill] sm:$0xff] %v11681_v25  ;;  %v9391_v28 = vld [vmem:[#allocation9 + $0x10c] sm:$0xf]  ;;  %4683 = vmatpush.bf16.msra.mxu0 %v11673_v58  ;;  %v11691_v24 = vor.u32 %v9439_v30, %v8304_v37  ;;  %4594 = vmatpush.bf16.msrb.mxu1 %v11681_v25  ;;  %v8566_v30 = vld [vmem:[#allocation9 + $0x490] sm:$0xf] }
 0xb34   :  { %v8112_v11 = vld [vmem:[#allocation9 + $0x128] sm:$0xf0]  ;;  %4673 = vmatpush.bf16.msrb.mxu3 %v11686_v13  ;;  %13973 = vst [vmem:[#allocation338_spill] sm:$0xff] %v11699_v20  ;;  %v9508_v37 = vld [vmem:[#allocation9 + $0x4ac] sm:$0xf0] }
 0xb35   :  { %13971 = vst [vmem:[#allocation336_spill] sm:$0xff] %v11691_v24  ;;  %v11695_v14 = vor.u32 %v9391_v28, %v8112_v11  ;;  %v9431_v31 = vld [vmem:[#allocation9 + $0x24c] sm:$0xf]  ;;  %v9588_v45 = vld [vmem:[#allocation9 + $0x72c] sm:$0xf0]  ;;  %v11711_v49 = vor.u32 %v9508_v37, %v8566_v30 }
 0xb36   :  { %v8272_v58 = vld [vmem:[#allocation9 + $0x268] sm:$0xf0]  ;;  %13974 = vst [vmem:[#allocation339_spill] sm:$0xff] %v11701_v23  ;;  %4610 = vmatpush.bf16.msrb.mxu2 %v11691_v24  ;;  %v8470_v29 = vld [vmem:[#allocation9 + $0x3d0] sm:$0xf]  ;;  %v11713_v63 = vor.u32 %v9588_v45, %v8886_v9 }
 0xb37   :  { %13972 = vst [vmem:[#allocation337_spill] sm:$0xff] %v11695_v14  ;;  %v9383_v21 = vld [vmem:[#allocation9 + $0xcc] sm:$0xf]  ;;  %4684 = vmatpush.bf16.msra.mxu0 %v11688_v1  ;;  %v11704_v28 = vor.u32 %v9431_v31, %v8272_v58  ;;  %4595 = vmatpush.bf16.msrb.mxu1 %v11695_v14  ;;  %v9484_v47 = vld [vmem:[#allocation9 + $0x3ec] sm:$0xf0] }
 0xb38   :  { %v8080_v35 = vld [vmem:[#allocation9 + $0xe8] sm:$0xf0]  ;;  %4674 = vmatpush.bf16.msrb.mxu3 %v11699_v20  ;;  %13977 = vst [vmem:[#allocation342_spill] sm:$0xff] %v11711_v49  ;;  %v8534_v58 = vld [vmem:[#allocation9 + $0x450] sm:$0xf]  ;;  %v11721_v0 = vor.u32 %v9484_v47, %v8470_v29 }
 0xb39   :  { %13975 = vst [vmem:[#allocation340_spill] sm:$0xff] %v11704_v28  ;;  %v9375_v11 = vld [vmem:[#allocation9 + $0x8c] sm:$0xf]  ;;  %v11707_v25 = vor.u32 %v9383_v21, %v8080_v35  ;;  %v9500_v31 = vld [vmem:[#allocation9 + $0x46c] sm:$0xf0] }
 0xb3a   :  { %v8048_v13 = vld [vmem:[#allocation9 + $0xa8] sm:$0xf0]  ;;  %13978 = vst [vmem:[#allocation343_spill] sm:$0xff] %v11713_v63  ;;  %v8854_v24 = vld [vmem:[#allocation9 + $0x6d0] sm:$0xf]  ;;  %4611 = vmatpush.bf16.msrb.mxu2 %v11704_v28  ;;  %v11725_v45 = vor.u32 %v9500_v31, %v8534_v58 }
 0xb3b   :  { %13976 = vst [vmem:[#allocation341_spill] sm:$0xff] %v11707_v25  ;;  %v9423_v36 = vld [vmem:[#allocation9 + $0x20c] sm:$0xf]  ;;  %4685 = vmatpush.bf16.msra.mxu0 %v11701_v23  ;;  %4596 = vmatpush.bf16.msrb.mxu1 %v11707_v25  ;;  %v11719_v35 = vor.u32 %v9375_v11, %v8048_v13  ;;  %v8438_v30 = vld [vmem:[#allocation9 + $0x390] sm:$0xf]  ;;  %v11727_v9 = vor.u32 %v9580_v34, %v8854_v24 }
 0xb3c   :  { %v8240_v1 = vld [vmem:[#allocation9 + $0x228] sm:$0xf0]  ;;  %13981 = vst [vmem:[#allocation346_spill] sm:$0xff] %v11721_v0  ;;  %v9476_v37 = vld [vmem:[#allocation9 + $0x3ac] sm:$0xf0]  ;;  %4675 = vmatpush.bf16.msrb.mxu3 %v11711_v49 }
 0xb3d   :  { %v11716_v21 = vor.u32 %v9423_v36, %v8240_v1  ;;  %13980 = vst [vmem:[#allocation345_spill] sm:$0xff] %v11719_v35  ;;  %v9367_v14 = vld [vmem:[#allocation9 + $0x4c] sm:$0xf]  ;;  %v8502_v1 = vld [vmem:[#allocation9 + $0x410] sm:$0xf]  ;;  %v11734_v58 = vor.u32 %v9476_v37, %v8438_v30 }
 0xb3e   :  { %v8016_v20 = vld [vmem:[#allocation9 + $0x68] sm:$0xf0]  ;;  %13982 = vst [vmem:[#allocation347_spill] sm:$0xff] %v11725_v45  ;;  %v9492_v36 = vld [vmem:[#allocation9 + $0x42c] sm:$0xf0] }
 0xb3f   :  { %13979 = vst [vmem:[#allocation344_spill] sm:$0xff] %v11716_v21  ;;  %4686 = vmatpush.bf16.msra.mxu0 %v11713_v63  ;;  %v8822_v28 = vld [vmem:[#allocation9 + $0x690] sm:$0xf]  ;;  %4612 = vmatpush.bf16.msrb.mxu2 %v11716_v21  ;;  %v9544_v13 = vld [vmem:[#allocation9 + $0x5d4] sm:$0xf]  ;;  %v11731_v29 = vor.u32 %v9367_v14, %v8016_v20  ;;  %v11738_v21 = vor.u32 %v9492_v36, %v8502_v1 }
 0xb40   :  { %13983 = vst [vmem:[#allocation348_spill] sm:$0xff] %v11727_v9  ;;  %v9572_v25 = vld [vmem:[#allocation9 + $0x6ac] sm:$0xf0]  ;;  %v8728_v11 = vld [vmem:[#allocation9 + $0x5f0] sm:$0xf0]  ;;  %4597 = vmatpush.bf16.msrb.mxu1 %v11719_v35  ;;  %4676 = vmatpush.bf16.msrb.mxu3 %v11725_v45 }
 0xb41   :  { %13984 = vst [vmem:[#allocation349_spill] sm:$0xff] %v11731_v29  ;;  %v9359_v47 = vld [vmem:[#allocation9 + $0xc] sm:$0xf]  ;;  %v8214_v34 = vld [vmem:[#allocation9 + $0x1d0] sm:$0xf]  ;;  %v11740_v23 = vor.u32 %v9572_v25, %v8822_v28  ;;  %v11743_v20 = vor.u32 %v9544_v13, %v8728_v11 }
 0xb42   :  { %v7984_v63 = vld [vmem:[#allocation9 + $0x28] sm:$0xf0]  ;;  %13985 = vst [vmem:[#allocation350_spill] sm:$0xff] %v11734_v58  ;;  %v8406_v24 = vld [vmem:[#allocation9 + $0x350] sm:$0xf]  ;;  %4613 = vmatmul.bf16.vlgmr.msrb.gmra.mxu2 %v11524_v2 }
 0xb43   :  { %4657 = vmatpush.bf16.msra.mxu2 %v11721_v0  ;;  %v9468_v31 = vld [vmem:[#allocation9 + $0x36c] sm:$0xf0]  ;;  %4687 = vmatpush.bf16.msra.mxu0 %v11727_v9  ;;  %13986 = vst [vmem:[#allocation351_spill] sm:$0xff] %v11738_v21  ;;  %v9536_v30 = vld [vmem:[#allocation9 + $0x594] sm:$0xf]  ;;  %v11746_v49 = vor.u32 %v9359_v47, %v7984_v63 }
 0xb44   :  { %13987 = vst [vmem:[#allocation352_spill] sm:$0xff] %v11740_v23  ;;  %v9420_v14 = vld [vmem:[#allocation9 + $0x1ec] sm:$0xf0]  ;;  %v8696_v37 = vld [vmem:[#allocation9 + $0x5b0] sm:$0xf0]  ;;  %4598 = vmatpush.bf16.msrb.mxu1 %v11731_v29  ;;  %v11749_v9 = vor.u32 %v9468_v31, %v8406_v24  ;;  %4677 = vmatpush.bf16.msrb.mxu3 %v11738_v21 }
 0xb45   :  { %13988 = vst [vmem:[#allocation353_spill] sm:$0xff] %v11743_v20  ;;  %v8790_v35 = vld [vmem:[#allocation9 + $0x650] sm:$0xf]  ;;  %v11751_v25 = vor.u32 %v9420_v14, %v8214_v34  ;;  %v11758_v63 = vor.u32 %v9536_v30, %v8696_v37  ;;  %v9528_v24 = vld [vmem:[#allocation9 + $0x554] sm:$0xf] }
 0xb46   :  { %v9564_v0 = vld [vmem:[#allocation9 + $0x66c] sm:$0xf0]  ;;  %13989 = vst [vmem:[#allocation354_spill] sm:$0xff] %v11746_v49  ;;  %v8664_v31 = vld [vmem:[#allocation9 + $0x570] sm:$0xf0] }
 0xb47   :  { %4658 = vmatpush.bf16.msra.mxu2 %v11734_v58  ;;  %13990 = vst [vmem:[#allocation355_spill] sm:$0xff] %v11749_v9  ;;  %v8182_v1 = vld [vmem:[#allocation9 + $0x190] sm:$0xf]  ;;  %4688 = vmatpush.bf16.msra.mxu0 %v11740_v23  ;;  %v11755_v13 = vor.u32 %v9564_v0, %v8790_v35  ;;  %v9608_v29 = vld [vmem:[#allocation9 + $0x7d4] sm:$0xf] }
 0xb48   :  { %13991 = vst [vmem:[#allocation356_spill] sm:$0xff] %v11751_v25  ;;  %v9412_v28 = vld [vmem:[#allocation9 + $0x1ac] sm:$0xf0]  ;;  %4722 = vmatpush.bf16.msra.mxu3 %v11743_v20  ;;  %v8984_v34 = vld [vmem:[#allocation9 + $0x7f0] sm:$0xf0]  ;;  %4599 = vmatpush.bf16.msrb.mxu1 %v11746_v49  ;;  %v11771_v20 = vor.u32 %v9528_v24, %v8664_v31 }
 0xb49   :  { %v8374_v36 = vld [vmem:[#allocation9 + $0x310] sm:$0xf]  ;;  %13992 = vst [vmem:[#allocation357_spill] sm:$0xff] %v11755_v13  ;;  %v11765_v0 = vor.u32 %v9412_v28, %v8182_v1  ;;  %v11773_v49 = vor.u32 %v9608_v29, %v8984_v34  ;;  %4678 = vmatmul.bf16.vlgmr.msrb.gmra.mxu3 %v13916_v40  ;;  %v8632_v1 = vld [vmem:[#allocation9 + $0x530] sm:$0xf0] }
 0xb4a   :  { %v9460_v45 = vld [vmem:[#allocation9 + $0x32c] sm:$0xf0]  ;;  %13993 = vst [vmem:[#allocation358_spill] sm:$0xff] %v11758_v63  ;;  %v9600_v28 = vld [vmem:[#allocation9 + $0x794] sm:$0xf] }
 0xb4b   :  { %v8758_v11 = vld [vmem:[#allocation9 + $0x610] sm:$0xf]  ;;  %4659 = vmatpush.bf16.msra.mxu2 %v11749_v9  ;;  %v11762_v14 = vor.u32 %v9460_v45, %v8374_v36  ;;  %13995 = vst [vmem:[#allocation360_spill] sm:$0xff] %v11765_v0  ;;  %4689 = vmatpush.bf16.msra.mxu0 %v11755_v13  ;;  %v9520_v45 = vld [vmem:[#allocation9 + $0x514] sm:$0xf] }
 0xb4c   :  { %v9556_v47 = vld [vmem:[#allocation9 + $0x62c] sm:$0xf0]  ;;  %4644 = vmatpush.bf16.msra.mxu1 %v11751_v25  ;;  %4723 = vmatpush.bf16.msra.mxu3 %v11758_v63  ;;  %13997 = vst [vmem:[#allocation362_spill] sm:$0xff] %v11771_v20  ;;  %v8952_v36 = vld [vmem:[#allocation9 + $0x7b0] sm:$0xf0]  ;;  %v11786_v25 = vor.u32 %v9520_v45, %v8632_v1 }
 0xb4d   :  { %13994 = vst [vmem:[#allocation359_spill] sm:$0xff] %v11762_v14  ;;  %v8342_v35 = vld [vmem:[#allocation9 + $0x2d0] sm:$0xf]  ;;  %v11768_v30 = vor.u32 %v9556_v47, %v8758_v11  ;;  %4600 = vmatmul.bf16.vlgmr.msrb.gmra.mxu1 %v11554_v53  ;;  %v11788_v9 = vor.u32 %v9600_v28, %v8952_v36  ;;  %v8856_v63 = vld [vmem:[#allocation9 + $0x6f0] sm:$0xf0] }
 0xb4e   :  { %v9452_v58 = vld [vmem:[#allocation9 + $0x2ec] sm:$0xf0]  ;;  %13998 = vst [vmem:[#allocation363_spill] sm:$0xff] %v11773_v49 }
 0xb4f   :  { %13996 = vst [vmem:[#allocation361_spill] sm:$0xff] %v11768_v30  ;;  %v8150_v37 = vld [vmem:[#allocation9 + $0x150] sm:$0xf]  ;;  %4660 = vmatpush.bf16.msra.mxu2 %v11762_v14  ;;  %v11778_v11 = vor.u32 %v9452_v58, %v8342_v35  ;;  %4690 = vmatpush.bf16.msra.mxu0 %v11768_v30  ;;  %v9512_v58 = vld [vmem:[#allocation9 + $0x4d4] sm:$0xf] }
 0xb50   :  { %v9404_v23 = vld [vmem:[#allocation9 + $0x16c] sm:$0xf0]  ;;  %4645 = vmatpush.bf16.msra.mxu1 %v11765_v0  ;;  %4724 = vmatpush.bf16.msra.mxu3 %v11771_v20  ;;  %14001 = vst [vmem:[#allocation366_spill] sm:$0xff] %v11786_v25  ;;  %v8600_v35 = vld [vmem:[#allocation9 + $0x4f0] sm:$0xf0] }
 0xb51   :  { %13999 = vst [vmem:[#allocation364_spill] sm:$0xff] %v11778_v11  ;;  %v11781_v47 = vor.u32 %v9404_v23, %v8150_v37  ;;  %v8310_v24 = vld [vmem:[#allocation9 + $0x290] sm:$0xf]  ;;  %v9592_v14 = vld [vmem:[#allocation9 + $0x754] sm:$0xf]  ;;  %v11799_v28 = vor.u32 %v9512_v58, %v8600_v35 }
 0xb52   :  { %v9444_v31 = vld [vmem:[#allocation9 + $0x2ac] sm:$0xf0]  ;;  %14002 = vst [vmem:[#allocation367_spill] sm:$0xff] %v11788_v9  ;;  %v8920_v0 = vld [vmem:[#allocation9 + $0x770] sm:$0xf0]  ;;  %4691 = vmatmul.bf16.vlgmr.msra.gmra.mxu0 %v13916_v40 }
 0xb53   :  { %14000 = vst [vmem:[#allocation365_spill] sm:$0xff] %v11781_v47  ;;  %v8118_v29 = vld [vmem:[#allocation9 + $0x110] sm:$0xf]  ;;  %4735 = vmatpush.bf16.msrb.mxu0 %v11773_v49  ;;  %4661 = vmatpush.bf16.msra.mxu2 %v11778_v11  ;;  %v11791_v23 = vor.u32 %v9444_v31, %v8310_v24  ;;  %v11801_v36 = vor.u32 %v9592_v14, %v8920_v0  ;;  %v9504_v24 = vld [vmem:[#allocation9 + $0x494] sm:$0xf] }
 0xb54   :  { %v9396_v34 = vld [vmem:[#allocation9 + $0x12c] sm:$0xf0]  ;;  %4646 = vmatpush.bf16.msra.mxu1 %v11781_v47  ;;  %4725 = vmatpush.bf16.msra.mxu3 %v11786_v25  ;;  %14005 = vst [vmem:[#allocation370_spill] sm:$0xff] %v11799_v28  ;;  %v8568_v31 = vld [vmem:[#allocation9 + $0x4b0] sm:$0xf0] }
 0xb55   :  { %14003 = vst [vmem:[#allocation368_spill] sm:$0xff] %v11791_v23  ;;  %v11795_v37 = vor.u32 %v9396_v34, %v8118_v29  ;;  %v8278_v30 = vld [vmem:[#allocation9 + $0x250] sm:$0xf]  ;;  %v9584_v11 = vld [vmem:[#allocation9 + $0x714] sm:$0xf]  ;;  %v11811_v14 = vor.u32 %v9504_v24, %v8568_v31 }
 0xb56   :  { %v9436_v49 = vld [vmem:[#allocation9 + $0x26c] sm:$0xf0]  ;;  %14006 = vst [vmem:[#allocation371_spill] sm:$0xff] %v11801_v36  ;;  %v8888_v20 = vld [vmem:[#allocation9 + $0x730] sm:$0xf0] }
 0xb57   :  { %14004 = vst [vmem:[#allocation369_spill] sm:$0xff] %v11795_v37  ;;  %v8086_v45 = vld [vmem:[#allocation9 + $0xd0] sm:$0xf]  ;;  %4736 = vmatpush.bf16.msrb.mxu0 %v11788_v9  ;;  %4662 = vmatpush.bf16.msra.mxu2 %v11791_v23  ;;  %v11804_v29 = vor.u32 %v9436_v49, %v8278_v30  ;;  %v9480_v58 = vld [vmem:[#allocation9 + $0x3d4] sm:$0xf]  ;;  %v11813_v0 = vor.u32 %v9584_v11, %v8888_v20 }
 0xb58   :  { %v9388_v1 = vld [vmem:[#allocation9 + $0xec] sm:$0xf0]  ;;  %4647 = vmatpush.bf16.msra.mxu1 %v11795_v37  ;;  %v8472_v35 = vld [vmem:[#allocation9 + $0x3f0] sm:$0xf0]  ;;  %4726 = vmatpush.bf16.msra.mxu3 %v11799_v28  ;;  %14009 = vst [vmem:[#allocation374_spill] sm:$0xff] %v11811_v14 }
 0xb59   :  { %14007 = vst [vmem:[#allocation372_spill] sm:$0xff] %v11804_v29  ;;  %v8054_v34 = vld [vmem:[#allocation9 + $0x90] sm:$0xf]  ;;  %v11807_v47 = vor.u32 %v9388_v1, %v8086_v45  ;;  %v9496_v49 = vld [vmem:[#allocation9 + $0x454] sm:$0xf]  ;;  %v11821_v21 = vor.u32 %v9480_v58, %v8472_v35 }
 0xb5a   :  { %v9380_v25 = vld [vmem:[#allocation9 + $0xac] sm:$0xf0]  ;;  %14010 = vst [vmem:[#allocation375_spill] sm:$0xff] %v11813_v0  ;;  %v8536_v30 = vld [vmem:[#allocation9 + $0x470] sm:$0xf0] }
 0xb5b   :  { %14008 = vst [vmem:[#allocation373_spill] sm:$0xff] %v11807_v47  ;;  %v8246_v13 = vld [vmem:[#allocation9 + $0x210] sm:$0xf]  ;;  %4737 = vmatpush.bf16.msrb.mxu0 %v11801_v36  ;;  %v9576_v23 = vld [vmem:[#allocation9 + $0x6d4] sm:$0xf]  ;;  %4663 = vmatpush.bf16.msra.mxu2 %v11804_v29  ;;  %v11819_v1 = vor.u32 %v9380_v25, %v8054_v34  ;;  %v11825_v20 = vor.u32 %v9496_v49, %v8536_v30 }
 0xb5c   :  { %v9428_v9 = vld [vmem:[#allocation9 + $0x22c] sm:$0xf0]  ;;  %4648 = vmatpush.bf16.msra.mxu1 %v11807_v47  ;;  %14013 = vst [vmem:[#allocation378_spill] sm:$0xff] %v11821_v21  ;;  %v9472_v24 = vld [vmem:[#allocation9 + $0x394] sm:$0xf]  ;;  %4727 = vmatpush.bf16.msra.mxu3 %v11811_v14  ;;  %v11827_v11 = vor.u32 %v9576_v23, %v8856_v63 }
 0xb5d   :  { %v11816_v45 = vor.u32 %v9428_v9, %v8246_v13  ;;  %14012 = vst [vmem:[#allocation377_spill] sm:$0xff] %v11819_v1  ;;  %v8022_v37 = vld [vmem:[#allocation9 + $0x50] sm:$0xf]  ;;  %v8440_v31 = vld [vmem:[#allocation9 + $0x3b0] sm:$0xf0] }
 0xb5e   :  { %v9372_v28 = vld [vmem:[#allocation9 + $0x6c] sm:$0xf0]  ;;  %14014 = vst [vmem:[#allocation379_spill] sm:$0xff] %v11825_v20  ;;  %v9488_v9 = vld [vmem:[#allocation9 + $0x414] sm:$0xf]  ;;  %v11834_v49 = vor.u32 %v9472_v24, %v8440_v31 }
 0xb5f   :  { %14011 = vst [vmem:[#allocation376_spill] sm:$0xff] %v11816_v45  ;;  %4738 = vmatpush.bf16.msrb.mxu0 %v11813_v0  ;;  %v8504_v13 = vld [vmem:[#allocation9 + $0x430] sm:$0xf0]  ;;  %4664 = vmatpush.bf16.msra.mxu2 %v11816_v45  ;;  %v8734_v25 = vld [vmem:[#allocation9 + $0x5d8] sm:$0xf]  ;;  %v11831_v58 = vor.u32 %v9372_v28, %v8022_v37 }
 0xb60   :  { %14015 = vst [vmem:[#allocation380_spill] sm:$0xff] %v11827_v11  ;;  %v9568_v29 = vld [vmem:[#allocation9 + $0x694] sm:$0xf]  ;;  %v9549_v34 = vld [vmem:[#allocation9 + $0x5f4] sm:$0xf0]  ;;  %4649 = vmatpush.bf16.msra.mxu1 %v11819_v1  ;;  %4728 = vmatpush.bf16.msra.mxu3 %v11825_v20  ;;  %v11838_v45 = vor.u32 %v9488_v9, %v8504_v13 }
 0xb61   :  { %v8824_v47 = vld [vmem:[#allocation9 + $0x6b0] sm:$0xf0]  ;;  %14016 = vst [vmem:[#allocation381_spill] sm:$0xff] %v11831_v58  ;;  %v7990_v35 = vld [vmem:[#allocation9 + $0x10] sm:$0xf]  ;;  %v11843_v28 = vor.u32 %v9549_v34, %v8734_v25 }
 0xb62   :  { %v9364_v0 = vld [vmem:[#allocation9 + $0x2c] sm:$0xf0]  ;;  %14017 = vst [vmem:[#allocation382_spill] sm:$0xff] %v11834_v49  ;;  %v9416_v63 = vld [vmem:[#allocation9 + $0x1d4] sm:$0xf]  ;;  %v11840_v36 = vor.u32 %v9568_v29, %v8824_v47  ;;  %4665 = vmatmul.bf16.vlgmr.msra.gmra.mxu2 %v11524_v2 }
 0xb63   :  { %4709 = vmatpush.bf16.msrb.mxu2 %v11821_v21  ;;  %v9464_v23 = vld [vmem:[#allocation9 + $0x354] sm:$0xf]  ;;  %4739 = vmatpush.bf16.msrb.mxu0 %v11827_v11  ;;  %14018 = vst [vmem:[#allocation383_spill] sm:$0xff] %v11838_v45  ;;  %v8702_v24 = vld [vmem:[#allocation9 + $0x598] sm:$0xf]  ;;  %v11846_v14 = vor.u32 %v9364_v0, %v7990_v35 }
 0xb64   :  { %v8408_v30 = vld [vmem:[#allocation9 + $0x370] sm:$0xf0]  ;;  %14019 = vst [vmem:[#allocation384_spill] sm:$0xff] %v11840_v36  ;;  %v9541_v31 = vld [vmem:[#allocation9 + $0x5b4] sm:$0xf0]  ;;  %4650 = vmatpush.bf16.msra.mxu1 %v11831_v58  ;;  %4729 = vmatpush.bf16.msra.mxu3 %v11838_v45 }
 0xb65   :  { %v8216_v37 = vld [vmem:[#allocation9 + $0x1f0] sm:$0xf0]  ;;  %14020 = vst [vmem:[#allocation385_spill] sm:$0xff] %v11843_v28  ;;  %v11849_v11 = vor.u32 %v9464_v23, %v8408_v30  ;;  %v11858_v0 = vor.u32 %v9541_v31, %v8702_v24  ;;  %v8670_v23 = vld [vmem:[#allocation9 + $0x558] sm:$0xf] }
 0xb66   :  { %v9560_v1 = vld [vmem:[#allocation9 + $0x654] sm:$0xf]  ;;  %14021 = vst [vmem:[#allocation386_spill] sm:$0xff] %v11846_v14  ;;  %v11851_v47 = vor.u32 %v9416_v63, %v8216_v37  ;;  %v9533_v30 = vld [vmem:[#allocation9 + $0x574] sm:$0xf0] }
 0xb67   :  { %v8792_v21 = vld [vmem:[#allocation9 + $0x670] sm:$0xf0]  ;;  %4710 = vmatpush.bf16.msrb.mxu2 %v11834_v49  ;;  %14022 = vst [vmem:[#allocation387_spill] sm:$0xff] %v11849_v11  ;;  %4740 = vmatpush.bf16.msrb.mxu0 %v11840_v36  ;;  %v8990_v58 = vld [vmem:[#allocation9 + $0x7d8] sm:$0xf] }
 0xb68   :  { %v9408_v9 = vld [vmem:[#allocation9 + $0x194] sm:$0xf]  ;;  %14023 = vst [vmem:[#allocation388_spill] sm:$0xff] %v11851_v47  ;;  %v11855_v25 = vor.u32 %v9560_v1, %v8792_v21  ;;  %4774 = vmatpush.bf16.msrb.mxu3 %v11843_v28  ;;  %v9613_v63 = vld [vmem:[#allocation9 + $0x7f4] sm:$0xf0]  ;;  %4651 = vmatpush.bf16.msra.mxu1 %v11846_v14  ;;  %v11871_v28 = vor.u32 %v9533_v30, %v8670_v23 }
 0xb69   :  { %v8184_v29 = vld [vmem:[#allocation9 + $0x1b0] sm:$0xf0]  ;;  %14025 = vst [vmem:[#allocation390_spill] sm:$0xff] %v11858_v0  ;;  %v11873_v14 = vor.u32 %v9613_v63, %v8990_v58  ;;  %4730 = vmatmul.bf16.vlgmr.msra.gmra.mxu3 %v13916_v40 }
 0xb6a   :  { %v9456_v13 = vld [vmem:[#allocation9 + $0x314] sm:$0xf]  ;;  %14024 = vst [vmem:[#allocation389_spill] sm:$0xff] %v11855_v25  ;;  %v11865_v21 = vor.u32 %v9408_v9, %v8184_v29  ;;  %v9525_v9 = vld [vmem:[#allocation9 + $0x534] sm:$0xf0] }
 0xb6b   :  { %v8376_v20 = vld [vmem:[#allocation9 + $0x330] sm:$0xf0]  ;;  %4711 = vmatpush.bf16.msrb.mxu2 %v11849_v11  ;;  %4741 = vmatpush.bf16.msrb.mxu0 %v11855_v25  ;;  %14029 = vst [vmem:[#allocation394_spill] sm:$0xff] %v11871_v28  ;;  %v8958_v29 = vld [vmem:[#allocation9 + $0x798] sm:$0xf] }
 0xb6c   :  { %v9552_v34 = vld [vmem:[#allocation9 + $0x614] sm:$0xf]  ;;  %v11862_v37 = vor.u32 %v9456_v13, %v8376_v20  ;;  %4696 = vmatpush.bf16.msrb.mxu1 %v11851_v47  ;;  %14027 = vst [vmem:[#allocation392_spill] sm:$0xff] %v11865_v21  ;;  %4775 = vmatpush.bf16.msrb.mxu3 %v11858_v0  ;;  %v8638_v20 = vld [vmem:[#allocation9 + $0x518] sm:$0xf] }
 0xb6d   :  { %v8760_v35 = vld [vmem:[#allocation9 + $0x630] sm:$0xf0]  ;;  %14030 = vst [vmem:[#allocation395_spill] sm:$0xff] %v11873_v14  ;;  %4652 = vmatmul.bf16.vlgmr.msra.gmra.mxu1 %v11554_v53  ;;  %v9605_v13 = vld [vmem:[#allocation9 + $0x7b4] sm:$0xf0]  ;;  %v11888_v11 = vor.u32 %v9525_v9, %v8638_v20 }
 0xb6e   :  { %14026 = vst [vmem:[#allocation391_spill] sm:$0xff] %v11862_v37  ;;  %v9448_v1 = vld [vmem:[#allocation9 + $0x2d4] sm:$0xf]  ;;  %v11868_v24 = vor.u32 %v9552_v34, %v8760_v35  ;;  %v11880_v35 = vpop.f32.mrf.mxu0  ;;  %v8926_v25 = vld [vmem:[#allocation9 + $0x758] sm:$0xf] }
 0xb6f   :  { %v8344_v49 = vld [vmem:[#allocation9 + $0x2f0] sm:$0xf0]  ;;  %4712 = vmatpush.bf16.msrb.mxu2 %v11862_v37  ;;  %14033 = vst [vmem:[#allocation398_spill] sm:$0xff] %v11888_v11  ;;  %v9517_v37 = vld [vmem:[#allocation9 + $0x4f4] sm:$0xf0] }
 0xb70   :  { %14028 = vst [vmem:[#allocation393_spill] sm:$0xff] %v11868_v24  ;;  %v9400_v31 = vld [vmem:[#allocation9 + $0x154] sm:$0xf]  ;;  %v11878_v34 = vor.u32 %v9448_v1, %v8344_v49  ;;  %4697 = vmatpush.bf16.msrb.mxu1 %v11865_v21  ;;  %4742 = vmatpush.bf16.msrb.mxu0 %v11868_v24  ;;  %v11890_v49 = vor.u32 %v9605_v13, %v8958_v29  ;;  %v8606_v1 = vld [vmem:[#allocation9 + $0x4d8] sm:$0xf]  ;;  %v11901_v29 = vpop.f32.mrf.mxu3 }
 0xb71   :  { %v8152_v36 = vld [vmem:[#allocation9 + $0x170] sm:$0xf0]  ;;  %4776 = vmatpush.bf16.msrb.mxu3 %v11871_v28  ;;  %v9597_v21 = vld [vmem:[#allocation9 + $0x774] sm:$0xf0]  ;;  %v11903_v13 = vor.u32 %v9517_v37, %v8606_v1 }
 0xb72   :  { %14031 = vst [vmem:[#allocation396_spill] sm:$0xff] %v11878_v34  ;;  %v11883_v23 = vor.u32 %v9400_v31, %v8152_v36  ;;  %v9440_v58 = vld [vmem:[#allocation9 + $0x294] sm:$0xf]  ;;  %v8894_v28 = vld [vmem:[#allocation9 + $0x718] sm:$0xf] }
 0xb73   :  { %v8312_v30 = vld [vmem:[#allocation9 + $0x2b0] sm:$0xf0]  ;;  %14034 = vst [vmem:[#allocation399_spill] sm:$0xff] %v11890_v49  ;;  %4713 = vmatpush.bf16.msrb.mxu2 %v11878_v34  ;;  %4743 = vmatmul.bf16.vlgmr.msrb.gmra.mxu0 %v13916_v40  ;;  %v9509_v34 = vld [vmem:[#allocation9 + $0x4b4] sm:$0xf0] }
 0xb74   :  { %14032 = vst [vmem:[#allocation397_spill] sm:$0xff] %v11883_v23  ;;  %v9392_v63 = vld [vmem:[#allocation9 + $0x114] sm:$0xf]  ;;  %4787 = vmatpush.bf16.msra.mxu0 %v11873_v14  ;;  %v11893_v36 = vor.u32 %v9440_v58, %v8312_v30  ;;  %4698 = vmatpush.bf16.msrb.mxu1 %v11883_v23  ;;  %v11905_v58 = vor.u32 %v9597_v21, %v8926_v25  ;;  %v8574_v30 = vld [vmem:[#allocation9 + $0x498] sm:$0xf] }
 0xb75   :  { %v8120_v47 = vld [vmem:[#allocation9 + $0x130] sm:$0xf0]  ;;  %4777 = vmatpush.bf16.msrb.mxu3 %v11888_v11  ;;  %14037 = vst [vmem:[#allocation402_spill] sm:$0xff] %v11903_v13  ;;  %v9589_v23 = vld [vmem:[#allocation9 + $0x734] sm:$0xf0]  ;;  %v11915_v21 = vor.u32 %v9509_v34, %v8574_v30 }
 0xb76   :  { %14035 = vst [vmem:[#allocation400_spill] sm:$0xff] %v11893_v36  ;;  %v11897_v31 = vor.u32 %v9392_v63, %v8120_v47  ;;  %v9432_v24 = vld [vmem:[#allocation9 + $0x254] sm:$0xf]  ;;  %v4486_v0 = vpop.f32.mrf.mxu0  ;;  %v8478_v1 = vld [vmem:[#allocation9 + $0x3d8] sm:$0xf] }
 0xb77   :  { %v8280_v14 = vld [vmem:[#allocation9 + $0x270] sm:$0xf0]  ;;  %14038 = vst [vmem:[#allocation403_spill] sm:$0xff] %v11905_v58  ;;  %4714 = vmatpush.bf16.msrb.mxu2 %v11893_v36  ;;  %v9485_v25 = vld [vmem:[#allocation9 + $0x3f4] sm:$0xf0]  ;;  %v11917_v36 = vor.u32 %v9589_v23, %v8894_v28 }
 0xb78   :  { %14036 = vst [vmem:[#allocation401_spill] sm:$0xff] %v11897_v31  ;;  %v9384_v20 = vld [vmem:[#allocation9 + $0xd4] sm:$0xf]  ;;  %4788 = vmatpush.bf16.msra.mxu0 %v11890_v49  ;;  %v11908_v47 = vor.u32 %v9432_v24, %v8280_v14  ;;  %4699 = vmatpush.bf16.msrb.mxu1 %v11897_v31  ;;  %v8542_v14 = vld [vmem:[#allocation9 + $0x458] sm:$0xf]  ;;  %v11925_v43 = vor.u32 %v9485_v25, %v8478_v1  ;;  %v4473_v28 = vpop.f32.mrf.mxu3 }
 0xb79   :  { %v8088_v9 = vld [vmem:[#allocation9 + $0xf0] sm:$0xf0]  ;;  %4778 = vmatpush.bf16.msrb.mxu3 %v11903_v13  ;;  %14041 = vst [vmem:[#allocation406_spill] sm:$0xff] %v11915_v21  ;;  %v9501_v24 = vld [vmem:[#allocation9 + $0x474] sm:$0xf0] }
 0xb7a   :  { %14039 = vst [vmem:[#allocation404_spill] sm:$0xff] %v11908_v47  ;;  %v9376_v63 = vld [vmem:[#allocation9 + $0x94] sm:$0xf]  ;;  %v11911_v11 = vor.u32 %v9384_v20, %v8088_v9  ;;  %v8862_v0 = vld [vmem:[#allocation9 + $0x6d8] sm:$0xf]  ;;  %v11929_v23 = vor.u32 %v9501_v24, %v8542_v14 }
 0xb7b   :  { %v8056_v49 = vld [vmem:[#allocation9 + $0xb0] sm:$0xf0]  ;;  %14042 = vst [vmem:[#allocation407_spill] sm:$0xff] %v11917_v36  ;;  %4715 = vmatpush.bf16.msrb.mxu2 %v11908_v47  ;;  %v8446_v34 = vld [vmem:[#allocation9 + $0x398] sm:$0xf]  ;;  %v11931_v47 = vor.u32 %v9581_v19, %v8862_v0 }
 0xb7c   :  { %14040 = vst [vmem:[#allocation405_spill] sm:$0xff] %v11911_v11  ;;  %v9424_v45 = vld [vmem:[#allocation9 + $0x214] sm:$0xf]  ;;  %4789 = vmatpush.bf16.msra.mxu0 %v11905_v58  ;;  %4700 = vmatpush.bf16.msrb.mxu1 %v11911_v11  ;;  %v11923_v9 = vor.u32 %v9376_v63, %v8056_v49  ;;  %v9477_v30 = vld [vmem:[#allocation9 + $0x3b4] sm:$0xf0] }
 0xb7d   :  { %v8248_v37 = vld [vmem:[#allocation9 + $0x230] sm:$0xf0]  ;;  %14045 = vst [vmem:[#allocation410_spill] sm:$0xff] %v11925_v43  ;;  %4779 = vmatpush.bf16.msrb.mxu3 %v11915_v21  ;;  %v8830_v11 = vld [vmem:[#allocation9 + $0x698] sm:$0xf]  ;;  %v11938_v14 = vor.u32 %v9477_v30, %v8446_v34 }
 0xb7e   :  { %v11920_v20 = vor.u32 %v9424_v45, %v8248_v37  ;;  %14044 = vst [vmem:[#allocation409_spill] sm:$0xff] %v11923_v9  ;;  %v9368_v31 = vld [vmem:[#allocation9 + $0x54] sm:$0xf]  ;;  %v8510_v45 = vld [vmem:[#allocation9 + $0x418] sm:$0xf] }
 0xb7f   :  { %v8024_v13 = vld [vmem:[#allocation9 + $0x70] sm:$0xf0]  ;;  %14046 = vst [vmem:[#allocation411_spill] sm:$0xff] %v11929_v23  ;;  %v9493_v37 = vld [vmem:[#allocation9 + $0x434] sm:$0xf0] }
 0xb80   :  { %14043 = vst [vmem:[#allocation408_spill] sm:$0xff] %v11920_v20  ;;  %4790 = vmatpush.bf16.msra.mxu0 %v11917_v36  ;;  %v9573_v49 = vld [vmem:[#allocation9 + $0x6b4] sm:$0xf0]  ;;  %4716 = vmatpush.bf16.msrb.mxu2 %v11920_v20  ;;  %v9545_v63 = vld [vmem:[#allocation9 + $0x5dc] sm:$0xf]  ;;  %v11935_v25 = vor.u32 %v9368_v31, %v8024_v13  ;;  %v11942_v20 = vor.u32 %v9493_v37, %v8510_v45 }
 0xb81   :  { %14047 = vst [vmem:[#allocation412_spill] sm:$0xff] %v11931_v47  ;;  %v8736_v1 = vld [vmem:[#allocation9 + $0x5f8] sm:$0xf0]  ;;  %4701 = vmatpush.bf16.msrb.mxu1 %v11923_v9  ;;  %v9360_v36 = vld [vmem:[#allocation9 + $0x14] sm:$0xf]  ;;  %4780 = vmatpush.bf16.msrb.mxu3 %v11929_v23  ;;  %v11944_v58 = vor.u32 %v9573_v49, %v8830_v11 }
 0xb82   :  { %14048 = vst [vmem:[#allocation413_spill] sm:$0xff] %v11935_v25  ;;  %v7992_v28 = vld [vmem:[#allocation9 + $0x30] sm:$0xf0]  ;;  %v8222_v19 = vld [vmem:[#allocation9 + $0x1d8] sm:$0xf]  ;;  %v11947_v13 = vor.u32 %v9545_v63, %v8736_v1 }
 0xb83   :  { %14049 = vst [vmem:[#allocation414_spill] sm:$0xff] %v11938_v14  ;;  %v8414_v24 = vld [vmem:[#allocation9 + $0x358] sm:$0xf]  ;;  %4717 = vmatmul.bf16.vlgmr.msrb.gmra.mxu2 %v11524_v2  ;;  %v9537_v34 = vld [vmem:[#allocation9 + $0x59c] sm:$0xf]  ;;  %v11950_v21 = vor.u32 %v9360_v36, %v7992_v28 }
 0xb84   :  { %4761 = vmatpush.bf16.msra.mxu2 %v11925_v43  ;;  %v9469_v0 = vld [vmem:[#allocation9 + $0x374] sm:$0xf0]  ;;  %4791 = vmatpush.bf16.msra.mxu0 %v11931_v47  ;;  %14050 = vst [vmem:[#allocation415_spill] sm:$0xff] %v11942_v20  ;;  %v8704_v30 = vld [vmem:[#allocation9 + $0x5b8] sm:$0xf0] }
 0xb85   :  { %14051 = vst [vmem:[#allocation416_spill] sm:$0xff] %v11944_v58  ;;  %v9421_v31 = vld [vmem:[#allocation9 + $0x1f4] sm:$0xf0]  ;;  %4702 = vmatpush.bf16.msrb.mxu1 %v11935_v25  ;;  %v11953_v47 = vor.u32 %v9469_v0, %v8414_v24  ;;  %4781 = vmatpush.bf16.msrb.mxu3 %v11942_v20  ;;  %v11962_v36 = vor.u32 %v9537_v34, %v8704_v30  ;;  %v9529_v24 = vld [vmem:[#allocation9 + $0x55c] sm:$0xf]  ;;  %v11964_v0 = vpop.f32.mrf.mxu3 }
 0xb86   :  { %14052 = vst [vmem:[#allocation417_spill] sm:$0xff] %v11947_v13  ;;  %v8798_v9 = vld [vmem:[#allocation9 + $0x658] sm:$0xf]  ;;  %v11955_v11 = vor.u32 %v9421_v31, %v8222_v19  ;;  %v8672_v19 = vld [vmem:[#allocation9 + $0x578] sm:$0xf0] }
 0xb87   :  { %v9565_v43 = vld [vmem:[#allocation9 + $0x674] sm:$0xf0]  ;;  %14053 = vst [vmem:[#allocation418_spill] sm:$0xff] %v11950_v21  ;;  %v9609_v31 = vld [vmem:[#allocation9 + $0x7dc] sm:$0xf] }
 0xb88   :  { %4762 = vmatpush.bf16.msra.mxu2 %v11938_v14  ;;  %14054 = vst [vmem:[#allocation419_spill] sm:$0xff] %v11953_v47  ;;  %v8190_v45 = vld [vmem:[#allocation9 + $0x198] sm:$0xf]  ;;  %4792 = vmatpush.bf16.msra.mxu0 %v11944_v58  ;;  %v11959_v63 = vor.u32 %v9565_v43, %v8798_v9  ;;  %v8992_v25 = vld [vmem:[#allocation9 + $0x7f8] sm:$0xf0]  ;;  %v11970_v43 = vpop.f32.mrf.mxu0 }
 0xb89   :  { %14055 = vst [vmem:[#allocation420_spill] sm:$0xff] %v11955_v11  ;;  %v9413_v37 = vld [vmem:[#allocation9 + $0x1b4] sm:$0xf0]  ;;  %4826 = vmatpush.bf16.msra.mxu3 %v11947_v13  ;;  %4703 = vmatpush.bf16.msrb.mxu1 %v11950_v21  ;;  %v9521_v21 = vld [vmem:[#allocation9 + $0x51c] sm:$0xf] }
 0xb8a   :  { %v8382_v49 = vld [vmem:[#allocation9 + $0x318] sm:$0xf]  ;;  %14056 = vst [vmem:[#allocation421_spill] sm:$0xff] %v11959_v63  ;;  %v11973_v9 = vor.u32 %v9413_v37, %v8190_v45  ;;  %4782 = vmatmul.bf16.vlgmr.msrb.gmra.mxu3 %v13916_v40  ;;  %v8640_v45 = vld [vmem:[#allocation9 + $0x538] sm:$0xf0] }
 0xb8b   :  { %v9461_v23 = vld [vmem:[#allocation9 + $0x334] sm:$0xf0]  ;;  %14057 = vst [vmem:[#allocation422_spill] sm:$0xff] %v11962_v36  ;;  %v9601_v37 = vld [vmem:[#allocation9 + $0x79c] sm:$0xf] }
 0xb8c   :  { %v8766_v1 = vld [vmem:[#allocation9 + $0x618] sm:$0xf]  ;;  %4763 = vmatpush.bf16.msra.mxu2 %v11953_v47  ;;  %v11968_v14 = vor.u32 %v9461_v23, %v8382_v49  ;;  %14059 = vst [vmem:[#allocation424_spill] sm:$0xff] %v11973_v9  ;;  %4793 = vmatpush.bf16.msra.mxu0 %v11959_v63  ;;  %v11981_v23 = vor.u32 %v9529_v24, %v8672_v19  ;;  %v8928_v24 = vld [vmem:[#allocation9 + $0x778] sm:$0xf0] }
 0xb8d   :  { %v9557_v28 = vld [vmem:[#allocation9 + $0x634] sm:$0xf0]  ;;  %4748 = vmatpush.bf16.msra.mxu1 %v11955_v11  ;;  %4827 = vmatpush.bf16.msra.mxu3 %v11962_v36  ;;  %v11983_v49 = vor.u32 %v9609_v31, %v8992_v25  ;;  %v8960_v11 = vld [vmem:[#allocation9 + $0x7b8] sm:$0xf0]  ;;  %v4458_v31 = vpop.f32.mrf.mxu2 }
 0xb8e   :  { %14058 = vst [vmem:[#allocation423_spill] sm:$0xff] %v11968_v14  ;;  %v8158_v34 = vld [vmem:[#allocation9 + $0x158] sm:$0xf]  ;;  %v11976_v13 = vor.u32 %v9557_v28, %v8766_v1  ;;  %4704 = vmatmul.bf16.vlgmr.msrb.gmra.mxu1 %v11554_v53 }
 0xb8f   :  { %v8350_v30 = vld [vmem:[#allocation9 + $0x2d8] sm:$0xf]  ;;  %14061 = vst [vmem:[#allocation426_spill] sm:$0xff] %v11981_v23 }
 0xb90   :  { %v9453_v58 = vld [vmem:[#allocation9 + $0x2f4] sm:$0xf0]  ;;  %14060 = vst [vmem:[#allocation425_spill] sm:$0xff] %v11976_v13  ;;  %4764 = vmatpush.bf16.msra.mxu2 %v11968_v14  ;;  %4794 = vmatpush.bf16.msra.mxu0 %v11976_v13  ;;  %v11997_v14 = vor.u32 %v9521_v21, %v8640_v45  ;;  %v4538_v13 = vpop.f32.mrf.mxu0  ;;  %v14069_v45 = vperm.slane %v11978_v15, 0 }
 0xb91   :  { %v9405_v20 = vld [vmem:[#allocation9 + $0x174] sm:$0xf0]  ;;  %14062 = vst [vmem:[#allocation427_spill] sm:$0xff] %v11983_v49  ;;  %v11988_v1 = vor.u32 %v9453_v58, %v8350_v30  ;;  %4749 = vmatpush.bf16.msra.mxu1 %v11973_v9  ;;  %4828 = vmatpush.bf16.msra.mxu3 %v11981_v23  ;;  %v11999_v58 = vor.u32 %v9601_v37, %v8960_v11  ;;  %v9513_v30 = vld [vmem:[#allocation9 + $0x4dc] sm:$0xf]  ;;  %v4445_v23 = vpop.f32.mrf.mxu1 }
 0xb92   :  { %v11991_v28 = vor.u32 %v9405_v20, %v8158_v34  ;;  %v8318_v25 = vld [vmem:[#allocation9 + $0x298] sm:$0xf]  ;;  %14065 = vst [vmem:[#allocation430_spill] sm:$0xff] %v11997_v14  ;;  %v4525_v20 = vpop.f32.mrf.mxu3  ;;  %v8608_v34 = vld [vmem:[#allocation9 + $0x4f8] sm:$0xf0]  ;;  %v4446_v37 = vadd.f32 %v4445_v23, %v14069_v45 }
 0xb93   :  { %14063 = vst [vmem:[#allocation428_spill] sm:$0xff] %v11988_v1  ;;  %v9445_v19 = vld [vmem:[#allocation9 + $0x2b4] sm:$0xf0]  ;;  %v9593_v9 = vld [vmem:[#allocation9 + $0x75c] sm:$0xf]  ;;  %4795 = vmatmul.bf16.vlgmr.msra.gmra.mxu0 %v13916_v40 }
 0xb94   :  { %14064 = vst [vmem:[#allocation429_spill] sm:$0xff] %v11991_v28  ;;  %v8126_v47 = vld [vmem:[#allocation9 + $0x118] sm:$0xf]  ;;  %4839 = vmatpush.bf16.msrb.mxu0 %v11983_v49  ;;  %4765 = vmatpush.bf16.msra.mxu2 %v11988_v1  ;;  %v12002_v36 = vor.u32 %v9445_v19, %v8318_v25  ;;  %v12012_v25 = vor.u32 %v9513_v30, %v8608_v34  ;;  %v9505_v13 = vld [vmem:[#allocation9 + $0x49c] sm:$0xf] }
 0xb95   :  { %v9397_v63 = vld [vmem:[#allocation9 + $0x134] sm:$0xf0]  ;;  %14066 = vst [vmem:[#allocation431_spill] sm:$0xff] %v11999_v58  ;;  %4750 = vmatpush.bf16.msra.mxu1 %v11991_v28  ;;  %4829 = vmatpush.bf16.msra.mxu3 %v11997_v14  ;;  %v12014_v19 = vor.u32 %v9593_v9, %v8928_v24  ;;  %v8576_v28 = vld [vmem:[#allocation9 + $0x4b8] sm:$0xf0]  ;;  %v4460_v24 = vpop.f32.mrf.mxu2 }
 0xb96   :  { %14067 = vst [vmem:[#allocation432_spill] sm:$0xff] %v12002_v36  ;;  %v12006_v49 = vor.u32 %v9397_v63, %v8126_v47  ;;  %v8286_v21 = vld [vmem:[#allocation9 + $0x258] sm:$0xf]  ;;  %v9585_v1 = vld [vmem:[#allocation9 + $0x71c] sm:$0xf]  ;;  %v4459_v63 = vadd.f32 %v4458_v31, %v4446_v37  ;;  %v12025_v31 = vor.u32 %v9505_v13, %v8576_v28 }
 0xb97   :  { %v9437_v11 = vld [vmem:[#allocation9 + $0x274] sm:$0xf0]  ;;  %14070 = vst [vmem:[#allocation434_spill] sm:$0xff] %v12014_v19  ;;  %v8896_v47 = vld [vmem:[#allocation9 + $0x738] sm:$0xf0] }
 0xb98   :  { %14068 = vst [vmem:[#allocation433_spill] sm:$0xff] %v12006_v49  ;;  %v8094_v20 = vld [vmem:[#allocation9 + $0xd8] sm:$0xf]  ;;  %4840 = vmatpush.bf16.msrb.mxu0 %v11999_v58  ;;  %4766 = vmatpush.bf16.msra.mxu2 %v12002_v36  ;;  %v12017_v8 = vor.u32 %v9437_v11, %v8286_v21  ;;  %v4472_v9 = vadd.f32 %v11901_v29, %v4459_v63  ;;  %v9481_v34 = vld [vmem:[#allocation9 + $0x3dc] sm:$0xf] }
 0xb99   :  { %v8062_v23 = vld [vmem:[#allocation9 + $0x98] sm:$0xf]  ;;  %4751 = vmatpush.bf16.msra.mxu1 %v12006_v49  ;;  %v12020_v45 = vor.u32 %v9389_v16, %v8094_v20  ;;  %4830 = vmatpush.bf16.msra.mxu3 %v12012_v25  ;;  %14073 = vst [vmem:[#allocation437_spill] sm:$0xff] %v12025_v31  ;;  %v12027_v21 = vor.u32 %v9585_v1, %v8896_v47  ;;  %v9497_v11 = vld [vmem:[#allocation9 + $0x45c] sm:$0xf]  ;;  %v4447_v63 = vpop.f32.mrf.mxu1  ;;  %v12040_v47 = vpop.f32.mrf.mxu0 }
 0xb9a   :  { %14071 = vst [vmem:[#allocation435_spill] sm:$0xff] %v12017_v8  ;;  %v9381_v14 = vld [vmem:[#allocation9 + $0xb4] sm:$0xf0]  ;;  %v8544_v37 = vld [vmem:[#allocation9 + $0x478] sm:$0xf0]  ;;  %v12030_v49 = vadd.f32 %v11880_v35, %v4472_v9  ;;  %v12038_v1 = vor.u32 %v9481_v34, %v8480_v44 }
 0xb9b   :  { %14072 = vst [vmem:[#allocation436_spill] sm:$0xff] %v12020_v45  ;;  %v8254_v58 = vld [vmem:[#allocation9 + $0x218] sm:$0xf]  ;;  %v9577_v16 = vld [vmem:[#allocation9 + $0x6dc] sm:$0xf]  ;;  %v12036_v24 = vor.u32 %v9381_v14, %v8062_v23  ;;  %v12044_v35 = vor.u32 %v9497_v11, %v8544_v37 }
 0xb9c   :  { %v9429_v30 = vld [vmem:[#allocation9 + $0x234] sm:$0xf0]  ;;  %4841 = vmatpush.bf16.msrb.mxu0 %v12014_v19  ;;  %14074 = vst [vmem:[#allocation438_spill] sm:$0xff] %v12027_v21  ;;  %v8864_v20 = vld [vmem:[#allocation9 + $0x6f8] sm:$0xf0]  ;;  %4767 = vmatpush.bf16.msra.mxu2 %v12017_v8 }
 0xb9d   :  { %v12033_v29 = vor.u32 %v9429_v30, %v8254_v58  ;;  %4752 = vmatpush.bf16.msra.mxu1 %v12020_v45  ;;  %14076 = vst [vmem:[#allocation440_spill] sm:$0xff] %v12036_v24  ;;  %v8030_v28 = vld [vmem:[#allocation9 + $0x58] sm:$0xf]  ;;  %v9473_v36 = vld [vmem:[#allocation9 + $0x39c] sm:$0xf]  ;;  %4831 = vmatpush.bf16.msra.mxu3 %v12025_v31  ;;  %v12046_v58 = vor.u32 %v9577_v16, %v8864_v20  ;;  %v12048_v30 = vpop.f32.mrf.mxu3  ;;  %v4510_v16 = vpop.f32.mrf.mxu2 }
 0xb9e   :  { %v9373_v13 = vld [vmem:[#allocation9 + $0x74] sm:$0xf0]  ;;  %14077 = vst [vmem:[#allocation441_spill] sm:$0xff] %v12038_v1  ;;  %v8448_v19 = vld [vmem:[#allocation9 + $0x3b8] sm:$0xf0] }
 0xb9f   :  { %14075 = vst [vmem:[#allocation439_spill] sm:$0xff] %v12033_v29  ;;  %v9489_v14 = vld [vmem:[#allocation9 + $0x41c] sm:$0xf]  ;;  %v12052_v44 = vor.u32 %v9373_v13, %v8030_v28  ;;  %v7998_v11 = vld [vmem:[#allocation9 + $0x18] sm:$0xf]  ;;  %v12056_v37 = vor.u32 %v9473_v36, %v8448_v19 }
 0xba0   :  { %4842 = vmatpush.bf16.msrb.mxu0 %v12027_v21  ;;  %14078 = vst [vmem:[#allocation442_spill] sm:$0xff] %v12044_v35  ;;  %v8512_v23 = vld [vmem:[#allocation9 + $0x438] sm:$0xf0]  ;;  %4768 = vmatpush.bf16.msra.mxu2 %v12033_v29  ;;  %v9365_v20 = vld [vmem:[#allocation9 + $0x34] sm:$0xf0] }
 0xba1   :  { %14079 = vst [vmem:[#allocation443_spill] sm:$0xff] %v12046_v58  ;;  %v9569_v9 = vld [vmem:[#allocation9 + $0x69c] sm:$0xf]  ;;  %4753 = vmatpush.bf16.msra.mxu1 %v12036_v24  ;;  %4832 = vmatpush.bf16.msra.mxu3 %v12044_v35  ;;  %v12060_v29 = vor.u32 %v9489_v14, %v8512_v23  ;;  %v4497_v36 = vpop.f32.mrf.mxu1  ;;  %v12066_v19 = vor.u32 %v9365_v20, %v7998_v11  ;;  %v14082_v14 = vperm.slane %v11978_v15, 1 }
 0xba2   :  { %v8832_v63 = vld [vmem:[#allocation9 + $0x6b8] sm:$0xf0]  ;;  %14080 = vst [vmem:[#allocation444_spill] sm:$0xff] %v12052_v44 }
 0xba3   :  { %14081 = vst [vmem:[#allocation445_spill] sm:$0xff] %v12056_v37  ;;  %v9465_v45 = vld [vmem:[#allocation9 + $0x35c] sm:$0xf]  ;;  %v12062_v24 = vor.u32 %v9569_v9, %v8832_v63  ;;  %4769 = vmatmul.bf16.vlgmr.msra.gmra.mxu2 %v11524_v2  ;;  %v4498_v23 = vadd.f32 %v4497_v36, %v14082_v14 }
 0xba4   :  { %4813 = vmatpush.bf16.msrb.mxu2 %v12038_v1  ;;  %v8416_v8 = vld [vmem:[#allocation9 + $0x378] sm:$0xf0]  ;;  %4843 = vmatpush.bf16.msrb.mxu0 %v12046_v58  ;;  %v4590_v58 = vpop.f32.mrf.mxu0 }
 0xba5   :  { %v9417_v28 = vld [vmem:[#allocation9 + $0x1dc] sm:$0xf]  ;;  %4754 = vmatpush.bf16.msra.mxu1 %v12052_v44  ;;  %v12069_v21 = vor.u32 %v9465_v45, %v8416_v8  ;;  %4833 = vmatpush.bf16.msra.mxu3 %v12060_v29  ;;  %v4577_v44 = vpop.f32.mrf.mxu3 }
 0xba6   :  { %v8224_v13 = vld [vmem:[#allocation9 + $0x1f8] sm:$0xf0]  ;;  %v4512_v44 = vpop.f32.mrf.mxu2 }
 0xba7   :  { %v9561_v34 = vld [vmem:[#allocation9 + $0x65c] sm:$0xf]  ;;  %v12073_v9 = vor.u32 %v9417_v28, %v8224_v13 }
 0xba8   :  { %v8800_v1 = vld [vmem:[#allocation9 + $0x678] sm:$0xf0]  ;;  %4814 = vmatpush.bf16.msrb.mxu2 %v12056_v37  ;;  %4844 = vmatpush.bf16.msrb.mxu0 %v12062_v24  ;;  %v4511_v37 = vadd.f32 %v4510_v16, %v4498_v23 }
 0xba9   :  { %v9457_v63 = vld [vmem:[#allocation9 + $0x31c] sm:$0xf]  ;;  %v12077_v20 = vor.u32 %v9561_v34, %v8800_v1  ;;  %4755 = vmatpush.bf16.msra.mxu1 %v12066_v19  ;;  %4834 = vmatmul.bf16.vlgmr.msra.gmra.mxu3 %v13916_v40 }
 0xbaa   :  { %v8384_v35 = vld [vmem:[#allocation9 + $0x338] sm:$0xf0]  ;;  %v4524_v28 = vadd.f32 %v11964_v0, %v4511_v37  ;;  %v4499_v0 = vpop.f32.mrf.mxu1 }
 0xbab   :  { %v9409_v31 = vld [vmem:[#allocation9 + $0x19c] sm:$0xf]  ;;  %v12081_v58 = vor.u32 %v9457_v63, %v8384_v35 }
 0xbac   :  { %v8192_v11 = vld [vmem:[#allocation9 + $0x1b8] sm:$0xf0]  ;;  %4815 = vmatpush.bf16.msrb.mxu2 %v12069_v21  ;;  %4845 = vmatpush.bf16.msrb.mxu0 %v12077_v20  ;;  %v12092_v35 = vadd.f32 %v11970_v43, %v4524_v28 }
 0xbad   :  { %v9553_v8 = vld [vmem:[#allocation9 + $0x61c] sm:$0xf]  ;;  %4800 = vmatpush.bf16.msrb.mxu1 %v12073_v9  ;;  %v12085_v13 = vor.u32 %v9409_v31, %v8192_v11 }
 0xbae   :  { %v8768_v45 = vld [vmem:[#allocation9 + $0x638] sm:$0xf0]  ;;  %4756 = vmatmul.bf16.vlgmr.msra.gmra.mxu1 %v11554_v53  ;;  %v4562_v28 = vpop.f32.mrf.mxu2 }
 0xbaf   :  { %v9449_v36 = vld [vmem:[#allocation9 + $0x2dc] sm:$0xf]  ;;  %v12089_v16 = vor.u32 %v9553_v8, %v8768_v45  ;;  %v13616_v8 = vperm.slane %v11978_v15, 2 }
 0xbb0   :  { %v8352_v14 = vld [vmem:[#allocation9 + $0x2f8] sm:$0xf0]  ;;  %4816 = vmatpush.bf16.msrb.mxu2 %v12081_v58 }
 0xbb1   :  { %v9401_v1 = vld [vmem:[#allocation9 + $0x15c] sm:$0xf]  ;;  %v12096_v31 = vor.u32 %v9449_v36, %v8352_v14  ;;  %4801 = vmatpush.bf16.msrb.mxu1 %v12085_v13  ;;  %4846 = vmatpush.bf16.msrb.mxu0 %v12089_v16 }
 0xbb2   :  { %v8160_v34 = vld [vmem:[#allocation9 + $0x178] sm:$0xf0] }
 0xbb3   :  { %14083 = vst [vmem:[#allocation446_spill] sm:$0xff] %v12096_v31  ;;  %v12099_v37 = vor.u32 %v9401_v1, %v8160_v34  ;;  %v9441_v23 = vld [vmem:[#allocation9 + $0x29c] sm:$0xf] }
 0xbb4   :  { %v8320_v63 = vld [vmem:[#allocation9 + $0x2b8] sm:$0xf0]  ;;  %4817 = vmatpush.bf16.msrb.mxu2 %v12096_v31  ;;  %4847 = vmatmul.bf16.vlgmr.msrb.gmra.mxu0 %v13916_v40 }
 0xbb5   :  { %14084 = vst [vmem:[#allocation447_spill] sm:$0xff] %v12099_v37  ;;  %v9393_v11 = vld [vmem:[#allocation9 + $0x11c] sm:$0xf]  ;;  %5237 = vmatpush.bf16.msra.mxu0 %v10226_v3  ;;  %v12104_v43 = vor.u32 %v9441_v23, %v8320_v63  ;;  %4802 = vmatpush.bf16.msrb.mxu1 %v12099_v37  ;;  %v4549_v3 = vpop.f32.mrf.mxu1 }
 0xbb6   :  { %v8128_v44 = vld [vmem:[#allocation9 + $0x138] sm:$0xf0]  ;;  %v4550_v23 = vadd.f32 %v4549_v3, %v13616_v8  ;;  %v4564_v3 = vpop.f32.mrf.mxu2 }
 0xbb7   :  { %14085 = vst [vmem:[#allocation448_spill] sm:$0xff] %v12104_v43  ;;  %v12108_v45 = vor.u32 %v9393_v11, %v8128_v44  ;;  %v9433_v36 = vld [vmem:[#allocation9 + $0x25c] sm:$0xf] }
 0xbb8   :  { %v8288_v14 = vld [vmem:[#allocation9 + $0x278] sm:$0xf0]  ;;  %4818 = vmatpush.bf16.msrb.mxu2 %v12104_v43  ;;  %v4563_v31 = vadd.f32 %v4562_v28, %v4550_v23 }
 0xbb9   :  { %14086 = vst [vmem:[#allocation449_spill] sm:$0xff] %v12108_v45  ;;  %v9385_v1 = vld [vmem:[#allocation9 + $0xdc] sm:$0xf]  ;;  %5238 = vmatpush.bf16.msra.mxu0 %v10231_v10  ;;  %v12113_v0 = vor.u32 %v9433_v36, %v8288_v14  ;;  %4803 = vmatpush.bf16.msrb.mxu1 %v12108_v45  ;;  %v4627_v45 = vpop.f32.mrf.mxu3 }
 0xbba   :  { %v8096_v34 = vld [vmem:[#allocation9 + $0xf8] sm:$0xf0]  ;;  %v4576_v36 = vadd.f32 %v12048_v30, %v4563_v31 }
 0xbbb   :  { %14087 = vst [vmem:[#allocation450_spill] sm:$0xff] %v12113_v0  ;;  %v12118_v63 = vor.u32 %v9385_v1, %v8096_v34  ;;  %v9425_v11 = vld [vmem:[#allocation9 + $0x21c] sm:$0xf]  ;;  %v4640_v1 = vpop.f32.mrf.mxu0 }
 0xbbc   :  { %v8256_v44 = vld [vmem:[#allocation9 + $0x238] sm:$0xf0]  ;;  %4819 = vmatpush.bf16.msrb.mxu2 %v12113_v0  ;;  %v4589_v43 = vadd.f32 %v12040_v47, %v4576_v36 }
 0xbbd   :  { %14088 = vst [vmem:[#allocation451_spill] sm:$0xff] %v12118_v63  ;;  %v9377_v37 = vld [vmem:[#allocation9 + $0x9c] sm:$0xf]  ;;  %5239 = vmatpush.bf16.msra.mxu0 %v10239_v22  ;;  %v12122_v10 = vor.u32 %v9425_v11, %v8256_v44  ;;  %4804 = vmatpush.bf16.msrb.mxu1 %v12118_v63  ;;  %v4551_v22 = vpop.f32.mrf.mxu1 }
 0xbbe   :  { %v8064_v40 = vld [vmem:[#allocation9 + $0xb8] sm:$0xf0] }
 0xbbf   :  { %14089 = vst [vmem:[#allocation452_spill] sm:$0xff] %v12122_v10  ;;  %v12126_v14 = vor.u32 %v9377_v37, %v8064_v40  ;;  %v9369_v34 = vld [vmem:[#allocation9 + $0x5c] sm:$0xf] }
 0xbc0   :  { %v8032_v8 = vld [vmem:[#allocation9 + $0x78] sm:$0xf0]  ;;  %4820 = vmatpush.bf16.msrb.mxu2 %v12122_v10 }
 0xbc1   :  { %14090 = vst [vmem:[#allocation453_spill] sm:$0xff] %v12126_v14  ;;  %5240 = vmatpush.bf16.msra.mxu0 %v10248_v41  ;;  %4805 = vmatpush.bf16.msrb.mxu1 %v12126_v14  ;;  %v12132_v28 = vor.u32 %v9369_v34, %v8032_v8  ;;  %v9361_v30 = vld [vmem:[#allocation9 + $0x1c] sm:$0xf]  ;;  %v4629_v23 = vpop.f32.mrf.mxu3  ;;  %v12146_v41 = vpack.c.b16 %v10311_v59, %v10311_v59  ;;  %v13621_v8 = vperm.slane %v11978_v15, 3 }
 0xbc2   :  { %v8000_v31 = vld [vmem:[#allocation9 + $0x38] sm:$0xf0] }
 0xbc3   :  { %14091 = vst [vmem:[#allocation454_spill] sm:$0xff] %v12132_v28  ;;  %4821 = vmatmul.bf16.vlgmr.msrb.gmra.mxu2 %v11524_v2  ;;  %v12137_v37 = vor.u32 %v9361_v30, %v8000_v31  ;;  %v4642_v47 = vpop.f32.mrf.mxu0 }
 0xbc5   :  { %5241 = vmatpush.bf16.msra.mxu0 %v10256_v50  ;;  %4806 = vmatpush.bf16.msrb.mxu1 %v12132_v28  ;;  %14092 = vst [vmem:[#allocation455_spill] sm:$0xff] %v12137_v37  ;;  %v8998_v50 = vmul.f32 -1.442695, %v4589_v43  ;;  %v4614_v11 = vpop.f32.mrf.mxu2 }
 0xbc7   :  { %9727 = vpow2.f32 %v8998_v50 }
 0xbc9   :  { %5242 = vmatpush.bf16.msra.mxu0 %v10260_v52  ;;  %4807 = vmatpush.bf16.msrb.mxu1 %v12137_v37  ;;  %v8996_v52 = vmul.f32 -1.442695, %v12030_v49 }
 0xbca   :  { %v4601_v44 = vpop.f32.mrf.mxu1 }
 0xbcb   :  { %9729 = vpow2.f32 %v8996_v52 }
 0xbcc   :  { %4808 = vmatmul.bf16.vlgmr.msrb.gmra.mxu1 %v11554_v53  ;;  %v4679_v59 = vpop.f32.mrf.mxu3 }
 0xbcd   :  { %5243 = vmatpush.bf16.msra.mxu0 %v10266_v56  ;;  %v4602_v56 = vadd.f32 %v4601_v44, %v13621_v8  ;;  %v4616_v36 = vpop.f32.mrf.mxu2  ;;  %v9728_v34 = vpop.eup %9727 }
 0xbce   :  { %v4896_v31 = vadd.f32 1.0, %v9728_v34 }
 0xbcf   :  { %v4615_v40 = vadd.f32 %v4614_v11, %v4602_v56  ;;  %v4692_v3 = vpop.f32.mrf.mxu0 }
 0xbd0   :  { %9731 = vrcp.f32 %v4896_v31  ;;  %vm4903_vm15 = vweird.f32 %v4896_v31 }
 0xbd1   :  { %5244 = vmatpush.bf16.msra.mxu0 %v10274_v62  ;;  %v4628_v62 = vadd.f32 %v4627_v45, %v4615_v40  ;;  %v9730_v30 = vpop.eup %9729  ;;  %v13626_v45 = vperm.slane %v11978_v15, 4  ;;  %v8997_v40 = vmul.f32 -1.442695, %v12092_v35 }
 0xbd2   :  { %v4603_v22 = vpop.f32.mrf.mxu1  ;;  %v4858_v47 = vadd.f32 1.0, %v9730_v30 }
 0xbd3   :  { %v4641_v43 = vadd.f32 %v4640_v1, %v4628_v62 }
 0xbd4   :  { %5245 = vmatmul.bf16.vlgmr.msra.gmra.mxu0 %v12146_v41  ;;  %v4681_v49 = vpop.f32.mrf.mxu3  ;;  %9733 = vrcp.f32 %v4858_v47  ;;  %vm4865_vm2 = vweird.f32 %v4858_v47 }
 0xbd5   :  { %v8999_v52 = vmul.f32 -1.442695, %v4641_v43 }
 0xbd6   :  { %v9732_v50 = vpop.eup %9731 }
 0xbd7   :  { %v4694_v23 = vpop.f32.mrf.mxu0  ;;  %v4899_v28 = vmul.f32 %v9732_v50, %v4896_v31  ;;  %9735 = vpow2.f32 %v8999_v52  ;;  %vm4904_vm14 = vweird.f32 %v9732_v50 }
 0xbd8   :  { %9737 = vpow2.f32 %v8997_v40  ;;  %vm4905_vm1 = vmor %vm4903_vm15, %vm4904_vm14 }
 0xbd9   :  { %v4900_v56 = vsub.f32 1.0, %v4899_v28  ;;  %v4909_v28 = vand.u32 2147483648, %v4896_v31 }
 0xbda   :  { %v9734_v37 = vpop.eup %9733 }
 0xbdb   :  { %v4861_v44 = vmul.f32 %v9734_v37, %v4858_v47  ;;  %v4901_v34 = vmul.f32 %v9732_v50, %v4900_v56  ;;  %vm4866_vm0 = vweird.f32 %v9734_v37  ;;  %v4910_v40 = vor.u32 1.1754944e-38, %v4909_v28 }
 0xbdc   :  { %vm4867_vm3 = vmor %vm4865_vm2, %vm4866_vm0 }
 0xbdd   :  { %v4862_v62 = vsub.f32 1.0, %v4861_v44  ;;  %v4902_v43 = vadd.f32 %v9732_v50, %v4901_v34  ;;  %v9736_v10 = vpop.eup %9735  ;;  %v4907_v44 = vand.u32 2147483647, %v4896_v31 }
 0xbde   :  { %v9738_v0 = vpop.eup %9737 }
 0xbdf   :  { %v4863_v30 = vmul.f32 %v9734_v37, %v4862_v62  ;;  %v4906_v56 = vsel %vm4905_vm1, %v9732_v50, %v4902_v43  ;;  %v4859_v62 = vadd.f32 1.0, %v9738_v0  ;;  %vm4908_vm4 = vcmp.eq.f32.partialorder %v4907_v44, 8.507059e+37 }
 0xbe0   :  { %v750_v0 = vperm.slane %v11978_v15, 5 }
 0xbe1   :  { %v4864_v35 = vadd.f32 %v9734_v37, %v4863_v30  ;;  %vm4880_vm13 = vweird.f32 %v4859_v62 }
 0xbe5   :  { %v4666_v11 = vpop.f32.mrf.mxu2 }
 0xbea   :  { %v4653_v1 = vpop.f32.mrf.mxu1 }
 0xbeb   :  { %v4654_v36 = vadd.f32 %v4653_v1, %v13626_v45  ;;  %v4871_v1 = vand.u32 2147483648, %v4858_v47  ;;  %v4886_v45 = vand.u32 2147483648, %v4859_v62 }
 0xbec   :  { %v4731_v14 = vpop.f32.mrf.mxu3 }
 0xbed   :  { %v4667_v22 = vadd.f32 %v4666_v11, %v4654_v36  ;;  %v4668_v49 = vpop.f32.mrf.mxu2  ;;  %v4897_v11 = vadd.f32 1.0, %v9736_v10  ;;  %v4868_v36 = vsel %vm4867_vm3, %v9734_v37, %v4864_v35  ;;  %v4872_v34 = vor.u32 1.1754944e-38, %v4871_v1 }
 0xbef   :  { %v4680_v23 = vadd.f32 %v4679_v59, %v4667_v22  ;;  %v4869_v59 = vand.u32 2147483647, %v4858_v47  ;;  %vm4918_vm10 = vweird.f32 %v4897_v11 }
 0xbf0   :  { %v4744_v8 = vpop.f32.mrf.mxu0 }
 0xbf1   :  { %v4693_v63 = vadd.f32 %v4692_v3, %v4680_v23  ;;  %v4911_v3 = vsel %vm4908_vm4, %v4910_v40, %v4906_v56  ;;  %vm4870_vm5 = vcmp.eq.f32.partialorder %v4869_v59, 8.507059e+37 }
 0xbf2   :  { %v4655_v52 = vpop.f32.mrf.mxu1  ;;  %v4873_v23 = vsel %vm4870_vm5, %v4872_v34, %v4868_v36  ;;  %v4968_v49 = vmul.f32 0.0, %v4911_v3 }
 0xbf3   :  { %9739 = vtanh.f32 %v4693_v63 }
 0xbf4   :  { %9741 = vrcp.f32 %v4897_v11  ;;  %v4733_v31 = vpop.f32.mrf.mxu3 }
 0xbf5   :  { %9743 = vrcp.f32 %v4859_v62 }
 0xbf8   :  { %v4746_v22 = vpop.f32.mrf.mxu0 }
 0xbf9   :  { %v9740_v30 = vpop.eup %9739  ;;  %v9621_v22 = vld [vmem:[#allocation12 + $0x38] sm:$0xff] }
 0xbfa   :  { %v4970_v63 = vmul.f32 %v9740_v30, %v4873_v23  ;;  %v9742_v47 = vpop.eup %9741  ;;  %v4924_v23 = vand.u32 2147483648, %v4897_v11  ;;  %5076 = vmatpush.bf16.msra.mxu1 %v9621_v22 }
 0xbfb   :  { %v9744_v50 = vpop.eup %9743  ;;  %v4914_v43 = vmul.f32 %v9742_v47, %v4897_v11  ;;  %vm4919_vm6 = vweird.f32 %v9742_v47 }
 0xbfc   :  { %v12157_v10 = vadd.f32 %v4970_v63, %v4968_v49  ;;  %v4876_v28 = vmul.f32 %v9744_v50, %v4859_v62  ;;  %vm4881_vm11 = vweird.f32 %v9744_v50  ;;  %vm4920_vm12 = vmor %vm4918_vm10, %vm4919_vm6 }
 0xbfd   :  { %v4915_v35 = vsub.f32 1.0, %v4914_v43  ;;  %v4922_v43 = vand.u32 2147483647, %v4897_v11  ;;  %vm4882_vm14 = vmor %vm4880_vm13, %vm4881_vm11 }
 0xbfe   :  { %v4877_v44 = vsub.f32 1.0, %v4876_v28 }
 0xbff   :  { %v4916_v59 = vmul.f32 %v9742_v47, %v4915_v35  ;;  %vm4923_vm15 = vcmp.eq.f32.partialorder %v4922_v43, 8.507059e+37 }
 0xc00   :  { %v4878_v40 = vmul.f32 %v9744_v50, %v4877_v44  ;;  %v4925_v44 = vor.u32 1.1754944e-38, %v4924_v23  ;;  %v9615_v23 = vld [vmem:[#allocation12 + $0x8] sm:$0xff] }
 0xc01   :  { %v4917_v31 = vadd.f32 %v9742_v47, %v4916_v59  ;;  %v9619_v59 = vld [vmem:[#allocation12 + $0x28] sm:$0xff] }
 0xc02   :  { %v4879_v63 = vadd.f32 %v9744_v50, %v4878_v40 }
 0xc03   :  { %v4921_v35 = vsel %vm4920_vm12, %v9742_v47, %v4917_v31  ;;  %v9616_v47 = vld [vmem:[#allocation12 + $0x10] sm:$0xff]  ;;  %vm5180_vm12 = vcmask 24576  }
 0xc06   :  { %v4718_v37 = vpop.f32.mrf.mxu2 }
 0xc0b   :  { %v4705_v52 = vpop.f32.mrf.mxu1 }
 0xc0c   :  { %v4706_v1 = vadd.f32 %v4705_v52, %v750_v0  ;;  %v4883_v52 = vsel %vm4882_vm14, %v9744_v50, %v4879_v63  ;;  %v751_v50 = vperm.slane %v11978_v15, 6 }
 0xc0d   :  { %v4783_v30 = vpop.f32.mrf.mxu3 }
 0xc0e   :  { %v4719_v56 = vadd.f32 %v4718_v37, %v4706_v1  ;;  %v4720_v34 = vpop.f32.mrf.mxu2  ;;  %v9620_v37 = vld [vmem:[#allocation12 + $0x30] sm:$0xff]  ;;  %v4887_v1 = vor.u32 1.1754944e-38, %v4886_v45 }
 0xc0f   :  { %5077 = vmatpush.bf16.msra.mxu1 %v9620_v37 }
 0xc10   :  { %v4732_v36 = vadd.f32 %v4731_v14, %v4719_v56  ;;  %v4796_v3 = vpop.f32.mrf.mxu0  ;;  %v4884_v14 = vand.u32 2147483647, %v4859_v62  ;;  %v9617_v62 = vld [vmem:[#allocation12 + $0x18] sm:$0xff] }
 0xc12   :  { %v4745_v49 = vadd.f32 %v4744_v8, %v4732_v36  ;;  %v4926_v8 = vsel %vm4923_vm15, %v4925_v44, %v4921_v35  ;;  %vm4885_vm0 = vcmp.eq.f32.partialorder %v4884_v14, 8.507059e+37  ;;  %v9614_v14 = vld [vmem:[#allocation12] sm:$0xff] }
 0xc13   :  { %v4707_v28 = vpop.f32.mrf.mxu1  ;;  %v4888_v36 = vsel %vm4885_vm0, %v4887_v1, %v4883_v52  ;;  %5078 = vmatpush.bf16.msra.mxu1 %v9619_v59  ;;  %v4969_v34 = vmul.f32 0.0, %v4926_v8  ;;  %v9629_v52 = vld [vmem:[#allocation12 + $0x78] sm:$0xff] }
 0xc14   :  { %9745 = vtanh.f32 %v4745_v49  ;;  %v9618_v49 = vld [vmem:[#allocation12 + $0x20] sm:$0xff]  ;;  %5089 = vmatpush.bf16.msra.mxu2 %v9629_v52 }
 0xc15   :  { %v4785_v40 = vpop.f32.mrf.mxu3 }
 0xc16   :  { %v9628_v40 = vld [vmem:[#allocation12 + $0x70] sm:$0xff] }
 0xc17   :  { %5079 = vmatpush.bf16.msra.mxu1 %v9618_v49 }
 0xc18   :  { %v4798_v56 = vpop.f32.mrf.mxu0  ;;  %5090 = vmatpush.bf16.msra.mxu2 %v9628_v40 }
 0xc1a   :  { %v9746_v11 = vpop.eup %9745 }
 0xc1b   :  { %v4971_v22 = vmul.f32 %v9746_v11, %v4888_v36  ;;  %5080 = vmatpush.bf16.msra.mxu1 %v9617_v62  ;;  %v9627_v36 = vld [vmem:[#allocation12 + $0x68] sm:$0xff] }
 0xc1c   :  { %5091 = vmatpush.bf16.msra.mxu2 %v9627_v36 }
 0xc1d   :  { %v12162_v28 = vadd.f32 %v4971_v22, %v4969_v34  ;;  %v9626_v22 = vld [vmem:[#allocation12 + $0x60] sm:$0xff] }
 0xc1f   :  { %5081 = vmatpush.bf16.msra.mxu1 %v9616_v47 }
 0xc20   :  { %5092 = vmatpush.bf16.msra.mxu2 %v9626_v22 }
 0xc23   :  { %5082 = vmatpush.bf16.msra.mxu1 %v9615_v23  ;;  %v9623_v23 = vld [vmem:[#allocation12 + $0x48] sm:$0xff] }
 0xc26   :  { %v4770_v45 = vpop.f32.mrf.mxu2 }
 0xc27   :  { %5083 = vmatpush.bf16.msra.mxu1 %v9614_v14 }
 0xc2b   :  { %v4757_v31 = vpop.f32.mrf.mxu1  ;;  %5250 = vmatpush.bf16.msrb.mxu1 %v10228_v7  ;;  %v9625_v7 = vld [vmem:[#allocation12 + $0x58] sm:$0xff] }
 0xc2c   :  { %v4758_v63 = vadd.f32 %v4757_v31, %v751_v50  ;;  %v4835_v37 = vpop.f32.mrf.mxu3  ;;  %5093 = vmatpush.bf16.msra.mxu2 %v9625_v7 }
 0xc2e   :  { %v4771_v43 = vadd.f32 %v4770_v45, %v4758_v63  ;;  %v4772_v44 = vpop.f32.mrf.mxu2 }
 0xc2f   :  { %5251 = vmatpush.bf16.msrb.mxu1 %v10234_v12  ;;  %v752_v12 = vperm.slane %v11978_v15, 7  ;;  %v9622_v44 = vld [vmem:[#allocation12 + $0x40] sm:$0xff] }
 0xc30   :  { %v4784_v35 = vadd.f32 %v4783_v30, %v4771_v43 }
 0xc31   :  { %v4848_v1 = vpop.f32.mrf.mxu0 }
 0xc32   :  { %v4797_v8 = vadd.f32 %v4796_v3, %v4784_v35  ;;  %v9624_v3 = vld [vmem:[#allocation12 + $0x50] sm:$0xff] }
 0xc33   :  { %v4759_v59 = vpop.f32.mrf.mxu1  ;;  %5252 = vmatpush.bf16.msrb.mxu1 %v10245_v27  ;;  %5094 = vmatpush.bf16.msra.mxu2 %v9624_v3 }
 0xc34   :  { %v9000_v56 = vmul.f32 -1.442695, %v4797_v8  ;;  %v4837_v11 = vpop.f32.mrf.mxu3 }
 0xc36   :  { %9747 = vpow2.f32 %v9000_v56 }
 0xc37   :  { %5253 = vmatpush.bf16.msrb.mxu1 %v10254_v46  ;;  %5095 = vmatpush.bf16.msra.mxu2 %v9623_v23  ;;  %v9632_v23 = vld [vmem:[%s13177_s12 + $0x10] sm:$0xff] }
 0xc39   :  { %v4850_v34 = vpop.f32.mrf.mxu0 }
 0xc3b   :  { %5254 = vmatpush.bf16.msrb.mxu1 %v10258_v51  ;;  %5096 = vmatpush.bf16.msra.mxu2 %v9622_v44 }
 0xc3c   :  { %v9748_v30 = vpop.eup %9747 }
 0xc3d   :  { %v4936_v49 = vadd.f32 1.0, %v9748_v30 }
 0xc3f   :  { %9749 = vrcp.f32 %v4936_v49  ;;  %5255 = vmatpush.bf16.msrb.mxu1 %v10262_v54  ;;  %v4949_v46 = vand.u32 2147483648, %v4936_v49  ;;  %v4947_v51 = vand.u32 2147483647, %v4936_v49  ;;  %vm4943_vm2 = vweird.f32 %v4936_v49  ;;  %5263 = vmatpush.bf16.msrb.mxu2 %v10236_v18 }
 0xc40   :  { %9751 = vtanh.f32 %v12157_v10 }
 0xc41   :  { %v4950_v54 = vor.u32 1.1754944e-38, %v4949_v46  ;;  %vm4948_vm4 = vcmp.eq.f32.partialorder %v4947_v51, 8.507059e+37 }
 0xc43   :  { %5256 = vmatpush.bf16.msrb.mxu1 %v10268_v57  ;;  %5264 = vmatpush.bf16.msrb.mxu2 %v10242_v26 }
 0xc45   :  { %v9750_v62 = vpop.eup %9749 }
 0xc46   :  { %v4822_v47 = vpop.f32.mrf.mxu2  ;;  %v4939_v45 = vmul.f32 %v9750_v62, %v4936_v49  ;;  %vm4944_vm1 = vweird.f32 %v9750_v62  ;;  %v9752_v56 = vpop.eup %9751 }
 0xc47   :  { %vm4945_vm3 = vmor %vm4943_vm2, %vm4944_vm1  ;;  %5257 = vmatpush.bf16.msrb.mxu1 %v10294_v32  ;;  %5265 = vmatpush.bf16.msrb.mxu2 %v10251_v42 }
 0xc48   :  { %v4940_v27 = vsub.f32 1.0, %v4939_v45  ;;  %v9855_v45 = vld [vmem:[%s13168_s3 + $0x8] sm:$0xff] }
 0xc49   :  { %v4809_v31 = vpop.f32.mrf.mxu1 }
 0xc4a   :  { %v4810_v63 = vadd.f32 %v4809_v31, %v752_v12  ;;  %v4941_v43 = vmul.f32 %v9750_v62, %v4940_v27  ;;  %v9635_v27 = vld [vmem:[%s13177_s12 + $0x28] sm:$0xff]  ;;  %v9634_v31 = vld [vmem:[%s13177_s12 + $0x20] sm:$0xff] }
 0xc4b   :  { %5266 = vmatpush.bf16.msrb.mxu2 %v10264_v55 }
 0xc4c   :  { %v4823_v14 = vadd.f32 %v4822_v47, %v4810_v63  ;;  %v4942_v35 = vadd.f32 %v9750_v62, %v4941_v43  ;;  %v9631_v63 = vld [vmem:[%s13177_s12 + $0x8] sm:$0xff]  ;;  %v9630_v43 = vld [vmem:[%s13177_s12] sm:$0xff] }
 0xc4e   :  { %v4836_v52 = vadd.f32 %v4835_v37, %v4823_v14  ;;  %v4824_v8 = vpop.f32.mrf.mxu2  ;;  %v4946_v59 = vsel %vm4945_vm3, %v9750_v62, %v4942_v35  ;;  %v14093_v35 = vperm.slane %v10317_v60, 0 }
 0xc4f   :  { %v4951_v40 = vsel %vm4948_vm4, %v4950_v54, %v4946_v59  ;;  %5267 = vmatpush.bf16.msrb.mxu2 %v10272_v61  ;;  %v14094_v8 = vperm.slane %v10317_v60, 1 }
 0xc50   :  { %v4849_v11 = vadd.f32 %v4848_v1, %v4836_v52  ;;  %v4976_v36 = vmul.f32 %v9752_v56, %v4951_v40 }
 0xc51   :  { %v4811_v57 = vpop.f32.mrf.mxu1  ;;  %v5246_v14 = vpop.f32.mrf.mxu0 }
 0xc52   :  { %v9001_v34 = vmul.f32 -1.442695, %v4849_v11  ;;  %v12180_v30 = vpack.c.bf16 %v4976_v36, %v4976_v36  ;;  %v5247_v44 = vadd.f32 %v5246_v14, %v14093_v35  ;;  %v9661_v57 = vld [vmem:[%s13176_s11] ss:$0 sm:$0xff] }
 0xc53   :  { %5268 = vmatpush.bf16.msrb.mxu2 %v10277_v4 }
 0xc54   :  { %9753 = vpow2.f32 %v9001_v34  ;;  %5084 = vmatmul.bf16.vlgmr.msra.gmra.mxu1 %v12180_v30  ;;  %v12225_v54 = vpack.c.bf16 %v5247_v44, %v5247_v44 }
 0xc56   :  { %5362 = vrot.lane.b32.xlu1 %v12225_v54, %s10107_s20 }
 0xc57   :  { %5269 = vmatpush.bf16.msrb.mxu2 %v10298_v39  ;;  %v9637_v39 = vld [vmem:[%s13177_s12 + $0x38] sm:$0xff] }
 0xc58   :  { %5152 = vmatpush.bf16.msrb.mxu3 %v9637_v39 }
 0xc59   :  { %v5248_v40 = vpop.f32.mrf.mxu0 }
 0xc5a   :  { %v9754_v37 = vpop.eup %9753 }
 0xc5b   :  { %v4937_v22 = vadd.f32 1.0, %v9754_v37  ;;  %5270 = vmatpush.bf16.msrb.mxu2 %v10304_v48  ;;  %v9636_v48 = vld [vmem:[%s13177_s12 + $0x30] sm:$0xff] }
 0xc5c   :  { %5153 = vmatpush.bf16.msrb.mxu3 %v9636_v48 }
 0xc5d   :  { %9755 = vrcp.f32 %v4937_v22  ;;  %v4964_v26 = vand.u32 2147483648, %v4937_v22  ;;  %v4962_v42 = vand.u32 2147483647, %v4937_v22  ;;  %vm4958_vm6 = vweird.f32 %v4937_v22 }
 0xc5e   :  { %9757 = vtanh.f32 %v12162_v28 }
 0xc5f   :  { %v4965_v55 = vor.u32 1.1754944e-38, %v4964_v26  ;;  %vm4963_vm11 = vcmp.eq.f32.partialorder %v4962_v42, 8.507059e+37  ;;  %v9856_v26 = vld [vmem:[%s13168_s3] sm:$0xff] }
 0xc60   :  { %5154 = vmatpush.bf16.msrb.mxu3 %v9635_v27 }
 0xc63   :  { %v9756_v18 = vpop.eup %9755 }
 0xc64   :  { %v4954_v32 = vmul.f32 %v9756_v18, %v4937_v22  ;;  %5258 = vmatmul.bf16.vlgmr.msrb.gmra.mxu1 %v12146_v41  ;;  %vm4959_vm5 = vweird.f32 %v9756_v18  ;;  %v9758_v4 = vpop.eup %9757  ;;  %5155 = vmatpush.bf16.msrb.mxu3 %v9634_v31 }
 0xc65   :  { %vm4960_vm10 = vmor %vm4958_vm6, %vm4959_vm5 }
 0xc66   :  { %v4955_v1 = vsub.f32 1.0, %v4954_v32 }
 0xc68   :  { %v4956_v49 = vmul.f32 %v9756_v18, %v4955_v1 }
 0xc6a   :  { %v4957_v7 = vadd.f32 %v9756_v18, %v4956_v49  ;;  %v9662_v49 = vld [vmem:[#allocation13] ss:$0 sm:$0xff] }
 0xc6c   :  { %v4961_v61 = vsel %vm4960_vm10, %v9756_v18, %v4957_v7 }
 0xc6d   :  { %v4966_v3 = vsel %vm4963_vm11, %v4965_v55, %v4961_v61 }
 0xc6e   :  { %v4977_v62 = vmul.f32 %v9758_v4, %v4966_v3 }
 0xc70   :  { %v12192_v47 = vpack.c.bf16 %v4977_v62, %v4977_v62 }
 0xc72   :  { %5097 = vmatmul.bf16.vlgmr.msra.gmra.mxu2 %v12192_v47 }
 0xc73   :  { %5445 = vmatpush.bf16.msra.mxu2 %v9855_v45 }
 0xc82   :  { %5271 = vmatmul.bf16.vlgmr.msrb.gmra.mxu2 %v12146_v41  ;;  %v9633_v41 = vld [vmem:[%s13177_s12 + $0x18] sm:$0xff] }
 0xc83   :  { %5156 = vmatpush.bf16.msrb.mxu3 %v9633_v41 }
 0xc87   :  { %5157 = vmatpush.bf16.msrb.mxu3 %v9632_v23 }
 0xc8b   :  { %5158 = vmatpush.bf16.msrb.mxu3 %v9631_v63 }
 0xc8f   :  { %5159 = vmatpush.bf16.msrb.mxu3 %v9630_v43 }
 0xcd1   :  { %v5085_v46 = vpop.f32.mrf.mxu1 }
 0xcd2   :  { %v5086_v34 = vadd.f32 %v9661_v57, %v5085_v46 }
 0xcd9   :  { %v5087_v51 = vpop.f32.mrf.mxu1 }
 0xce1   :  { %v5259_v52 = vpop.f32.mrf.mxu1 }
 0xce2   :  { %v5260_v59 = vadd.f32 %v5259_v52, %v14094_v8  ;;  %v14095_v52 = vperm.slane %v10317_v60, 2 }
 0xce4   :  { %v12231_v56 = vpack.c.bf16 %v5260_v59, %v5260_v59 }
 0xce6   :  { %v5283_v11 = vsel %vm994_vm7, %v12231_v56, 0 }
 0xce7   :  { %5292 = vmatpush.bf16.xpose.msra.mxu3 %v5283_v11 }
 0xce9   :  { %v5261_v36 = vpop.f32.mrf.mxu1 }
 0xcf5   :  { %v5098_v37 = vpop.f32.mrf.mxu2 }
 0xcf6   :  { %v5099_v22 = vadd.f32 %v5098_v37, %v5086_v34 }
 0xcf8   :  { %v5102_v18 = vmax.f32 %v5099_v22, 0.0 }
 0xcfa   :  { %v5103_v32 = vpack.c.bf16 %v5102_v18, %v5102_v18 }
 0xcfc   :  { %5160 = vmatmul.bf16.vlgmr.msrb.gmra.mxu3 %v5103_v32 }
 0xcfd   :  { %v5100_v1 = vpop.f32.mrf.mxu2  ;;  %5354 = vmatpush.bf16.msrb.mxu3 %v9856_v26 }
 0xd05   :  { %v5272_v43 = vpop.f32.mrf.mxu2 }
 0xd06   :  { %v5273_v8 = vadd.f32 %v5272_v43, %v14095_v52 }
 0xd08   :  { %v12281_v59 = vpack.c.bf16 %v5273_v8, %v5273_v8 }
 0xd0a   :  { %v5328_v40 = vsel %vm1044_vm9, %v12281_v59, 0 }
 0xd0b   :  { %5337 = vmatpush.bf16.msrb.mxu0 %v5328_v40 }
 0xd0c   :  { %9098 = vmatmul.msk.bf16.vlgmr.msra.gmra.mxu3 %vm994_vm7, %v12225_v54 }
 0xd0d   :  { %v5274_v14 = vpop.f32.mrf.mxu2 }
 0xd7f   :  { %v5161_v42 = vpop.f32.mrf.mxu3 }
 0xd80   :  { %v5162_v7 = vadd.f32 %v9662_v49, %v5161_v42 }
 0xd82   :  { %v5166_v55 = vrot.slane %v5162_v7, 1  ;;  %v5167_v61 = vrot.slane %v5162_v7, 2  ;;  %v5168_v4 = vrot.slane %v5162_v7, 3  ;;  %5181 = vst.msk [vmem:[%s13179_s14] sm:$0x1] %vm5180_vm12, %v5162_v7  ;;  %v5169_v3 = vrot.slane %v5162_v7, 4 }
 0xd83   :  { %v5170_v62 = vrot.slane %v5162_v7, 5  ;;  %v5171_v45 = vrot.slane %v5162_v7, 6  ;;  %v5172_v39 = vrot.slane %v5162_v7, 7 }
 0xd84   :  { %5182 = vst.msk [vmem:[%s13179_s14 + $0x2] sm:$0x1] %vm5180_vm12, %v5166_v55 }
 0xd85   :  { %5183 = vst.msk [vmem:[%s13179_s14 + $0x4] sm:$0x1] %vm5180_vm12, %v5167_v61 }
 0xd86   :  { %5184 = vst.msk [vmem:[%s13179_s14 + $0x6] sm:$0x1] %vm5180_vm12, %v5168_v4 }
 0xd87   :  { %5185 = vst.msk [vmem:[%s13179_s14 + $0x8] sm:$0x1] %vm5180_vm12, %v5169_v3  ;;  %v5163_v48 = vpop.f32.mrf.mxu3  ;;  %v9857_v3 = vld [vmem:[%s13168_s3 + $0x10] sm:$0xff] }
 0xd88   :  { %5186 = vst.msk [vmem:[%s13179_s14 + $0xa] sm:$0x1] %vm5180_vm12, %v5170_v62 }
 0xd89   :  { %5187 = vst.msk [vmem:[%s13179_s14 + $0xc] sm:$0x1] %vm5180_vm12, %v5171_v45 }
 0xd8a   :  { %5188 = vst.msk [vmem:[%s13179_s14 + $0xe] sm:$0x1] %vm5180_vm12, %v5172_v39  ;;  %v5363_v39 = vpop.permute.xlu1 %5362 }
 0xd8f   :  { %v5294_v27 = vpop.f32.mrf.mxu3 }
 0xd90   :  { %v5298_v31 = vmul.f32 0.25, %v5294_v27 }
 0xd92   :  { %v5299_v41 = vsel %vm1015_vm8, %v5298_v31, -inf }
 0xd93   :  { %5300 = vmax.xlane.f32.xlu0 %v5299_v41 }
 0xd97   :  { %v5296_v23 = vpop.f32.mrf.mxu3 }
 0xe06   :  { %v5301_v46 = vpop.xlane.xlu0 %5300 }
 0xe07   :  { %v5302_v63 = vsub.f32 %v5298_v31, %v5301_v46 }
 0xe09   :  { %v5303_v51 = vmul.f32 1.442695, %v5302_v63 }
 0xe0b   :  { %9759 = vpow2.f32 %v5303_v51 }
 0xe11   :  { %v9760_v35 = vpop.eup %9759 }
 0xe12   :  { %v5305_v44 = vsel %vm1015_vm8, %v9760_v35, 0.0 }
 0xe13   :  { %5306 = vadd.xlane.f32.xlu0 %v5305_v44 }
 0xe27   :  { %5365 = vrot.lane.b32.xlu0 %v12231_v56, %s10107_s20 }
 0xe2f   :  { %5413 = vrot.lane.b32.xlu0 %v12281_v59, %s10107_s20 }
 0xe37   :  { %5542 = vrot.lane.b32.xlu0 %v12231_v56, %s10108_s2 }
 0xe3f   :  { %5454 = vrot.lane.b32.xlu0 %v12231_v56, %s10109_s21 }
 0xe47   :  { %5540 = vrot.lane.b32.xlu0 %v12225_v54, %s10108_s2 }
 0xe86   :  { %v5307_v60 = vpop.xlane.xlu0 %5306 }
 0xe87   :  { %9761 = vrcp.f32 %v5307_v60  ;;  %v5319_v34 = vand.u32 2147483648, %v5307_v60  ;;  %v5317_v22 = vand.u32 2147483647, %v5307_v60  ;;  %vm5313_vm14 = vweird.f32 %v5307_v60 }
 0xe89   :  { %v5320_v32 = vor.u32 1.1754944e-38, %v5319_v34  ;;  %vm5318_vm0 = vcmp.eq.f32.partialorder %v5317_v22, 8.507059e+37  ;;  %v9858_v34 = vld [vmem:[%s13168_s3 + $0x20] sm:$0xff] }
 0xe8d   :  { %v9762_v11 = vpop.eup %9761 }
 0xe8e   :  { %v5309_v36 = vmul.f32 %v9762_v11, %v5307_v60  ;;  %vm5314_vm13 = vweird.f32 %v9762_v11 }
 0xe8f   :  { %vm5315_vm15 = vmor %vm5313_vm14, %vm5314_vm13 }
 0xe90   :  { %v5310_v57 = vsub.f32 1.0, %v5309_v36 }
 0xe92   :  { %v5311_v37 = vmul.f32 %v9762_v11, %v5310_v57 }
 0xe94   :  { %v5312_v18 = vadd.f32 %v9762_v11, %v5311_v37 }
 0xe96   :  { %v5316_v1 = vsel %vm5315_vm15, %v9762_v11, %v5312_v18 }
 0xe97   :  { %v5321_v26 = vsel %vm5318_vm0, %v5320_v32, %v5316_v1 }
 0xe98   :  { %v5322_v49 = vmul.f32 %v9760_v35, %v5321_v26 }
 0xe99   :  { %v5366_v42 = vpop.permute.xlu0 %5365 }
 0xe9a   :  { %v5323_v7 = vpack.c.bf16 %v5322_v49, %v5322_v49  ;;  %v5371_v55 = vsel %vm994_vm7, %v5366_v42, 0 }
 0xe9b   :  { %5380 = vmatpush.bf16.xpose.msra.mxu0 %v5371_v55 }
 0xe9c   :  { %9099 = vmatmul.msk.bf16.vlgmr.msrb.gmra.mxu0 %vm1015_vm8, %v5323_v7 }
 0xea1   :  { %v5414_v61 = vpop.permute.xlu0 %5413 }
 0xea2   :  { %v5419_v4 = vsel %vm1044_vm9, %v5414_v61, 0 }
 0xea3   :  { %5428 = vmatpush.bf16.msra.mxu1 %v5419_v4 }
 0xea7   :  { %5533 = vmatpush.bf16.msrb.mxu1 %v9857_v3 }
 0xea9   :  { %v5543_v62 = vpop.permute.xlu0 %5542 }
 0xeaa   :  { %v5548_v45 = vsel %vm994_vm7, %v5543_v62, 0 }
 0xeab   :  { %5557 = vmatpush.bf16.xpose.msrb.mxu2 %v5548_v45 }
 0xeac   :  { %9101 = vmatmul.msk.bf16.vlgmr.msra.gmra.mxu0 %vm994_vm7, %v5363_v39 }
 0xeb1   :  { %v5455_v48 = vpop.permute.xlu0 %5454 }
 0xeb2   :  { %v5460_v27 = vsel %vm994_vm7, %v5455_v48, 0 }
 0xeb3   :  { %5469 = vmatpush.bf16.xpose.msra.mxu3 %v5460_v27 }
 0xf19   :  { %v5339_v31 = vpop.f32.mrf.mxu0 }
 0xf1a   :  { %v5343_v41 = vpack.c.bf16 %v5339_v31, %v5339_v31 }
 0xf1c   :  { %9100 = vmatmul.msk.bf16.vlgmr.msrb.gmra.mxu3 %vm994_vm7, %v5343_v41 }
 0xf21   :  { %v5341_v23 = vpop.f32.mrf.mxu0 }
 0xf29   :  { %v5382_v46 = vpop.f32.mrf.mxu0 }
 0xf2a   :  { %v5386_v63 = vmul.f32 0.25, %v5382_v46 }
 0xf2c   :  { %v5387_v43 = vsel %vm1015_vm8, %v5386_v63, -inf }
 0xf2d   :  { %5388 = vmax.xlane.f32.xlu2 %v5387_v43 }
 0xf31   :  { %v5384_v51 = vpop.f32.mrf.mxu0 }
 0xf45   :  { %5452 = vrot.lane.b32.xlu2 %v12225_v54, %s10109_s21 }
 0xf4d   :  { %5589 = vrot.lane.b32.xlu2 %v12281_v59, %s10108_s2 }
 0xf55   :  { %5630 = vrot.lane.b32.xlu2 %v12231_v56, %s10104_s6 }
 0xf5d   :  { %5718 = vrot.lane.b32.xlu2 %v12231_v56, %s10110_s27 }
 0xf65   :  { %5716 = vrot.lane.b32.xlu2 %v12225_v54, %s10110_s27 }
 0xf9f   :  { %v5356_v14 = vpop.f32.mrf.mxu3 }
 0xfa0   :  { %v5389_v35 = vpop.xlane.xlu2 %5388 }
 0xfa1   :  { %v5390_v44 = vsub.f32 %v5386_v63, %v5389_v35 }
 0xfa3   :  { %v5391_v52 = vmul.f32 1.442695, %v5390_v44 }
 0xfa5   :  { %9763 = vpow2.f32 %v5391_v52  ;;  %v5541_v52 = vpop.permute.xlu0 %5540 }
 0xfa7   :  { %v5358_v8 = vpop.f32.mrf.mxu3 }
 0xfa8   :  { %v5453_v40 = vpop.permute.xlu2 %5452  ;;  %v9859_v8 = vld [vmem:[%s13169_s4] ss:$0 sm:$0xff] }
 0xfa9   :  { %9104 = vmatmul.msk.bf16.vlgmr.msra.gmra.mxu3 %vm994_vm7, %v5453_v40  ;;  %v5360_v40 = vadd.f32 %v9859_v8, %v5356_v14 }
 0xfab   :  { %v9764_v60 = vpop.eup %9763 }
 0xfac   :  { %v5393_v11 = vsel %vm1015_vm8, %v9764_v60, 0.0 }
 0xfad   :  { %5394 = vadd.xlane.f32.xlu1 %v5393_v11 }
 0xfb0   :  { %v5590_v36 = vpop.permute.xlu2 %5589 }
 0xfb1   :  { %v5595_v57 = vsel %vm1044_vm9, %v5590_v36, 0 }
 0xfb2   :  { %5604 = vmatpush.bf16.msrb.mxu3 %v5595_v57 }
 0xfb6   :  { %5709 = vmatpush.bf16.msra.mxu3 %v9858_v34 }
 0xfb8   :  { %v5631_v39 = vpop.permute.xlu2 %5630 }
 0xfb9   :  { %v5636_v31 = vsel %vm994_vm7, %v5631_v39, 0 }
0x1020   :  { %v5395_v37 = vpop.xlane.xlu1 %5394 }
0x1021   :  { %9765 = vrcp.f32 %v5395_v37  ;;  %v5407_v1 = vand.u32 2147483648, %v5395_v37  ;;  %v5405_v49 = vand.u32 2147483647, %v5395_v37  ;;  %vm5401_vm2 = vweird.f32 %v5395_v37 }
0x1023   :  { %v5408_v61 = vor.u32 1.1754944e-38, %v5407_v1  ;;  %vm5406_vm4 = vcmp.eq.f32.partialorder %v5405_v49, 8.507059e+37 }
0x1027   :  { %v9766_v22 = vpop.eup %9765 }
0x1028   :  { %v5397_v18 = vmul.f32 %v9766_v22, %v5395_v37  ;;  %vm5402_vm1 = vweird.f32 %v9766_v22 }
0x1029   :  { %vm5403_vm3 = vmor %vm5401_vm2, %vm5402_vm1 }
0x102a   :  { %v5398_v32 = vsub.f32 1.0, %v5397_v18 }
0x102c   :  { %v5399_v26 = vmul.f32 %v9766_v22, %v5398_v32  ;;  %v5471_v42 = vpop.f32.mrf.mxu3 }
0x102d   :  { %v5475_v7 = vmul.f32 0.25, %v5471_v42 }
0x102e   :  { %v5400_v55 = vadd.f32 %v9766_v22, %v5399_v26 }
0x102f   :  { %v5476_v4 = vsel %vm1015_vm8, %v5475_v7, -inf }
0x1030   :  { %v5404_v3 = vsel %vm5403_vm3, %v9766_v22, %v5400_v55  ;;  %5477 = vmax.xlane.f32.xlu1 %v5476_v4 }
0x1031   :  { %v5409_v62 = vsel %vm5406_vm4, %v5408_v61, %v5404_v3 }
0x1032   :  { %v5410_v45 = vmul.f32 %v9764_v60, %v5409_v62 }
0x1034   :  { %v5411_v48 = vpack.c.bf16 %v5410_v45, %v5410_v45  ;;  %v5473_v27 = vpop.f32.mrf.mxu3 }
0x1036   :  { %9102 = vmatmul.msk.bf16.vlgmr.msra.gmra.mxu1 %vm1015_vm8, %v5411_v48 }
0x1037   :  { %5645 = vmatpush.bf16.xpose.msra.mxu1 %v5636_v31 }
0x10a3   :  { %v5478_v41 = vpop.xlane.xlu1 %5477 }
0x10a4   :  { %v5479_v23 = vsub.f32 %v5475_v7, %v5478_v41 }
0x10a6   :  { %v5480_v46 = vmul.f32 1.442695, %v5479_v23 }
0x10a8   :  { %9767 = vpow2.f32 %v5480_v46 }
0x10ae   :  { %v12323_v63 = vpop.eup %9767 }
0x10af   :  { %v5482_v43 = vsel %vm1015_vm8, %v12323_v63, 0.0 }
0x10b0   :  { %5483 = vadd.xlane.f32.xlu1 %v5482_v43 }
0x10b3   :  { %v5430_v51 = vpop.f32.mrf.mxu1 }
0x10b4   :  { %v5434_v35 = vpack.c.bf16 %v5430_v51, %v5430_v51 }
0x10b6   :  { %9103 = vmatmul.msk.bf16.vlgmr.msra.gmra.mxu2 %vm994_vm7, %v5434_v35 }
0x10bb   :  { %v5432_v44 = vpop.f32.mrf.mxu1 }
0x10c6   :  { %9107 = vmatmul.msk.bf16.vlgmr.msrb.gmra.mxu2 %vm994_vm7, %v5541_v52 }
0x1123   :  { %v5484_v49 = vpop.xlane.xlu1 %5483 }
0x1124   :  { %v5496_v41 = vand.u32 2147483648, %v5484_v49  ;;  %vm5490_vm11 = vweird.f32 %v5484_v49  ;;  %v5494_v46 = vand.u32 2147483647, %v5484_v49 }
0x1126   :  { %v5497_v52 = vor.u32 1.1754944e-38, %v5496_v41  ;;  %vm5495_vm0 = vcmp.eq.f32.partialorder %v5494_v46, 8.507059e+37 }
0x1139   :  { %v5447_v60 = vpop.f32.mrf.mxu2 }
0x113a   :  { %v12332_v11 = vadd.f32 %v5447_v60, %v5360_v40 }
0x1141   :  { %v5449_v36 = vpop.f32.mrf.mxu2 }
0x1149   :  { %v5559_v57 = vpop.f32.mrf.mxu2 }
0x114a   :  { %v5563_v34 = vmul.f32 0.25, %v5559_v57 }
0x114c   :  { %v5564_v37 = vsel %vm1015_vm8, %v5563_v34, -inf }
0x114d   :  { %5565 = vmax.xlane.f32.xlu0 %v5564_v37  ;;  %v5719_v37 = vpop.permute.xlu2 %5718 }
0x1151   :  { %v5561_v22 = vpop.f32.mrf.mxu2 }
0x1161   :  { %5628 = vrot.lane.b32.xlu0 %v12225_v54, %s10104_s6 }
0x11c0   :  { %v5566_v18 = vpop.xlane.xlu0 %5565 }
0x11c1   :  { %v5567_v32 = vsub.f32 %v5563_v34, %v5566_v18  ;;  %v9860_v18 = vld [vmem:[%s13168_s3 + $0x18] sm:$0xff] }
0x11c3   :  { %v5568_v1 = vmul.f32 1.442695, %v5567_v32  ;;  %v5724_v32 = vsel %vm994_vm7, %v5719_v37, 0 }
0x11c5   :  { %9769 = vpow2.f32 %v5568_v1 }
0x11c6   :  { %9771 = vrcp.f32 %v5484_v49 }
0x11cb   :  { %v9770_v26 = vpop.eup %9769 }
0x11cc   :  { %v5570_v14 = vsel %vm1015_vm8, %v9770_v26, 0.0  ;;  %v9772_v42 = vpop.eup %9771 }
0x11cd   :  { %5571 = vadd.xlane.f32.xlu1 %v5570_v14  ;;  %v5486_v55 = vmul.f32 %v9772_v42, %v5484_v49  ;;  %vm5491_vm6 = vweird.f32 %v9772_v42 }
0x11ce   :  { %vm5492_vm14 = vmor %vm5490_vm11, %vm5491_vm6 }
0x11cf   :  { %v5487_v61 = vsub.f32 1.0, %v5486_v55 }
0x11d1   :  { %v5488_v62 = vmul.f32 %v9772_v42, %v5487_v61 }
0x11d3   :  { %v5489_v31 = vadd.f32 %v9772_v42, %v5488_v62  ;;  %v5629_v55 = vpop.permute.xlu0 %5628 }
0x11d5   :  { %v5493_v35 = vsel %vm5492_vm14, %v9772_v42, %v5489_v31 }
0x11d6   :  { %v5498_v40 = vsel %vm5495_vm0, %v5497_v52, %v5493_v35 }
0x11d7   :  { %v5499_v36 = vmul.f32 %v12323_v63, %v5498_v40 }
0x11d9   :  { %v5500_v22 = vpack.c.bf16 %v5499_v36, %v5499_v36 }
0x11e6   :  { %5501 = vrot.lane.b32.xlu1 %v12281_v59, %s10109_s21 }
0x1240   :  { %v5572_v7 = vpop.xlane.xlu1 %5571 }
0x1241   :  { %9773 = vrcp.f32 %v5572_v7  ;;  %v5584_v39 = vand.u32 2147483648, %v5572_v7  ;;  %v5582_v27 = vand.u32 2147483647, %v5572_v7  ;;  %vm5578_vm10 = vweird.f32 %v5572_v7 }
0x1243   :  { %v5585_v43 = vor.u32 1.1754944e-38, %v5584_v39  ;;  %vm5583_vm15 = vcmp.eq.f32.partialorder %v5582_v27, 8.507059e+37 }
0x1247   :  { %v9774_v4 = vpop.eup %9773 }
0x1248   :  { %v5574_v3 = vmul.f32 %v9774_v4, %v5572_v7  ;;  %vm5579_vm5 = vweird.f32 %v9774_v4  ;;  %v5717_v7 = vpop.permute.xlu2 %5716 }
0x1249   :  { %vm5580_vm13 = vmor %vm5578_vm10, %vm5579_vm5 }
0x124a   :  { %v5575_v45 = vsub.f32 1.0, %v5574_v3 }
0x124c   :  { %v5576_v48 = vmul.f32 %v9774_v4, %v5575_v45 }
0x124e   :  { %v5577_v23 = vadd.f32 %v9774_v4, %v5576_v48 }
0x1250   :  { %v5581_v51 = vsel %vm5580_vm13, %v9774_v4, %v5577_v23 }
0x1251   :  { %v5586_v44 = vsel %vm5583_vm15, %v5585_v43, %v5581_v51 }
0x1252   :  { %v5587_v8 = vmul.f32 %v9770_v26, %v5586_v44 }
0x1254   :  { %v5588_v60 = vpack.c.bf16 %v5587_v8, %v5587_v8 }
0x1256   :  { %9108 = vmatmul.msk.bf16.vlgmr.msrb.gmra.mxu3 %vm1015_vm8, %v5588_v60 }
0x1258   :  { %v5502_v57 = vpop.permute.xlu1 %5501 }
0x1259   :  { %v5507_v34 = vsel %vm1044_vm9, %v5502_v57, 0 }
0x125a   :  { %5516 = vmatpush.bf16.msrb.mxu0 %v5507_v34 }
0x125d   :  { %9105 = vmatmul.msk.bf16.vlgmr.msrb.gmra.mxu0 %vm1015_vm8, %v5500_v22 }
0x125e   :  { %5621 = vmatpush.bf16.msra.mxu0 %v9860_v18  ;;  %v9861_v18 = vld [vmem:[%s13168_s3 + $0x28] sm:$0xff] }
0x1262   :  { %5733 = vmatpush.bf16.xpose.msrb.mxu0 %v5724_v32 }
0x12d9   :  { %v5606_v1 = vpop.f32.mrf.mxu3 }
0x12da   :  { %v5610_v26 = vpack.c.bf16 %v5606_v1, %v5606_v1  ;;  %v5518_v14 = vpop.f32.mrf.mxu0 }
0x12db   :  { %v5522_v63 = vpack.c.bf16 %v5518_v14, %v5518_v14 }
0x12dc   :  { %9109 = vmatmul.msk.bf16.vlgmr.msra.gmra.mxu0 %vm994_vm7, %v5610_v26 }
0x12dd   :  { %9106 = vmatmul.msk.bf16.vlgmr.msrb.gmra.mxu1 %vm994_vm7, %v5522_v63 }
0x12e1   :  { %v5608_v49 = vpop.f32.mrf.mxu3 }
0x12e2   :  { %v5520_v42 = vpop.f32.mrf.mxu0 }
0x12ec   :  { %9113 = vmatmul.msk.bf16.vlgmr.msrb.gmra.mxu0 %vm994_vm7, %v5717_v7 }
0x12ed   :  { %9110 = vmatmul.msk.bf16.vlgmr.msra.gmra.mxu1 %vm994_vm7, %v5629_v55 }
0x1359   :  { %v5623_v61 = vpop.f32.mrf.mxu0 }
0x135a   :  { %v5535_v4 = vpop.f32.mrf.mxu1 }
0x135b   :  { %v5539_v3 = vadd.f32 %v5535_v4, %v12332_v11 }
0x135d   :  { %v12353_v62 = vadd.f32 %v5623_v61, %v5539_v3 }
0x1361   :  { %v5625_v45 = vpop.f32.mrf.mxu0 }
0x1362   :  { %v5537_v39 = vpop.f32.mrf.mxu1  ;;  %v9862_v45 = vld [vmem:[%s13168_s3 + $0x30] sm:$0xff] }
0x1369   :  { %v5735_v48 = vpop.f32.mrf.mxu0 }
0x136a   :  { %v5739_v27 = vmul.f32 0.25, %v5735_v48  ;;  %v5647_v31 = vpop.f32.mrf.mxu1 }
0x136b   :  { %v5651_v41 = vmul.f32 0.25, %v5647_v31 }
0x136c   :  { %v5740_v23 = vsel %vm1015_vm8, %v5739_v27, -inf }
0x136d   :  { %5741 = vmax.xlane.f32.xlu1 %v5740_v23  ;;  %v5652_v46 = vsel %vm1015_vm8, %v5651_v41, -inf }
0x136e   :  { %5653 = vmax.xlane.f32.xlu2 %v5652_v46 }
0x1371   :  { %v5737_v43 = vpop.f32.mrf.mxu0 }
0x1372   :  { %v5649_v51 = vpop.f32.mrf.mxu1 }
0x1386   :  { %5677 = vrot.lane.b32.xlu1 %v12281_v59, %s10104_s6 }
0x138e   :  { %5806 = vrot.lane.b32.xlu1 %v12231_v56, %s10097_s28 }
0x13e0   :  { %v5742_v11 = vpop.xlane.xlu1 %5741 }
0x13e1   :  { %v5743_v35 = vsub.f32 %v5739_v27, %v5742_v11  ;;  %v5654_v44 = vpop.xlane.xlu2 %5653 }
0x13e2   :  { %v5655_v52 = vsub.f32 %v5651_v41, %v5654_v44 }
0x13e3   :  { %v5744_v8 = vmul.f32 1.442695, %v5743_v35 }
0x13e4   :  { %v5656_v40 = vmul.f32 1.442695, %v5655_v52 }
0x13e5   :  { %9775 = vpow2.f32 %v5744_v8 }
0x13e6   :  { %9777 = vpow2.f32 %v5656_v40 }
0x13eb   :  { %v9776_v60 = vpop.eup %9775 }
0x13ec   :  { %v9778_v36 = vpop.eup %9777  ;;  %v5746_v57 = vsel %vm1015_vm8, %v9776_v60, 0.0 }
0x13ed   :  { %5747 = vadd.xlane.f32.xlu2 %v5746_v57  ;;  %v5658_v34 = vsel %vm1015_vm8, %v9778_v36, 0.0 }
0x13ee   :  { %5659 = vadd.xlane.f32.xlu0 %v5658_v34 }
0x13f8   :  { %v5678_v37 = vpop.permute.xlu1 %5677 }
0x13f9   :  { %v5683_v22 = vsel %vm1044_vm9, %v5678_v37, 0 }
0x13fa   :  { %5692 = vmatpush.bf16.msra.mxu2 %v5683_v22  ;;  %v14096_v22 = vld [vmem:[#allocation20_spill] sm:$0xff] }
0x13fe   :  { %5797 = vmatpush.bf16.msrb.mxu2 %v9861_v18  ;;  %v14097_v18 = vld [vmem:[#allocation23_spill] sm:$0xff] }
0x1400   :  { %v5807_v32 = vpop.permute.xlu1 %5806 }
0x1401   :  { %v5812_v1 = vsel %vm994_vm7, %v5807_v32, 0  ;;  %v14098_v32 = vld [vmem:[#allocation26_spill] sm:$0xff] }
0x1402   :  { %5894 = vrot.lane.b32.xlu0 %v12231_v56, %s10111_s8  ;;  %5821 = vmatpush.bf16.xpose.msrb.mxu3 %v5812_v1  ;;  %v14099_v1 = vld [vmem:[#allocation29_spill] sm:$0xff] }
0x1405   :  { %5765 = vrot.lane.b32.xlu2 %v12281_v59, %s10110_s27 }
0x140a   :  { %5804 = vrot.lane.b32.xlu0 %v12225_v54, %s10097_s28 }
0x140d   :  { %5892 = vrot.lane.b32.xlu2 %v12225_v54, %s10111_s8 }
0x1460   :  { %v5748_v26 = vpop.xlane.xlu2 %5747 }
0x1461   :  { %9779 = vrcp.f32 %v5748_v26  ;;  %v5660_v14 = vpop.xlane.xlu0 %5659  ;;  %v5760_v4 = vand.u32 2147483648, %v5748_v26  ;;  %v5758_v39 = vand.u32 2147483647, %v5748_v26  ;;  %vm5754_vm3 = vweird.f32 %v5748_v26 }
0x1462   :  { %9781 = vrcp.f32 %v5660_v14  ;;  %v5672_v48 = vand.u32 2147483648, %v5660_v14  ;;  %v5670_v31 = vand.u32 2147483647, %v5660_v14  ;;  %vm5666_vm5 = vweird.f32 %v5660_v14 }
0x1463   :  { %v5761_v23 = vor.u32 1.1754944e-38, %v5760_v4  ;;  %vm5759_vm6 = vcmp.eq.f32.partialorder %v5758_v39, 8.507059e+37  ;;  %v14106_v4 = vld [vmem:[#allocation27_spill] sm:$0xff]  ;;  %v14108_v39 = vld [vmem:[#allocation33_spill] sm:$0xff] }
0x1464   :  { %v5673_v51 = vor.u32 1.1754944e-38, %v5672_v48  ;;  %vm5671_vm11 = vcmp.eq.f32.partialorder %v5670_v31, 8.507059e+37  ;;  %v14109_v48 = vld [vmem:[#allocation36_spill] sm:$0xff]  ;;  %v14110_v31 = vld [vmem:[#allocation39_spill] sm:$0xff] }
0x1467   :  { %v9780_v63 = vpop.eup %9779 }
0x1468   :  { %v9782_v49 = vpop.eup %9781  ;;  %v5750_v42 = vmul.f32 %v9780_v63, %v5748_v26  ;;  %v5766_v7 = vpop.permute.xlu2 %5765  ;;  %vm5755_vm1 = vweird.f32 %v9780_v63  ;;  %v14102_v26 = vld [vmem:[#allocation38_spill] sm:$0xff] }
0x1469   :  { %v5662_v55 = vmul.f32 %v9782_v49, %v5660_v14  ;;  %v5771_v56 = vsel %vm1044_vm9, %v5766_v7, 0  ;;  %vm5667_vm2 = vweird.f32 %v9782_v49  ;;  %vm5756_vm4 = vmor %vm5754_vm3, %vm5755_vm1  ;;  %v14103_v14 = vld [vmem:[#allocation48_spill] sm:$0xff] }
0x146a   :  { %v5751_v61 = vsub.f32 1.0, %v5750_v42  ;;  %5780 = vmatpush.bf16.msrb.mxu1 %v5771_v56  ;;  %vm5668_vm10 = vmor %vm5666_vm5, %vm5667_vm2  ;;  %v14104_v42 = vld [vmem:[#allocation21_spill] sm:$0xff]  ;;  %v14105_v56 = vld [vmem:[#allocation24_spill] sm:$0xff] }
0x146b   :  { %v5663_v3 = vsub.f32 1.0, %v5662_v55 }
0x146c   :  { %v5752_v54 = vmul.f32 %v9780_v63, %v5751_v61 }
0x146d   :  { %v5664_v27 = vmul.f32 %v9782_v49, %v5663_v3 }
0x146e   :  { %5885 = vmatpush.bf16.msra.mxu1 %v9862_v45  ;;  %v5753_v41 = vadd.f32 %v9780_v63, %v5752_v54  ;;  %v14107_v45 = vld [vmem:[#allocation30_spill] sm:$0xff] }
0x146f   :  { %v5665_v46 = vadd.f32 %v9782_v49, %v5664_v27 }
0x1470   :  { %v5757_v43 = vsel %vm5756_vm4, %v9780_v63, %v5753_v41  ;;  %v5893_v54 = vpop.permute.xlu2 %5892  ;;  %v14111_v41 = vld [vmem:[#allocation49_spill] sm:$0xff] }
0x1471   :  { %v5762_v11 = vsel %vm5759_vm6, %v5761_v23, %v5757_v43  ;;  %v5669_v35 = vsel %vm5668_vm10, %v9782_v49, %v5665_v46  ;;  %v14112_v23 = vld [vmem:[#allocation52_spill] sm:$0xff]  ;;  %v14113_v46 = vld [vmem:[#allocation54_spill] sm:$0xff] }
0x1472   :  { %v5763_v44 = vmul.f32 %v9776_v60, %v5762_v11  ;;  %v5674_v52 = vsel %vm5671_vm11, %v5673_v51, %v5669_v35  ;;  %v14100_v60 = vld [vmem:[#allocation32_spill] sm:$0xff]  ;;  %v14115_v51 = vld [vmem:[#allocation58_spill] sm:$0xff] }
0x1473   :  { %v5675_v8 = vmul.f32 %v9778_v36, %v5674_v52  ;;  %v14101_v36 = vld [vmem:[#allocation35_spill] sm:$0xff]  ;;  %v14114_v43 = vld [vmem:[#allocation56_spill] sm:$0xff]  ;;  %v14117_v35 = vld [vmem:[#allocation62_spill] sm:$0xff] }
0x1474   :  { %v5764_v40 = vpack.c.bf16 %v5763_v44, %v5763_v44  ;;  %v5895_v57 = vpop.permute.xlu0 %5894  ;;  %v14116_v11 = vld [vmem:[#allocation60_spill] sm:$0xff]  ;;  %v14119_v52 = vld [vmem:[#allocation67_spill] sm:$0xff] }
0x1475   :  { %v5676_v34 = vpack.c.bf16 %v5675_v8, %v5675_v8  ;;  %v5900_v37 = vsel %vm994_vm7, %v5895_v57, 0  ;;  %v14118_v44 = vld [vmem:[#allocation64_spill] sm:$0xff]  ;;  %v14120_v8 = vld [vmem:[#allocation70_spill] sm:$0xff]  ;;  %v14122_v57 = vld [vmem:[#allocation77_spill] sm:$0xff] }
0x1476   :  { %9114 = vmatmul.msk.bf16.vlgmr.msrb.gmra.mxu1 %vm1015_vm8, %v5764_v40  ;;  %v14121_v40 = vld [vmem:[#allocation73_spill] sm:$0xff] }
0x1477   :  { %9111 = vmatmul.msk.bf16.vlgmr.msra.gmra.mxu2 %vm1015_vm8, %v5676_v34  ;;  %5981 = vmatpush.bf16.msrb.mxu1 %v14096_v22  ;;  %v14123_v34 = vld [vmem:[#allocation81_spill] sm:$0xff] }
0x1478   :  { %5909 = vmatpush.bf16.xpose.msra.mxu2 %v5900_v37  ;;  %v14124_v37 = vld [vmem:[#allocation85_spill] sm:$0xff] }
0x1479   :  { %v14125_v22 = vld [vmem:[#allocation89_spill] sm:$0xff] }
0x147b   :  { %5982 = vmatpush.bf16.msrb.mxu1 %v14097_v18  ;;  %v14126_v18 = vld [vmem:[#allocation93_spill] sm:$0xff] }
0x147c   :  { %v5805_v27 = vpop.permute.xlu0 %5804 }
0x147f   :  { %5983 = vmatpush.bf16.msrb.mxu1 %v14098_v32  ;;  %v14127_v32 = vld [vmem:[#allocation98_spill] sm:$0xff] }
0x1483   :  { %5984 = vmatpush.bf16.msrb.mxu1 %v14099_v1  ;;  %v14128_v1 = vld [vmem:[#allocation102_spill] sm:$0xff] }
0x1487   :  { %5985 = vmatpush.bf16.msrb.mxu1 %v14100_v60  ;;  %v14129_v60 = vld [vmem:[#allocation106_spill] sm:$0xff] }
0x148b   :  { %5986 = vmatpush.bf16.msrb.mxu1 %v14101_v36  ;;  %v14130_v36 = vld [vmem:[#allocation110_spill] sm:$0xff] }
0x148f   :  { %5987 = vmatpush.bf16.msrb.mxu1 %v14102_v26  ;;  %v14131_v26 = vld [vmem:[#allocation114_spill] sm:$0xff] }
0x1493   :  { %5988 = vmatpush.bf16.msrb.mxu1 %v14103_v14  ;;  %v14132_v14 = vld [vmem:[#allocation118_spill] sm:$0xff] }
0x14f3   :  { %v5782_v63 = vpop.f32.mrf.mxu1 }
0x14f4   :  { %v5786_v49 = vpack.c.bf16 %v5782_v63, %v5782_v63  ;;  %v14133_v63 = vld [vmem:[#allocation122_spill] sm:$0xff] }
0x14f6   :  { %9115 = vmatmul.msk.bf16.vlgmr.msrb.gmra.mxu2 %vm994_vm7, %v5786_v49  ;;  %v14134_v49 = vld [vmem:[#allocation126_spill] sm:$0xff] }
0x14f7   :  { %5994 = vmatpush.bf16.msrb.mxu2 %v14104_v42  ;;  %v14135_v42 = vld [vmem:[#allocation132_spill] sm:$0xff] }
0x14fa   :  { %v5694_v7 = vpop.f32.mrf.mxu2 }
0x14fb   :  { %v5698_v55 = vpack.c.bf16 %v5694_v7, %v5694_v7  ;;  %5995 = vmatpush.bf16.msrb.mxu2 %v14105_v56  ;;  %v5784_v61 = vpop.f32.mrf.mxu1  ;;  %v14136_v7 = vld [vmem:[#allocation135_spill] sm:$0xff] }
0x14fc   :  { %v14138_v56 = vld [vmem:[#allocation143_spill] sm:$0xff] }
0x14fd   :  { %9112 = vmatmul.msk.bf16.vlgmr.msra.gmra.mxu3 %vm994_vm7, %v5698_v55  ;;  %v14137_v55 = vld [vmem:[#allocation139_spill] sm:$0xff] }
0x14fe   :  { %v14139_v61 = vld [vmem:[#allocation147_spill] sm:$0xff] }
0x14ff   :  { %5996 = vmatpush.bf16.msrb.mxu2 %v14106_v4 }
0x1502   :  { %v5696_v3 = vpop.f32.mrf.mxu2 }
0x1503   :  { %5997 = vmatpush.bf16.msrb.mxu2 %v14107_v45  ;;  %v14140_v3 = vld [vmem:[#allocation151_spill] sm:$0xff] }
0x1504   :  { %v14141_v45 = vld [vmem:[#allocation155_spill] sm:$0xff] }
0x1506   :  { %9119 = vmatmul.msk.bf16.vlgmr.msra.gmra.mxu2 %vm994_vm7, %v5893_v54 }
0x1507   :  { %5998 = vmatpush.bf16.msrb.mxu2 %v14108_v39 }
0x150b   :  { %5999 = vmatpush.bf16.msrb.mxu2 %v14109_v48 }
0x150d   :  { %9116 = vmatmul.msk.bf16.vlgmr.msrb.gmra.mxu3 %vm994_vm7, %v5805_v27  ;;  %v14142_v27 = vld [vmem:[#allocation160_spill] sm:$0xff] }
0x150f   :  { %6000 = vmatpush.bf16.msrb.mxu2 %v14110_v31 }
0x1513   :  { %6001 = vmatpush.bf16.msrb.mxu2 %v14111_v41  ;;  %v14143_v41 = vld [vmem:[#allocation165_spill] sm:$0xff] }
0x1516   :  { %6002 = vmatmul.bf16.vlgmr.msrb.gmra.mxu2 %v11524_v2 }
0x1517   :  { %6046 = vmatpush.bf16.msra.mxu2 %v14112_v23 }
0x151b   :  { %6047 = vmatpush.bf16.msra.mxu2 %v14113_v46  ;;  %v14144_v46 = vld [vmem:[#allocation168_spill] sm:$0xff] }
0x151f   :  { %6048 = vmatpush.bf16.msra.mxu2 %v14114_v43 }
0x1523   :  { %6049 = vmatpush.bf16.msra.mxu2 %v14115_v51 }
0x1527   :  { %6050 = vmatpush.bf16.msra.mxu2 %v14116_v11 }
0x152b   :  { %6051 = vmatpush.bf16.msra.mxu2 %v14117_v35  ;;  %v14145_v35 = vld [vmem:[#allocation172_spill] sm:$0xff] }
0x152f   :  { %6052 = vmatpush.bf16.msra.mxu2 %v14118_v44 }
0x1533   :  { %6053 = vmatpush.bf16.msra.mxu2 %v14119_v52  ;;  %v14146_v52 = vld [vmem:[#allocation176_spill] sm:$0xff] }
0x1536   :  { %6054 = vmatmul.bf16.vlgmr.msra.gmra.mxu2 %v11524_v2 }
0x1537   :  { %6098 = vmatpush.bf16.msrb.mxu2 %v14120_v8 }
0x153b   :  { %6099 = vmatpush.bf16.msrb.mxu2 %v14121_v40 }
0x153f   :  { %6100 = vmatpush.bf16.msrb.mxu2 %v14122_v57  ;;  %v14147_v57 = vld [vmem:[#allocation180_spill] sm:$0xff] }
0x1543   :  { %6101 = vmatpush.bf16.msrb.mxu2 %v14123_v34 }
0x1547   :  { %6102 = vmatpush.bf16.msrb.mxu2 %v14124_v37  ;;  %v14148_v37 = vld [vmem:[#allocation184_spill] sm:$0xff] }
0x154b   :  { %6103 = vmatpush.bf16.msrb.mxu2 %v14125_v22 }
0x154f   :  { %6104 = vmatpush.bf16.msrb.mxu2 %v14126_v18  ;;  %v14149_v18 = vld [vmem:[#allocation188_spill] sm:$0xff] }
0x1553   :  { %6105 = vmatpush.bf16.msrb.mxu2 %v14127_v32  ;;  %v14150_v32 = vld [vmem:[#allocation193_spill] sm:$0xff] }
0x1556   :  { %6106 = vmatmul.bf16.vlgmr.msrb.gmra.mxu2 %v11524_v2 }
0x1557   :  { %6150 = vmatpush.bf16.msra.mxu2 %v14128_v1 }
0x155b   :  { %6151 = vmatpush.bf16.msra.mxu2 %v14129_v60  ;;  %v14151_v60 = vld [vmem:[#allocation197_spill] sm:$0xff] }
0x155f   :  { %6152 = vmatpush.bf16.msra.mxu2 %v14130_v36 }
0x1563   :  { %6153 = vmatpush.bf16.msra.mxu2 %v14131_v26 }
0x1567   :  { %6154 = vmatpush.bf16.msra.mxu2 %v14132_v14 }
0x156b   :  { %6155 = vmatpush.bf16.msra.mxu2 %v14133_v63 }
0x156f   :  { %6156 = vmatpush.bf16.msra.mxu2 %v14134_v49 }
0x1573   :  { %6157 = vmatpush.bf16.msra.mxu2 %v14135_v42 }
0x1576   :  { %6158 = vmatmul.bf16.vlgmr.msra.gmra.mxu2 %v11524_v2 }
0x1577   :  { %6202 = vmatpush.bf16.msrb.mxu2 %v14136_v7 }
0x1579   :  { %v5799_v4 = vpop.f32.mrf.mxu2 }
0x157b   :  { %6203 = vmatpush.bf16.msrb.mxu2 %v14137_v55 }
0x157f   :  { %6204 = vmatpush.bf16.msrb.mxu2 %v14138_v56 }
0x1580   :  { %v5711_v54 = vpop.f32.mrf.mxu3 }
0x1581   :  { %v5715_v39 = vadd.f32 %v5711_v54, %v12353_v62  ;;  %v5801_v48 = vpop.f32.mrf.mxu2 }
0x1583   :  { %6205 = vmatpush.bf16.msrb.mxu2 %v14139_v61  ;;  %v12439_v31 = vadd.f32 %v5799_v4, %v5715_v39 }
0x1587   :  { %6206 = vmatpush.bf16.msrb.mxu2 %v14140_v3 }
0x1588   :  { %v5713_v23 = vpop.f32.mrf.mxu3 }
0x1589   :  { %v5911_v43 = vpop.f32.mrf.mxu2 }
0x158a   :  { %v5915_v51 = vmul.f32 0.25, %v5911_v43  ;;  %v14154_v43 = vld [vmem:[#allocation28_spill] sm:$0xff] }
0x158b   :  { %6207 = vmatpush.bf16.msrb.mxu2 %v14141_v45 }
0x158c   :  { %v5916_v11 = vsel %vm1015_vm8, %v5915_v51, -inf }
0x158d   :  { %5917 = vmax.xlane.f32.xlu1 %v5916_v11  ;;  %v14156_v11 = vld [vmem:[#allocation34_spill] sm:$0xff] }
0x158f   :  { %6208 = vmatpush.bf16.msrb.mxu2 %v14142_v27 }
0x1590   :  { %v5823_v44 = vpop.f32.mrf.mxu3 }
0x1591   :  { %v5827_v62 = vmul.f32 0.25, %v5823_v44  ;;  %v5913_v8 = vpop.f32.mrf.mxu2  ;;  %v14158_v44 = vld [vmem:[#allocation40_spill] sm:$0xff] }
0x1593   :  { %6209 = vmatpush.bf16.msrb.mxu2 %v14143_v41  ;;  %v5828_v40 = vsel %vm1015_vm8, %v5827_v62, -inf  ;;  %v14152_v41 = vld [vmem:[#allocation22_spill] sm:$0xff] }
0x1594   :  { %5829 = vmax.xlane.f32.xlu2 %v5828_v40 }
0x1597   :  { %6254 = vmatpush.bf16.msra.mxu2 %v14144_v46  ;;  %v14153_v46 = vld [vmem:[#allocation25_spill] sm:$0xff] }
0x1598   :  { %v5825_v34 = vpop.f32.mrf.mxu3 }
0x1599   :  { %v12449_v22 = vpop.f32.mrf.mxu2 }
0x159b   :  { %6255 = vmatpush.bf16.msra.mxu2 %v14145_v35  ;;  %v14157_v35 = vld [vmem:[#allocation37_spill] sm:$0xff] }
0x159f   :  { %6256 = vmatpush.bf16.msra.mxu2 %v14146_v52  ;;  %v14159_v52 = vld [vmem:[#allocation50_spill] sm:$0xff] }
0x15a1   :  { %v6005_v1 = vpop.f32.mrf.mxu2 }
0x15a3   :  { %6257 = vmatpush.bf16.msra.mxu2 %v14147_v57 }
0x15a7   :  { %6258 = vmatpush.bf16.msra.mxu2 %v14148_v37 }
0x15ab   :  { %6259 = vmatpush.bf16.msra.mxu2 %v14149_v18 }
0x15ac   :  { %5941 = vrot.lane.b32.xlu2 %v12281_v59, %s10111_s8 }
0x15af   :  { %6260 = vmatpush.bf16.msra.mxu2 %v14150_v32 }
0x15b3   :  { %6261 = vmatpush.bf16.msra.mxu2 %v14151_v60 }
0x15b9   :  { %v12456_v36 = vpop.f32.mrf.mxu2 }
0x15c1   :  { %v6057_v26 = vpop.f32.mrf.mxu2 }
0x15d9   :  { %v12458_v14 = vpop.f32.mrf.mxu2 }
0x15e1   :  { %v6109_v63 = vpop.f32.mrf.mxu2 }
0x15f9   :  { %v12460_v49 = vpop.f32.mrf.mxu2 }
0x1600   :  { %v5918_v7 = vpop.xlane.xlu1 %5917 }
0x1601   :  { %v6161_v42 = vpop.f32.mrf.mxu2  ;;  %v5919_v55 = vsub.f32 %v5915_v51, %v5918_v7  ;;  %v14155_v51 = vld [vmem:[#allocation31_spill] sm:$0xff] }
0x1603   :  { %v5920_v56 = vmul.f32 1.442695, %v5919_v55 }
0x1605   :  { %9783 = vpow2.f32 %v5920_v56 }
0x1607   :  { %v5830_v61 = vpop.xlane.xlu2 %5829 }
0x1608   :  { %v5831_v4 = vsub.f32 %v5827_v62, %v5830_v61 }
0x160a   :  { %v5832_v3 = vmul.f32 1.442695, %v5831_v4 }
0x160b   :  { %v9784_v45 = vpop.eup %9783 }
0x160c   :  { %9785 = vpow2.f32 %v5832_v3  ;;  %v5922_v54 = vsel %vm1015_vm8, %v9784_v45, 0.0 }
0x160d   :  { %5923 = vadd.xlane.f32.xlu0 %v5922_v54 }
0x160f   :  { %v5942_v39 = vpop.permute.xlu2 %5941 }
0x1610   :  { %v5947_v48 = vsel %vm1044_vm9, %v5942_v39, 0 }
0x1611   :  { %5956 = vmatpush.bf16.msra.mxu3 %v5947_v48 }
0x1612   :  { %v9786_v27 = vpop.eup %9785 }
0x1613   :  { %v5834_v23 = vsel %vm1015_vm8, %v9786_v27, 0.0 }
0x1614   :  { %5835 = vadd.xlane.f32.xlu1 %v5834_v23  ;;  %v9863_v23 = vld [vmem:[%s13168_s3 + $0x38] sm:$0xff] }
0x1615   :  { %6007 = vmatpush.bf16.msrb.mxu3 %v14152_v41 }
0x1619   :  { %6008 = vmatpush.bf16.msrb.mxu3 %v14153_v46  ;;  %v14160_v46 = vld [vmem:[#allocation53_spill] sm:$0xff] }
0x161d   :  { %6009 = vmatpush.bf16.msrb.mxu3 %v14154_v43 }
0x1621   :  { %6010 = vmatpush.bf16.msrb.mxu3 %v14155_v51  ;;  %5853 = vrot.lane.b32.xlu0 %v12281_v59, %s10097_s28 }
0x1625   :  { %6011 = vmatpush.bf16.msrb.mxu3 %v14156_v11 }
0x1629   :  { %6012 = vmatpush.bf16.msrb.mxu3 %v14157_v35  ;;  %v14161_v35 = vld [vmem:[#allocation55_spill] sm:$0xff] }
0x162d   :  { %6013 = vmatpush.bf16.msrb.mxu3 %v14158_v44  ;;  %v14162_v44 = vld [vmem:[#allocation41_spill] sm:$0xff] }
0x1631   :  { %6014 = vmatpush.bf16.msrb.mxu3 %v14159_v52  ;;  %v14163_v52 = vld [vmem:[#allocation57_spill] sm:$0xff] }
0x1680   :  { %v5924_v62 = vpop.xlane.xlu0 %5923 }
0x1681   :  { %9787 = vrcp.f32 %v5924_v62  ;;  %v5936_v37 = vand.u32 2147483648, %v5924_v62  ;;  %v5934_v32 = vand.u32 2147483647, %v5924_v62  ;;  %vm5930_vm14 = vweird.f32 %v5924_v62 }
0x1683   :  { %v5937_v60 = vor.u32 1.1754944e-38, %v5936_v37  ;;  %vm5935_vm0 = vcmp.eq.f32.partialorder %v5934_v32, 8.507059e+37  ;;  %v14170_v37 = vld [vmem:[#allocation45_spill] sm:$0xff]  ;;  %v14172_v32 = vld [vmem:[#allocation46_spill] sm:$0xff] }
0x1687   :  { %v9788_v8 = vpop.eup %9787  ;;  %v5836_v40 = vpop.xlane.xlu1 %5835 }
0x1688   :  { %v5926_v57 = vmul.f32 %v9788_v8, %v5924_v62  ;;  %9789 = vrcp.f32 %v5836_v40  ;;  %vm5931_vm13 = vweird.f32 %v9788_v8  ;;  %v5848_v56 = vand.u32 2147483648, %v5836_v40  ;;  %v14164_v62 = vld [vmem:[#allocation42_spill] sm:$0xff] }
0x1689   :  { %vm5932_vm15 = vmor %vm5930_vm14, %vm5931_vm13  ;;  %v5846_v4 = vand.u32 2147483647, %v5836_v40  ;;  %vm5842_vm2 = vweird.f32 %v5836_v40 }
0x168a   :  { %v5927_v34 = vsub.f32 1.0, %v5926_v57  ;;  %v5849_v41 = vor.u32 1.1754944e-38, %v5848_v56  ;;  %v14167_v57 = vld [vmem:[#allocation61_spill] sm:$0xff]  ;;  %v14181_v56 = vld [vmem:[#allocation91_spill] sm:$0xff] }
0x168b   :  { %vm5847_vm4 = vcmp.eq.f32.partialorder %v5846_v4, 8.507059e+37  ;;  %v14183_v4 = vld [vmem:[#allocation100_spill] sm:$0xff] }
0x168c   :  { %v5928_v18 = vmul.f32 %v9788_v8, %v5927_v34  ;;  %v14169_v34 = vld [vmem:[#allocation63_spill] sm:$0xff] }
0x168e   :  { %v9790_v59 = vpop.eup %9789  ;;  %v5929_v1 = vadd.f32 %v9788_v8, %v5928_v18  ;;  %v14171_v18 = vld [vmem:[#allocation65_spill] sm:$0xff] }
0x168f   :  { %v5838_v26 = vmul.f32 %v9790_v59, %v5836_v40  ;;  %vm5843_vm1 = vweird.f32 %v9790_v59  ;;  %v14166_v40 = vld [vmem:[#allocation43_spill] sm:$0xff] }
0x1690   :  { %v5933_v63 = vsel %vm5932_vm15, %v9788_v8, %v5929_v1  ;;  %vm5844_vm3 = vmor %vm5842_vm2, %vm5843_vm1  ;;  %v14165_v8 = vld [vmem:[#allocation59_spill] sm:$0xff] }
0x1691   :  { %v5938_v42 = vsel %vm5935_vm0, %v5937_v60, %v5933_v63  ;;  %v5839_v7 = vsub.f32 1.0, %v5838_v26  ;;  %v14174_v1 = vld [vmem:[#allocation71_spill] sm:$0xff] }
0x1692   :  { %v5939_v55 = vmul.f32 %v9784_v45, %v5938_v42  ;;  %v14175_v60 = vld [vmem:[#allocation47_spill] sm:$0xff] }
0x1693   :  { %v5840_v61 = vmul.f32 %v9790_v59, %v5839_v7  ;;  %v5854_v3 = vpop.permute.xlu0 %5853  ;;  %v14176_v26 = vld [vmem:[#allocation75_spill] sm:$0xff] }
0x1694   :  { %v5940_v54 = vpack.c.bf16 %v5939_v55, %v5939_v55  ;;  %v5859_v39 = vsel %vm1044_vm9, %v5854_v3, 0  ;;  %v14177_v63 = vld [vmem:[#allocation51_spill] sm:$0xff] }
0x1695   :  { %v5841_v48 = vadd.f32 %v9790_v59, %v5840_v61  ;;  %5868 = vmatpush.bf16.msra.mxu0 %v5859_v39  ;;  %v14178_v42 = vld [vmem:[#allocation79_spill] sm:$0xff] }
0x1696   :  { %9120 = vmatmul.msk.bf16.vlgmr.msra.gmra.mxu3 %vm1015_vm8, %v5940_v54  ;;  %v14179_v7 = vld [vmem:[#allocation83_spill] sm:$0xff] }
0x1697   :  { %v5845_v45 = vsel %vm5844_vm3, %v9790_v59, %v5841_v48  ;;  %6059 = vmatpush.bf16.msra.mxu3 %v14160_v46  ;;  %v14173_v59 = vld [vmem:[#allocation68_spill] sm:$0xff]  ;;  %v14180_v55 = vld [vmem:[#allocation87_spill] sm:$0xff]  ;;  %v14191_v46 = vld [vmem:[#allocation133_spill] sm:$0xff] }
0x1698   :  { %v5850_v43 = vsel %vm5847_vm4, %v5849_v41, %v5845_v45  ;;  %v14182_v61 = vld [vmem:[#allocation95_spill] sm:$0xff] }
0x1699   :  { %5973 = vmatpush.bf16.msrb.mxu0 %v9863_v23  ;;  %v5851_v51 = vmul.f32 %v9786_v27, %v5850_v43  ;;  %v14168_v27 = vld [vmem:[#allocation44_spill] sm:$0xff]  ;;  %v14184_v3 = vld [vmem:[#allocation103_spill] sm:$0xff] }
0x169a   :  { %v14185_v54 = vld [vmem:[#allocation107_spill] sm:$0xff]  ;;  %v14192_v43 = vld [vmem:[#allocation136_spill] sm:$0xff] }
0x169b   :  { %v5852_v11 = vpack.c.bf16 %v5851_v51, %v5851_v51  ;;  %6060 = vmatpush.bf16.msra.mxu3 %v14161_v35  ;;  %v14186_v39 = vld [vmem:[#allocation111_spill] sm:$0xff]  ;;  %v14193_v51 = vld [vmem:[#allocation140_spill] sm:$0xff] }
0x169c   :  { %v14187_v48 = vld [vmem:[#allocation115_spill] sm:$0xff]  ;;  %v14195_v35 = vld [vmem:[#allocation148_spill] sm:$0xff] }
0x169d   :  { %9117 = vmatmul.msk.bf16.vlgmr.msra.gmra.mxu0 %vm1015_vm8, %v5852_v11  ;;  %v14188_v41 = vld [vmem:[#allocation119_spill] sm:$0xff]  ;;  %v14194_v11 = vld [vmem:[#allocation144_spill] sm:$0xff] }
0x169e   :  { %6020 = vmatpush.bf16.msra.mxu0 %v14162_v44  ;;  %v14189_v23 = vld [vmem:[#allocation123_spill] sm:$0xff]  ;;  %v14196_v44 = vld [vmem:[#allocation152_spill] sm:$0xff] }
0x169f   :  { %6061 = vmatpush.bf16.msra.mxu3 %v14163_v52  ;;  %v14190_v45 = vld [vmem:[#allocation127_spill] sm:$0xff]  ;;  %v14197_v52 = vld [vmem:[#allocation156_spill] sm:$0xff] }
0x16a2   :  { %6021 = vmatpush.bf16.msra.mxu0 %v14164_v62  ;;  %v14198_v62 = vld [vmem:[#allocation162_spill] sm:$0xff] }
0x16a3   :  { %6062 = vmatpush.bf16.msra.mxu3 %v14165_v8  ;;  %v14199_v8 = vld [vmem:[#allocation166_spill] sm:$0xff] }
0x16a6   :  { %6015 = vmatmul.bf16.vlgmr.msrb.gmra.mxu3 %v11554_v53  ;;  %6022 = vmatpush.bf16.msra.mxu0 %v14166_v40  ;;  %v14200_v40 = vld [vmem:[#allocation169_spill] sm:$0xff] }
0x16a7   :  { %6063 = vmatpush.bf16.msra.mxu3 %v14167_v57  ;;  %v14201_v57 = vld [vmem:[#allocation173_spill] sm:$0xff] }
0x16aa   :  { %6023 = vmatpush.bf16.msra.mxu0 %v14168_v27  ;;  %v14202_v27 = vld [vmem:[#allocation177_spill] sm:$0xff] }
0x16ab   :  { %6064 = vmatpush.bf16.msra.mxu3 %v14169_v34  ;;  %v14203_v34 = vld [vmem:[#allocation181_spill] sm:$0xff] }
0x16ae   :  { %6024 = vmatpush.bf16.msra.mxu0 %v14170_v37 }
0x16af   :  { %6065 = vmatpush.bf16.msra.mxu3 %v14171_v18 }
0x16b2   :  { %6025 = vmatpush.bf16.msra.mxu0 %v14172_v32 }
0x16b3   :  { %6066 = vmatpush.bf16.msra.mxu3 %v14173_v59 }
0x16b6   :  { %6067 = vmatmul.bf16.vlgmr.msra.gmra.mxu3 %v11554_v53  ;;  %6026 = vmatpush.bf16.msra.mxu0 %v14175_v60  ;;  %v14205_v60 = vld [vmem:[#allocation69_spill] sm:$0xff] }
0x16b7   :  { %6111 = vmatpush.bf16.msrb.mxu3 %v14174_v1  ;;  %v14204_v1 = vld [vmem:[#allocation185_spill] sm:$0xff] }
0x16ba   :  { %6027 = vmatpush.bf16.msra.mxu0 %v14177_v63  ;;  %v14207_v63 = vld [vmem:[#allocation189_spill] sm:$0xff] }
0x16bb   :  { %6112 = vmatpush.bf16.msrb.mxu3 %v14176_v26  ;;  %v14206_v26 = vld [vmem:[#allocation66_spill] sm:$0xff] }
0x16bf   :  { %6113 = vmatpush.bf16.msrb.mxu3 %v14178_v42  ;;  %v14208_v42 = vld [vmem:[#allocation74_spill] sm:$0xff] }
0x16c3   :  { %6114 = vmatpush.bf16.msrb.mxu3 %v14179_v7 }
0x16c7   :  { %6115 = vmatpush.bf16.msrb.mxu3 %v14180_v55  ;;  %v14209_v55 = vld [vmem:[#allocation72_spill] sm:$0xff] }
0x16cb   :  { %6116 = vmatpush.bf16.msrb.mxu3 %v14181_v56 }
0x16cf   :  { %6117 = vmatpush.bf16.msrb.mxu3 %v14182_v61  ;;  %v14210_v61 = vld [vmem:[#allocation195_spill] sm:$0xff] }
0x16d3   :  { %6118 = vmatpush.bf16.msrb.mxu3 %v14183_v4  ;;  %v14211_v4 = vld [vmem:[#allocation78_spill] sm:$0xff] }
0x16d6   :  { %6119 = vmatmul.bf16.vlgmr.msrb.gmra.mxu3 %v11554_v53 }
0x16d7   :  { %6163 = vmatpush.bf16.msra.mxu3 %v14184_v3  ;;  %v14212_v3 = vld [vmem:[#allocation76_spill] sm:$0xff] }
0x16db   :  { %6164 = vmatpush.bf16.msra.mxu3 %v14185_v54  ;;  %v14213_v54 = vld [vmem:[#allocation199_spill] sm:$0xff] }
0x16df   :  { %6165 = vmatpush.bf16.msra.mxu3 %v14186_v39  ;;  %v14214_v39 = vld [vmem:[#allocation82_spill] sm:$0xff] }
0x16e3   :  { %6166 = vmatpush.bf16.msra.mxu3 %v14187_v48 }
0x16e7   :  { %6167 = vmatpush.bf16.msra.mxu3 %v14188_v41  ;;  %v14215_v41 = vld [vmem:[#allocation80_spill] sm:$0xff] }
0x16eb   :  { %6168 = vmatpush.bf16.msra.mxu3 %v14189_v23  ;;  %v14216_v23 = vld [vmem:[#allocation86_spill] sm:$0xff] }
0x16ef   :  { %6169 = vmatpush.bf16.msra.mxu3 %v14190_v45  ;;  %v14217_v45 = vld [vmem:[#allocation84_spill] sm:$0xff] }
0x16f3   :  { %6170 = vmatpush.bf16.msra.mxu3 %v14191_v46  ;;  %v14218_v46 = vld [vmem:[#allocation90_spill] sm:$0xff] }
0x16f6   :  { %6171 = vmatmul.bf16.vlgmr.msra.gmra.mxu3 %v11554_v53 }
0x16f7   :  { %6215 = vmatpush.bf16.msrb.mxu3 %v14192_v43 }
0x16fb   :  { %6216 = vmatpush.bf16.msrb.mxu3 %v14193_v51  ;;  %v14219_v51 = vld [vmem:[#allocation88_spill] sm:$0xff] }
0x16ff   :  { %6217 = vmatpush.bf16.msrb.mxu3 %v14194_v11  ;;  %v14220_v11 = vld [vmem:[#allocation94_spill] sm:$0xff] }
0x1703   :  { %6218 = vmatpush.bf16.msrb.mxu3 %v14195_v35  ;;  %v14221_v35 = vld [vmem:[#allocation92_spill] sm:$0xff] }
0x1707   :  { %6219 = vmatpush.bf16.msrb.mxu3 %v14196_v44  ;;  %v14222_v44 = vld [vmem:[#allocation99_spill] sm:$0xff] }
0x170b   :  { %6220 = vmatpush.bf16.msrb.mxu3 %v14197_v52 }
0x170f   :  { %6221 = vmatpush.bf16.msrb.mxu3 %v14198_v62  ;;  %v14223_v62 = vld [vmem:[#allocation96_spill] sm:$0xff] }
0x1713   :  { %6222 = vmatpush.bf16.msrb.mxu3 %v14199_v8  ;;  %v14224_v8 = vld [vmem:[#allocation101_spill] sm:$0xff] }
0x1717   :  { %6267 = vmatpush.bf16.msra.mxu3 %v14200_v40  ;;  %v14225_v40 = vld [vmem:[#allocation97_spill] sm:$0xff] }
0x1719   :  { %v5958_v37 = vpop.f32.mrf.mxu3 }
0x171a   :  { %v5962_v18 = vpack.c.bf16 %v5958_v37, %v5958_v37  ;;  %v5870_v32 = vpop.f32.mrf.mxu0  ;;  %v14228_v37 = vld [vmem:[#allocation109_spill] sm:$0xff] }
0x171b   :  { %6268 = vmatpush.bf16.msra.mxu3 %v14201_v57  ;;  %v5874_v59 = vpack.c.bf16 %v5870_v32, %v5870_v32  ;;  %v14226_v57 = vld [vmem:[#allocation105_spill] sm:$0xff] }
0x171c   :  { %9121 = vmatmul.msk.bf16.vlgmr.msrb.gmra.mxu0 %vm994_vm7, %v5962_v18  ;;  %v14229_v18 = vld [vmem:[#allocation108_spill] sm:$0xff]  ;;  %v14230_v32 = vld [vmem:[#allocation113_spill] sm:$0xff] }
0x171d   :  { %6072 = vmatpush.bf16.msrb.mxu0 %v14205_v60  ;;  %9118 = vmatmul.msk.bf16.vlgmr.msra.gmra.mxu1 %vm994_vm7, %v5874_v59  ;;  %v14231_v59 = vld [vmem:[#allocation112_spill] sm:$0xff] }
0x171e   :  { %6033 = vmatpush.bf16.msra.mxu1 %v14206_v26  ;;  %v14233_v60 = vld [vmem:[#allocation116_spill] sm:$0xff]  ;;  %v14234_v26 = vld [vmem:[#allocation121_spill] sm:$0xff] }
0x171f   :  { %6269 = vmatpush.bf16.msra.mxu3 %v14202_v27  ;;  %v14227_v27 = vld [vmem:[#allocation104_spill] sm:$0xff] }
0x1721   :  { %6073 = vmatpush.bf16.msrb.mxu0 %v14208_v42  ;;  %v5960_v7 = vpop.f32.mrf.mxu3  ;;  %v14236_v42 = vld [vmem:[#allocation125_spill] sm:$0xff] }
0x1722   :  { %6034 = vmatpush.bf16.msra.mxu1 %v14209_v55  ;;  %v5872_v56 = vpop.f32.mrf.mxu0  ;;  %v14237_v7 = vld [vmem:[#allocation124_spill] sm:$0xff] }
0x1723   :  { %6270 = vmatpush.bf16.msra.mxu3 %v14203_v34  ;;  %v14238_v56 = vld [vmem:[#allocation130_spill] sm:$0xff] }
0x1725   :  { %6074 = vmatpush.bf16.msrb.mxu0 %v14211_v4  ;;  %v14240_v4 = vld [vmem:[#allocation131_spill] sm:$0xff] }
0x1726   :  { %6035 = vmatpush.bf16.msra.mxu1 %v14212_v3  ;;  %v14241_v3 = vld [vmem:[#allocation129_spill] sm:$0xff] }
0x1727   :  { %6271 = vmatpush.bf16.msra.mxu3 %v14204_v1  ;;  %v14232_v1 = vld [vmem:[#allocation117_spill] sm:$0xff] }
0x1729   :  { %6075 = vmatpush.bf16.msrb.mxu0 %v14214_v39  ;;  %v12542_v48 = vpop.f32.mrf.mxu3  ;;  %v14243_v39 = vld [vmem:[#allocation134_spill] sm:$0xff] }
0x172a   :  { %6036 = vmatpush.bf16.msra.mxu1 %v14215_v41 }
0x172b   :  { %6272 = vmatpush.bf16.msra.mxu3 %v14207_v63  ;;  %v14235_v63 = vld [vmem:[#allocation120_spill] sm:$0xff] }
0x172c   :  { %6028 = vmatmul.bf16.vlgmr.msra.gmra.mxu0 %v11524_v2 }
0x172d   :  { %6076 = vmatpush.bf16.msrb.mxu0 %v14216_v23  ;;  %5989 = vmatmul.bf16.vlgmr.msrb.gmra.mxu1 %v11554_v53  ;;  %v14244_v23 = vld [vmem:[#allocation141_spill] sm:$0xff] }
0x172e   :  { %6037 = vmatpush.bf16.msra.mxu1 %v14217_v45  ;;  %v14245_v45 = vld [vmem:[#allocation138_spill] sm:$0xff] }
0x172f   :  { %6273 = vmatpush.bf16.msra.mxu3 %v14210_v61  ;;  %v14239_v61 = vld [vmem:[#allocation128_spill] sm:$0xff] }
0x1731   :  { %6077 = vmatpush.bf16.msrb.mxu0 %v14218_v46  ;;  %v6018_v43 = vpop.f32.mrf.mxu3  ;;  %v14246_v46 = vld [vmem:[#allocation145_spill] sm:$0xff] }
0x1732   :  { %6038 = vmatpush.bf16.msra.mxu1 %v14219_v51  ;;  %v14247_v43 = vld [vmem:[#allocation142_spill] sm:$0xff]  ;;  %v14248_v51 = vld [vmem:[#allocation149_spill] sm:$0xff] }
0x1733   :  { %6274 = vmatpush.bf16.msra.mxu3 %v14213_v54  ;;  %v14242_v54 = vld [vmem:[#allocation137_spill] sm:$0xff] }
0x1735   :  { %6078 = vmatpush.bf16.msrb.mxu0 %v14220_v11  ;;  %v14249_v11 = vld [vmem:[#allocation146_spill] sm:$0xff] }
0x1736   :  { %6039 = vmatpush.bf16.msra.mxu1 %v14221_v35  ;;  %v14250_v35 = vld [vmem:[#allocation153_spill] sm:$0xff] }
0x1739   :  { %6079 = vmatpush.bf16.msrb.mxu0 %v14222_v44  ;;  %v12554_v52 = vpop.f32.mrf.mxu3  ;;  %v14251_v44 = vld [vmem:[#allocation150_spill] sm:$0xff] }
0x173a   :  { %6040 = vmatpush.bf16.msra.mxu1 %v14223_v62  ;;  %v14252_v62 = vld [vmem:[#allocation157_spill] sm:$0xff] }
0x173c   :  { %6080 = vmatmul.bf16.vlgmr.msrb.gmra.mxu0 %v11524_v2 }
0x173d   :  { %6124 = vmatpush.bf16.msra.mxu0 %v14224_v8  ;;  %6041 = vmatmul.bf16.vlgmr.msra.gmra.mxu1 %v11554_v53  ;;  %v14253_v8 = vld [vmem:[#allocation154_spill] sm:$0xff] }
0x173e   :  { %6085 = vmatpush.bf16.msrb.mxu1 %v14225_v40 }
0x1741   :  { %6125 = vmatpush.bf16.msra.mxu0 %v14226_v57  ;;  %v6070_v34 = vpop.f32.mrf.mxu3  ;;  %v14254_v57 = vld [vmem:[#allocation161_spill] sm:$0xff] }
0x1742   :  { %6086 = vmatpush.bf16.msrb.mxu1 %v14227_v27  ;;  %v14255_v27 = vld [vmem:[#allocation158_spill] sm:$0xff]  ;;  %v14256_v34 = vld [vmem:[#allocation163_spill] sm:$0xff] }
0x1745   :  { %6126 = vmatpush.bf16.msra.mxu0 %v14228_v37  ;;  %v14257_v37 = vld [vmem:[#allocation159_spill] sm:$0xff] }
0x1746   :  { %6087 = vmatpush.bf16.msrb.mxu1 %v14229_v18  ;;  %v14258_v18 = vld [vmem:[#allocation167_spill] sm:$0xff] }
0x1749   :  { %6127 = vmatpush.bf16.msra.mxu0 %v14230_v32  ;;  %v14259_v32 = vld [vmem:[#allocation164_spill] sm:$0xff] }
0x174a   :  { %6088 = vmatpush.bf16.msrb.mxu1 %v14231_v59 }
0x174d   :  { %6128 = vmatpush.bf16.msra.mxu0 %v14232_v1  ;;  %v14260_v1 = vld [vmem:[#allocation171_spill] sm:$0xff] }
0x174e   :  { %6089 = vmatpush.bf16.msrb.mxu1 %v14233_v60  ;;  %v14261_v60 = vld [vmem:[#allocation170_spill] sm:$0xff] }
0x1751   :  { %6129 = vmatpush.bf16.msra.mxu0 %v14234_v26  ;;  %v14262_v26 = vld [vmem:[#allocation175_spill] sm:$0xff] }
0x1752   :  { %6090 = vmatpush.bf16.msrb.mxu1 %v14235_v63  ;;  %v14263_v63 = vld [vmem:[#allocation174_spill] sm:$0xff] }
0x1755   :  { %6130 = vmatpush.bf16.msra.mxu0 %v14236_v42  ;;  %v14264_v42 = vld [vmem:[#allocation179_spill] sm:$0xff] }
0x1756   :  { %6091 = vmatpush.bf16.msrb.mxu1 %v14237_v7  ;;  %v14265_v7 = vld [vmem:[#allocation178_spill] sm:$0xff] }
0x1759   :  { %v12573_v55 = vpop.f32.mrf.mxu3  ;;  %6131 = vmatpush.bf16.msra.mxu0 %v14238_v56  ;;  %v14268_v56 = vld [vmem:[#allocation187_spill] sm:$0xff] }
0x175a   :  { %6092 = vmatpush.bf16.msrb.mxu1 %v14239_v61  ;;  %v14269_v61 = vld [vmem:[#allocation186_spill] sm:$0xff] }
0x175c   :  { %6132 = vmatmul.bf16.vlgmr.msra.gmra.mxu0 %v11524_v2 }
0x175d   :  { %6176 = vmatpush.bf16.msrb.mxu0 %v14240_v4  ;;  %6093 = vmatmul.bf16.vlgmr.msrb.gmra.mxu1 %v11554_v53  ;;  %v14270_v4 = vld [vmem:[#allocation192_spill] sm:$0xff] }
0x175e   :  { %6137 = vmatpush.bf16.msra.mxu1 %v14241_v3  ;;  %v14271_v3 = vld [vmem:[#allocation194_spill] sm:$0xff] }
0x1761   :  { %6177 = vmatpush.bf16.msrb.mxu0 %v14242_v54  ;;  %v6122_v41 = vpop.f32.mrf.mxu3  ;;  %v14272_v54 = vld [vmem:[#allocation190_spill] sm:$0xff] }
0x1762   :  { %6138 = vmatpush.bf16.msra.mxu1 %v14243_v39  ;;  %v14273_v39 = vld [vmem:[#allocation191_spill] sm:$0xff]  ;;  %v14274_v41 = vld [vmem:[#allocation198_spill] sm:$0xff] }
0x1765   :  { %6178 = vmatpush.bf16.msrb.mxu0 %v14244_v23  ;;  %v14275_v23 = vld [vmem:[#allocation196_spill] sm:$0xff] }
0x1766   :  { %6139 = vmatpush.bf16.msra.mxu1 %v14245_v45  ;;  %v14276_v45 = vld [vmem:[#allocation201_spill] sm:$0xff] }
0x1769   :  { %6179 = vmatpush.bf16.msrb.mxu0 %v14246_v46 }
0x176a   :  { %6140 = vmatpush.bf16.msra.mxu1 %v14247_v43 }
0x176d   :  { %6180 = vmatpush.bf16.msrb.mxu0 %v14248_v51  ;;  %v14277_v51 = vld [vmem:[#allocation200_spill] sm:$0xff] }
0x176e   :  { %6141 = vmatpush.bf16.msra.mxu1 %v14249_v11 }
0x1771   :  { %6181 = vmatpush.bf16.msrb.mxu0 %v14250_v35 }
0x1772   :  { %6142 = vmatpush.bf16.msra.mxu1 %v14251_v44  ;;  %v14278_v44 = vld [vmem:[#allocation203_spill] sm:$0xff] }
0x1775   :  { %6182 = vmatpush.bf16.msrb.mxu0 %v14252_v62  ;;  %v14279_v62 = vld [vmem:[#allocation202_spill] sm:$0xff] }
0x1776   :  { %6143 = vmatpush.bf16.msra.mxu1 %v14253_v8 }
0x1779   :  { %v12593_v40 = vpop.f32.mrf.mxu3  ;;  %6183 = vmatpush.bf16.msrb.mxu0 %v14254_v57  ;;  %v14280_v57 = vld [vmem:[#allocation205_spill] sm:$0xff] }
0x177a   :  { %6144 = vmatpush.bf16.msra.mxu1 %v14255_v27 }
0x177c   :  { %6184 = vmatmul.bf16.vlgmr.msrb.gmra.mxu0 %v11524_v2  ;;  %v14266_v2 = vld [vmem:[#allocation183_spill] sm:$0xff] }
0x177d   :  { %6228 = vmatpush.bf16.msra.mxu0 %v14256_v34  ;;  %6145 = vmatmul.bf16.vlgmr.msra.gmra.mxu1 %v11554_v53  ;;  %v14267_v53 = vld [vmem:[#allocation182_spill] sm:$0xff] }
0x177e   :  { %6189 = vmatpush.bf16.msrb.mxu1 %v14257_v37  ;;  %v14281_v37 = vld [vmem:[#allocation212_spill] sm:$0xff] }
0x1781   :  { %6229 = vmatpush.bf16.msra.mxu0 %v14258_v18  ;;  %v6174_v59 = vpop.f32.mrf.mxu3  ;;  %v14282_v18 = vld [vmem:[#allocation204_spill] sm:$0xff] }
0x1782   :  { %6190 = vmatpush.bf16.msrb.mxu1 %v14259_v32  ;;  %v14283_v32 = vld [vmem:[#allocation213_spill] sm:$0xff]  ;;  %v14285_v59 = vld [vmem:[#allocation214_spill] sm:$0xff] }
0x1785   :  { %6230 = vmatpush.bf16.msra.mxu0 %v14260_v1  ;;  %v14286_v1 = vld [vmem:[#allocation206_spill] sm:$0xff] }
0x1786   :  { %6191 = vmatpush.bf16.msrb.mxu1 %v14261_v60  ;;  %v14287_v60 = vld [vmem:[#allocation217_spill] sm:$0xff] }
0x1789   :  { %6231 = vmatpush.bf16.msra.mxu0 %v14262_v26  ;;  %v14288_v26 = vld [vmem:[#allocation209_spill] sm:$0xff] }
0x178a   :  { %6192 = vmatpush.bf16.msrb.mxu1 %v14263_v63 }
0x178d   :  { %6232 = vmatpush.bf16.msra.mxu0 %v14264_v42 }
0x178e   :  { %6193 = vmatpush.bf16.msrb.mxu1 %v14265_v7  ;;  %v14289_v7 = vld [vmem:[#allocation216_spill] sm:$0xff] }
0x1791   :  { %6233 = vmatpush.bf16.msra.mxu0 %v14266_v2  ;;  %v14290_v2 = vld [vmem:[#allocation208_spill] sm:$0xff] }
0x1792   :  { %6194 = vmatpush.bf16.msrb.mxu1 %v14267_v53  ;;  %v14291_v53 = vld [vmem:[#allocation221_spill] sm:$0xff] }
0x1795   :  { %6234 = vmatpush.bf16.msra.mxu0 %v14268_v56  ;;  %v14292_v56 = vld [vmem:[#allocation211_spill] sm:$0xff] }
0x1796   :  { %6195 = vmatpush.bf16.msrb.mxu1 %v14269_v61  ;;  %v14293_v61 = vld [vmem:[#allocation215_spill] sm:$0xff] }
0x1799   :  { %6235 = vmatpush.bf16.msra.mxu0 %v14270_v4  ;;  %v5975_v46 = vpop.f32.mrf.mxu0  ;;  %v14294_v4 = vld [vmem:[#allocation219_spill] sm:$0xff] }
0x179a   :  { %6196 = vmatpush.bf16.msrb.mxu1 %v14272_v54  ;;  %v5887_v43 = vpop.f32.mrf.mxu1  ;;  %v14296_v54 = vld [vmem:[#allocation225_spill] sm:$0xff] }
0x179b   :  { %v5891_v11 = vadd.f32 %v5887_v43, %v12439_v31  ;;  %v14284_v31 = vld [vmem:[#allocation207_spill] sm:$0xff]  ;;  %v14300_v43 = vld [vmem:[#allocation222_spill] sm:$0xff] }
0x179d   :  { %6280 = vmatpush.bf16.msrb.mxu0 %v14271_v3  ;;  %v5979_v35 = vadd.f32 %v5975_v46, %v5891_v11  ;;  %v14295_v3 = vld [vmem:[#allocation210_spill] sm:$0xff]  ;;  %v14299_v46 = vld [vmem:[#allocation220_spill] sm:$0xff]  ;;  %v14302_v11 = vld [vmem:[#allocation227_spill] sm:$0xff] }
0x179e   :  { %6241 = vmatpush.bf16.msra.mxu1 %v14273_v39 }
0x179f   :  { %v5980_v8 = vpack.c.bf16 %v5979_v35, %v5979_v35  ;;  %v14303_v35 = vld [vmem:[#allocation224_spill] sm:$0xff] }
0x17a1   :  { %6281 = vmatpush.bf16.msrb.mxu0 %v14274_v41  ;;  %v5977_v27 = vpop.f32.mrf.mxu0  ;;  %6197 = vmatmul.bf16.vlgmr.msrb.gmra.mxu1 %v5980_v8  ;;  %v14297_v41 = vld [vmem:[#allocation218_spill] sm:$0xff] }
0x17a2   :  { %6242 = vmatpush.bf16.msra.mxu1 %v14275_v23  ;;  %6210 = vmatmul.bf16.vlgmr.msrb.gmra.mxu2 %v5980_v8  ;;  %v5889_v34 = vpop.f32.mrf.mxu1 }
0x17a3   :  { %6223 = vmatmul.bf16.vlgmr.msrb.gmra.mxu3 %v5980_v8  ;;  %6236 = vmatmul.bf16.vlgmr.msra.gmra.mxu0 %v5980_v8  ;;  %v14307_v34 = vld [vmem:[#allocation228_spill] sm:$0xff] }
0x17a4   :  { %6455 = vmatpush.bf16.msrb.mxu3 %v14281_v37  ;;  %6442 = vmatpush.bf16.msrb.mxu2 %v14283_v32  ;;  %v14308_v37 = vld [vmem:[#allocation230_spill] sm:$0xff]  ;;  %v14310_v32 = vld [vmem:[#allocation235_spill] sm:$0xff] }
0x17a5   :  { %6282 = vmatpush.bf16.msrb.mxu0 %v14276_v45  ;;  %v14298_v45 = vld [vmem:[#allocation223_spill] sm:$0xff] }
0x17a6   :  { %6243 = vmatpush.bf16.msra.mxu1 %v14277_v51  ;;  %v14301_v51 = vld [vmem:[#allocation229_spill] sm:$0xff] }
0x17a8   :  { %6456 = vmatpush.bf16.msrb.mxu3 %v14285_v59  ;;  %6443 = vmatpush.bf16.msrb.mxu2 %v14287_v60  ;;  %v14312_v59 = vld [vmem:[#allocation238_spill] sm:$0xff] }
0x17a9   :  { %6283 = vmatpush.bf16.msrb.mxu0 %v14278_v44  ;;  %v12633_v63 = vpop.f32.mrf.mxu0  ;;  %v14313_v60 = vld [vmem:[#allocation234_spill] sm:$0xff] }
0x17aa   :  { %6244 = vmatpush.bf16.msra.mxu1 %v14279_v62  ;;  %v12635_v42 = vpop.f32.mrf.mxu1  ;;  %v14304_v62 = vld [vmem:[#allocation226_spill] sm:$0xff] }
0x17ac   :  { %6457 = vmatpush.bf16.msrb.mxu3 %v14289_v7  ;;  %6444 = vmatpush.bf16.msrb.mxu2 %v14291_v53  ;;  %v14314_v7 = vld [vmem:[#allocation242_spill] sm:$0xff]  ;;  %v14316_v53 = vld [vmem:[#allocation236_spill] sm:$0xff] }
0x17ad   :  { %6284 = vmatpush.bf16.msrb.mxu0 %v14280_v57  ;;  %v14305_v57 = vld [vmem:[#allocation233_spill] sm:$0xff] }
0x17ae   :  { %6245 = vmatpush.bf16.msra.mxu1 %v14282_v18  ;;  %v14309_v18 = vld [vmem:[#allocation237_spill] sm:$0xff] }
0x17b0   :  { %6458 = vmatpush.bf16.msrb.mxu3 %v14294_v4  ;;  %6445 = vmatpush.bf16.msrb.mxu2 %v14296_v54  ;;  %v14319_v4 = vld [vmem:[#allocation250_spill] sm:$0xff]  ;;  %v14321_v54 = vld [vmem:[#allocation247_spill] sm:$0xff] }
0x17b1   :  { %6285 = vmatpush.bf16.msrb.mxu0 %v14284_v31  ;;  %v6031_v39 = vpop.f32.mrf.mxu0  ;;  %v14311_v31 = vld [vmem:[#allocation232_spill] sm:$0xff] }
0x17b2   :  { %6246 = vmatpush.bf16.msra.mxu1 %v14286_v1  ;;  %6262 = vmatmul.bf16.vlgmr.msra.gmra.mxu2 %v5980_v8  ;;  %v5992_v23 = vpop.f32.mrf.mxu1  ;;  %v14322_v39 = vld [vmem:[#allocation244_spill] sm:$0xff] }
0x17b3   :  { %6275 = vmatmul.bf16.vlgmr.msra.gmra.mxu3 %v5980_v8  ;;  %v14324_v23 = vld [vmem:[#allocation246_spill] sm:$0xff] }
0x17b4   :  { %6459 = vmatpush.bf16.msrb.mxu3 %v14298_v45  ;;  %6446 = vmatpush.bf16.msrb.mxu2 %v14301_v51  ;;  %v14325_v45 = vld [vmem:[#allocation252_spill] sm:$0xff]  ;;  %v14328_v51 = vld [vmem:[#allocation251_spill] sm:$0xff] }
0x17b5   :  { %6286 = vmatpush.bf16.msrb.mxu0 %v14288_v26 }
0x17b6   :  { %6247 = vmatpush.bf16.msra.mxu1 %v14290_v2  ;;  %v14315_v2 = vld [vmem:[#allocation245_spill] sm:$0xff] }
0x17b8   :  { %6460 = vmatpush.bf16.msrb.mxu3 %v14302_v11  ;;  %6447 = vmatpush.bf16.msrb.mxu2 %v14305_v57  ;;  %v14329_v11 = vld [vmem:[#allocation258_spill] sm:$0xff]  ;;  %v14332_v57 = vld [vmem:[#allocation255_spill] sm:$0xff] }
0x17b9   :  { %6287 = vmatpush.bf16.msrb.mxu0 %v14292_v56  ;;  %v12652_v44 = vpop.f32.mrf.mxu0  ;;  %v14317_v56 = vld [vmem:[#allocation243_spill] sm:$0xff] }
0x17ba   :  { %6248 = vmatpush.bf16.msra.mxu1 %v14295_v3  ;;  %v12656_v27 = vpop.f32.mrf.mxu1  ;;  %v14320_v3 = vld [vmem:[#allocation241_spill] sm:$0xff] }
0x17bc   :  { %6288 = vmatmul.bf16.vlgmr.msrb.gmra.mxu0 %v5980_v8  ;;  %6448 = vmatpush.bf16.msrb.mxu2 %v14309_v18 }
0x17bd   :  { %6468 = vmatpush.bf16.msra.mxu0 %v14293_v61  ;;  %6249 = vmatmul.bf16.vlgmr.msra.gmra.mxu1 %v5980_v8  ;;  %v14306_v8 = vld [vmem:[#allocation231_spill] sm:$0xff] }
0x17be   :  { %6429 = vmatpush.bf16.msrb.mxu1 %v14297_v41  ;;  %6461 = vmatpush.bf16.msrb.mxu3 %v14306_v8  ;;  %v14318_v61 = vld [vmem:[#allocation239_spill] sm:$0xff]  ;;  %v14323_v41 = vld [vmem:[#allocation254_spill] sm:$0xff] }
0x17bf   :  { %v14333_v8 = vld [vmem:[#allocation262_spill] sm:$0xff] }
0x17c0   :  { %6449 = vmatpush.bf16.msrb.mxu2 %v14314_v7  ;;  %v14341_v7 = vld [vmem:[#allocation265_spill] sm:$0xff] }
0x17c1   :  { %6469 = vmatpush.bf16.msra.mxu0 %v14299_v46  ;;  %v6083_v1 = vpop.f32.mrf.mxu0  ;;  %v14326_v46 = vld [vmem:[#allocation248_spill] sm:$0xff] }
0x17c2   :  { %6430 = vmatpush.bf16.msrb.mxu1 %v14300_v43  ;;  %6462 = vmatpush.bf16.msrb.mxu3 %v14310_v32  ;;  %v6044_v26 = vpop.f32.mrf.mxu1  ;;  %v14327_v43 = vld [vmem:[#allocation249_spill] sm:$0xff]  ;;  %v14338_v1 = vld [vmem:[#allocation264_spill] sm:$0xff] }
0x17c3   :  { %v14340_v26 = vld [vmem:[#allocation263_spill] sm:$0xff] }
0x17c4   :  { %6494 = vmatpush.bf16.msra.mxu2 %v14315_v2 }
0x17c5   :  { %6470 = vmatpush.bf16.msra.mxu0 %v14303_v35  ;;  %6463 = vmatmul.bf16.vlgmr.msrb.gmra.mxu3 %v12180_v30  ;;  %v14330_v35 = vld [vmem:[#allocation256_spill] sm:$0xff] }
0x17c6   :  { %6431 = vmatpush.bf16.msrb.mxu1 %v14304_v62  ;;  %6507 = vmatpush.bf16.msra.mxu3 %v14312_v59  ;;  %v14331_v62 = vld [vmem:[#allocation253_spill] sm:$0xff]  ;;  %v14337_v59 = vld [vmem:[#allocation266_spill] sm:$0xff] }
0x17c8   :  { %6495 = vmatpush.bf16.msra.mxu2 %v14319_v4  ;;  %v14344_v4 = vld [vmem:[#allocation268_spill] sm:$0xff] }
0x17c9   :  { %6471 = vmatpush.bf16.msra.mxu0 %v14307_v34  ;;  %v14334_v34 = vld [vmem:[#allocation260_spill] sm:$0xff] }
0x17ca   :  { %6432 = vmatpush.bf16.msrb.mxu1 %v14308_v37  ;;  %6508 = vmatpush.bf16.msra.mxu3 %v14317_v56  ;;  %v14335_v37 = vld [vmem:[#allocation257_spill] sm:$0xff]  ;;  %v14342_v56 = vld [vmem:[#allocation267_spill] sm:$0xff] }
0x17cc   :  { %6496 = vmatpush.bf16.msra.mxu2 %v14323_v41  ;;  %v14351_v41 = vld [vmem:[#allocation276_spill] sm:$0xff] }
0x17cd   :  { %6472 = vmatpush.bf16.msra.mxu0 %v14311_v31  ;;  %v14336_v31 = vld [vmem:[#allocation259_spill] sm:$0xff] }
0x17ce   :  { %6433 = vmatpush.bf16.msrb.mxu1 %v14313_v60  ;;  %6509 = vmatpush.bf16.msra.mxu3 %v14321_v54  ;;  %v14339_v60 = vld [vmem:[#allocation261_spill] sm:$0xff]  ;;  %v14349_v54 = vld [vmem:[#allocation279_spill] sm:$0xff] }
0x17d0   :  { %6497 = vmatpush.bf16.msra.mxu2 %v14329_v11  ;;  %v14357_v11 = vld [vmem:[#allocation282_spill] sm:$0xff] }
0x17d1   :  { %6473 = vmatpush.bf16.msra.mxu0 %v14316_v53 }
0x17d2   :  { %6434 = vmatpush.bf16.msrb.mxu1 %v14318_v61  ;;  %6510 = vmatpush.bf16.msra.mxu3 %v14325_v45  ;;  %v14343_v61 = vld [vmem:[#allocation270_spill] sm:$0xff]  ;;  %v14355_v45 = vld [vmem:[#allocation280_spill] sm:$0xff] }
0x17d4   :  { %6498 = vmatpush.bf16.msra.mxu2 %v14333_v8 }
0x17d5   :  { %6474 = vmatpush.bf16.msra.mxu0 %v14320_v3  ;;  %v14347_v3 = vld [vmem:[#allocation271_spill] sm:$0xff] }
0x17d6   :  { %6435 = vmatpush.bf16.msrb.mxu1 %v14322_v39  ;;  %6511 = vmatpush.bf16.msra.mxu3 %v14330_v35  ;;  %v14350_v39 = vld [vmem:[#allocation274_spill] sm:$0xff]  ;;  %v14358_v35 = vld [vmem:[#allocation289_spill] sm:$0xff] }
0x17d8   :  { %6499 = vmatpush.bf16.msra.mxu2 %v14337_v59  ;;  %v14363_v59 = vld [vmem:[#allocation293_spill] sm:$0xff] }
0x17d9   :  { %6475 = vmatpush.bf16.msra.mxu0 %v14324_v23  ;;  %v12690_v18 = vpop.f32.mrf.mxu0  ;;  %v14354_v23 = vld [vmem:[#allocation283_spill] sm:$0xff] }
0x17da   :  { %6436 = vmatpush.bf16.msrb.mxu1 %v14327_v43  ;;  %6512 = vmatpush.bf16.msra.mxu3 %v14334_v34  ;;  %v12692_v32 = vpop.f32.mrf.mxu1 }
0x17dc   :  { %6476 = vmatmul.bf16.vlgmr.msra.gmra.mxu0 %v12192_v47  ;;  %6500 = vmatpush.bf16.msra.mxu2 %v11398_v6  ;;  %v14345_v6 = vld [vmem:[#allocation269_spill] sm:$0xff] }
0x17dd   :  { %6520 = vmatpush.bf16.msrb.mxu0 %v14326_v46 }
0x17de   :  { %6481 = vmatpush.bf16.msra.mxu1 %v14328_v51  ;;  %6513 = vmatpush.bf16.msra.mxu3 %v14338_v1  ;;  %v14356_v51 = vld [vmem:[#allocation286_spill] sm:$0xff] }
0x17df   :  { %v14364_v1 = vld [vmem:[#allocation298_spill] sm:$0xff] }
0x17e0   :  { %6501 = vmatpush.bf16.msra.mxu2 %v11448_v5  ;;  %v14353_v5 = vld [vmem:[#allocation278_spill] sm:$0xff] }
0x17e1   :  { %6521 = vmatpush.bf16.msrb.mxu0 %v14331_v62  ;;  %v6135_v2 = vpop.f32.mrf.mxu0  ;;  %v14359_v62 = vld [vmem:[#allocation285_spill] sm:$0xff] }
0x17e2   :  { %6482 = vmatpush.bf16.msra.mxu1 %v14332_v57  ;;  %6514 = vmatpush.bf16.msra.mxu3 %v11365_v17  ;;  %v6096_v53 = vpop.f32.mrf.mxu1  ;;  %v14346_v17 = vld [vmem:[#allocation273_spill] sm:$0xff]  ;;  %v14360_v57 = vld [vmem:[#allocation290_spill] sm:$0xff] }
0x17e3   :  { %v14368_v2 = vld [vmem:[#allocation306_spill] sm:$0xff]  ;;  %v14369_v53 = vld [vmem:[#allocation303_spill] sm:$0xff] }
0x17e5   :  { %6522 = vmatpush.bf16.msrb.mxu0 %v14335_v37  ;;  %6515 = vmatmul.bf16.vlgmr.msra.gmra.mxu3 %v12180_v30  ;;  %v14361_v37 = vld [vmem:[#allocation288_spill] sm:$0xff] }
0x17e6   :  { %6483 = vmatpush.bf16.msra.mxu1 %v14336_v31  ;;  %6559 = vmatpush.bf16.msrb.mxu3 %v11419_v38  ;;  %v14348_v38 = vld [vmem:[#allocation272_spill] sm:$0xff]  ;;  %v14362_v31 = vld [vmem:[#allocation294_spill] sm:$0xff] }
0x17e9   :  { %6523 = vmatpush.bf16.msrb.mxu0 %v14339_v60  ;;  %v14365_v60 = vld [vmem:[#allocation297_spill] sm:$0xff] }
0x17ea   :  { %6484 = vmatpush.bf16.msra.mxu1 %v14340_v26  ;;  %6560 = vmatpush.bf16.msrb.mxu3 %v14343_v61  ;;  %v14366_v26 = vld [vmem:[#allocation302_spill] sm:$0xff]  ;;  %v14371_v61 = vld [vmem:[#allocation307_spill] sm:$0xff] }
0x17ed   :  { %6524 = vmatpush.bf16.msrb.mxu0 %v14341_v7  ;;  %v14367_v7 = vld [vmem:[#allocation299_spill] sm:$0xff] }
0x17ee   :  { %6485 = vmatpush.bf16.msra.mxu1 %v14342_v56  ;;  %6561 = vmatpush.bf16.msrb.mxu3 %v14346_v17  ;;  %v14370_v56 = vld [vmem:[#allocation310_spill] sm:$0xff]  ;;  %v14374_v17 = vld [vmem:[#allocation319_spill] sm:$0xff] }
0x17f1   :  { %6525 = vmatpush.bf16.msrb.mxu0 %v11367_v33  ;;  %v14352_v33 = vld [vmem:[#allocation281_spill] sm:$0xff] }
0x17f2   :  { %6486 = vmatpush.bf16.msra.mxu1 %v14344_v4  ;;  %6562 = vmatpush.bf16.msrb.mxu3 %v14349_v54  ;;  %v14372_v4 = vld [vmem:[#allocation315_spill] sm:$0xff]  ;;  %v14377_v54 = vld [vmem:[#allocation320_spill] sm:$0xff] }
0x17f5   :  { %6526 = vmatpush.bf16.msrb.mxu0 %v14345_v6  ;;  %v14373_v6 = vld [vmem:[#allocation311_spill] sm:$0xff] }
0x17f6   :  { %6487 = vmatpush.bf16.msra.mxu1 %v14347_v3  ;;  %6563 = vmatpush.bf16.msrb.mxu3 %v14352_v33  ;;  %v14375_v3 = vld [vmem:[#allocation316_spill] sm:$0xff] }
0x17f9   :  { %6527 = vmatpush.bf16.msrb.mxu0 %v14348_v38  ;;  %v12721_v46 = vpop.f32.mrf.mxu0  ;;  %v14376_v38 = vld [vmem:[#allocation321_spill] sm:$0xff] }
0x17fa   :  { %6488 = vmatpush.bf16.msra.mxu1 %v14351_v41  ;;  %6564 = vmatpush.bf16.msrb.mxu3 %v14354_v23  ;;  %v12723_v43 = vpop.f32.mrf.mxu1  ;;  %v6004_v41 = vadd.f32 %v12449_v22, %v12635_v42  ;;  %v14379_v23 = vld [vmem:[#allocation325_spill] sm:$0xff]  ;;  %v6030_v22 = vadd.f32 %v12633_v63, %v12542_v48  ;;  %v14385_v42 = vld [vmem:[#allocation334_spill] sm:$0xff] }
0x17fc   :  { %6528 = vmatmul.bf16.vlgmr.msrb.gmra.mxu0 %v12192_v47 }
0x17fd   :  { %6572 = vmatpush.bf16.msra.mxu0 %v14350_v39  ;;  %v14378_v39 = vld [vmem:[#allocation326_spill] sm:$0xff] }
0x17fe   :  { %6565 = vmatpush.bf16.msrb.mxu3 %v14356_v51  ;;  %v14380_v51 = vld [vmem:[#allocation330_spill] sm:$0xff] }
0x1801   :  { %6573 = vmatpush.bf16.msra.mxu0 %v14353_v5  ;;  %v6187_v8 = vpop.f32.mrf.mxu0  ;;  %v6082_v5 = vadd.f32 %v12652_v44, %v12554_v52  ;;  %v6056_v52 = vadd.f32 %v12456_v36, %v12656_v27  ;;  %v14386_v44 = vld [vmem:[#allocation331_spill] sm:$0xff]  ;;  %v14389_v27 = vld [vmem:[#allocation338_spill] sm:$0xff] }
0x1802   :  { %6566 = vmatpush.bf16.msrb.mxu3 %v14358_v35  ;;  %v6148_v34 = vpop.f32.mrf.mxu1  ;;  %v14381_v35 = vld [vmem:[#allocation240_spill] sm:$0xff] }
0x1803   :  { %v14388_v63 = vperm.slane %v14381_v35, 2 }
0x1805   :  { %6574 = vmatpush.bf16.msra.mxu0 %v14355_v45  ;;  %6567 = vmatmul.bf16.vlgmr.msrb.gmra.mxu3 %v12180_v30 }
0x1806   :  { %6611 = vmatpush.bf16.msra.mxu3 %v14360_v57 }
0x1809   :  { %6575 = vmatpush.bf16.msra.mxu0 %v14357_v11 }
0x180a   :  { %6612 = vmatpush.bf16.msra.mxu3 %v14362_v31 }
0x180d   :  { %6576 = vmatpush.bf16.msra.mxu0 %v14359_v62  ;;  %v14382_v62 = vperm.slane %v14381_v35, 0 }
0x180e   :  { %6613 = vmatpush.bf16.msra.mxu3 %v14364_v1 }
0x1811   :  { %6577 = vmatpush.bf16.msra.mxu0 %v14361_v37  ;;  %v14383_v37 = vperm.slane %v14381_v35, 3 }
0x1812   :  { %6614 = vmatpush.bf16.msra.mxu3 %v14366_v26 }
0x1815   :  { %6578 = vmatpush.bf16.msra.mxu0 %v14363_v59  ;;  %v14384_v59 = vld [vmem:[#allocation329_spill] sm:$0xff] }
0x1816   :  { %6615 = vmatpush.bf16.msra.mxu3 %v14368_v2 }
0x1819   :  { %6579 = vmatpush.bf16.msra.mxu0 %v14365_v60 }
0x181a   :  { %6616 = vmatpush.bf16.msra.mxu3 %v14370_v56  ;;  %v14387_v56 = vperm.slane %v14381_v35, 1 }
0x181c   :  { %6580 = vmatmul.bf16.vlgmr.msra.gmra.mxu0 %v12192_v47 }
0x181d   :  { %6624 = vmatpush.bf16.msrb.mxu0 %v14367_v7 }
0x181e   :  { %6617 = vmatpush.bf16.msra.mxu3 %v14372_v4  ;;  %v6198_v33 = vpop.f32.mrf.mxu1 }
0x181f   :  { %v6199_v45 = vadd.f32 %v6198_v33, %v6004_v41 }
0x1820   :  { %v6237_v11 = vpop.f32.mrf.mxu0 }
0x1821   :  { %6625 = vmatpush.bf16.msrb.mxu0 %v14369_v53  ;;  %v6293_v57 = vadd.f32 %v6199_v45, %v14382_v62  ;;  %v6238_v8 = vadd.f32 %v6237_v11, %v6082_v5  ;;  %v6108_v45 = vadd.f32 %v12458_v14, %v12692_v32  ;;  %v14393_v11 = vld [vmem:[#allocation347_spill] sm:$0xff]  ;;  %v14396_v32 = vperm.slane %v14381_v35, 7 }
0x1822   :  { %6618 = vmatpush.bf16.msra.mxu3 %v14374_v17  ;;  %v14394_v62 = vld [vmem:[#allocation343_spill] sm:$0xff] }
0x1823   :  { %v9122_v34 = vmul.f32 -1.442695, %v6293_v57  ;;  %v6296_v31 = vadd.f32 %v6238_v8, %v14383_v37 }
0x1825   :  { %6626 = vmatpush.bf16.msrb.mxu0 %v14371_v61  ;;  %6619 = vmatmul.bf16.vlgmr.msra.gmra.mxu3 %v12180_v30  ;;  %9791 = vpow2.f32 %v9122_v34  ;;  %v9125_v1 = vmul.f32 -1.442695, %v6296_v31  ;;  %v6211_v60 = vpop.f32.mrf.mxu2  ;;  %v14390_v61 = vld [vmem:[#allocation335_spill] sm:$0xff] }
0x1826   :  { %6663 = vmatpush.bf16.msrb.mxu3 %v14376_v38  ;;  %v6224_v26 = vpop.f32.mrf.mxu3  ;;  %v6212_v7 = vadd.f32 %v6211_v60, %v6030_v22  ;;  %v6200_v53 = vpop.f32.mrf.mxu1 }
0x1827   :  { %v6225_v2 = vadd.f32 %v6224_v26, %v6056_v52  ;;  %9793 = vpow2.f32 %v9125_v1  ;;  %v14395_v52 = vperm.slane %v14381_v35, 4  ;;  %v14398_v1 = vld [vmem:[#allocation348_spill] sm:$0xff] }
0x1828   :  { %v6294_v48 = vadd.f32 %v6212_v7, %v14387_v56  ;;  %v6239_v4 = vpop.f32.mrf.mxu0  ;;  %v14399_v7 = vld [vmem:[#allocation353_spill] sm:$0xff] }
0x1829   :  { %6627 = vmatpush.bf16.msrb.mxu0 %v14373_v6  ;;  %v6295_v36 = vadd.f32 %v6225_v2, %v14388_v63  ;;  %v6160_v4 = vadd.f32 %v12460_v49, %v12723_v43 }
0x182a   :  { %6664 = vmatpush.bf16.msrb.mxu3 %v14378_v39  ;;  %v9123_v6 = vmul.f32 -1.442695, %v6294_v48  ;;  %v14392_v39 = vld [vmem:[#allocation339_spill] sm:$0xff]  ;;  %v6134_v48 = vadd.f32 %v12690_v18, %v12573_v55  ;;  %v14400_v18 = vld [vmem:[#allocation352_spill] sm:$0xff] }
0x182b   :  { %v9124_v17 = vmul.f32 -1.442695, %v6295_v36 }
0x182c   :  { %9795 = vpow2.f32 %v9123_v6 }
0x182d   :  { %6628 = vmatpush.bf16.msrb.mxu0 %v14375_v3  ;;  %v9792_v3 = vpop.eup %9791  ;;  %9797 = vpow2.f32 %v9124_v17  ;;  %v6213_v33 = vpop.f32.mrf.mxu2 }
0x182e   :  { %6665 = vmatpush.bf16.msrb.mxu3 %v14380_v51  ;;  %v12775_v38 = vadd.f32 1.0, %v9792_v3  ;;  %v9794_v41 = vpop.eup %9793  ;;  %v6226_v5 = vpop.f32.mrf.mxu3  ;;  %v6186_v51 = vadd.f32 %v12721_v46, %v12593_v40 }
0x1830   :  { %9799 = vrcp.f32 %v12775_v38  ;;  %v6318_v63 = vand.u32 2147483647, %v12775_v38  ;;  %v6320_v36 = vand.u32 2147483648, %v12775_v38  ;;  %vm6314_vm7 = vweird.f32 %v12775_v38 }
0x1831   :  { %6629 = vmatpush.bf16.msrb.mxu0 %v14377_v54  ;;  %v14391_v54 = vld [vmem:[#allocation342_spill] sm:$0xff] }
0x1832   :  { %6666 = vmatpush.bf16.msrb.mxu3 %v14385_v42  ;;  %v9796_v31 = vpop.eup %9795  ;;  %vm12819_vm5 = vcmp.eq.f32.partialorder %v6318_v63, 8.507059e+37  ;;  %v6321_v49 = vor.u32 1.1754944e-38, %v6320_v36 }
0x1833   :  { %v12789_v22 = vadd.f32 1.0, %v9796_v31 }
0x1835   :  { %6630 = vmatpush.bf16.msrb.mxu0 %v14379_v23  ;;  %v12780_v23 = vadd.f32 1.0, %v9794_v41  ;;  %v6263_v2 = vpop.f32.mrf.mxu2  ;;  %v14401_v41 = vld [vmem:[#allocation358_spill] sm:$0xff]  ;;  %vm6329_vm15 = vweird.f32 %v12789_v22 }
0x1836   :  { %6667 = vmatpush.bf16.msrb.mxu3 %v14389_v27  ;;  %v6276_v53 = vpop.f32.mrf.mxu3  ;;  %v6264_v55 = vadd.f32 %v6263_v2, %v6134_v48  ;;  %v14407_v48 = vperm.slane %v14381_v35, 6 }
0x1837   :  { %9801 = vrcp.f32 %v12780_v23  ;;  %v6373_v6 = vand.u32 2147483648, %v12780_v23  ;;  %vm6367_vm9 = vweird.f32 %v12780_v23  ;;  %v6277_v43 = vadd.f32 %v6276_v53, %v6160_v4 }
0x1838   :  { %9803 = vrcp.f32 %v12789_v22  ;;  %v6335_v53 = vand.u32 2147483648, %v12789_v22 }
0x1839   :  { %6631 = vmatpush.bf16.msrb.mxu0 %v14384_v59  ;;  %v6289_v8 = vpop.f32.mrf.mxu0  ;;  %v9798_v59 = vpop.eup %9797  ;;  %v6299_v63 = vadd.f32 %v6277_v43, %v14407_v48  ;;  %v14420_v48 = vld [vmem:[#allocation375_spill] sm:$0xff] }
0x183a   :  { %6668 = vmatpush.bf16.msrb.mxu3 %v14391_v54  ;;  %v6250_v57 = vpop.f32.mrf.mxu1  ;;  %v6290_v37 = vadd.f32 %v6289_v8, %v6186_v51  ;;  %v9800_v46 = vpop.eup %9799  ;;  %v12795_v42 = vadd.f32 1.0, %v9798_v59  ;;  %v14405_v59 = vld [vmem:[#allocation357_spill] sm:$0xff] }
0x183b   :  { %v6251_v34 = vadd.f32 %v6250_v57, %v6108_v45  ;;  %v6310_v60 = vmul.f32 %v9800_v46, %v12775_v38  ;;  %vm6315_vm8 = vweird.f32 %v9800_v46  ;;  %v6371_v57 = vand.u32 2147483647, %v12780_v23 }
0x183c   :  { %6632 = vmatmul.bf16.vlgmr.msrb.gmra.mxu0 %v12192_v47  ;;  %v6300_v40 = vadd.f32 %v6290_v37, %v14396_v32  ;;  %9805 = vrcp.f32 %v12795_v42  ;;  %v6358_v31 = vand.u32 2147483648, %v12795_v42  ;;  %vm6316_vm10 = vmor %vm6314_vm7, %vm6315_vm8  ;;  %vm6352_vm1 = vweird.f32 %v12795_v42 }
0x183d   :  { %6676 = vmatpush.bf16.msra.mxu0 %v14386_v44  ;;  %v6297_v14 = vadd.f32 %v6251_v34, %v14395_v52  ;;  %v14397_v44 = vld [vmem:[#allocation351_spill] sm:$0xff]  ;;  %v12802_v56 = vpop.eup %9801  ;;  %v6311_v27 = vsub.f32 1.0, %v6310_v60  ;;  %v6374_v34 = vor.u32 1.1754944e-38, %v6373_v6  ;;  %v6265_v60 = vpop.f32.mrf.mxu2  ;;  %v9126_v6 = vmul.f32 -1.442695, %v6299_v63 }
0x183e   :  { %6669 = vmatpush.bf16.msrb.mxu3 %v14393_v11  ;;  %v9127_v26 = vmul.f32 -1.442695, %v6300_v40  ;;  %v9804_v5 = vpop.eup %9803  ;;  %v14404_v11 = vperm.slane %v14381_v35, 5  ;;  %vm6368_vm6 = vweird.f32 %v12802_v56  ;;  %v6333_v40 = vand.u32 2147483647, %v12789_v22 }
0x183f   :  { %9807 = vtanh.f32 %v6297_v14  ;;  %v6325_v37 = vmul.f32 %v9804_v5, %v12789_v22  ;;  %vm12847_vm11 = vmor %vm6367_vm9, %vm6368_vm6  ;;  %vm6330_vm13 = vweird.f32 %v9804_v5  ;;  %vm6372_vm0 = vcmp.eq.f32.partialorder %v6371_v57, 8.507059e+37 }
0x1840   :  { %9809 = vpow2.f32 %v9127_v26  ;;  %v6278_v26 = vpop.f32.mrf.mxu3  ;;  %vm6331_vm2 = vmor %vm6329_vm15, %vm6330_vm13  ;;  %v6359_v33 = vor.u32 1.1754944e-38, %v6358_v31  ;;  %vm6334_vm4 = vcmp.eq.f32.partialorder %v6333_v40, 8.507059e+37 }
0x1841   :  { %6677 = vmatpush.bf16.msra.mxu0 %v14390_v61  ;;  %v6363_v61 = vmul.f32 %v12802_v56, %v12780_v23  ;;  %v6291_v3 = vpop.f32.mrf.mxu0  ;;  %v6326_v2 = vsub.f32 1.0, %v6325_v37  ;;  %v6356_v23 = vand.u32 2147483647, %v12795_v42 }
0x1842   :  { %6670 = vmatpush.bf16.msrb.mxu3 %v14397_v44  ;;  %v6252_v17 = vpop.f32.mrf.mxu1  ;;  %v9806_v8 = vpop.eup %9805  ;;  %v14412_v3 = vld [vmem:[#allocation363_spill] sm:$0xff] }
0x1843   :  { %v6364_v54 = vsub.f32 1.0, %v6363_v61  ;;  %v6348_v14 = vmul.f32 %v9806_v8, %v12795_v42  ;;  %v6327_v4 = vmul.f32 %v9804_v5, %v6326_v2  ;;  %vm6353_vm14 = vweird.f32 %v9806_v8  ;;  %v14411_v17 = vld [vmem:[#allocation366_spill] sm:$0xff] }
0x1844   :  { %vm6354_vm3 = vmor %vm6352_vm1, %vm6353_vm14  ;;  %vm6357_vm7 = vcmp.eq.f32.partialorder %v6356_v23, 8.507059e+37 }
0x1845   :  { %6678 = vmatpush.bf16.msra.mxu0 %v14392_v39  ;;  %6671 = vmatmul.bf16.vlgmr.msrb.gmra.mxu3 %v12180_v30  ;;  %v6312_v39 = vmul.f32 %v9800_v46, %v6311_v27  ;;  %v6365_v45 = vmul.f32 %v12802_v56, %v6364_v54  ;;  %v9808_v52 = vpop.eup %9807  ;;  %v6349_v36 = vsub.f32 1.0, %v6348_v14  ;;  %v6328_v54 = vadd.f32 %v9804_v5, %v6327_v4 }
0x1846   :  { %6715 = vmatpush.bf16.msra.mxu3 %v14399_v7  ;;  %v9810_v7 = vpop.eup %9809 }
0x1847   :  { %v6313_v51 = vadd.f32 %v9800_v46, %v6312_v39  ;;  %v6366_v44 = vadd.f32 %v12802_v56, %v6365_v45  ;;  %v12851_v61 = vadd.f32 1.0, %v9810_v7  ;;  %v6336_v39 = vor.u32 1.1754944e-38, %v6335_v53  ;;  %v14419_v53 = vld [vmem:[#allocation379_spill] sm:$0xff] }
0x1849   :  { %6679 = vmatpush.bf16.msra.mxu0 %v14394_v62  ;;  %v6298_v62 = vadd.f32 %v6264_v55, %v14404_v11  ;;  %v6317_v32 = vsel %vm6316_vm10, %v9800_v46, %v6313_v51  ;;  %v6370_v35 = vsel %vm12847_vm11, %v12802_v56, %v6366_v44  ;;  %v14410_v55 = vld [vmem:[#allocation361_spill] sm:$0xff]  ;;  %v14413_v51 = vld [vmem:[#allocation370_spill] sm:$0xff]  ;;  %v14414_v11 = vld [vmem:[#allocation367_spill] sm:$0xff]  ;;  %v6413_v26 = vand.u32 2147483648, %v12851_v61 }
0x184a   :  { %6716 = vmatpush.bf16.msra.mxu3 %v14401_v41  ;;  %v6322_v38 = vsel %vm12819_vm5, %v6321_v49, %v6317_v32  ;;  %v6375_v41 = vsel %vm6372_vm0, %v6374_v34, %v6370_v35  ;;  %v6332_v49 = vsel %vm6331_vm2, %v9804_v5, %v6328_v54  ;;  %v12869_v34 = vpop.f32.mrf.mxu3  ;;  %v14417_v44 = vld [vmem:[#allocation374_spill] sm:$0xff]  ;;  %v6411_v2 = vand.u32 2147483647, %v12851_v61 }
0x184b   :  { %v6419_v27 = vmul.f32 %v9808_v52, %v6322_v38  ;;  %9811 = vtanh.f32 %v6298_v62  ;;  %v6337_v22 = vsel %vm6334_vm4, %v6336_v39, %v6332_v49  ;;  %v14415_v62 = vld [vmem:[#allocation275_spill] sm:$0xff]  ;;  %v14416_v52 = vld [vmem:[#allocation277_spill] sm:$0xff]  ;;  %vm6407_vm9 = vweird.f32 %v12851_v61  ;;  %v14424_v39 = vld [vmem:[#allocation384_spill] sm:$0xff] }
0x184c   :  { %9813 = vrcp.f32 %v12851_v61  ;;  %v6418_v57 = vmul.f32 %v6375_v41, %v14415_v62  ;;  %vm6412_vm6 = vcmp.eq.f32.partialorder %v6411_v2, 8.507059e+37  ;;  %v14439_v2 = vld [vmem:[#allocation406_spill] sm:$0xff] }
0x184d   :  { %6680 = vmatpush.bf16.msra.mxu0 %v14398_v1  ;;  %v14406_v1 = vld [vmem:[#allocation362_spill] sm:$0xff]  ;;  %9815 = vpow2.f32 %v9126_v6  ;;  %v14421_v6 = vld [vmem:[#allocation383_spill] sm:$0xff] }
0x184e   :  { %6717 = vmatpush.bf16.msra.mxu3 %v14406_v1  ;;  %v14418_v1 = vld [vmem:[#allocation371_spill] sm:$0xff] }
0x1851   :  { %6681 = vmatpush.bf16.msra.mxu0 %v14400_v18  ;;  %v6350_v18 = vmul.f32 %v9806_v8, %v6349_v36  ;;  %v9812_v43 = vpop.eup %9811  ;;  %v6414_v36 = vor.u32 1.1754944e-38, %v6413_v26  ;;  %v14437_v26 = vld [vmem:[#allocation295_spill] sm:$0xff] }
0x1852   :  { %6718 = vmatpush.bf16.msra.mxu3 %v14411_v17  ;;  %v6420_v37 = vmul.f32 %v9812_v43, %v6337_v22  ;;  %v6466_v46 = vpop.f32.mrf.mxu3  ;;  %v14423_v17 = vld [vmem:[#allocation385_spill] sm:$0xff] }
0x1853   :  { %v6351_v56 = vadd.f32 %v9806_v8, %v6350_v18  ;;  %v14442_v46 = vld [vmem:[#allocation301_spill] sm:$0xff] }
0x1854   :  { %v6422_v32 = vadd.f32 %v6420_v37, %v6418_v57  ;;  %v14429_v57 = vld [vmem:[#allocation287_spill] sm:$0xff] }
0x1855   :  { %6682 = vmatpush.bf16.msra.mxu0 %v14405_v59  ;;  %v6355_v45 = vsel %vm6354_vm3, %v9806_v8, %v6351_v56  ;;  %v9814_v59 = vpop.eup %9813 }
0x1856   :  { %6719 = vmatpush.bf16.msra.mxu3 %v14413_v51  ;;  %v6360_v42 = vsel %vm6357_vm7, %v6359_v33, %v6355_v45  ;;  %v9816_v31 = vpop.eup %9815  ;;  %v6403_v5 = vmul.f32 %v9814_v59, %v12851_v61  ;;  %9817 = vtanh.f32 %v6422_v32  ;;  %vm6408_vm8 = vweird.f32 %v9814_v59  ;;  %v14425_v33 = vld [vmem:[#allocation390_spill] sm:$0xff]  ;;  %v14426_v45 = vld [vmem:[#allocation284_spill] sm:$0xff]  ;;  %v14427_v51 = vld [vmem:[#allocation389_spill] sm:$0xff] }
0x1857   :  { %v6417_v14 = vmul.f32 %v6360_v42, %v14416_v52  ;;  %v6385_v40 = vadd.f32 1.0, %v9816_v31  ;;  %vm6409_vm5 = vmor %vm6407_vm9, %vm6408_vm8  ;;  %v14428_v42 = vld [vmem:[#allocation394_spill] sm:$0xff] }
0x1858   :  { %v6404_v60 = vsub.f32 1.0, %v6403_v5  ;;  %v14431_v31 = vld [vmem:[#allocation398_spill] sm:$0xff]  ;;  %v14432_v5 = vld [vmem:[#allocation395_spill] sm:$0xff] }
0x1859   :  { %6683 = vmatpush.bf16.msra.mxu0 %v14410_v55  ;;  %v6421_v8 = vadd.f32 %v6419_v27, %v6417_v14  ;;  %9819 = vrcp.f32 %v6385_v40  ;;  %v12877_v38 = vpop.f32.mrf.mxu0  ;;  %v14422_v55 = vld [vmem:[#allocation380_spill] sm:$0xff]  ;;  %v6398_v41 = vand.u32 2147483648, %v6385_v40  ;;  %v6396_v43 = vand.u32 2147483647, %v6385_v40  ;;  %v14430_v14 = vld [vmem:[#allocation393_spill] sm:$0xff] }
0x185a   :  { %6720 = vmatpush.bf16.msra.mxu3 %v14417_v44  ;;  %v6405_v7 = vmul.f32 %v9814_v59, %v6404_v60  ;;  %vm6392_vm11 = vweird.f32 %v6385_v40  ;;  %v14435_v44 = vld [vmem:[#allocation402_spill] sm:$0xff] }
0x185b   :  { %9821 = vtanh.f32 %v6421_v8  ;;  %vm6397_vm14 = vcmp.eq.f32.partialorder %v6396_v43, 8.507059e+37  ;;  %v14433_v8 = vld [vmem:[#allocation291_spill] sm:$0xff]  ;;  %v14457_v43 = vld [vmem:[#allocation421_spill] sm:$0xff] }
0x185c   :  { %6684 = vmatmul.bf16.vlgmr.msra.gmra.mxu0 %v12192_v47  ;;  %v6406_v63 = vadd.f32 %v9814_v59, %v6405_v7  ;;  %v9818_v27 = vpop.eup %9817  ;;  %v14438_v7 = vld [vmem:[#allocation296_spill] sm:$0xff] }
0x185d   :  { %6728 = vmatpush.bf16.msrb.mxu0 %v14412_v3 }
0x185e   :  { %6721 = vmatpush.bf16.msra.mxu3 %v14419_v53  ;;  %v6410_v4 = vsel %vm6409_vm5, %v9814_v59, %v6406_v63  ;;  %v14440_v53 = vld [vmem:[#allocation403_spill] sm:$0xff] }
0x185f   :  { %v6415_v35 = vsel %vm6412_vm6, %v6414_v36, %v6410_v4  ;;  %v9820_v18 = vpop.eup %9819  ;;  %v14443_v36 = vld [vmem:[#allocation411_spill] sm:$0xff] }
0x1860   :  { %v6426_v23 = vmul.f32 %v9818_v27, %v6415_v35  ;;  %v6388_v3 = vmul.f32 %v9820_v18, %v6385_v40  ;;  %vm6393_vm10 = vweird.f32 %v9820_v18  ;;  %v14434_v40 = vld [vmem:[#allocation292_spill] sm:$0xff]  ;;  %v14444_v27 = vld [vmem:[#allocation407_spill] sm:$0xff] }
0x1861   :  { %6729 = vmatpush.bf16.msrb.mxu0 %v14414_v11  ;;  %v6479_v56 = vpop.f32.mrf.mxu0  ;;  %vm6394_vm13 = vmor %vm6392_vm11, %vm6393_vm10  ;;  %v6399_v11 = vor.u32 1.1754944e-38, %v6398_v41  ;;  %v9822_v37 = vpop.eup %9821  ;;  %v14445_v35 = vld [vmem:[#allocation304_spill] sm:$0xff] }
0x1862   :  { %6722 = vmatpush.bf16.msra.mxu3 %v14421_v6  ;;  %v12885_v54 = vpack.c.bf16 %v6426_v23, %v6426_v23  ;;  %v6389_v61 = vsub.f32 1.0, %v6388_v3  ;;  %v14446_v6 = vld [vmem:[#allocation305_spill] sm:$0xff]  ;;  %v14454_v41 = vld [vmem:[#allocation312_spill] sm:$0xff] }
0x1863   :  { %v14449_v23 = vld [vmem:[#allocation417_spill] sm:$0xff] }
0x1864   :  { %6450 = vmatmul.bf16.vlgmr.msrb.gmra.mxu2 %v12885_v54  ;;  %v6390_v49 = vmul.f32 %v9820_v18, %v6389_v61  ;;  %v14451_v56 = vld [vmem:[#allocation309_spill] sm:$0xff]  ;;  %v14452_v61 = vld [vmem:[#allocation416_spill] sm:$0xff] }
0x1865   :  { %6730 = vmatpush.bf16.msrb.mxu0 %v14418_v1  ;;  %6723 = vmatmul.bf16.vlgmr.msra.gmra.mxu3 %v12180_v30  ;;  %v14436_v1 = vld [vmem:[#allocation399_spill] sm:$0xff] }
0x1866   :  { %6767 = vmatpush.bf16.msrb.mxu3 %v14423_v17  ;;  %6546 = vmatpush.bf16.msrb.mxu2 %v14426_v45  ;;  %v6391_v22 = vadd.f32 %v9820_v18, %v6390_v49  ;;  %v14450_v17 = vld [vmem:[#allocation308_spill] sm:$0xff]  ;;  %v14456_v49 = vld [vmem:[#allocation313_spill] sm:$0xff]  ;;  %v14458_v45 = vld [vmem:[#allocation426_spill] sm:$0xff] }
0x1868   :  { %v6395_v62 = vsel %vm6394_vm13, %v9820_v18, %v6391_v22  ;;  %v12906_v60 = vpop.f32.mrf.mxu3  ;;  %v14448_v18 = vld [vmem:[#allocation412_spill] sm:$0xff]  ;;  %v14459_v22 = vld [vmem:[#allocation318_spill] sm:$0xff] }
0x1869   :  { %6731 = vmatpush.bf16.msrb.mxu0 %v14420_v48  ;;  %v6400_v59 = vsel %vm6397_vm14, %v6399_v11, %v6395_v62  ;;  %v14441_v48 = vld [vmem:[#allocation300_spill] sm:$0xff]  ;;  %v14461_v11 = vld [vmem:[#allocation425_spill] sm:$0xff]  ;;  %v14463_v62 = vld [vmem:[#allocation427_spill] sm:$0xff] }
0x186a   :  { %6768 = vmatpush.bf16.msrb.mxu3 %v14425_v33  ;;  %6547 = vmatpush.bf16.msrb.mxu2 %v14429_v57  ;;  %v6425_v52 = vmul.f32 %v9822_v37, %v6400_v59  ;;  %v14455_v33 = vld [vmem:[#allocation314_spill] sm:$0xff]  ;;  %v14464_v57 = vld [vmem:[#allocation323_spill] sm:$0xff]  ;;  %v14466_v59 = vld [vmem:[#allocation324_spill] sm:$0xff] }
0x186b   :  { %v14465_v37 = vld [vmem:[#allocation322_spill] sm:$0xff] }
0x186c   :  { %v12898_v32 = vpack.c.bf16 %v6425_v52, %v6425_v52  ;;  %v14467_v52 = vld [vmem:[#allocation431_spill] sm:$0xff] }
0x186d   :  { %6732 = vmatpush.bf16.msrb.mxu0 %v14422_v55  ;;  %v14447_v55 = vld [vmem:[#allocation415_spill] sm:$0xff] }
0x186e   :  { %6769 = vmatpush.bf16.msrb.mxu3 %v14428_v42  ;;  %6548 = vmatpush.bf16.msrb.mxu2 %v14433_v8  ;;  %v14462_v42 = vld [vmem:[#allocation430_spill] sm:$0xff]  ;;  %v14470_v8 = vld [vmem:[#allocation437_spill] sm:$0xff] }
0x186f   :  { %6437 = vmatmul.bf16.vlgmr.msrb.gmra.mxu1 %v12898_v32 }
0x1870   :  { %6533 = vmatpush.bf16.msrb.mxu1 %v14434_v40  ;;  %v6518_v4 = vpop.f32.mrf.mxu3  ;;  %v14471_v40 = vld [vmem:[#allocation434_spill] sm:$0xff] }
0x1871   :  { %6733 = vmatpush.bf16.msrb.mxu0 %v14424_v39  ;;  %v14453_v39 = vld [vmem:[#allocation422_spill] sm:$0xff] }
0x1872   :  { %6770 = vmatpush.bf16.msrb.mxu3 %v14431_v31  ;;  %6549 = vmatpush.bf16.msrb.mxu2 %v14437_v26  ;;  %v14468_v31 = vld [vmem:[#allocation327_spill] sm:$0xff]  ;;  %v14473_v26 = vld [vmem:[#allocation333_spill] sm:$0xff] }
0x1874   :  { %6534 = vmatpush.bf16.msrb.mxu1 %v14438_v7  ;;  %6502 = vmatmul.bf16.vlgmr.msra.gmra.mxu2 %v12885_v54  ;;  %v14475_v7 = vld [vmem:[#allocation438_spill] sm:$0xff] }
0x1875   :  { %6734 = vmatpush.bf16.msrb.mxu0 %v14427_v51  ;;  %v14460_v51 = vld [vmem:[#allocation317_spill] sm:$0xff] }
0x1876   :  { %6771 = vmatpush.bf16.msrb.mxu3 %v14435_v44  ;;  %6550 = vmatpush.bf16.msrb.mxu2 %v14441_v48  ;;  %v14472_v44 = vld [vmem:[#allocation332_spill] sm:$0xff]  ;;  %v14477_v48 = vld [vmem:[#allocation337_spill] sm:$0xff] }
0x1878   :  { %6535 = vmatpush.bf16.msrb.mxu1 %v14442_v46  ;;  %v14478_v46 = vld [vmem:[#allocation443_spill] sm:$0xff] }
0x1879   :  { %6735 = vmatpush.bf16.msrb.mxu0 %v14430_v14  ;;  %v12914_v63 = vpop.f32.mrf.mxu0 }
0x187a   :  { %6772 = vmatpush.bf16.msrb.mxu3 %v14439_v2  ;;  %6551 = vmatpush.bf16.msrb.mxu2 %v14445_v35  ;;  %v14480_v35 = vld [vmem:[#allocation341_spill] sm:$0xff] }
0x187c   :  { %6736 = vmatmul.bf16.vlgmr.msrb.gmra.mxu0 %v12192_v47  ;;  %6536 = vmatpush.bf16.msrb.mxu1 %v14446_v6  ;;  %v14481_v6 = vld [vmem:[#allocation344_spill] sm:$0xff] }
0x187d   :  { %6780 = vmatpush.bf16.msra.mxu0 %v14432_v5  ;;  %v14469_v5 = vld [vmem:[#allocation328_spill] sm:$0xff] }
0x187e   :  { %6773 = vmatpush.bf16.msrb.mxu3 %v14443_v36  ;;  %6552 = vmatpush.bf16.msrb.mxu2 %v14450_v17  ;;  %v14479_v36 = vld [vmem:[#allocation340_spill] sm:$0xff] }
0x187f   :  { %6489 = vmatmul.bf16.vlgmr.msra.gmra.mxu1 %v12898_v32  ;;  %v9867_v17 = vld [vmem:[%s13177_s12 + $0x20] sm:$0xff] }
0x1880   :  { %6537 = vmatpush.bf16.msrb.mxu1 %v14451_v56  ;;  %v14487_v56 = vld [vmem:[#allocation354_spill] sm:$0xff] }
0x1881   :  { %6781 = vmatpush.bf16.msra.mxu0 %v14436_v1  ;;  %v6531_v3 = vpop.f32.mrf.mxu0 }
0x1882   :  { %6774 = vmatpush.bf16.msrb.mxu3 %v14447_v55  ;;  %6553 = vmatpush.bf16.msrb.mxu2 %v14454_v41  ;;  %v14482_v55 = vld [vmem:[#allocation346_spill] sm:$0xff]  ;;  %v14486_v3 = vld [vmem:[#allocation355_spill] sm:$0xff]  ;;  %v14490_v41 = vld [vmem:[#allocation360_spill] sm:$0xff] }
0x1884   :  { %6538 = vmatpush.bf16.msrb.mxu1 %v14456_v49 }
0x1885   :  { %6782 = vmatpush.bf16.msra.mxu0 %v14440_v53  ;;  %6775 = vmatmul.bf16.vlgmr.msrb.gmra.mxu3 %v12180_v30  ;;  %v14476_v53 = vld [vmem:[#allocation336_spill] sm:$0xff] }
0x1886   :  { %6819 = vmatpush.bf16.msra.mxu3 %v14449_v23  ;;  %6598 = vmatpush.bf16.msra.mxu2 %v14455_v33  ;;  %v14485_v23 = vld [vmem:[#allocation349_spill] sm:$0xff]  ;;  %v9869_v33 = vld [vmem:[%s13177_s12 + $0x10] sm:$0xff] }
0x1887   :  { %6554 = vmatmul.bf16.vlgmr.msrb.gmra.mxu2 %v12885_v54 }
0x1888   :  { %6539 = vmatpush.bf16.msrb.mxu1 %v14460_v51  ;;  %v12947_v14 = vpop.f32.mrf.mxu3  ;;  %v14493_v51 = vld [vmem:[#allocation368_spill] sm:$0xff] }
0x1889   :  { %6783 = vmatpush.bf16.msra.mxu0 %v14444_v27  ;;  %v9864_v27 = vld [vmem:[%s13177_s12 + $0x38] sm:$0xff] }
0x188a   :  { %6820 = vmatpush.bf16.msra.mxu3 %v14453_v39  ;;  %6599 = vmatpush.bf16.msra.mxu2 %v14459_v22  ;;  %v9868_v39 = vld [vmem:[%s13177_s12 + $0x18] sm:$0xff]  ;;  %v9870_v22 = vld [vmem:[%s13177_s12 + $0x8] sm:$0xff] }
0x188c   :  { %6540 = vmatpush.bf16.msrb.mxu1 %v14465_v37  ;;  %v14496_v37 = vld [vmem:[#allocation373_spill] sm:$0xff] }
0x188d   :  { %6784 = vmatpush.bf16.msra.mxu0 %v14448_v18  ;;  %v14483_v18 = vld [vmem:[#allocation345_spill] sm:$0xff] }
0x188e   :  { %6821 = vmatpush.bf16.msra.mxu3 %v14458_v45  ;;  %6600 = vmatpush.bf16.msra.mxu2 %v14464_v57 }
0x188f   :  { %6541 = vmatmul.bf16.vlgmr.msrb.gmra.mxu1 %v12898_v32 }
0x1890   :  { %6585 = vmatpush.bf16.msra.mxu1 %v14466_v59  ;;  %v6570_v2 = vpop.f32.mrf.mxu3  ;;  %v14497_v59 = vld [vmem:[#allocation376_spill] sm:$0xff] }
0x1891   :  { %6785 = vmatpush.bf16.msra.mxu0 %v14452_v61  ;;  %v14506_v2 = vld [vmem:[#allocation392_spill] sm:$0xff] }
0x1892   :  { %6822 = vmatpush.bf16.msra.mxu3 %v14462_v42  ;;  %6601 = vmatpush.bf16.msra.mxu2 %v14468_v31  ;;  %v9871_v42 = vld [vmem:[%s13177_s12] sm:$0xff] }
0x1893   :  { %v14499_v31 = vld [vmem:[#allocation377_spill] sm:$0xff] }
0x1894   :  { %6586 = vmatpush.bf16.msra.mxu1 %v14469_v5  ;;  %v14500_v5 = vld [vmem:[#allocation382_spill] sm:$0xff] }
0x1895   :  { %6786 = vmatpush.bf16.msra.mxu0 %v14457_v43  ;;  %v14492_v43 = vld [vmem:[#allocation365_spill] sm:$0xff] }
0x1896   :  { %6823 = vmatpush.bf16.msra.mxu3 %v12012_v25  ;;  %6602 = vmatpush.bf16.msra.mxu2 %v14472_v44  ;;  %v14474_v25 = vld [vmem:[#allocation442_spill] sm:$0xff] }
0x1897   :  { %v14503_v44 = vld [vmem:[#allocation386_spill] sm:$0xff] }
0x1898   :  { %6587 = vmatpush.bf16.msra.mxu1 %v14473_v26  ;;  %v14504_v26 = vld [vmem:[#allocation388_spill] sm:$0xff] }
0x1899   :  { %6787 = vmatpush.bf16.msra.mxu0 %v14461_v11  ;;  %v12955_v1 = vpop.f32.mrf.mxu0  ;;  %v14494_v11 = vld [vmem:[#allocation369_spill] sm:$0xff] }
0x189a   :  { %6824 = vmatpush.bf16.msra.mxu3 %v14470_v8  ;;  %6603 = vmatpush.bf16.msra.mxu2 %v14476_v53  ;;  %v14501_v8 = vld [vmem:[#allocation381_spill] sm:$0xff]  ;;  %v14507_v53 = vld [vmem:[#allocation396_spill] sm:$0xff] }
0x189c   :  { %6788 = vmatmul.bf16.vlgmr.msra.gmra.mxu0 %v12192_v47  ;;  %6588 = vmatpush.bf16.msra.mxu1 %v14477_v48 }
0x189d   :  { %6832 = vmatpush.bf16.msrb.mxu0 %v14463_v62  ;;  %v14495_v62 = vld [vmem:[#allocation372_spill] sm:$0xff] }
0x189e   :  { %6825 = vmatpush.bf16.msra.mxu3 %v14474_v25  ;;  %6604 = vmatpush.bf16.msra.mxu2 %v14479_v36 }
0x18a0   :  { %6589 = vmatpush.bf16.msra.mxu1 %v14480_v35  ;;  %v14511_v35 = vld [vmem:[#allocation404_spill] sm:$0xff] }
0x18a1   :  { %6833 = vmatpush.bf16.msrb.mxu0 %v14467_v52  ;;  %v6583_v4 = vpop.f32.mrf.mxu0  ;;  %v14498_v52 = vld [vmem:[#allocation378_spill] sm:$0xff] }
0x18a2   :  { %6826 = vmatpush.bf16.msra.mxu3 %v12060_v29  ;;  %6605 = vmatpush.bf16.msra.mxu2 %v14481_v6  ;;  %v9865_v29 = vld [vmem:[%s13177_s12 + $0x30] sm:$0xff]  ;;  %v14510_v4 = vld [vmem:[#allocation401_spill] sm:$0xff] }
0x18a4   :  { %6590 = vmatpush.bf16.msra.mxu1 %v14483_v18  ;;  %v14514_v18 = vld [vmem:[#allocation410_spill] sm:$0xff] }
0x18a5   :  { %6834 = vmatpush.bf16.msrb.mxu0 %v14471_v40  ;;  %6827 = vmatmul.bf16.vlgmr.msra.gmra.mxu3 %v12180_v30  ;;  %v9866_v30 = vld [vmem:[%s13177_s12 + $0x28] sm:$0xff]  ;;  %v14502_v40 = vld [vmem:[#allocation387_spill] sm:$0xff] }
0x18a6   :  { %7001 = vmatpush.bf16.msrb.mxu3 %v9864_v27  ;;  %6650 = vmatpush.bf16.msrb.mxu2 %v14482_v55  ;;  %v14509_v27 = vld [vmem:[#allocation400_spill] sm:$0xff] }
0x18a7   :  { %6606 = vmatmul.bf16.vlgmr.msra.gmra.mxu2 %v12885_v54  ;;  %v14513_v55 = vld [vmem:[#allocation408_spill] sm:$0xff] }
0x18a8   :  { %6591 = vmatpush.bf16.msra.mxu1 %v14485_v23  ;;  %v12992_v61 = vpop.f32.mrf.mxu3  ;;  %v14517_v23 = vld [vmem:[#allocation413_spill] sm:$0xff] }
0x18a9   :  { %6835 = vmatpush.bf16.msrb.mxu0 %v14475_v7  ;;  %v14505_v7 = vld [vmem:[#allocation391_spill] sm:$0xff] }
0x18aa   :  { %7002 = vmatpush.bf16.msrb.mxu3 %v9865_v29  ;;  %v14512_v29 = vld [vmem:[#allocation405_spill] sm:$0xff] }
0x18ac   :  { %6592 = vmatpush.bf16.msra.mxu1 %v14487_v56  ;;  %v14520_v56 = vld [vmem:[#allocation420_spill] sm:$0xff] }
0x18ad   :  { %6836 = vmatpush.bf16.msrb.mxu0 %v14478_v46  ;;  %v14508_v46 = vld [vmem:[#allocation397_spill] sm:$0xff] }
0x18ae   :  { %7003 = vmatpush.bf16.msrb.mxu3 %v9866_v30  ;;  %v14515_v30 = vld [vmem:[#allocation409_spill] sm:$0xff] }
0x18af   :  { %6593 = vmatmul.bf16.vlgmr.msra.gmra.mxu1 %v12898_v32 }
0x18b0   :  { %v6622_v45 = vpop.f32.mrf.mxu3 }
0x18b1   :  { %6837 = vmatpush.bf16.msrb.mxu0 %v12062_v24  ;;  %v14484_v24 = vld [vmem:[#allocation350_spill] sm:$0xff] }
0x18b2   :  { %6651 = vmatpush.bf16.msrb.mxu2 %v14484_v24  ;;  %7004 = vmatpush.bf16.msrb.mxu3 %v9867_v17  ;;  %v14516_v24 = vld [vmem:[#allocation414_spill] sm:$0xff]  ;;  %v14518_v17 = vld [vmem:[#allocation419_spill] sm:$0xff] }
0x18b5   :  { %6838 = vmatpush.bf16.msrb.mxu0 %v12077_v20  ;;  %v14488_v20 = vld [vmem:[#allocation356_spill] sm:$0xff] }
0x18b6   :  { %6652 = vmatpush.bf16.msrb.mxu2 %v14486_v3  ;;  %6637 = vmatpush.bf16.msrb.mxu1 %v14488_v20  ;;  %v14519_v3 = vld [vmem:[#allocation418_spill] sm:$0xff] }
0x18b7   :  { %7005 = vmatpush.bf16.msrb.mxu3 %v9868_v39  ;;  %v14521_v39 = vld [vmem:[#allocation423_spill] sm:$0xff] }
0x18b9   :  { %6839 = vmatpush.bf16.msrb.mxu0 %v12089_v16  ;;  %v14489_v16 = vld [vmem:[#allocation359_spill] sm:$0xff]  ;;  %v13004_v49 = vpop.f32.mrf.mxu0 }
0x18ba   :  { %6653 = vmatpush.bf16.msrb.mxu2 %v14489_v16  ;;  %6638 = vmatpush.bf16.msrb.mxu1 %v14490_v41  ;;  %v14522_v41 = vld [vmem:[#allocation424_spill] sm:$0xff] }
0x18bb   :  { %7006 = vmatpush.bf16.msrb.mxu3 %v9869_v33  ;;  %v14523_v33 = vld [vmem:[#allocation428_spill] sm:$0xff] }
0x18bc   :  { %6840 = vmatmul.bf16.vlgmr.msrb.gmra.mxu0 %v12192_v47  ;;  %v14491_v47 = vld [vmem:[#allocation364_spill] sm:$0xff] }
0x18be   :  { %6654 = vmatpush.bf16.msrb.mxu2 %v14491_v47  ;;  %6639 = vmatpush.bf16.msrb.mxu1 %v14492_v43  ;;  %v14524_v43 = vld [vmem:[#allocation429_spill] sm:$0xff] }
0x18bf   :  { %7007 = vmatpush.bf16.msrb.mxu3 %v9870_v22  ;;  %v14525_v22 = vperm.slane %v11978_v15, 0 }
0x18c1   :  { %v6635_v57 = vpop.f32.mrf.mxu0 }
0x18c2   :  { %6655 = vmatpush.bf16.msrb.mxu2 %v14493_v51  ;;  %6640 = vmatpush.bf16.msrb.mxu1 %v14494_v11 }
0x18c3   :  { %7008 = vmatpush.bf16.msrb.mxu3 %v9871_v42  ;;  %v14526_v42 = vld [vmem:[#allocation432_spill] sm:$0xff] }
0x18c6   :  { %6656 = vmatpush.bf16.msrb.mxu2 %v14495_v62  ;;  %6641 = vmatpush.bf16.msrb.mxu1 %v14496_v37  ;;  %v14527_v37 = vld [vmem:[#allocation433_spill] sm:$0xff] }
0x18c8   :  { %v13026_v25 = vpop.f32.mrf.mxu3 }
0x18ca   :  { %6657 = vmatpush.bf16.msrb.mxu2 %v14497_v59  ;;  %6642 = vmatpush.bf16.msrb.mxu1 %v14499_v31  ;;  %v14528_v59 = vld [vmem:[#allocation435_spill] sm:$0xff]  ;;  %v14529_v31 = vld [vmem:[#allocation436_spill] sm:$0xff] }
0x18cd   :  { %6658 = vmatmul.bf16.vlgmr.msrb.gmra.mxu2 %v12885_v54 }
0x18ce   :  { %6702 = vmatpush.bf16.msra.mxu2 %v14498_v52  ;;  %6643 = vmatpush.bf16.msrb.mxu1 %v14501_v8  ;;  %v14530_v8 = vld [vmem:[#allocation439_spill] sm:$0xff] }
0x18d0   :  { %v6674_v36 = vpop.f32.mrf.mxu3 }
0x18d2   :  { %6703 = vmatpush.bf16.msra.mxu2 %v14500_v5  ;;  %6644 = vmatpush.bf16.msrb.mxu1 %v14503_v44  ;;  %v14532_v44 = vld [vmem:[#allocation440_spill] sm:$0xff] }
0x18d5   :  { %6645 = vmatmul.bf16.vlgmr.msrb.gmra.mxu1 %v12898_v32 }
0x18d6   :  { %6704 = vmatpush.bf16.msra.mxu2 %v14502_v40  ;;  %6689 = vmatpush.bf16.msra.mxu1 %v14504_v26  ;;  %v14531_v40 = vld [vmem:[#allocation441_spill] sm:$0xff] }
0x18d9   :  { %v13032_v48 = vpop.f32.mrf.mxu0 }
0x18da   :  { %6705 = vmatpush.bf16.msra.mxu2 %v14505_v7  ;;  %6690 = vmatpush.bf16.msra.mxu1 %v14506_v2  ;;  %v14533_v7 = vld [vmem:[#allocation445_spill] sm:$0xff]  ;;  %v14534_v2 = vld [vmem:[#allocation444_spill] sm:$0xff] }
0x18de   :  { %6706 = vmatpush.bf16.msra.mxu2 %v14507_v53  ;;  %6691 = vmatpush.bf16.msra.mxu1 %v14508_v46  ;;  %v14535_v46 = vperm.slane %v11978_v15, 1 }
0x18e1   :  { %v6687_v6 = vpop.f32.mrf.mxu0 }
0x18e2   :  { %6707 = vmatpush.bf16.msra.mxu2 %v14509_v27  ;;  %6692 = vmatpush.bf16.msra.mxu1 %v14510_v4 }
0x18e6   :  { %6708 = vmatpush.bf16.msra.mxu2 %v14511_v35  ;;  %6693 = vmatpush.bf16.msra.mxu1 %v14512_v29  ;;  %v14536_v29 = vld [vmem:[#allocation446_spill] sm:$0xff] }
0x18e7   :  { %v6451_v16 = vpop.f32.mrf.mxu2 }
0x18e8   :  { %v13048_v20 = vpop.f32.mrf.mxu3 }
0x18ea   :  { %6709 = vmatpush.bf16.msra.mxu2 %v14513_v55  ;;  %6694 = vmatpush.bf16.msra.mxu1 %v14515_v30  ;;  %v14538_v30 = vld [vmem:[#allocation448_spill] sm:$0xff] }
0x18ec   :  { %v6438_v45 = vpop.f32.mrf.mxu1 }
0x18ed   :  { %6710 = vmatmul.bf16.vlgmr.msra.gmra.mxu2 %v12885_v54  ;;  %v6439_v51 = vadd.f32 %v6438_v45, %v14525_v22  ;;  %v9873_v45 = vld [vmem:[#allocation12 + $0x70] sm:$0xff] }
0x18ee   :  { %6754 = vmatpush.bf16.msrb.mxu2 %v14514_v18  ;;  %6695 = vmatpush.bf16.msra.mxu1 %v14517_v23  ;;  %v14537_v18 = vld [vmem:[#allocation447_spill] sm:$0xff]  ;;  %v14545_v22 = vld [vmem:[#allocation454_spill] sm:$0xff] }
0x18ef   :  { %v6452_v62 = vadd.f32 %v6451_v16, %v6439_v51  ;;  %v6453_v57 = vpop.f32.mrf.mxu2  ;;  %v14543_v16 = vld [vmem:[#allocation452_spill] sm:$0xff] }
0x18f0   :  { %v6726_v11 = vpop.f32.mrf.mxu3  ;;  %v9874_v51 = vld [vmem:[#allocation12 + $0x68] sm:$0xff]  ;;  %v9875_v57 = vld [vmem:[#allocation12 + $0x38] sm:$0xff] }
0x18f1   :  { %v14546_v11 = vld [vmem:[#allocation455_spill] sm:$0xff] }
0x18f2   :  { %6755 = vmatpush.bf16.msrb.mxu2 %v14516_v24  ;;  %6696 = vmatpush.bf16.msra.mxu1 %v14519_v3  ;;  %v14539_v24 = vperm.slane %v11978_v15, 2  ;;  %v14541_v3 = vld [vmem:[#allocation450_spill] sm:$0xff] }
0x18f4   :  { %v6440_v5 = vpop.f32.mrf.mxu1 }
0x18f5   :  { %6697 = vmatmul.bf16.vlgmr.msra.gmra.mxu1 %v12898_v32 }
0x18f6   :  { %6756 = vmatpush.bf16.msrb.mxu2 %v14518_v17  ;;  %6741 = vmatpush.bf16.msrb.mxu1 %v14520_v56  ;;  %v14540_v17 = vld [vmem:[#allocation449_spill] sm:$0xff]  ;;  %v14542_v56 = vld [vmem:[#allocation451_spill] sm:$0xff] }
0x18f7   :  { %v6503_v26 = vpop.f32.mrf.mxu2 }
0x18f9   :  { %v13054_v47 = vpop.f32.mrf.mxu0 }
0x18fa   :  { %6757 = vmatpush.bf16.msrb.mxu2 %v14521_v39  ;;  %6742 = vmatpush.bf16.msrb.mxu1 %v14522_v41 }
0x18fc   :  { %v6490_v53 = vpop.f32.mrf.mxu1 }
0x18fd   :  { %v6491_v36 = vadd.f32 %v6490_v53, %v14535_v46  ;;  %v9881_v53 = vld [vmem:[#allocation12 + $0x20] sm:$0xff]  ;;  %v9882_v46 = vld [vmem:[#allocation12 + $0x48] sm:$0xff] }
0x18fe   :  { %6758 = vmatpush.bf16.msrb.mxu2 %v14523_v33  ;;  %6743 = vmatpush.bf16.msrb.mxu1 %v14524_v43  ;;  %v9872_v33 = vld [vmem:[#allocation12 + $0x78] sm:$0xff]  ;;  %v14544_v43 = vld [vmem:[#allocation453_spill] sm:$0xff] }
0x18ff   :  { %v13071_v27 = vadd.f32 %v6503_v26, %v6491_v36  ;;  %v6505_v4 = vpop.f32.mrf.mxu2  ;;  %v9879_v26 = vld [vmem:[#allocation12 + $0x28] sm:$0xff] }
0x1901   :  { %v6739_v52 = vpop.f32.mrf.mxu0 }
0x1902   :  { %6759 = vmatpush.bf16.msrb.mxu2 %v14526_v42  ;;  %6744 = vmatpush.bf16.msrb.mxu1 %v14527_v37  ;;  %v6465_v37 = vadd.f32 %v12869_v34, %v6452_v62  ;;  %v9876_v52 = vld [vmem:[#allocation12 + $0x60] sm:$0xff]  ;;  %v9880_v62 = vld [vmem:[#allocation12 + $0x50] sm:$0xff] }
0x1904   :  { %v6492_v6 = vpop.f32.mrf.mxu1  ;;  %v6478_v5 = vadd.f32 %v12877_v38, %v6465_v37 }
0x1905   :  { %v9883_v6 = vld [vmem:[#allocation12 + $0x18] sm:$0xff] }
0x1906   :  { %6760 = vmatpush.bf16.msrb.mxu2 %v14528_v59  ;;  %6745 = vmatpush.bf16.msrb.mxu1 %v14529_v31  ;;  %v9877_v31 = vld [vmem:[#allocation12 + $0x30] sm:$0xff]  ;;  %v9128_v34 = vmul.f32 -1.442695, %v6478_v5 }
0x1908   :  { %v13076_v35 = vpop.f32.mrf.mxu3 }
0x190a   :  { %6761 = vmatpush.bf16.msrb.mxu2 %v14530_v8  ;;  %6746 = vmatpush.bf16.msrb.mxu1 %v14532_v44  ;;  %v6555_v55 = vpop.f32.mrf.mxu2  ;;  %v9878_v8 = vld [vmem:[#allocation12 + $0x58] sm:$0xff] }
0x190d   :  { %6762 = vmatmul.bf16.vlgmr.msrb.gmra.mxu2 %v12885_v54 }
0x190e   :  { %6806 = vmatpush.bf16.msra.mxu2 %v14531_v40  ;;  %6747 = vmatpush.bf16.msrb.mxu1 %v14534_v2 }
0x1912   :  { %6807 = vmatpush.bf16.msra.mxu2 %v14533_v7  ;;  %6748 = vmatpush.bf16.msrb.mxu1 %v12066_v19  ;;  %v6778_v19 = vpop.f32.mrf.mxu3 }
0x1915   :  { %6749 = vmatmul.bf16.vlgmr.msrb.gmra.mxu1 %v12898_v32 }
0x1916   :  { %6808 = vmatpush.bf16.msra.mxu2 %v12069_v21  ;;  %6793 = vmatpush.bf16.msra.mxu1 %v12073_v9  ;;  %v6542_v9 = vpop.f32.mrf.mxu1 }
0x1917   :  { %v6543_v23 = vadd.f32 %v6542_v9, %v14539_v24 }
0x1919   :  { %v13083_v21 = vpop.f32.mrf.mxu0 }
0x191a   :  { %6809 = vmatpush.bf16.msra.mxu2 %v12081_v58  ;;  %6794 = vmatpush.bf16.msra.mxu1 %v12085_v13  ;;  %v6556_v58 = vadd.f32 %v6555_v55, %v6543_v23  ;;  %v6557_v13 = vpop.f32.mrf.mxu2  ;;  %v9884_v55 = vld [vmem:[#allocation12 + $0x40] sm:$0xff]  ;;  %v9886_v23 = vld [vmem:[#allocation12 + $0x8] sm:$0xff] }
0x191b   :  { %v6517_v13 = vadd.f32 %v12906_v60, %v13071_v27 }
0x191c   :  { %v6569_v42 = vadd.f32 %v12947_v14, %v6556_v58 }
0x191e   :  { %6810 = vmatpush.bf16.msra.mxu2 %v14536_v29  ;;  %6795 = vmatpush.bf16.msra.mxu1 %v14537_v18  ;;  %v6544_v41 = vpop.f32.mrf.mxu1 }
0x191f   :  { %v6530_v41 = vadd.f32 %v12914_v63, %v6517_v13 }
0x1921   :  { %v6791_v39 = vpop.f32.mrf.mxu0 }
0x1922   :  { %6811 = vmatpush.bf16.msra.mxu2 %v14538_v30  ;;  %6796 = vmatpush.bf16.msra.mxu1 %v14540_v17  ;;  %v9885_v30 = vld [vmem:[#allocation12 + $0x10] sm:$0xff]  ;;  %v9887_v17 = vld [vmem:[#allocation12] sm:$0xff] }
0x1926   :  { %6812 = vmatpush.bf16.msra.mxu2 %v14541_v3  ;;  %6797 = vmatpush.bf16.msra.mxu1 %v14542_v56 }
0x1928   :  { %v13099_v59 = vpop.f32.mrf.mxu3 }
0x192a   :  { %6813 = vmatpush.bf16.msra.mxu2 %v14543_v16  ;;  %6798 = vmatpush.bf16.msra.mxu1 %v14544_v43  ;;  %v6607_v40 = vpop.f32.mrf.mxu2 }
0x192c   :  { %v6594_v7 = vpop.f32.mrf.mxu1 }
0x192d   :  { %6814 = vmatmul.bf16.vlgmr.msra.gmra.mxu2 %v12885_v54  ;;  %v6582_v54 = vadd.f32 %v12955_v1, %v6569_v42  ;;  %v14547_v1 = vperm.slane %v11978_v15, 3 }
0x192e   :  { %6986 = vmatpush.bf16.msrb.mxu2 %v9872_v33  ;;  %6799 = vmatpush.bf16.msra.mxu1 %v14545_v22 }
0x192f   :  { %v9130_v14 = vmul.f32 -1.442695, %v6582_v54  ;;  %v6595_v2 = vadd.f32 %v6594_v7, %v14547_v1 }
0x1931   :  { %9823 = vpow2.f32 %v9130_v14  ;;  %v6608_v38 = vadd.f32 %v6607_v40, %v6595_v2 }
0x1932   :  { %6987 = vmatpush.bf16.msrb.mxu2 %v9873_v45  ;;  %6800 = vmatpush.bf16.msra.mxu1 %v14546_v11  ;;  %9825 = vpow2.f32 %v9128_v34  ;;  %v6609_v36 = vpop.f32.mrf.mxu2 }
0x1933   :  { %v6621_v58 = vadd.f32 %v12992_v61, %v6608_v38  ;;  %v14548_v61 = vperm.slane %v11978_v15, 4 }
0x1934   :  { %v6596_v18 = vpop.f32.mrf.mxu1 }
0x1935   :  { %6801 = vmatmul.bf16.vlgmr.msra.gmra.mxu1 %v12898_v32  ;;  %v6830_v32 = vpop.f32.mrf.mxu3  ;;  %v6634_v39 = vadd.f32 %v13004_v49, %v6621_v58 }
0x1936   :  { %6988 = vmatpush.bf16.msrb.mxu2 %v9874_v51  ;;  %6973 = vmatpush.bf16.msrb.mxu1 %v9875_v57  ;;  %v9129_v51 = vmul.f32 -1.442695, %v6530_v41 }
0x1937   :  { %v9824_v29 = vpop.eup %9823  ;;  %v9131_v45 = vmul.f32 -1.442695, %v6634_v39 }
0x1938   :  { %v9826_v19 = vpop.eup %9825  ;;  %v6889_v9 = vadd.f32 1.0, %v9824_v29 }
0x1939   :  { %v13103_v44 = vpop.f32.mrf.mxu0  ;;  %v6851_v24 = vadd.f32 1.0, %v9826_v19 }
0x193a   :  { %6989 = vmatpush.bf16.msrb.mxu2 %v9876_v52  ;;  %6974 = vmatpush.bf16.msrb.mxu1 %v9877_v31  ;;  %9827 = vrcp.f32 %v6889_v9  ;;  %v6902_v31 = vand.u32 2147483648, %v6889_v9  ;;  %vm6896_vm0 = vweird.f32 %v6889_v9  ;;  %v6900_v40 = vand.u32 2147483647, %v6889_v9 }
0x193b   :  { %9829 = vrcp.f32 %v6851_v24  ;;  %v6864_v34 = vand.u32 2147483648, %v6851_v24  ;;  %vm6858_vm3 = vweird.f32 %v6851_v24 }
0x193c   :  { %9831 = vpow2.f32 %v9131_v45  ;;  %vm6901_vm7 = vcmp.eq.f32.partialorder %v6900_v40, 8.507059e+37 }
0x193d   :  { %9833 = vpow2.f32 %v9129_v51 }
0x193e   :  { %6990 = vmatpush.bf16.msrb.mxu2 %v9878_v8  ;;  %6975 = vmatpush.bf16.msrb.mxu1 %v9879_v26 }
0x1940   :  { %v9828_v3 = vpop.eup %9827 }
0x1941   :  { %v6843_v4 = vpop.f32.mrf.mxu0  ;;  %v9830_v56 = vpop.eup %9829  ;;  %v6892_v16 = vmul.f32 %v9828_v3, %v6889_v9  ;;  %vm6897_vm15 = vweird.f32 %v9828_v3 }
0x1942   :  { %6991 = vmatpush.bf16.msrb.mxu2 %v9880_v62  ;;  %6976 = vmatpush.bf16.msrb.mxu1 %v9881_v53  ;;  %v6854_v33 = vmul.f32 %v9830_v56, %v6851_v24  ;;  %v9832_v54 = vpop.eup %9831  ;;  %vm6859_vm1 = vweird.f32 %v9830_v56  ;;  %vm6898_vm2 = vmor %vm6896_vm0, %vm6897_vm15  ;;  %v6862_v62 = vand.u32 2147483647, %v6851_v24  ;;  %v6865_v53 = vor.u32 1.1754944e-38, %v6864_v34 }
0x1943   :  { %v6893_v22 = vsub.f32 1.0, %v6892_v16  ;;  %v9834_v26 = vpop.eup %9833  ;;  %v6890_v32 = vadd.f32 1.0, %v9832_v54  ;;  %vm6860_vm4 = vmor %vm6858_vm3, %vm6859_vm1 }
0x1944   :  { %v6855_v11 = vsub.f32 1.0, %v6854_v33  ;;  %v6852_v1 = vadd.f32 1.0, %v9834_v26  ;;  %vm6863_vm8 = vcmp.eq.f32.partialorder %v6862_v62, 8.507059e+37 }
0x1945   :  { %v6894_v37 = vmul.f32 %v9828_v3, %v6893_v22  ;;  %v6917_v16 = vand.u32 2147483648, %v6890_v32  ;;  %vm6911_vm5 = vweird.f32 %v6890_v32 }
0x1946   :  { %6992 = vmatpush.bf16.msrb.mxu2 %v9882_v46  ;;  %6977 = vmatpush.bf16.msrb.mxu1 %v9883_v6  ;;  %v6856_v27 = vmul.f32 %v9830_v56, %v6855_v11  ;;  %v6879_v22 = vand.u32 2147483648, %v6852_v1  ;;  %vm6873_vm11 = vweird.f32 %v6852_v1 }
0x1947   :  { %v6895_v63 = vadd.f32 %v9828_v3, %v6894_v37  ;;  %v6918_v11 = vor.u32 1.1754944e-38, %v6917_v16 }
0x1948   :  { %v6857_v8 = vadd.f32 %v9830_v56, %v6856_v27 }
0x1949   :  { %v6899_v7 = vsel %vm6898_vm2, %v9828_v3, %v6895_v63 }
0x194a   :  { %6993 = vmatpush.bf16.msrb.mxu2 %v9884_v55  ;;  %6978 = vmatpush.bf16.msrb.mxu1 %v9885_v30  ;;  %v6861_v2 = vsel %vm6860_vm4, %v9830_v56, %v6857_v8 }
0x194b   :  { %v6866_v46 = vsel %vm6863_vm8, %v6865_v53, %v6861_v2 }
0x194e   :  { %6979 = vmatpush.bf16.msrb.mxu1 %v9886_v23 }
0x1950   :  { %v6659_v43 = vpop.f32.mrf.mxu2 }
0x1952   :  { %6980 = vmatpush.bf16.msrb.mxu1 %v9887_v17  ;;  %v6646_v42 = vpop.f32.mrf.mxu1 }
0x1953   :  { %v6647_v57 = vadd.f32 %v6646_v42, %v14548_v61 }
0x1955   :  { %v6660_v60 = vadd.f32 %v6659_v43, %v6647_v57  ;;  %v6915_v43 = vand.u32 2147483647, %v6890_v32 }
0x1957   :  { %v6673_v49 = vadd.f32 %v13026_v25, %v6660_v60  ;;  %v6903_v25 = vor.u32 1.1754944e-38, %v6902_v31  ;;  %vm6916_vm14 = vcmp.eq.f32.partialorder %v6915_v43, 8.507059e+37  ;;  %v9888_v43 = vld [vmem:[%s13176_s11] ss:$0 sm:$0xff] }
0x1958   :  { %v6661_v52 = vpop.f32.mrf.mxu2 }
0x1959   :  { %v6686_v5 = vadd.f32 %v13032_v48, %v6673_v49  ;;  %v6904_v48 = vsel %vm6901_vm7, %v6903_v25, %v6899_v7 }
0x195a   :  { %v6648_v14 = vpop.f32.mrf.mxu1  ;;  %v6961_v36 = vmul.f32 %v6904_v48, %v12157_v10 }
0x195b   :  { %9835 = vtanh.f32 %v6686_v5 }
0x195c   :  { %9837 = vrcp.f32 %v6890_v32 }
0x195d   :  { %9839 = vrcp.f32 %v6852_v1 }
0x1961   :  { %v9836_v38 = vpop.eup %9835 }
0x1962   :  { %v6963_v4 = vmul.f32 %v9836_v38, %v6866_v46  ;;  %v9838_v29 = vpop.eup %9837 }
0x1963   :  { %v9840_v55 = vpop.eup %9839  ;;  %v6907_v18 = vmul.f32 %v9838_v29, %v6890_v32  ;;  %vm6912_vm9 = vweird.f32 %v9838_v29 }
0x1964   :  { %v6965_v6 = vadd.f32 %v6963_v4, %v6961_v36  ;;  %v6869_v19 = vmul.f32 %v9840_v55, %v6852_v1  ;;  %vm6874_vm6 = vweird.f32 %v9840_v55  ;;  %vm6913_vm10 = vmor %vm6911_vm5, %vm6912_vm9 }
0x1965   :  { %v6908_v9 = vsub.f32 1.0, %v6907_v18  ;;  %vm6875_vm13 = vmor %vm6873_vm11, %vm6874_vm6 }
0x1966   :  { %v6870_v24 = vsub.f32 1.0, %v6869_v19 }
0x1967   :  { %v6909_v58 = vmul.f32 %v9838_v29, %v6908_v9 }
0x1968   :  { %v6871_v13 = vmul.f32 %v9840_v55, %v6870_v24 }
0x1969   :  { %v6910_v10 = vadd.f32 %v9838_v29, %v6909_v58 }
0x196a   :  { %v6872_v33 = vadd.f32 %v9840_v55, %v6871_v13 }
0x196b   :  { %v6914_v51 = vsel %vm6913_vm10, %v9838_v29, %v6910_v10 }
0x196c   :  { %v6876_v42 = vsel %vm6875_vm13, %v9840_v55, %v6872_v33  ;;  %v6919_v61 = vsel %vm6916_vm14, %v6918_v11, %v6914_v51 }
0x196d   :  { %v6962_v37 = vmul.f32 %v6919_v61, %v12162_v28  ;;  %v9889_v61 = vld [vmem:[#allocation13] ss:$0 sm:$0xff] }
0x1970   :  { %v6711_v30 = vpop.f32.mrf.mxu2 }
0x1972   :  { %v6698_v23 = vpop.f32.mrf.mxu1 }
0x1973   :  { %v6699_v17 = vadd.f32 %v6698_v23, %v750_v0  ;;  %v6877_v0 = vand.u32 2147483647, %v6852_v1 }
0x1975   :  { %v6712_v3 = vadd.f32 %v6711_v30, %v6699_v17  ;;  %vm6878_vm15 = vcmp.eq.f32.partialorder %v6877_v0, 8.507059e+37 }
0x1977   :  { %v6725_v39 = vadd.f32 %v13048_v20, %v6712_v3  ;;  %v6880_v20 = vor.u32 1.1754944e-38, %v6879_v22 }
0x1978   :  { %v6713_v56 = vpop.f32.mrf.mxu2 }
0x1979   :  { %v6738_v41 = vadd.f32 %v13054_v47, %v6725_v39  ;;  %v6881_v47 = vsel %vm6878_vm15, %v6880_v20, %v6876_v42 }
0x197a   :  { %v6700_v45 = vpop.f32.mrf.mxu1 }
0x197b   :  { %9841 = vtanh.f32 %v6738_v41 }
0x1981   :  { %v9842_v57 = vpop.eup %9841 }
0x1982   :  { %v6964_v60 = vmul.f32 %v9842_v57, %v6881_v47 }
0x1984   :  { %v6966_v27 = vadd.f32 %v6964_v60, %v6962_v37 }
0x1990   :  { %v6763_v52 = vpop.f32.mrf.mxu2 }
0x1992   :  { %v6750_v49 = vpop.f32.mrf.mxu1 }
0x1993   :  { %v6751_v63 = vadd.f32 %v6750_v49, %v751_v50 }
0x1995   :  { %v6764_v54 = vadd.f32 %v6763_v52, %v6751_v63 }
0x1997   :  { %v6777_v5 = vadd.f32 %v13076_v35, %v6764_v54 }
0x1998   :  { %v6765_v31 = vpop.f32.mrf.mxu2 }
0x1999   :  { %v6790_v8 = vadd.f32 %v13083_v21, %v6777_v5 }
0x199a   :  { %v6752_v40 = vpop.f32.mrf.mxu1 }
0x199b   :  { %v9132_v14 = vmul.f32 -1.442695, %v6790_v8 }
0x199d   :  { %9843 = vpow2.f32 %v9132_v14 }
0x19a3   :  { %v9844_v26 = vpop.eup %9843 }
0x19a4   :  { %v6929_v34 = vadd.f32 1.0, %v9844_v26 }
0x19a6   :  { %9845 = vrcp.f32 %v6929_v34  ;;  %v6942_v1 = vand.u32 2147483648, %v6929_v34  ;;  %v6940_v35 = vand.u32 2147483647, %v6929_v34  ;;  %vm6936_vm1 = vweird.f32 %v6929_v34 }
0x19a7   :  { %9847 = vtanh.f32 %v6965_v6 }
0x19a8   :  { %v6943_v46 = vor.u32 1.1754944e-38, %v6942_v1  ;;  %vm6941_vm3 = vcmp.eq.f32.partialorder %v6940_v35, 8.507059e+37 }
0x19ac   :  { %v9846_v32 = vpop.eup %9845 }
0x19ad   :  { %v6932_v62 = vmul.f32 %v9846_v32, %v6929_v34  ;;  %vm6937_vm0 = vweird.f32 %v9846_v32  ;;  %v9848_v4 = vpop.eup %9847 }
0x19ae   :  { %vm6938_vm2 = vmor %vm6936_vm1, %vm6937_vm0 }
0x19af   :  { %v6933_v7 = vsub.f32 1.0, %v6932_v62 }
0x19b0   :  { %v6815_v28 = vpop.f32.mrf.mxu2 }
0x19b1   :  { %v6934_v2 = vmul.f32 %v9846_v32, %v6933_v7 }
0x19b2   :  { %v6802_v25 = vpop.f32.mrf.mxu1 }
0x19b3   :  { %v6803_v50 = vadd.f32 %v6802_v25, %v752_v12  ;;  %v6935_v48 = vadd.f32 %v9846_v32, %v6934_v2 }
0x19b5   :  { %v6816_v21 = vadd.f32 %v6815_v28, %v6803_v50  ;;  %v6939_v36 = vsel %vm6938_vm2, %v9846_v32, %v6935_v48 }
0x19b6   :  { %v6944_v29 = vsel %vm6941_vm3, %v6943_v46, %v6939_v36 }
0x19b7   :  { %v6829_v38 = vadd.f32 %v13099_v59, %v6816_v21  ;;  %v6969_v12 = vmul.f32 %v9848_v4, %v6944_v29 }
0x19b8   :  { %v6817_v53 = vpop.f32.mrf.mxu2 }
0x19b9   :  { %v6842_v6 = vadd.f32 %v13103_v44, %v6829_v38  ;;  %v6971_v18 = vpack.c.bf16 %v6969_v12, %v6969_v12 }
0x19ba   :  { %v6804_v15 = vpop.f32.mrf.mxu1 }
0x19bb   :  { %v9133_v55 = vmul.f32 -1.442695, %v6842_v6  ;;  %6981 = vmatmul.bf16.vlgmr.msrb.gmra.mxu1 %v6971_v18 }
0x19bd   :  { %9849 = vpow2.f32 %v9133_v55 }
0x19c3   :  { %v9850_v19 = vpop.eup %9849 }
0x19c4   :  { %v6930_v30 = vadd.f32 1.0, %v9850_v19 }
0x19c6   :  { %9851 = vrcp.f32 %v6930_v30  ;;  %v6957_v23 = vand.u32 2147483648, %v6930_v30  ;;  %v6955_v58 = vand.u32 2147483647, %v6930_v30  ;;  %vm6951_vm7 = vweird.f32 %v6930_v30 }
0x19c7   :  { %9853 = vtanh.f32 %v6966_v27 }
0x19c8   :  { %v6958_v44 = vor.u32 1.1754944e-38, %v6957_v23  ;;  %vm6956_vm9 = vcmp.eq.f32.partialorder %v6955_v58, 8.507059e+37 }
0x19cc   :  { %v9852_v9 = vpop.eup %9851 }
0x19cd   :  { %v6947_v24 = vmul.f32 %v9852_v9, %v6930_v30  ;;  %vm6952_vm4 = vweird.f32 %v9852_v9  ;;  %v9854_v56 = vpop.eup %9853 }
0x19ce   :  { %vm6953_vm8 = vmor %vm6951_vm7, %vm6952_vm4 }
0x19cf   :  { %v6948_v59 = vsub.f32 1.0, %v6947_v24 }
0x19d1   :  { %v6949_v17 = vmul.f32 %v9852_v9, %v6948_v59 }
0x19d3   :  { %v6950_v3 = vadd.f32 %v9852_v9, %v6949_v17 }
0x19d5   :  { %v6954_v13 = vsel %vm6953_vm8, %v9852_v9, %v6950_v3 }
0x19d6   :  { %v6959_v39 = vsel %vm6956_vm9, %v6958_v44, %v6954_v13 }
0x19d7   :  { %v6970_v10 = vmul.f32 %v9854_v56, %v6959_v39 }
0x19d9   :  { %v6972_v16 = vpack.c.bf16 %v6970_v10, %v6970_v10 }
0x19db   :  { %6994 = vmatmul.bf16.vlgmr.msrb.gmra.mxu2 %v6972_v16 }
0x1a38   :  { %v6982_v41 = vpop.f32.mrf.mxu1 }
0x1a39   :  { %v6983_v45 = vadd.f32 %v9888_v43, %v6982_v41 }
0x1a40   :  { %v6984_v33 = vpop.f32.mrf.mxu1 }
0x1a5e   :  { %v6995_v22 = vpop.f32.mrf.mxu2 }
0x1a5f   :  { %v6996_v0 = vadd.f32 %v6995_v22, %v6983_v45 }
0x1a61   :  { %v6999_v51 = vmax.f32 %v6996_v0, 0.0 }
0x1a63   :  { %v7000_v11 = vpack.c.bf16 %v6999_v51, %v6999_v51 }
0x1a65   :  { %7009 = vmatmul.bf16.vlgmr.msrb.gmra.mxu3 %v7000_v11 }
0x1a66   :  { %v6997_v42 = vpop.f32.mrf.mxu2 }
0x1ae8   :  { %v7010_v20 = vpop.f32.mrf.mxu3 }
0x1ae9   :  { %v7011_v57 = vadd.f32 %v9889_v61, %v7010_v20 }
0x1aeb   :  { %v7015_v47 = vrot.slane %v7011_v57, 1  ;;  %v7016_v37 = vrot.slane %v7011_v57, 2  ;;  %v7017_v60 = vrot.slane %v7011_v57, 3  ;;  %7029 = vst.msk [vmem:[%s13179_s14 + $0x1] sm:$0x1] %vm5180_vm12, %v7011_v57  ;;  %v7018_v27 = vrot.slane %v7011_v57, 4 }
0x1aec   :  { %v7019_v52 = vrot.slane %v7011_v57, 5  ;;  %v7020_v49 = vrot.slane %v7011_v57, 6  ;;  %v7021_v63 = vrot.slane %v7011_v57, 7 }
0x1aed   :  { %7030 = vst.msk [vmem:[%s13179_s14 + $0x3] sm:$0x1] %vm5180_vm12, %v7015_v47 }
0x1aee   :  { %7031 = vst.msk [vmem:[%s13179_s14 + $0x5] sm:$0x1] %vm5180_vm12, %v7016_v37 }
0x1aef   :  { %7032 = vst.msk [vmem:[%s13179_s14 + $0x7] sm:$0x1] %vm5180_vm12, %v7017_v60 }
0x1af0   :  { %7033 = vst.msk [vmem:[%s13179_s14 + $0x9] sm:$0x1] %vm5180_vm12, %v7018_v27  ;;  %v7012_v54 = vpop.f32.mrf.mxu3 }
0x1af1   :  { %7034 = vst.msk [vmem:[%s13179_s14 + $0xb] sm:$0x1] %vm5180_vm12, %v7019_v52 }
0x1af2   :  { %7035 = vst.msk [vmem:[%s13179_s14 + $0xd] sm:$0x1] %vm5180_vm12, %v7020_v49 }
0x1af3   :  { %7036 = vst.msk [vmem:[%s13179_s14 + $0xf] sm:$0x1] %vm5180_vm12, %v7021_v63 }
0x1af4   :  { %7041 = vsyncpa [#allocation3], 1 }
0x1af5   :  { %7042 = vsyncpa [#allocation5], 1 }
0x1af6   :  { %7043 = vsyncpa [#allocation8], 1 }
0x1af7   :  { %7044 = vsyncpa [#allocation11], 1 }
0x1af8   :  { %7045 = vsyncpa [#allocation14], 1 }

</bundles_post_ra>
